<compile_context>
chip_gen: v5e
topology: v5e:2x2
jax: 0.10.0
libtpu: 0.0.40
codegen_flags: <defaults>
</compile_context>

<pallas_src>
import functools

import jax
import jax.numpy as jnp
from jax.experimental import pallas as pl
from jax.experimental.pallas import tpu as pltpu


def _vmem_limit_bytes():
    """Per-generation VMEM budget: ~75% of physical, capped at 100 MiB."""
    try:
        cap = pltpu.get_tpu_info().vmem_capacity_bytes
    except Exception:
        cap = 64 * 1024 * 1024  # conservative (v7x-sized) fallback
    return max(32 * 1024 * 1024, min(int(cap) * 3 // 4, 100 * 1024 * 1024))


# ----------------------------------------------------------------------------
# Pallas kernel: one grid point per branch.  The whole [B*N, C] token slab for
# that branch is resident in VMEM; LayerNorm + fused QKV projection + per-head
# attention + output projection all happen here.
# ----------------------------------------------------------------------------
def _parallel_block_kernel(heads, dim_head, batch, eps,
                           x_ref, gamma_ref, beta_ref,
                           wqkv_ref, wo_ref, bo_ref,
                           o_ref, qkv_ref, ctx_ref):
    f32 = jnp.float32
    bf16 = jnp.bfloat16

    _, BN, C = x_ref.shape
    B = batch
    N = BN // B
    d = dim_head

    x = x_ref[0].astype(f32)                                   # [B*N, C]

    # ---- PreNorm: LayerNorm over channels, single-pass stats (f32) ----
    inv_c = 1.0 / C
    mean = jnp.sum(x, axis=-1, keepdims=True) * inv_c
    ex2 = jnp.sum(x * x, axis=-1, keepdims=True) * inv_c
    var = ex2 - mean * mean
    xn = (x - mean) * jax.lax.rsqrt(var + eps)
    xn = xn * gamma_ref[0] + beta_ref[0]                       # (1, C) broadcast
    xn_bf = xn.astype(bf16)

    # ---- Fused, lane-dense QKV projection: [B*N, C] @ [C, 3C] (K = C) ----
    # (softmax scale already folded into the q columns at prep time)
    qkv = jnp.dot(xn_bf, wqkv_ref[0], preferred_element_type=f32)   # [B*N, 3C]
    qkv_ref[...] = qkv.astype(bf16).reshape(B, N, 3 * C)

    # ---- Per-head attention.  Heads are split only here, where the
    # contraction genuinely needs it; q/k/v slices come from the VMEM scratch
    # (cheap ref-view loads), batched over B via einsum like the flash kernels.
    # Static unroll is fine at heads=8 / tiny N; switch to lax.fori_loop with
    # pl.ds offsets once N/d grow enough for vreg pressure to matter.
    for h in range(heads):
        qh = qkv_ref[:, :, h * d:(h + 1) * d]                       # [B, N, d]
        kh = qkv_ref[:, :, C + h * d:C + (h + 1) * d]               # [B, N, d]
        vh = qkv_ref[:, :, 2 * C + h * d:2 * C + (h + 1) * d]       # [B, N, d]

        s = jnp.einsum('bqd,bkd->bqk', qh, kh,
                       preferred_element_type=f32)                  # [B, N, N]

        # softmax with deferred normalization (f32 max/exp/sum)
        s = s - jnp.max(s, axis=-1, keepdims=True)
        e = jnp.exp(s)
        den = jnp.sum(e, axis=-1, keepdims=True)                    # [B, N, 1]

        pv = jnp.einsum('bqk,bkd->bqd', e.astype(bf16), vh,
                        preferred_element_type=f32)                 # [B, N, d]
        pv = pv * pl.reciprocal(den, approx=True)                   # EUP slot

        # pack per-head context back to a lane-packed [B*N, C] slab so the
        # output projection runs as one full-K matmul.
        ctx_ref[:, h * d:(h + 1) * d] = pv.reshape(BN, d).astype(bf16)

    # ---- Output projection: [B*N, C] @ [C, C] (K = C) + bias ----
    out = jnp.dot(ctx_ref[...], wo_ref[0], preferred_element_type=f32)
    out = out + bo_ref[0]                                       # (1, C) broadcast
    o_ref[0] = out.astype(o_ref.dtype)


# ----------------------------------------------------------------------------
# One-time parameter prep (hoisted out of the forward): stack branches, fuse
# q/k/v weights into [C, 3C] with the softmax scale folded into the q columns,
# cast matmul weights to bf16.
# ----------------------------------------------------------------------------
def prepare_params(branch_params, heads):
    # branch_params: tuple of 3 tuples (gamma, beta, wq, wk, wv, wo, bo),
    # each weight stored so the math is tokens @ W (already transposed).
    gammas = jnp.stack([p[0] for p in branch_params], axis=0)   # [3, 1, C] f32
    betas = jnp.stack([p[1] for p in branch_params], axis=0)    # [3, 1, C] f32
    C = gammas.shape[-1]
    assert C % heads == 0
    scale = float(C // heads) ** -0.5

    wqkv = jnp.stack(
        [jnp.concatenate([p[2] * scale, p[3], p[4]], axis=1)    # [C, 3C]
         for p in branch_params], axis=0).astype(jnp.bfloat16)  # [3, C, 3C]
    wo = jnp.stack([p[5] for p in branch_params],
                   axis=0).astype(jnp.bfloat16)                 # [3, C, C]
    bo = jnp.stack([p[6] for p in branch_params], axis=0)       # [3, 1, C] f32
    return gammas, betas, wqkv, wo, bo


# ----------------------------------------------------------------------------
# Forward wrapper: single fused relayout of the three NCHW inputs + one
# pallas_call over the branch axis.
# ----------------------------------------------------------------------------
@functools.partial(jax.jit, static_argnums=(4,))
def parallel_block_forward(x1, x2, x3, prepped, heads):
    gammas, betas, wqkv, wo, bo = prepped
    B, C, H, W = x1.shape
    N = H * W
    P = 3
    d = C // heads

    # One stack + one NCHW->tokens transpose over the stacked tensor (single
    # relayout pass XLA can fuse), instead of 3 transposes + a stack.
    xs = jnp.stack([x1, x2, x3], axis=0)                        # [3, B, C, H, W]
    xs = jnp.transpose(xs, (0, 1, 3, 4, 2)).reshape(P, B * N, C)  # [3, B*N, C]

    kernel = functools.partial(_parallel_block_kernel, heads, d, B, 1e-5)

    branch3 = lambda p: (p, 0, 0)

    y = pl.pallas_call(
        kernel,
        out_shape=jax.ShapeDtypeStruct((P, B * N, C), xs.dtype),
        grid=(P,),
        in_specs=[
            pl.BlockSpec((1, B * N, C), branch3),       # x      [3, B*N, C]
            pl.BlockSpec((1, 1, C), branch3),           # gamma  [3, 1, C]
            pl.BlockSpec((1, 1, C), branch3),           # beta   [3, 1, C]
            pl.BlockSpec((1, C, 3 * C), branch3),       # Wqkv   [3, C, 3C]
            pl.BlockSpec((1, C, C), branch3),           # Wo     [3, C, C]
            pl.BlockSpec((1, 1, C), branch3),           # bo     [3, 1, C]
        ],
        out_specs=pl.BlockSpec((1, B * N, C), branch3),
        scratch_shapes=[
            pltpu.VMEM((B, N, 3 * C), jnp.bfloat16),    # fused QKV slab
            pltpu.VMEM((B * N, C), jnp.bfloat16),       # per-head context pack
        ],
        compiler_params=pltpu.CompilerParams(
            dimension_semantics=("parallel",),
            vmem_limit_bytes=_vmem_limit_bytes()),
    )(xs, gammas, betas, wqkv, wo, bo)

    y = y.reshape(P, B, N, C)
    return y[0], y[1], y[2]


# ----------------------------------------------------------------------------
# Deterministic parameter init (synthetic; LayerNorm affine = ones/zeros).
# Weight matrices are stored so the math is  tokens @ W  (pre-transposed).
# ----------------------------------------------------------------------------
def init_branch_params(key, C):
    k1, k2, k3, k4, k5 = jax.random.split(key, 5)
    std = 0.02
    gamma = jnp.ones((1, C), jnp.float32)
    beta = jnp.zeros((1, C), jnp.float32)
    wq = jax.random.normal(k1, (C, C), jnp.float32) * std
    wk = jax.random.normal(k2, (C, C), jnp.float32) * std
    wv = jax.random.normal(k3, (C, C), jnp.float32) * std
    wo = jax.random.normal(k4, (C, C), jnp.float32) * std
    bo = jax.random.normal(k5, (1, C), jnp.float32) * std
    return (gamma, beta, wq, wk, wv, wo, bo)


# ----------------------------------------------------------------------------
# Pure-JAX f32 reference (same math, full precision) for correctness checking.
# ----------------------------------------------------------------------------
def reference_branch(x_nchw, params, heads):
    gamma, beta, wq, wk, wv, wo, bo = params
    B, C, H, W = x_nchw.shape
    d = C // heads
    x = jnp.transpose(x_nchw, (0, 2, 3, 1)).reshape(B, H * W, C)
    mean = jnp.mean(x, axis=-1, keepdims=True)
    var = jnp.mean((x - mean) ** 2, axis=-1, keepdims=True)
    xn = (x - mean) / jnp.sqrt(var + 1e-5) * gamma[0] + beta[0]
    q = xn @ wq
    k = xn @ wk
    v = xn @ wv
    N = H * W
    qh = q.reshape(B, N, heads, d).transpose(0, 2, 1, 3)
    kh = k.reshape(B, N, heads, d).transpose(0, 2, 1, 3)
    vh = v.reshape(B, N, heads, d).transpose(0, 2, 1, 3)
    s = jnp.einsum('bhnd,bhmd->bhnm', qh, kh) * (d ** -0.5)
    a = jax.nn.softmax(s, axis=-1)
    o = jnp.einsum('bhnm,bhmd->bhnd', a, vh)
    o = o.transpose(0, 2, 1, 3).reshape(B, N, C)
    return o @ wo + bo[0]


if __name__ == "__main__":
    B, C, H, W = 2, 32, 8, 8
    NHEADS = 8

    key = jax.random.PRNGKey(0)
    kx1, kx2, kx3, kp1, kp2, kp3 = jax.random.split(key, 6)
    x1 = jax.random.normal(kx1, (B, C, H, W), jnp.float32)
    x2 = jax.random.normal(kx2, (B, C, H, W), jnp.float32)
    x3 = jax.random.normal(kx3, (B, C, H, W), jnp.float32)

    p1 = init_branch_params(kp1, C)
    p2 = init_branch_params(kp2, C)
    p3 = init_branch_params(kp3, C)

    # One-time parameter repack (hoisted out of the forward path).
    prepped = prepare_params((p1, p2, p3), NHEADS)
    prepped = jax.block_until_ready(prepped)

    y1, y2, y3 = parallel_block_forward(x1, x2, x3, prepped, NHEADS)
    jax.block_until_ready((y1, y2, y3))

    # correctness vs pure-f32 reference (looser tolerance: bf16 MXU operands,
    # bf16 context packing and approx reciprocal inside the kernel).
    r1 = reference_branch(x1, p1, NHEADS)
    r2 = reference_branch(x2, p2, NHEADS)
    r3 = reference_branch(x3, p3, NHEADS)
    for y, r in ((y1, r1), (y2, r2), (y3, r3)):
        assert y.shape == (B, H * W, C)
        assert jnp.allclose(y, r, atol=1e-2, rtol=1e-2)

    print("KERNEL_OK")
</pallas_src>

<mosaic_0001>
module attributes {stable_mosaic.version = 11 : i64} {
  func.func @_parallel_block_kernel(%arg0: i32, %arg1: memref<1x128x32xf32, #tpu.memory_space<vmem>>, %arg2: memref<1x1x32xf32, #tpu.memory_space<vmem>>, %arg3: memref<1x1x32xf32, #tpu.memory_space<vmem>>, %arg4: memref<1x32x96xbf16, #tpu.memory_space<vmem>>, %arg5: memref<1x32x32xbf16, #tpu.memory_space<vmem>>, %arg6: memref<1x1x32xf32, #tpu.memory_space<vmem>>, %arg7: memref<1x128x32xf32, #tpu.memory_space<vmem>>, %arg8: memref<2x64x96xbf16, #tpu.memory_space<vmem>>, %arg9: memref<128x32xbf16, #tpu.memory_space<vmem>>) attributes {dimension_semantics = [#tpu.dimension_semantics<parallel>], iteration_bounds = array<i64: 3>, scalar_prefetch = 0 : i64, scratch_operands = 2 : i64, tpu.core_type = #tpu.core_type<tc>, window_params = [{transform_indices = @transform_0, window_bounds = array<i64: 1, 128, 32>}, {transform_indices = @transform_1, window_bounds = array<i64: 1, 1, 32>}, {transform_indices = @transform_2, window_bounds = array<i64: 1, 1, 32>}, {transform_indices = @transform_3, window_bounds = array<i64: 1, 32, 96>}, {transform_indices = @transform_4, window_bounds = array<i64: 1, 32, 32>}, {transform_indices = @transform_5, window_bounds = array<i64: 1, 1, 32>}, {transform_indices = @transform_6, window_bounds = array<i64: 1, 128, 32>}]} {
    %c0 = arith.constant 0 : index
    %c0_0 = arith.constant 0 : index
    %c0_1 = arith.constant 0 : index
    %0 = vector.load %arg1[%c0, %c0_0, %c0_1] : memref<1x128x32xf32, #tpu.memory_space<vmem>>, vector<1x128x32xf32>
    %1 = vector.shape_cast %0 : vector<1x128x32xf32> to vector<128x32xf32>
    %cst = arith.constant dense<0.000000e+00> : vector<128xf32>
    %2 = vector.multi_reduction <add>, %1, %cst [1] : vector<128x32xf32> to vector<128xf32>
    %3 = vector.shape_cast %2 : vector<128xf32> to vector<128x1xf32>
    %cst_2 = arith.constant 3.125000e-02 : f32
    %4 = vector.broadcast %cst_2 : f32 to vector<128x1xf32>
    %5 = arith.mulf %3, %4 : vector<128x1xf32>
    %6 = arith.mulf %1, %1 : vector<128x32xf32>
    %cst_3 = arith.constant dense<0.000000e+00> : vector<128xf32>
    %7 = vector.multi_reduction <add>, %6, %cst_3 [1] : vector<128x32xf32> to vector<128xf32>
    %8 = vector.shape_cast %7 : vector<128xf32> to vector<128x1xf32>
    %cst_4 = arith.constant 3.125000e-02 : f32
    %9 = vector.broadcast %cst_4 : f32 to vector<128x1xf32>
    %10 = arith.mulf %8, %9 : vector<128x1xf32>
    %11 = arith.mulf %5, %5 : vector<128x1xf32>
    %12 = arith.subf %10, %11 : vector<128x1xf32>
    %13 = vector.broadcast %5 : vector<128x1xf32> to vector<128x32xf32>
    %14 = arith.subf %1, %13 : vector<128x32xf32>
    %cst_5 = arith.constant 9.99999974E-6 : f32
    %15 = vector.broadcast %cst_5 : f32 to vector<128x1xf32>
    %16 = arith.addf %12, %15 : vector<128x1xf32>
    %17 = math.rsqrt %16 : vector<128x1xf32>
    %18 = vector.broadcast %17 : vector<128x1xf32> to vector<128x32xf32>
    %19 = arith.mulf %14, %18 : vector<128x32xf32>
    %c0_6 = arith.constant 0 : index
    %c0_7 = arith.constant 0 : index
    %c0_8 = arith.constant 0 : index
    %20 = vector.load %arg2[%c0_6, %c0_7, %c0_8] : memref<1x1x32xf32, #tpu.memory_space<vmem>>, vector<1x1x32xf32>
    %21 = vector.shape_cast %20 : vector<1x1x32xf32> to vector<1x32xf32>
    %22 = vector.broadcast %21 : vector<1x32xf32> to vector<128x32xf32>
    %23 = arith.mulf %19, %22 : vector<128x32xf32>
    %c0_9 = arith.constant 0 : index
    %c0_10 = arith.constant 0 : index
    %c0_11 = arith.constant 0 : index
    %24 = vector.load %arg3[%c0_9, %c0_10, %c0_11] : memref<1x1x32xf32, #tpu.memory_space<vmem>>, vector<1x1x32xf32>
    %25 = vector.shape_cast %24 : vector<1x1x32xf32> to vector<1x32xf32>
    %26 = vector.broadcast %25 : vector<1x32xf32> to vector<128x32xf32>
    %27 = arith.addf %23, %26 : vector<128x32xf32>
    %28 = arith.truncf %27 : vector<128x32xf32> to vector<128x32xbf16>
    %c0_12 = arith.constant 0 : index
    %c0_13 = arith.constant 0 : index
    %c0_14 = arith.constant 0 : index
    %29 = vector.load %arg4[%c0_12, %c0_13, %c0_14] : memref<1x32x96xbf16, #tpu.memory_space<vmem>>, vector<1x32x96xbf16>
    %30 = vector.shape_cast %29 : vector<1x32x96xbf16> to vector<32x96xbf16>
    %cst_15 = arith.constant dense<0.000000e+00> : vector<128x96xf32>
    %31 = tpu.matmul %28, %30, %cst_15 {dimension_numbers = #tpu.dot_dimension_numbers<[1], [0], [0], [1], [0, 0, 1, 1], [], []>} : vector<128x32xbf16>, vector<32x96xbf16>, vector<128x96xf32> -> vector<128x96xf32>
    %32 = arith.truncf %31 : vector<128x96xf32> to vector<128x96xbf16>
    %33 = vector.shape_cast %32 : vector<128x96xbf16> to vector<2x64x96xbf16>
    %c0_16 = arith.constant 0 : index
    %c0_17 = arith.constant 0 : index
    %c0_18 = arith.constant 0 : index
    %34 = vector.load %arg8[%c0_16, %c0_17, %c0_18] : memref<2x64x96xbf16, #tpu.memory_space<vmem>>, vector<2x64x96xbf16>
    tpu.vector_store %arg8[%c0_16, %c0_17, %c0_18], %33 {strides = array<i32>} : memref<2x64x96xbf16, #tpu.memory_space<vmem>>, vector<2x64x96xbf16>,
    %c0_19 = arith.constant 0 : index
    %c0_20 = arith.constant 0 : index
    %c0_21 = arith.constant 0 : index
    %35 = vector.load %arg8[%c0_19, %c0_20, %c0_21] : memref<2x64x96xbf16, #tpu.memory_space<vmem>>, vector<2x64x4xbf16>
    %c0_22 = arith.constant 0 : index
    %c0_23 = arith.constant 0 : index
    %c32 = arith.constant 32 : index
    %36 = vector.load %arg8[%c0_22, %c0_23, %c32] : memref<2x64x96xbf16, #tpu.memory_space<vmem>>, vector<2x64x4xbf16>
    %c0_24 = arith.constant 0 : index
    %c0_25 = arith.constant 0 : index
    %c64 = arith.constant 64 : index
    %37 = vector.load %arg8[%c0_24, %c0_25, %c64] : memref<2x64x96xbf16, #tpu.memory_space<vmem>>, vector<2x64x4xbf16>
    "tpu.trace_start"() <{level = 10 : i32, message = "bqd,bkd->bqk"}> : () -> ()
    %cst_26 = arith.constant dense<0.000000e+00> : vector<2x64x64xf32>
    %38 = tpu.matmul %35, %36, %cst_26 {dimension_numbers = #tpu.dot_dimension_numbers<[2], [2], [1], [1], [0, 0, 0, 1, 1, 1], [0], [0]>} : vector<2x64x4xbf16>, vector<2x64x4xbf16>, vector<2x64x64xf32> -> vector<2x64x64xf32>
    "tpu.trace_stop"() : () -> ()
    %cst_27 = arith.constant dense<0xFF800000> : vector<2x64xf32>
    %39 = vector.multi_reduction <maximumf>, %38, %cst_27 [2] : vector<2x64x64xf32> to vector<2x64xf32>
    %40 = vector.shape_cast %39 : vector<2x64xf32> to vector<2x64x1xf32>
    %41 = vector.broadcast %40 : vector<2x64x1xf32> to vector<2x64x64xf32>
    %42 = arith.subf %38, %41 : vector<2x64x64xf32>
    %43 = math.exp %42 : vector<2x64x64xf32>
    %cst_28 = arith.constant dense<0.000000e+00> : vector<2x64xf32>
    %44 = vector.multi_reduction <add>, %43, %cst_28 [2] : vector<2x64x64xf32> to vector<2x64xf32>
    %45 = vector.shape_cast %44 : vector<2x64xf32> to vector<2x64x1xf32>
    %46 = arith.truncf %43 : vector<2x64x64xf32> to vector<2x64x64xbf16>
    "tpu.trace_start"() <{level = 10 : i32, message = "bqk,bkd->bqd"}> : () -> ()
    %cst_29 = arith.constant dense<0.000000e+00> : vector<2x64x4xf32>
    %47 = tpu.matmul %46, %37, %cst_29 {dimension_numbers = #tpu.dot_dimension_numbers<[2], [1], [1], [2], [0, 0, 0, 1, 1, 2], [0], [0]>} : vector<2x64x64xbf16>, vector<2x64x4xbf16>, vector<2x64x4xf32> -> vector<2x64x4xf32>
    "tpu.trace_stop"() : () -> ()
    %48 = tpu.reciprocal %45 {approx = true} : vector<2x64x1xf32> -> vector<2x64x1xf32>
    %49 = vector.broadcast %48 : vector<2x64x1xf32> to vector<2x64x4xf32>
    %50 = arith.mulf %47, %49 : vector<2x64x4xf32>
    %51 = vector.shape_cast %50 : vector<2x64x4xf32> to vector<128x4xf32>
    %52 = arith.truncf %51 : vector<128x4xf32> to vector<128x4xbf16>
    %c0_30 = arith.constant 0 : index
    %c0_31 = arith.constant 0 : index
    %53 = vector.load %arg9[%c0_30, %c0_31] : memref<128x32xbf16, #tpu.memory_space<vmem>>, vector<128x4xbf16>
    tpu.vector_store %arg9[%c0_30, %c0_31], %52 {strides = array<i32>} : memref<128x32xbf16, #tpu.memory_space<vmem>>, vector<128x4xbf16>,
    %c0_32 = arith.constant 0 : index
    %c0_33 = arith.constant 0 : index
    %c4 = arith.constant 4 : index
    %54 = vector.load %arg8[%c0_32, %c0_33, %c4] : memref<2x64x96xbf16, #tpu.memory_space<vmem>>, vector<2x64x4xbf16>
    %c0_34 = arith.constant 0 : index
    %c0_35 = arith.constant 0 : index
    %c36 = arith.constant 36 : index
    %55 = vector.load %arg8[%c0_34, %c0_35, %c36] : memref<2x64x96xbf16, #tpu.memory_space<vmem>>, vector<2x64x4xbf16>
    %c0_36 = arith.constant 0 : index
    %c0_37 = arith.constant 0 : index
    %c68 = arith.constant 68 : index
    %56 = vector.load %arg8[%c0_36, %c0_37, %c68] : memref<2x64x96xbf16, #tpu.memory_space<vmem>>, vector<2x64x4xbf16>
    "tpu.trace_start"() <{level = 10 : i32, message = "bqd,bkd->bqk"}> : () -> ()
    %cst_38 = arith.constant dense<0.000000e+00> : vector<2x64x64xf32>
    %57 = tpu.matmul %54, %55, %cst_38 {dimension_numbers = #tpu.dot_dimension_numbers<[2], [2], [1], [1], [0, 0, 0, 1, 1, 1], [0], [0]>} : vector<2x64x4xbf16>, vector<2x64x4xbf16>, vector<2x64x64xf32> -> vector<2x64x64xf32>
    "tpu.trace_stop"() : () -> ()
    %cst_39 = arith.constant dense<0xFF800000> : vector<2x64xf32>
    %58 = vector.multi_reduction <maximumf>, %57, %cst_39 [2] : vector<2x64x64xf32> to vector<2x64xf32>
    %59 = vector.shape_cast %58 : vector<2x64xf32> to vector<2x64x1xf32>
    %60 = vector.broadcast %59 : vector<2x64x1xf32> to vector<2x64x64xf32>
    %61 = arith.subf %57, %60 : vector<2x64x64xf32>
    %62 = math.exp %61 : vector<2x64x64xf32>
    %cst_40 = arith.constant dense<0.000000e+00> : vector<2x64xf32>
    %63 = vector.multi_reduction <add>, %62, %cst_40 [2] : vector<2x64x64xf32> to vector<2x64xf32>
    %64 = vector.shape_cast %63 : vector<2x64xf32> to vector<2x64x1xf32>
    %65 = arith.truncf %62 : vector<2x64x64xf32> to vector<2x64x64xbf16>
    "tpu.trace_start"() <{level = 10 : i32, message = "bqk,bkd->bqd"}> : () -> ()
    %cst_41 = arith.constant dense<0.000000e+00> : vector<2x64x4xf32>
    %66 = tpu.matmul %65, %56, %cst_41 {dimension_numbers = #tpu.dot_dimension_numbers<[2], [1], [1], [2], [0, 0, 0, 1, 1, 2], [0], [0]>} : vector<2x64x64xbf16>, vector<2x64x4xbf16>, vector<2x64x4xf32> -> vector<2x64x4xf32>
    "tpu.trace_stop"() : () -> ()
    %67 = tpu.reciprocal %64 {approx = true} : vector<2x64x1xf32> -> vector<2x64x1xf32>
    %68 = vector.broadcast %67 : vector<2x64x1xf32> to vector<2x64x4xf32>
    %69 = arith.mulf %66, %68 : vector<2x64x4xf32>
    %70 = vector.shape_cast %69 : vector<2x64x4xf32> to vector<128x4xf32>
    %71 = arith.truncf %70 : vector<128x4xf32> to vector<128x4xbf16>
    %c0_42 = arith.constant 0 : index
    %c4_43 = arith.constant 4 : index
    %72 = vector.load %arg9[%c0_42, %c4_43] : memref<128x32xbf16, #tpu.memory_space<vmem>>, vector<128x4xbf16>
    tpu.vector_store %arg9[%c0_42, %c4_43], %71 {strides = array<i32>} : memref<128x32xbf16, #tpu.memory_space<vmem>>, vector<128x4xbf16>,
    %c0_44 = arith.constant 0 : index
    %c0_45 = arith.constant 0 : index
    %c8 = arith.constant 8 : index
    %73 = vector.load %arg8[%c0_44, %c0_45, %c8] : memref<2x64x96xbf16, #tpu.memory_space<vmem>>, vector<2x64x4xbf16>
    %c0_46 = arith.constant 0 : index
    %c0_47 = arith.constant 0 : index
    %c40 = arith.constant 40 : index
    %74 = vector.load %arg8[%c0_46, %c0_47, %c40] : memref<2x64x96xbf16, #tpu.memory_space<vmem>>, vector<2x64x4xbf16>
    %c0_48 = arith.constant 0 : index
    %c0_49 = arith.constant 0 : index
    %c72 = arith.constant 72 : index
    %75 = vector.load %arg8[%c0_48, %c0_49, %c72] : memref<2x64x96xbf16, #tpu.memory_space<vmem>>, vector<2x64x4xbf16>
    "tpu.trace_start"() <{level = 10 : i32, message = "bqd,bkd->bqk"}> : () -> ()
    %cst_50 = arith.constant dense<0.000000e+00> : vector<2x64x64xf32>
    %76 = tpu.matmul %73, %74, %cst_50 {dimension_numbers = #tpu.dot_dimension_numbers<[2], [2], [1], [1], [0, 0, 0, 1, 1, 1], [0], [0]>} : vector<2x64x4xbf16>, vector<2x64x4xbf16>, vector<2x64x64xf32> -> vector<2x64x64xf32>
    "tpu.trace_stop"() : () -> ()
    %cst_51 = arith.constant dense<0xFF800000> : vector<2x64xf32>
    %77 = vector.multi_reduction <maximumf>, %76, %cst_51 [2] : vector<2x64x64xf32> to vector<2x64xf32>
    %78 = vector.shape_cast %77 : vector<2x64xf32> to vector<2x64x1xf32>
    %79 = vector.broadcast %78 : vector<2x64x1xf32> to vector<2x64x64xf32>
    %80 = arith.subf %76, %79 : vector<2x64x64xf32>
    %81 = math.exp %80 : vector<2x64x64xf32>
    %cst_52 = arith.constant dense<0.000000e+00> : vector<2x64xf32>
    %82 = vector.multi_reduction <add>, %81, %cst_52 [2] : vector<2x64x64xf32> to vector<2x64xf32>
    %83 = vector.shape_cast %82 : vector<2x64xf32> to vector<2x64x1xf32>
    %84 = arith.truncf %81 : vector<2x64x64xf32> to vector<2x64x64xbf16>
    "tpu.trace_start"() <{level = 10 : i32, message = "bqk,bkd->bqd"}> : () -> ()
    %cst_53 = arith.constant dense<0.000000e+00> : vector<2x64x4xf32>
    %85 = tpu.matmul %84, %75, %cst_53 {dimension_numbers = #tpu.dot_dimension_numbers<[2], [1], [1], [2], [0, 0, 0, 1, 1, 2], [0], [0]>} : vector<2x64x64xbf16>, vector<2x64x4xbf16>, vector<2x64x4xf32> -> vector<2x64x4xf32>
    "tpu.trace_stop"() : () -> ()
    %86 = tpu.reciprocal %83 {approx = true} : vector<2x64x1xf32> -> vector<2x64x1xf32>
    %87 = vector.broadcast %86 : vector<2x64x1xf32> to vector<2x64x4xf32>
    %88 = arith.mulf %85, %87 : vector<2x64x4xf32>
    %89 = vector.shape_cast %88 : vector<2x64x4xf32> to vector<128x4xf32>
    %90 = arith.truncf %89 : vector<128x4xf32> to vector<128x4xbf16>
    %c0_54 = arith.constant 0 : index
    %c8_55 = arith.constant 8 : index
    %91 = vector.load %arg9[%c0_54, %c8_55] : memref<128x32xbf16, #tpu.memory_space<vmem>>, vector<128x4xbf16>
    tpu.vector_store %arg9[%c0_54, %c8_55], %90 {strides = array<i32>} : memref<128x32xbf16, #tpu.memory_space<vmem>>, vector<128x4xbf16>,
    %c0_56 = arith.constant 0 : index
    %c0_57 = arith.constant 0 : index
    %c12 = arith.constant 12 : index
    %92 = vector.load %arg8[%c0_56, %c0_57, %c12] : memref<2x64x96xbf16, #tpu.memory_space<vmem>>, vector<2x64x4xbf16>
    %c0_58 = arith.constant 0 : index
    %c0_59 = arith.constant 0 : index
    %c44 = arith.constant 44 : index
    %93 = vector.load %arg8[%c0_58, %c0_59, %c44] : memref<2x64x96xbf16, #tpu.memory_space<vmem>>, vector<2x64x4xbf16>
    %c0_60 = arith.constant 0 : index
    %c0_61 = arith.constant 0 : index
    %c76 = arith.constant 76 : index
    %94 = vector.load %arg8[%c0_60, %c0_61, %c76] : memref<2x64x96xbf16, #tpu.memory_space<vmem>>, vector<2x64x4xbf16>
    "tpu.trace_start"() <{level = 10 : i32, message = "bqd,bkd->bqk"}> : () -> ()
    %cst_62 = arith.constant dense<0.000000e+00> : vector<2x64x64xf32>
    %95 = tpu.matmul %92, %93, %cst_62 {dimension_numbers = #tpu.dot_dimension_numbers<[2], [2], [1], [1], [0, 0, 0, 1, 1, 1], [0], [0]>} : vector<2x64x4xbf16>, vector<2x64x4xbf16>, vector<2x64x64xf32> -> vector<2x64x64xf32>
    "tpu.trace_stop"() : () -> ()
    %cst_63 = arith.constant dense<0xFF800000> : vector<2x64xf32>
    %96 = vector.multi_reduction <maximumf>, %95, %cst_63 [2] : vector<2x64x64xf32> to vector<2x64xf32>
    %97 = vector.shape_cast %96 : vector<2x64xf32> to vector<2x64x1xf32>
    %98 = vector.broadcast %97 : vector<2x64x1xf32> to vector<2x64x64xf32>
    %99 = arith.subf %95, %98 : vector<2x64x64xf32>
    %100 = math.exp %99 : vector<2x64x64xf32>
    %cst_64 = arith.constant dense<0.000000e+00> : vector<2x64xf32>
    %101 = vector.multi_reduction <add>, %100, %cst_64 [2] : vector<2x64x64xf32> to vector<2x64xf32>
    %102 = vector.shape_cast %101 : vector<2x64xf32> to vector<2x64x1xf32>
    %103 = arith.truncf %100 : vector<2x64x64xf32> to vector<2x64x64xbf16>
    "tpu.trace_start"() <{level = 10 : i32, message = "bqk,bkd->bqd"}> : () -> ()
    %cst_65 = arith.constant dense<0.000000e+00> : vector<2x64x4xf32>
    %104 = tpu.matmul %103, %94, %cst_65 {dimension_numbers = #tpu.dot_dimension_numbers<[2], [1], [1], [2], [0, 0, 0, 1, 1, 2], [0], [0]>} : vector<2x64x64xbf16>, vector<2x64x4xbf16>, vector<2x64x4xf32> -> vector<2x64x4xf32>
    "tpu.trace_stop"() : () -> ()
    %105 = tpu.reciprocal %102 {approx = true} : vector<2x64x1xf32> -> vector<2x64x1xf32>
    %106 = vector.broadcast %105 : vector<2x64x1xf32> to vector<2x64x4xf32>
    %107 = arith.mulf %104, %106 : vector<2x64x4xf32>
    %108 = vector.shape_cast %107 : vector<2x64x4xf32> to vector<128x4xf32>
    %109 = arith.truncf %108 : vector<128x4xf32> to vector<128x4xbf16>
    %c0_66 = arith.constant 0 : index
    %c12_67 = arith.constant 12 : index
    %110 = vector.load %arg9[%c0_66, %c12_67] : memref<128x32xbf16, #tpu.memory_space<vmem>>, vector<128x4xbf16>
    tpu.vector_store %arg9[%c0_66, %c12_67], %109 {strides = array<i32>} : memref<128x32xbf16, #tpu.memory_space<vmem>>, vector<128x4xbf16>,
    %c0_68 = arith.constant 0 : index
    %c0_69 = arith.constant 0 : index
    %c16 = arith.constant 16 : index
    %111 = vector.load %arg8[%c0_68, %c0_69, %c16] : memref<2x64x96xbf16, #tpu.memory_space<vmem>>, vector<2x64x4xbf16>
    %c0_70 = arith.constant 0 : index
    %c0_71 = arith.constant 0 : index
    %c48 = arith.constant 48 : index
    %112 = vector.load %arg8[%c0_70, %c0_71, %c48] : memref<2x64x96xbf16, #tpu.memory_space<vmem>>, vector<2x64x4xbf16>
    %c0_72 = arith.constant 0 : index
    %c0_73 = arith.constant 0 : index
    %c80 = arith.constant 80 : index
    %113 = vector.load %arg8[%c0_72, %c0_73, %c80] : memref<2x64x96xbf16, #tpu.memory_space<vmem>>, vector<2x64x4xbf16>
    "tpu.trace_start"() <{level = 10 : i32, message = "bqd,bkd->bqk"}> : () -> ()
    %cst_74 = arith.constant dense<0.000000e+00> : vector<2x64x64xf32>
    %114 = tpu.matmul %111, %112, %cst_74 {dimension_numbers = #tpu.dot_dimension_numbers<[2], [2], [1], [1], [0, 0, 0, 1, 1, 1], [0], [0]>} : vector<2x64x4xbf16>, vector<2x64x4xbf16>, vector<2x64x64xf32> -> vector<2x64x64xf32>
    "tpu.trace_stop"() : () -> ()
    %cst_75 = arith.constant dense<0xFF800000> : vector<2x64xf32>
    %115 = vector.multi_reduction <maximumf>, %114, %cst_75 [2] : vector<2x64x64xf32> to vector<2x64xf32>
    %116 = vector.shape_cast %115 : vector<2x64xf32> to vector<2x64x1xf32>
    %117 = vector.broadcast %116 : vector<2x64x1xf32> to vector<2x64x64xf32>
    %118 = arith.subf %114, %117 : vector<2x64x64xf32>
    %119 = math.exp %118 : vector<2x64x64xf32>
    %cst_76 = arith.constant dense<0.000000e+00> : vector<2x64xf32>
    %120 = vector.multi_reduction <add>, %119, %cst_76 [2] : vector<2x64x64xf32> to vector<2x64xf32>
    %121 = vector.shape_cast %120 : vector<2x64xf32> to vector<2x64x1xf32>
    %122 = arith.truncf %119 : vector<2x64x64xf32> to vector<2x64x64xbf16>
    "tpu.trace_start"() <{level = 10 : i32, message = "bqk,bkd->bqd"}> : () -> ()
    %cst_77 = arith.constant dense<0.000000e+00> : vector<2x64x4xf32>
    %123 = tpu.matmul %122, %113, %cst_77 {dimension_numbers = #tpu.dot_dimension_numbers<[2], [1], [1], [2], [0, 0, 0, 1, 1, 2], [0], [0]>} : vector<2x64x64xbf16>, vector<2x64x4xbf16>, vector<2x64x4xf32> -> vector<2x64x4xf32>
    "tpu.trace_stop"() : () -> ()
    %124 = tpu.reciprocal %121 {approx = true} : vector<2x64x1xf32> -> vector<2x64x1xf32>
    %125 = vector.broadcast %124 : vector<2x64x1xf32> to vector<2x64x4xf32>
    %126 = arith.mulf %123, %125 : vector<2x64x4xf32>
    %127 = vector.shape_cast %126 : vector<2x64x4xf32> to vector<128x4xf32>
    %128 = arith.truncf %127 : vector<128x4xf32> to vector<128x4xbf16>
    %c0_78 = arith.constant 0 : index
    %c16_79 = arith.constant 16 : index
    %129 = vector.load %arg9[%c0_78, %c16_79] : memref<128x32xbf16, #tpu.memory_space<vmem>>, vector<128x4xbf16>
    tpu.vector_store %arg9[%c0_78, %c16_79], %128 {strides = array<i32>} : memref<128x32xbf16, #tpu.memory_space<vmem>>, vector<128x4xbf16>,
    %c0_80 = arith.constant 0 : index
    %c0_81 = arith.constant 0 : index
    %c20 = arith.constant 20 : index
    %130 = vector.load %arg8[%c0_80, %c0_81, %c20] : memref<2x64x96xbf16, #tpu.memory_space<vmem>>, vector<2x64x4xbf16>
    %c0_82 = arith.constant 0 : index
    %c0_83 = arith.constant 0 : index
    %c52 = arith.constant 52 : index
    %131 = vector.load %arg8[%c0_82, %c0_83, %c52] : memref<2x64x96xbf16, #tpu.memory_space<vmem>>, vector<2x64x4xbf16>
    %c0_84 = arith.constant 0 : index
    %c0_85 = arith.constant 0 : index
    %c84 = arith.constant 84 : index
    %132 = vector.load %arg8[%c0_84, %c0_85, %c84] : memref<2x64x96xbf16, #tpu.memory_space<vmem>>, vector<2x64x4xbf16>
    "tpu.trace_start"() <{level = 10 : i32, message = "bqd,bkd->bqk"}> : () -> ()
    %cst_86 = arith.constant dense<0.000000e+00> : vector<2x64x64xf32>
    %133 = tpu.matmul %130, %131, %cst_86 {dimension_numbers = #tpu.dot_dimension_numbers<[2], [2], [1], [1], [0, 0, 0, 1, 1, 1], [0], [0]>} : vector<2x64x4xbf16>, vector<2x64x4xbf16>, vector<2x64x64xf32> -> vector<2x64x64xf32>
    "tpu.trace_stop"() : () -> ()
    %cst_87 = arith.constant dense<0xFF800000> : vector<2x64xf32>
    %134 = vector.multi_reduction <maximumf>, %133, %cst_87 [2] : vector<2x64x64xf32> to vector<2x64xf32>
    %135 = vector.shape_cast %134 : vector<2x64xf32> to vector<2x64x1xf32>
    %136 = vector.broadcast %135 : vector<2x64x1xf32> to vector<2x64x64xf32>
    %137 = arith.subf %133, %136 : vector<2x64x64xf32>
    %138 = math.exp %137 : vector<2x64x64xf32>
    %cst_88 = arith.constant dense<0.000000e+00> : vector<2x64xf32>
    %139 = vector.multi_reduction <add>, %138, %cst_88 [2] : vector<2x64x64xf32> to vector<2x64xf32>
    %140 = vector.shape_cast %139 : vector<2x64xf32> to vector<2x64x1xf32>
    %141 = arith.truncf %138 : vector<2x64x64xf32> to vector<2x64x64xbf16>
    "tpu.trace_start"() <{level = 10 : i32, message = "bqk,bkd->bqd"}> : () -> ()
    %cst_89 = arith.constant dense<0.000000e+00> : vector<2x64x4xf32>
    %142 = tpu.matmul %141, %132, %cst_89 {dimension_numbers = #tpu.dot_dimension_numbers<[2], [1], [1], [2], [0, 0, 0, 1, 1, 2], [0], [0]>} : vector<2x64x64xbf16>, vector<2x64x4xbf16>, vector<2x64x4xf32> -> vector<2x64x4xf32>
    "tpu.trace_stop"() : () -> ()
    %143 = tpu.reciprocal %140 {approx = true} : vector<2x64x1xf32> -> vector<2x64x1xf32>
    %144 = vector.broadcast %143 : vector<2x64x1xf32> to vector<2x64x4xf32>
    %145 = arith.mulf %142, %144 : vector<2x64x4xf32>
    %146 = vector.shape_cast %145 : vector<2x64x4xf32> to vector<128x4xf32>
    %147 = arith.truncf %146 : vector<128x4xf32> to vector<128x4xbf16>
    %c0_90 = arith.constant 0 : index
    %c20_91 = arith.constant 20 : index
    %148 = vector.load %arg9[%c0_90, %c20_91] : memref<128x32xbf16, #tpu.memory_space<vmem>>, vector<128x4xbf16>
    tpu.vector_store %arg9[%c0_90, %c20_91], %147 {strides = array<i32>} : memref<128x32xbf16, #tpu.memory_space<vmem>>, vector<128x4xbf16>,
    %c0_92 = arith.constant 0 : index
    %c0_93 = arith.constant 0 : index
    %c24 = arith.constant 24 : index
    %149 = vector.load %arg8[%c0_92, %c0_93, %c24] : memref<2x64x96xbf16, #tpu.memory_space<vmem>>, vector<2x64x4xbf16>
    %c0_94 = arith.constant 0 : index
    %c0_95 = arith.constant 0 : index
    %c56 = arith.constant 56 : index
    %150 = vector.load %arg8[%c0_94, %c0_95, %c56] : memref<2x64x96xbf16, #tpu.memory_space<vmem>>, vector<2x64x4xbf16>
    %c0_96 = arith.constant 0 : index
    %c0_97 = arith.constant 0 : index
    %c88 = arith.constant 88 : index
    %151 = vector.load %arg8[%c0_96, %c0_97, %c88] : memref<2x64x96xbf16, #tpu.memory_space<vmem>>, vector<2x64x4xbf16>
    "tpu.trace_start"() <{level = 10 : i32, message = "bqd,bkd->bqk"}> : () -> ()
    %cst_98 = arith.constant dense<0.000000e+00> : vector<2x64x64xf32>
    %152 = tpu.matmul %149, %150, %cst_98 {dimension_numbers = #tpu.dot_dimension_numbers<[2], [2], [1], [1], [0, 0, 0, 1, 1, 1], [0], [0]>} : vector<2x64x4xbf16>, vector<2x64x4xbf16>, vector<2x64x64xf32> -> vector<2x64x64xf32>
    "tpu.trace_stop"() : () -> ()
    %cst_99 = arith.constant dense<0xFF800000> : vector<2x64xf32>
    %153 = vector.multi_reduction <maximumf>, %152, %cst_99 [2] : vector<2x64x64xf32> to vector<2x64xf32>
    %154 = vector.shape_cast %153 : vector<2x64xf32> to vector<2x64x1xf32>
    %155 = vector.broadcast %154 : vector<2x64x1xf32> to vector<2x64x64xf32>
    %156 = arith.subf %152, %155 : vector<2x64x64xf32>
    %157 = math.exp %156 : vector<2x64x64xf32>
    %cst_100 = arith.constant dense<0.000000e+00> : vector<2x64xf32>
    %158 = vector.multi_reduction <add>, %157, %cst_100 [2] : vector<2x64x64xf32> to vector<2x64xf32>
    %159 = vector.shape_cast %158 : vector<2x64xf32> to vector<2x64x1xf32>
    %160 = arith.truncf %157 : vector<2x64x64xf32> to vector<2x64x64xbf16>
    "tpu.trace_start"() <{level = 10 : i32, message = "bqk,bkd->bqd"}> : () -> ()
    %cst_101 = arith.constant dense<0.000000e+00> : vector<2x64x4xf32>
    %161 = tpu.matmul %160, %151, %cst_101 {dimension_numbers = #tpu.dot_dimension_numbers<[2], [1], [1], [2], [0, 0, 0, 1, 1, 2], [0], [0]>} : vector<2x64x64xbf16>, vector<2x64x4xbf16>, vector<2x64x4xf32> -> vector<2x64x4xf32>
    "tpu.trace_stop"() : () -> ()
    %162 = tpu.reciprocal %159 {approx = true} : vector<2x64x1xf32> -> vector<2x64x1xf32>
    %163 = vector.broadcast %162 : vector<2x64x1xf32> to vector<2x64x4xf32>
    %164 = arith.mulf %161, %163 : vector<2x64x4xf32>
    %165 = vector.shape_cast %164 : vector<2x64x4xf32> to vector<128x4xf32>
    %166 = arith.truncf %165 : vector<128x4xf32> to vector<128x4xbf16>
    %c0_102 = arith.constant 0 : index
    %c24_103 = arith.constant 24 : index
    %167 = vector.load %arg9[%c0_102, %c24_103] : memref<128x32xbf16, #tpu.memory_space<vmem>>, vector<128x4xbf16>
    tpu.vector_store %arg9[%c0_102, %c24_103], %166 {strides = array<i32>} : memref<128x32xbf16, #tpu.memory_space<vmem>>, vector<128x4xbf16>,
    %c0_104 = arith.constant 0 : index
    %c0_105 = arith.constant 0 : index
    %c28 = arith.constant 28 : index
    %168 = vector.load %arg8[%c0_104, %c0_105, %c28] : memref<2x64x96xbf16, #tpu.memory_space<vmem>>, vector<2x64x4xbf16>
    %c0_106 = arith.constant 0 : index
    %c0_107 = arith.constant 0 : index
    %c60 = arith.constant 60 : index
    %169 = vector.load %arg8[%c0_106, %c0_107, %c60] : memref<2x64x96xbf16, #tpu.memory_space<vmem>>, vector<2x64x4xbf16>
    %c0_108 = arith.constant 0 : index
    %c0_109 = arith.constant 0 : index
    %c92 = arith.constant 92 : index
    %170 = vector.load %arg8[%c0_108, %c0_109, %c92] : memref<2x64x96xbf16, #tpu.memory_space<vmem>>, vector<2x64x4xbf16>
    "tpu.trace_start"() <{level = 10 : i32, message = "bqd,bkd->bqk"}> : () -> ()
    %cst_110 = arith.constant dense<0.000000e+00> : vector<2x64x64xf32>
    %171 = tpu.matmul %168, %169, %cst_110 {dimension_numbers = #tpu.dot_dimension_numbers<[2], [2], [1], [1], [0, 0, 0, 1, 1, 1], [0], [0]>} : vector<2x64x4xbf16>, vector<2x64x4xbf16>, vector<2x64x64xf32> -> vector<2x64x64xf32>
    "tpu.trace_stop"() : () -> ()
    %cst_111 = arith.constant dense<0xFF800000> : vector<2x64xf32>
    %172 = vector.multi_reduction <maximumf>, %171, %cst_111 [2] : vector<2x64x64xf32> to vector<2x64xf32>
    %173 = vector.shape_cast %172 : vector<2x64xf32> to vector<2x64x1xf32>
    %174 = vector.broadcast %173 : vector<2x64x1xf32> to vector<2x64x64xf32>
    %175 = arith.subf %171, %174 : vector<2x64x64xf32>
    %176 = math.exp %175 : vector<2x64x64xf32>
    %cst_112 = arith.constant dense<0.000000e+00> : vector<2x64xf32>
    %177 = vector.multi_reduction <add>, %176, %cst_112 [2] : vector<2x64x64xf32> to vector<2x64xf32>
    %178 = vector.shape_cast %177 : vector<2x64xf32> to vector<2x64x1xf32>
    %179 = arith.truncf %176 : vector<2x64x64xf32> to vector<2x64x64xbf16>
    "tpu.trace_start"() <{level = 10 : i32, message = "bqk,bkd->bqd"}> : () -> ()
    %cst_113 = arith.constant dense<0.000000e+00> : vector<2x64x4xf32>
    %180 = tpu.matmul %179, %170, %cst_113 {dimension_numbers = #tpu.dot_dimension_numbers<[2], [1], [1], [2], [0, 0, 0, 1, 1, 2], [0], [0]>} : vector<2x64x64xbf16>, vector<2x64x4xbf16>, vector<2x64x4xf32> -> vector<2x64x4xf32>
    "tpu.trace_stop"() : () -> ()
    %181 = tpu.reciprocal %178 {approx = true} : vector<2x64x1xf32> -> vector<2x64x1xf32>
    %182 = vector.broadcast %181 : vector<2x64x1xf32> to vector<2x64x4xf32>
    %183 = arith.mulf %180, %182 : vector<2x64x4xf32>
    %184 = vector.shape_cast %183 : vector<2x64x4xf32> to vector<128x4xf32>
    %185 = arith.truncf %184 : vector<128x4xf32> to vector<128x4xbf16>
    %c0_114 = arith.constant 0 : index
    %c28_115 = arith.constant 28 : index
    %186 = vector.load %arg9[%c0_114, %c28_115] : memref<128x32xbf16, #tpu.memory_space<vmem>>, vector<128x4xbf16>
    tpu.vector_store %arg9[%c0_114, %c28_115], %185 {strides = array<i32>} : memref<128x32xbf16, #tpu.memory_space<vmem>>, vector<128x4xbf16>,
    %c0_116 = arith.constant 0 : index
    %c0_117 = arith.constant 0 : index
    %187 = vector.load %arg9[%c0_116, %c0_117] : memref<128x32xbf16, #tpu.memory_space<vmem>>, vector<128x32xbf16>
    %c0_118 = arith.constant 0 : index
    %c0_119 = arith.constant 0 : index
    %c0_120 = arith.constant 0 : index
    %188 = vector.load %arg5[%c0_118, %c0_119, %c0_120] : memref<1x32x32xbf16, #tpu.memory_space<vmem>>, vector<1x32x32xbf16>
    %189 = vector.shape_cast %188 : vector<1x32x32xbf16> to vector<32x32xbf16>
    %cst_121 = arith.constant dense<0.000000e+00> : vector<128x32xf32>
    %190 = tpu.matmul %187, %189, %cst_121 {dimension_numbers = #tpu.dot_dimension_numbers<[1], [0], [0], [1], [0, 0, 1, 1], [], []>} : vector<128x32xbf16>, vector<32x32xbf16>, vector<128x32xf32> -> vector<128x32xf32>
    %c0_122 = arith.constant 0 : index
    %c0_123 = arith.constant 0 : index
    %c0_124 = arith.constant 0 : index
    %191 = vector.load %arg6[%c0_122, %c0_123, %c0_124] : memref<1x1x32xf32, #tpu.memory_space<vmem>>, vector<1x1x32xf32>
    %192 = vector.shape_cast %191 : vector<1x1x32xf32> to vector<1x32xf32>
    %193 = vector.broadcast %192 : vector<1x32xf32> to vector<128x32xf32>
    %194 = arith.addf %190, %193 : vector<128x32xf32>
    %c0_125 = arith.constant 0 : index
    %c0_126 = arith.constant 0 : index
    %c0_127 = arith.constant 0 : index
    %195 = vector.load %arg7[%c0_125, %c0_126, %c0_127] : memref<1x128x32xf32, #tpu.memory_space<vmem>>, vector<1x128x32xf32>
    %196 = vector.shape_cast %195 : vector<1x128x32xf32> to vector<128x32xf32>
    %197 = vector.shape_cast %194 : vector<128x32xf32> to vector<1x128x32xf32>
    tpu.vector_store %arg7[%c0_125, %c0_126, %c0_127], %197 {strides = array<i32>} : memref<1x128x32xf32, #tpu.memory_space<vmem>>, vector<1x128x32xf32>,
    return
  }
  func.func @transform_0(%arg0: i32) -> (i32, i32, i32) {
    %c0_i32 = arith.constant 0 : i32
    %c0_i32_0 = arith.constant 0 : i32
    %c0_i32_1 = arith.constant 0 : i32
    return %arg0, %c0_i32, %c0_i32_0 : i32, i32, i32
  }
  func.func @transform_1(%arg0: i32) -> (i32, i32, i32) {
    %c0_i32 = arith.constant 0 : i32
    %c0_i32_0 = arith.constant 0 : i32
    %c0_i32_1 = arith.constant 0 : i32
    return %arg0, %c0_i32, %c0_i32_0 : i32, i32, i32
  }
  func.func @transform_2(%arg0: i32) -> (i32, i32, i32) {
    %c0_i32 = arith.constant 0 : i32
    %c0_i32_0 = arith.constant 0 : i32
    %c0_i32_1 = arith.constant 0 : i32
    return %arg0, %c0_i32, %c0_i32_0 : i32, i32, i32
  }
  func.func @transform_3(%arg0: i32) -> (i32, i32, i32) {
    %c0_i32 = arith.constant 0 : i32
    %c0_i32_0 = arith.constant 0 : i32
    %c0_i32_1 = arith.constant 0 : i32
    return %arg0, %c0_i32, %c0_i32_0 : i32, i32, i32
  }
  func.func @transform_4(%arg0: i32) -> (i32, i32, i32) {
    %c0_i32 = arith.constant 0 : i32
    %c0_i32_0 = arith.constant 0 : i32
    %c0_i32_1 = arith.constant 0 : i32
    return %arg0, %c0_i32, %c0_i32_0 : i32, i32, i32
  }
  func.func @transform_5(%arg0: i32) -> (i32, i32, i32) {
    %c0_i32 = arith.constant 0 : i32
    %c0_i32_0 = arith.constant 0 : i32
    %c0_i32_1 = arith.constant 0 : i32
    return %arg0, %c0_i32, %c0_i32_0 : i32, i32, i32
  }
  func.func @transform_6(%arg0: i32) -> (i32, i32, i32) {
    %c0_i32 = arith.constant 0 : i32
    %c0_i32_0 = arith.constant 0 : i32
    %c0_i32_1 = arith.constant 0 : i32
    return %arg0, %c0_i32, %c0_i32_0 : i32, i32, i32
  }
}

</mosaic_0001>

<bundles_post_ra>
// kernel: parallel_block_forward.1
= control target key start
LH: loop header
LB: loop body
LE: loop exit
PB: predicated region body
PF: predicated region fallthrough
CT: control target
= control target key end

     0   :  { %s7346_s21 = smov 0   ;;  %s11038_s0 = inlined_call_operand.vmem [shape: f32[3,128,32], index: 0, kind: input, shape index: {}]   ;;  %s11039_s1 = inlined_call_operand.vmem [shape: f32[3,1,32], index: 1, kind: input, shape index: {}]   ;;  %s11040_s2 = inlined_call_operand.vmem [shape: f32[3,1,32], index: 2, kind: input, shape index: {}]   ;;  %s11041_s3 = inlined_call_operand.vmem [shape: bf16[3,32,96], index: 3, kind: input, shape index: {}]   ;;  %s11042_s4 = inlined_call_operand.vmem [shape: bf16[3,32,32], index: 4, kind: input, shape index: {}]   ;;  %s11043_s5 = inlined_call_operand.vmem [shape: f32[3,1,32], index: 5, kind: input, shape index: {}]   ;;  %s11044_s6 = inlined_call_operand.vmem [shape: f32[3,128,32], index: 6, kind: output, shape index: {}]  }
   0x1 LB: > { %s6131_s22 = sadd.s32 4294967295, %s7279_s21   ;;  %p6135_p0 = scmp.ge.s32.totalorder %s7279_s21, 1  ;;  %s7279_s21 = sphi %s7346_s21, %s16_s21  }
   0x2   : > { %p256_p1 = scmp.lt.s32.totalorder %s7279_s21, 4 }
   0x4   : > { %p257_p2 = pnand %p6135_p0, %p256_p1 }
   0x6   : > { %260 = sbr.rel (%p257_p2) target bundleno = 3281 (0xcd1), region = 44 }
   0xb   : > { %p305_p3 = scmp.lt.s32.totalorder %s6131_s22, 2  ;;  %vm11060_vm0 = vcmask 261120   ;;  %s7281_s20 = smov 92  }
   0xc   : > { %s7282_s24 = smov 64   ;;  %s7283_s25 = smov 96  }
   0xd   : > { %s11218_s22 = smov (!%p305_p3, %s6131_s22), 2  ;;  %s7285_s27 = smov 124  }
   0xe   : > { %s6594_s23 = sshll.u32 %s11218_s22, 7  ;;  %s312_s26 = scalar_lea.vmem %s11039_s1, %s11218_s22 }
   0xf   : > { %s7366_s29 = scalar_lea.vmem %s11038_s0, %s6594_s23  ;;  %s315_s8 = scalar_lea.vmem %s11040_s2, %s11218_s22 }
  0x10   : > { %s328_s11 = scalar_lea.vmem %s11043_s5, %s11218_s22  ;;  %v7377_v0 = vld [vmem:[%s7366_s29 + $0x20] sm:$0xff]  ;;  %v7382_v2 = vld [vmem:[%s7366_s29 + $0x10] sm:$0xff]  ;;  %v7392_v6 = vld [vmem:[%s7366_s29 + $0x28] sm:$0xff]  ;;  %s6595_s12 = sshll.u32 %s11218_s22, 4 }
  0x11   : > { %v364_v1 = vsel %vm11060_vm0, %v7377_v0, 0.0  ;;  %v358_v3 = vsel %vm11060_vm0, %v7382_v2, 0.0  ;;  %v7387_v4 = vld [vmem:[%s7366_s29] sm:$0xff]  ;;  %v7395_v7 = vld [vmem:[%s7366_s29 + $0x18] sm:$0xff]  ;;  %v7398_v8 = vld [vmem:[%s7366_s29 + $0x8] sm:$0xff]  ;;  %v367_v9 = vsel %vm11060_vm0, %v7392_v6, 0.0  ;;  %v420_v36 = vmul.f32 %v7377_v0, %v7377_v0  ;;  %s320_s15 = scalar_lea.vmem %s11041_s3, %s6595_s12 }
  0x12   : > { %365 = vadd.xlane.f32.xlu2 %v364_v1  ;;  %359 = vadd.xlane.f32.xlu1 %v358_v3  ;;  %v352_v5 = vsel %vm11060_vm0, %v7387_v4, 0.0  ;;  %v361_v10 = vsel %vm11060_vm0, %v7395_v7, 0.0  ;;  %v355_v11 = vsel %vm11060_vm0, %v7398_v8, 0.0  ;;  %v7407_v12 = vld [vmem:[%s7366_s29 + $0x40] sm:$0xff]  ;;  %v7410_v13 = vld [vmem:[%s7366_s29 + $0x38] sm:$0xff]  ;;  %v7413_v14 = vld [vmem:[%s7366_s29 + $0x30] sm:$0xff]  ;;  %v417_v30 = vmul.f32 %v7398_v8, %v7398_v8 }
  0x13   : > { %353 = vadd.xlane.f32.xlu0 %v352_v5  ;;  %v376_v15 = vsel %vm11060_vm0, %v7407_v12, 0.0  ;;  %v373_v16 = vsel %vm11060_vm0, %v7410_v13, 0.0  ;;  %v370_v17 = vsel %vm11060_vm0, %v7413_v14, 0.0  ;;  %v7422_v18 = vld [vmem:[%s7366_s29 + $0x58] sm:$0xff]  ;;  %v7425_v19 = vld [vmem:[%s7366_s29 + $0x50] sm:$0xff]  ;;  %v7428_v20 = vld [vmem:[%s7366_s29 + $0x48] sm:$0xff]  ;;  %v416_v31 = vmul.f32 %v7387_v4, %v7387_v4 }
  0x14   : > { %11076 = vst [vmem:[#allocation4_spill] sm:$0xff] %v7422_v18  ;;  %v385_v21 = vsel %vm11060_vm0, %v7422_v18, 0.0  ;;  %v382_v22 = vsel %vm11060_vm0, %v7425_v19, 0.0  ;;  %v379_v23 = vsel %vm11060_vm0, %v7428_v20, 0.0  ;;  %v7437_v24 = vld [vmem:[%s7366_s29 + $0x70] sm:$0xff]  ;;  %v7440_v25 = vld [vmem:[%s7366_s29 + $0x68] sm:$0xff]  ;;  %v419_v37 = vmul.f32 %v7395_v7, %v7395_v7 }
  0x15   : > { %11077 = vst [vmem:[#allocation5_spill] sm:$0xff] %v7425_v19  ;;  %v7443_v26 = vld [vmem:[%s7366_s29 + $0x60] sm:$0xff]  ;;  %v394_v27 = vsel %vm11060_vm0, %v7437_v24, 0.0  ;;  %v391_v28 = vsel %vm11060_vm0, %v7440_v25, 0.0  ;;  %v7456_v32 = vld [vmem:[%s7366_s29 + $0x78] sm:$0xff]  ;;  %v435_v33 = vsel %vm11060_vm0, %v417_v30, 0.0  ;;  %v418_v38 = vmul.f32 %v7382_v2, %v7382_v2 }
  0x16   : > { %11078 = vst [vmem:[#allocation6_spill] sm:$0xff] %v7428_v20  ;;  %v388_v29 = vsel %vm11060_vm0, %v7443_v26, 0.0  ;;  %v432_v34 = vsel %vm11060_vm0, %v416_v31, 0.0  ;;  %v397_v35 = vsel %vm11060_vm0, %v7456_v32, 0.0  ;;  %v444_v39 = vsel %vm11060_vm0, %v420_v36, 0.0  ;;  %s7286_s28 = smov 120  }
  0x17   : > { %11079 = vst [vmem:[#allocation7_spill] sm:$0xff] %v7437_v24  ;;  %v441_v40 = vsel %vm11060_vm0, %v419_v37, 0.0  ;;  %v438_v41 = vsel %vm11060_vm0, %v418_v38, 0.0  ;;  %v423_v42 = vmul.f32 %v7410_v13, %v7410_v13  ;;  %v422_v43 = vmul.f32 %v7413_v14, %v7413_v14  ;;  %s7287_s29 = smov 80   ;;  %s7288_s30 = smov 60  }
  0x18   : > { %11080 = vst [vmem:[#allocation8_spill] sm:$0xff] %v7440_v25  ;;  %v421_v44 = vmul.f32 %v7392_v6, %v7392_v6  ;;  %v426_v48 = vmul.f32 %v7425_v19, %v7425_v19  ;;  %v425_v49 = vmul.f32 %v7428_v20, %v7428_v20  ;;  %v424_v50 = vmul.f32 %v7407_v12, %v7407_v12  ;;  %s7289_s7 = smov 56   ;;  %s7291_s9 = smov 116  }
  0x19   : > { %11081 = vst [vmem:[#allocation9_spill] sm:$0xff] %v7443_v26  ;;  %v453_v45 = vsel %vm11060_vm0, %v423_v42, 0.0  ;;  %v450_v46 = vsel %vm11060_vm0, %v422_v43, 0.0  ;;  %v429_v54 = vmul.f32 %v7440_v25, %v7440_v25  ;;  %v428_v55 = vmul.f32 %v7443_v26, %v7443_v26  ;;  %s7292_s10 = smov 52   ;;  %s7293_s13 = smov 112  }
  0x1a   : > { %368 = vadd.xlane.f32.xlu2 %v367_v9  ;;  %362 = vadd.xlane.f32.xlu1 %v361_v10  ;;  %11082 = vst [vmem:[#allocation10_spill] sm:$0xff] %v7456_v32  ;;  %v447_v47 = vsel %vm11060_vm0, %v421_v44, 0.0  ;;  %v462_v51 = vsel %vm11060_vm0, %v426_v48, 0.0  ;;  %v459_v52 = vsel %vm11060_vm0, %v425_v49, 0.0  ;;  %v456_v53 = vsel %vm11060_vm0, %v424_v50, 0.0  ;;  %s7294_s14 = smov 4  }
  0x1b   : > { %356 = vadd.xlane.f32.xlu0 %v355_v11  ;;  %v427_v56 = vmul.f32 %v7422_v18, %v7422_v18  ;;  %v471_v57 = vsel %vm11060_vm0, %v429_v54, 0.0  ;;  %v468_v58 = vsel %vm11060_vm0, %v428_v55, 0.0  ;;  %v431_v60 = vmul.f32 %v7456_v32, %v7456_v32  ;;  %s7296_s16 = smov 12   ;;  %s7297_s17 = smov 76  }
  0x1c   : > { %v430_v61 = vmul.f32 %v7437_v24, %v7437_v24  ;;  %s7298_s18 = smov 108   ;;  %s7299_s19 = smov 72  }
  0x1d   : > { %v465_v59 = vsel %vm11060_vm0, %v427_v56, 0.0  ;;  %v477_v62 = vsel %vm11060_vm0, %v431_v60, 0.0 }
  0x1e   : > { %v474_v63 = vsel %vm11060_vm0, %v430_v61, 0.0 }
  0x22   : > { %377 = vadd.xlane.f32.xlu2 %v376_v15  ;;  %374 = vadd.xlane.f32.xlu1 %v373_v16 }
  0x23   : > { %371 = vadd.xlane.f32.xlu0 %v370_v17 }
  0x2a   : > { %386 = vadd.xlane.f32.xlu2 %v385_v21  ;;  %383 = vadd.xlane.f32.xlu1 %v382_v22 }
  0x2b   : > { %380 = vadd.xlane.f32.xlu0 %v379_v23 }
  0x32   : > { %395 = vadd.xlane.f32.xlu2 %v394_v27  ;;  %392 = vadd.xlane.f32.xlu1 %v391_v28 }
  0x33   : > { %389 = vadd.xlane.f32.xlu0 %v388_v29 }
  0x3a   : > { %436 = vadd.xlane.f32.xlu2 %v435_v33  ;;  %433 = vadd.xlane.f32.xlu1 %v432_v34  ;;  %v6599_v33 = vld [vmem:[%s320_s15 + $0x8] sm:$0xff] }
  0x3b   : > { %398 = vadd.xlane.f32.xlu0 %v397_v35  ;;  %830 = vmatpush.bf16.msra.mxu0 %v6599_v33 }
  0x42   : > { %445 = vadd.xlane.f32.xlu2 %v444_v39  ;;  %442 = vadd.xlane.f32.xlu1 %v441_v40 }
  0x43   : > { %439 = vadd.xlane.f32.xlu0 %v438_v41  ;;  %v6598_v41 = vld [vmem:[%s320_s15] sm:$0xff]  ;;  %s7295_s15 = smov 8  }
  0x44   : > { %831 = vmatpush.bf16.msra.mxu0 %v6598_v41 }
  0x4a   : > { %454 = vadd.xlane.f32.xlu2 %v453_v45  ;;  %451 = vadd.xlane.f32.xlu1 %v450_v46 }
  0x4b   : > { %448 = vadd.xlane.f32.xlu0 %v447_v47 }
  0x52   : > { %463 = vadd.xlane.f32.xlu2 %v462_v51  ;;  %460 = vadd.xlane.f32.xlu1 %v459_v52 }
  0x53   : > { %457 = vadd.xlane.f32.xlu0 %v456_v53 }
  0x5a   : > { %472 = vadd.xlane.f32.xlu2 %v471_v57  ;;  %469 = vadd.xlane.f32.xlu1 %v468_v58 }
  0x5b   : > { %466 = vadd.xlane.f32.xlu0 %v465_v59 }
  0x62   : > { %478 = vadd.xlane.f32.xlu1 %v477_v62 }
  0x63   : > { %475 = vadd.xlane.f32.xlu0 %v474_v63 }
  0x85   : > { %v366_v1 = vpop.xlane.xlu2 %365  ;;  %v360_v3 = vpop.xlane.xlu1 %359 }
  0x86   : > { %v354_v5 = vpop.xlane.xlu0 %353  ;;  %v7530_v44 = vmul.f32 0.03125, %v366_v1  ;;  %v7538_v48 = vmul.f32 0.03125, %v360_v3 }
  0x87   : > { %v7522_v31 = vmul.f32 0.03125, %v354_v5 }
  0x88   : > { %v500_v51 = vmul.f32 %v7530_v44, %v7530_v44  ;;  %v498_v59 = vmul.f32 %v7538_v48, %v7538_v48 }
  0x89   : > { %v496_v38 = vmul.f32 %v7522_v31, %v7522_v31 }
  0x8d   : > { %v369_v9 = vpop.xlane.xlu2 %368  ;;  %v363_v10 = vpop.xlane.xlu1 %362 }
  0x8e   : > { %v357_v11 = vpop.xlane.xlu0 %356  ;;  %v7534_v46 = vmul.f32 0.03125, %v363_v10  ;;  %v7541_v49 = vmul.f32 0.03125, %v369_v9 }
  0x8f   : > { %v7520_v30 = vmul.f32 0.03125, %v357_v11 }
  0x90   : > { %v499_v55 = vmul.f32 %v7534_v46, %v7534_v46  ;;  %v7560_v1 = vmul.f32 %v7541_v49, %v7541_v49 }
  0x91   : > { %v497_v35 = vmul.f32 %v7520_v30, %v7520_v30 }
  0x95   : > { %v378_v15 = vpop.xlane.xlu2 %377  ;;  %v375_v16 = vpop.xlane.xlu1 %374 }
  0x96   : > { %v372_v17 = vpop.xlane.xlu0 %371  ;;  %v7550_v56 = vmul.f32 0.03125, %v378_v15  ;;  %v7562_v3 = vmul.f32 0.03125, %v375_v16 }
  0x97   : > { %v7568_v11 = vmul.f32 0.03125, %v372_v17 }
  0x98   : > { %11083 = vst [vmem:[#allocation11_spill] sm:$0xff] %v7550_v56  ;;  %v503_v41 = vmul.f32 %v7562_v3, %v7562_v3 }
  0x9d   : > { %v387_v21 = vpop.xlane.xlu2 %386  ;;  %v7504_v22 = vpop.xlane.xlu1 %383 }
  0x9e   : > { %v7506_v23 = vpop.xlane.xlu0 %380 }
  0xa5   : > { %v7508_v27 = vpop.xlane.xlu2 %395  ;;  %v7511_v28 = vpop.xlane.xlu1 %392 }
  0xa6   : > { %v7513_v29 = vpop.xlane.xlu0 %389  ;;  %v7619_v17 = vmul.f32 0.03125, %v7508_v27 }
  0xa8   : > { %11087 = vst [vmem:[#allocation15_spill] sm:$0xff] %v7619_v17 }
  0xad   : > { %v437_v34 = vpop.xlane.xlu2 %436  ;;  %v434_v37 = vpop.xlane.xlu1 %433 }
  0xae   : > { %v481_v36 = vmul.f32 0.03125, %v437_v34  ;;  %v480_v39 = vmul.f32 0.03125, %v434_v37  ;;  %v7528_v40 = vpop.xlane.xlu0 %398 }
  0xb0   : > { %v513_v42 = vsub.f32 %v481_v36, %v497_v35  ;;  %v512_v43 = vsub.f32 %v480_v39, %v496_v38  ;;  %v7580_v36 = vmul.f32 %v7550_v56, %v7550_v56  ;;  %v7586_v38 = vmul.f32 0.03125, %v387_v21 }
  0xb2   : > { %v7532_v45 = vadd.f32 1e-05, %v513_v42  ;;  %v7536_v47 = vadd.f32 1e-05, %v512_v43  ;;  %11084 = vst [vmem:[#allocation12_spill] sm:$0xff] %v7586_v38 }
  0xb4   : > { %6715 = vrsqrt.f32 %v7532_v45  ;;  %vm576_vm1 = vweird.f32 %v7532_v45  ;;  %vm566_vm4 = vweird.f32 %v7536_v47 }
  0xb5   : > { %6717 = vrsqrt.f32 %v7536_v47  ;;  %v446_v50 = vpop.xlane.xlu2 %445  ;;  %v443_v53 = vpop.xlane.xlu1 %442 }
  0xb6   : > { %v484_v52 = vmul.f32 0.03125, %v446_v50  ;;  %v483_v57 = vmul.f32 0.03125, %v443_v53  ;;  %v440_v58 = vpop.xlane.xlu0 %439 }
  0xb7   : > { %v482_v62 = vmul.f32 0.03125, %v440_v58  ;;  %v7608_v58 = vmul.f32 0.03125, %v7506_v23 }
  0xb8   : > { %v516_v61 = vsub.f32 %v484_v52, %v500_v51  ;;  %v515_v5 = vsub.f32 %v483_v57, %v499_v55  ;;  %v502_v51 = vmul.f32 %v7568_v11, %v7568_v11  ;;  %v7603_v52 = vmul.f32 0.03125, %v7504_v22 }
  0xb9   : > { %v514_v33 = vsub.f32 %v482_v62, %v498_v59  ;;  %11086 = vst [vmem:[#allocation14_spill] sm:$0xff] %v7608_v58  ;;  %v7613_v62 = vmul.f32 %v7586_v38, %v7586_v38  ;;  %v505_v27 = vmul.f32 %v7608_v58, %v7608_v58 }
  0xba   : > { %v7564_v9 = vpop.eup %6715  ;;  %v7570_v15 = vadd.f32 1e-05, %v516_v61  ;;  %v7582_v37 = vadd.f32 1e-05, %v515_v5  ;;  %11085 = vst [vmem:[#allocation13_spill] sm:$0xff] %v7603_v52 }
  0xbb   : > { %v7572_v34 = vpop.eup %6717  ;;  %v571_v42 = vmul.f32 %v7564_v9, %v7532_v45  ;;  %v7596_v43 = vadd.f32 1e-05, %v514_v33  ;;  %vm577_vm2 = vweird.f32 %v7564_v9 }
  0xbc   : > { %v561_v39 = vmul.f32 %v7572_v34, %v7536_v47  ;;  %6719 = vrsqrt.f32 %v7570_v15  ;;  %vm567_vm3 = vweird.f32 %v7572_v34  ;;  %vm7719_vm6 = vmor %vm576_vm1, %vm577_vm2  ;;  %vm596_vm11 = vweird.f32 %v7582_v37 }
  0xbd   : > { %6721 = vrsqrt.f32 %v7582_v37  ;;  %v455_v50 = vpop.xlane.xlu2 %454  ;;  %v452_v55 = vpop.xlane.xlu1 %451  ;;  %v572_v23 = vmul.f32 %v7564_v9, %v571_v42  ;;  %vm7706_vm5 = vmor %vm566_vm4, %vm567_vm3  ;;  %vm586_vm9 = vweird.f32 %v7596_v43  ;;  %vm606_vm12 = vweird.f32 %v7570_v15 }
  0xbe   : > { %v487_v53 = vmul.f32 0.03125, %v455_v50  ;;  %6723 = vrsqrt.f32 %v7596_v43  ;;  %v486_v59 = vmul.f32 0.03125, %v452_v55  ;;  %v449_v61 = vpop.xlane.xlu0 %448  ;;  %v562_v5 = vmul.f32 %v7572_v34, %v561_v39 }
  0xbf   : > { %v485_v33 = vmul.f32 0.03125, %v449_v61  ;;  %v506_v55 = vmul.f32 %v7603_v52, %v7603_v52  ;;  %v7643_v61 = vmul.f32 0.03125, %v7513_v29  ;;  %v7652_v50 = vmul.f32 %v7619_v17, %v7619_v17 }
  0xc0   : > { %v519_v22 = vsub.f32 %v487_v53, %v503_v41  ;;  %v518_v21 = vsub.f32 %v486_v59, %v502_v51  ;;  %v7638_v51 = vmul.f32 0.03125, %v7511_v28  ;;  %v573_v10 = vmul.f32 0.5, %v572_v23 }
  0xc1   : > { %v517_v41 = vsub.f32 %v485_v33, %v7560_v1  ;;  %11089 = vst [vmem:[#allocation17_spill] sm:$0xff] %v7643_v61 }
  0xc2   : > { %v7622_v57 = vpop.eup %6719  ;;  %v7628_v39 = vadd.f32 1e-05, %v519_v22  ;;  %11088 = vst [vmem:[#allocation16_spill] sm:$0xff] %v7638_v51  ;;  %v7640_v59 = vadd.f32 1e-05, %v518_v21  ;;  %v563_v22 = vmul.f32 0.5, %v562_v5  ;;  %v509_v23 = vmul.f32 %v7638_v51, %v7638_v51 }
  0xc3   : > { %v7631_v53 = vpop.eup %6721  ;;  %v601_v1 = vmul.f32 %v7622_v57, %v7570_v15  ;;  %v7660_v5 = vmul.f32 0.03125, %v7528_v40  ;;  %v7664_v54 = vadd.f32 1e-05, %v517_v41  ;;  %v7672_v21 = vmul.f32 %v7643_v61, %v7643_v61 }
  0xc4   : > { %6725 = vrsqrt.f32 %v7628_v39  ;;  %v7648_v33 = vpop.eup %6723  ;;  %v591_v28 = vmul.f32 %v7631_v53, %v7582_v37  ;;  %v564_v40 = vsub.f32 1.5, %v563_v22  ;;  %v574_v41 = vsub.f32 1.5, %v573_v10 }
  0xc5   : > { %6727 = vrsqrt.f32 %v7640_v59  ;;  %v464_v29 = vpop.xlane.xlu2 %463  ;;  %11090 = vst [vmem:[#allocation18_spill] sm:$0xff] %v7660_v5  ;;  %v581_v42 = vmul.f32 %v7648_v33, %v7596_v43  ;;  %v461_v35 = vpop.xlane.xlu1 %460  ;;  %v602_v17 = vmul.f32 %v7622_v57, %v601_v1  ;;  %vm587_vm7 = vweird.f32 %v7648_v33 }
  0xc6   : > { %v490_v16 = vmul.f32 0.03125, %v464_v29  ;;  %v489_v63 = vmul.f32 0.03125, %v461_v35  ;;  %v458_v32 = vpop.xlane.xlu0 %457  ;;  %6729 = vrsqrt.f32 %v7664_v54  ;;  %v592_v24 = vmul.f32 %v7631_v53, %v591_v28  ;;  %vm7825_vm4 = vmor %vm586_vm9, %vm587_vm7 }
  0xc7   : > { %v7683_v29 = vmul.f32 %v7660_v5, %v7660_v5  ;;  %v582_v22 = vmul.f32 %v7648_v33, %v581_v42  ;;  %v488_v60 = vmul.f32 0.03125, %v458_v32  ;;  %v575_v32 = vmul.f32 %v7564_v9, %v574_v41 }
  0xc8   : > { %v522_v38 = vsub.f32 %v490_v16, %v506_v55  ;;  %v521_v18 = vsub.f32 %v489_v63, %v505_v27  ;;  %v565_v16 = vmul.f32 %v7572_v34, %v564_v40  ;;  %v603_v55 = vmul.f32 0.5, %v602_v17 }
  0xc9   : > { %v593_v42 = vmul.f32 0.5, %v592_v24  ;;  %v520_v40 = vsub.f32 %v488_v60, %v7580_v36  ;;  %v579_v45 = vsel %vm7719_vm6, %v7564_v9, %v575_v32  ;;  %v7744_v9 = vld [vmem:[%s312_s26] ss:$0 sm:$0xff]  ;;  %vm597_vm8 = vweird.f32 %v7631_v53  ;;  %s7284_s26 = smov 88  }
  0xca   : > { %v7677_v52 = vpop.eup %6725  ;;  %v7692_v10 = vadd.f32 1e-05, %v522_v38  ;;  %v7700_v28 = vadd.f32 1e-05, %v521_v18  ;;  %v583_v38 = vmul.f32 0.5, %v582_v22  ;;  %v604_v60 = vsub.f32 1.5, %v603_v55  ;;  %vm7847_vm7 = vmor %vm596_vm11, %vm597_vm8 }
  0xcb   : > { %v7686_v1 = vpop.eup %6727  ;;  %v631_v63 = vmul.f32 %v7677_v52, %v7628_v39  ;;  %v7723_v36 = vadd.f32 1e-05, %v520_v40  ;;  %v569_v22 = vsel %vm7706_vm5, %v7572_v34, %v565_v16  ;;  %v11095_v16 = vsub.f32 %v7387_v4, %v7522_v31  ;;  %v7772_v4 = vld [vmem:[%s315_s8] ss:$0 sm:$0xff]  ;;  %s7290_s8 = smov 84  }
  0xcc   : > { %v621_v27 = vmul.f32 %v7686_v1, %v7640_v59  ;;  %6731 = vrsqrt.f32 %v7692_v10  ;;  %v7702_v5 = vpop.eup %6729  ;;  %v584_v19 = vsub.f32 1.5, %v583_v38  ;;  %vm607_vm10 = vweird.f32 %v7622_v57 }
  0xcd   : > { %v473_v35 = vpop.xlane.xlu2 %472  ;;  %v470_v17 = vpop.xlane.xlu1 %469  ;;  %v632_v24 = vmul.f32 %v7677_v52, %v631_v63  ;;  %v611_v18 = vmul.f32 %v7702_v5, %v7664_v54  ;;  %6733 = vrsqrt.f32 %v7700_v28  ;;  %v594_v63 = vsub.f32 1.5, %v593_v42  ;;  %vm7873_vm11 = vmor %vm606_vm12, %vm607_vm10 }
  0xce   : > { %v493_v51 = vmul.f32 0.03125, %v473_v35  ;;  %v622_v41 = vmul.f32 %v7686_v1, %v621_v27  ;;  %v467_v61 = vpop.xlane.xlu0 %466  ;;  %v492_v27 = vmul.f32 0.03125, %v470_v17  ;;  %6735 = vrsqrt.f32 %v7723_v36 }
  0xcf   : > { %v491_v26 = vmul.f32 0.03125, %v467_v61  ;;  %v612_v58 = vmul.f32 %v7702_v5, %v611_v18  ;;  %v720_v32 = vmul.f32 %v569_v22, %v11095_v16  ;;  %vm627_vm13 = vweird.f32 %v7686_v1 }
  0xd0   : > { %v525_v35 = vsub.f32 %v493_v51, %v509_v23  ;;  %v633_v51 = vmul.f32 0.5, %v632_v24  ;;  %v623_v25 = vmul.f32 0.5, %v622_v41  ;;  %v524_v34 = vsub.f32 %v492_v27, %v7672_v21 }
  0xd1   : > { %v523_v61 = vsub.f32 %v491_v26, %v7613_v62  ;;  %v7756_v26 = vmul.f32 %v7622_v57, %v604_v60  ;;  %v7759_v62 = vmul.f32 %v7631_v53, %v594_v63  ;;  %v613_v31 = vmul.f32 0.5, %v612_v58 }
  0xd2   : > { %v7733_v55 = vadd.f32 1e-05, %v525_v35  ;;  %v7735_v40 = vpop.eup %6731  ;;  %v7763_v42 = vadd.f32 1e-05, %v524_v34  ;;  %v11096_v41 = vsub.f32 %v7398_v8, %v7520_v30  ;;  %v7783_v60 = vmul.f32 %v7648_v33, %v584_v19 }
  0xd3   : > { %v661_v23 = vmul.f32 %v7735_v40, %v7692_v10  ;;  %v7753_v21 = vpop.eup %6733  ;;  %v7765_v38 = vadd.f32 1e-05, %v523_v61  ;;  %v634_v35 = vsub.f32 1.5, %v633_v51  ;;  %v624_v22 = vsub.f32 1.5, %v623_v25 }
  0xd4   : > { %6737 = vrsqrt.f32 %v7733_v55  ;;  %v651_v24 = vmul.f32 %v7753_v21, %v7700_v28  ;;  %v721_v18 = vmul.f32 %v579_v45, %v11096_v41  ;;  %v7786_v63 = vpop.eup %6735  ;;  %v740_v8 = vmul.f32 %v7744_v9, %v720_v32 }
  0xd5   : > { %v662_v17 = vmul.f32 %v7735_v40, %v661_v23  ;;  %v479_v47 = vpop.xlane.xlu1 %478  ;;  %6739 = vrsqrt.f32 %v7763_v42  ;;  %vm617_vm14 = vweird.f32 %v7702_v5  ;;  %v641_v19 = vmul.f32 %v7786_v63, %v7723_v36 }
  0xd6   : > { %v476_v58 = vpop.xlane.xlu0 %475  ;;  %v652_v34 = vmul.f32 %v7753_v21, %v651_v24  ;;  %6741 = vrsqrt.f32 %v7765_v38  ;;  %v741_v30 = vmul.f32 %v7744_v9, %v721_v18  ;;  %v495_v45 = vmul.f32 0.03125, %v479_v47 }
  0xd7   : > { %v663_v27 = vmul.f32 0.5, %v662_v17  ;;  %vm637_vm15 = vweird.f32 %v7677_v52  ;;  %v614_v25 = vsub.f32 1.5, %v613_v31  ;;  %vm616_vm1 = vweird.f32 %v7664_v54 }
  0xd8   : > { %v653_v61 = vmul.f32 0.5, %v652_v34  ;;  %v760_v23 = vadd.f32 %v7772_v4, %v740_v8  ;;  %v494_v16 = vmul.f32 0.03125, %v476_v58  ;;  %v7803_v32 = vmul.f32 %v7677_v52, %v634_v35 }
  0xd9   : > { %vm626_vm2 = vweird.f32 %v7640_v59  ;;  %v642_v17 = vmul.f32 %v7786_v63, %v641_v19  ;;  %v761_v41 = vadd.f32 %v7772_v4, %v741_v30  ;;  %vm636_vm3 = vweird.f32 %v7628_v39 }
  0xda   : > { %v7797_v51 = vpop.eup %6737  ;;  %v7812_v31 = vmul.f32 %v7686_v1, %v624_v22  ;;  %v664_v18 = vsub.f32 1.5, %v663_v27  ;;  %v527_v47 = vsub.f32 %v495_v45, %v7683_v29  ;;  %v526_v35 = vsub.f32 %v494_v16, %v7652_v50 }
  0xdb   : > { %v691_v24 = vmul.f32 %v7797_v51, %v7733_v55  ;;  %v7816_v58 = vpop.eup %6739  ;;  %v654_v34 = vsub.f32 1.5, %v653_v61  ;;  %v643_v8 = vmul.f32 0.5, %v642_v17  ;;  %v776_v20 = vpack.c.bf16 %v761_v41, %v760_v23 }
  0xdc   : > { %v7819_v56 = vpop.eup %6741  ;;  %v615_v29 = vmul.f32 %v7702_v5, %v614_v25  ;;  %vm647_vm5 = vweird.f32 %v7786_v63  ;;  %v681_v50 = vmul.f32 %v7816_v58, %v7763_v42  ;;  %v7833_v27 = vadd.f32 1e-05, %v527_v47 }
  0xdd   : > { %v692_v19 = vmul.f32 %v7797_v51, %v691_v24  ;;  %vm657_vm6 = vweird.f32 %v7753_v21  ;;  %v644_v30 = vsub.f32 1.5, %v643_v8  ;;  %v671_v43 = vmul.f32 %v7819_v56, %v7765_v38  ;;  %6152 = vmatmul.msk.bf16.vlgmr.msra.gmra.mxu0 %vm11060_vm0, %v776_v20 }
  0xde   : > { %v589_v25 = vsel %vm7825_vm4, %v7648_v33, %v7783_v60  ;;  %v7852_v23 = vmul.f32 %v7735_v40, %v664_v18  ;;  %vm646_vm9 = vweird.f32 %v7723_v36  ;;  %v682_v20 = vmul.f32 %v7816_v58, %v681_v50 }
  0xdf   : > { %v693_v45 = vmul.f32 0.5, %v692_v19  ;;  %6743 = vrsqrt.f32 %v7833_v27  ;;  %v7857_v16 = vadd.f32 1e-05, %v526_v35  ;;  %vm667_vm4 = vweird.f32 %v7735_v40 }
  0xe0   : > { %v7861_v33 = vmul.f32 %v7753_v21, %v654_v34  ;;  %vm656_vm8 = vweird.f32 %v7700_v28  ;;  %v672_v60 = vmul.f32 %v7819_v56, %v671_v43  ;;  %v599_v17 = vsel %vm7847_vm7, %v7631_v53, %v7759_v62  ;;  %vm7887_vm7 = vmor %vm616_vm1, %vm617_vm14 }
  0xe1   : > { %v694_v37 = vsub.f32 1.5, %v693_v45  ;;  %v645_v41 = vmul.f32 %v7786_v63, %v644_v30  ;;  %v683_v18 = vmul.f32 0.5, %v682_v20  ;;  %vm677_vm0 = vweird.f32 %v7819_v56  ;;  %vm7907_vm14 = vmor %vm626_vm2, %vm627_vm13 }
  0xe2   : > { %6745 = vrsqrt.f32 %v7857_v16  ;;  %v11103_v47 = vsub.f32 %v7382_v2, %v7538_v48  ;;  %vm666_vm10 = vweird.f32 %v7692_v10  ;;  %v673_v62 = vmul.f32 0.5, %v672_v60  ;;  %vm7924_vm13 = vmor %vm636_vm3, %vm637_vm15 }
  0xe3   : > { %v7893_v53 = vmul.f32 %v7797_v51, %v694_v37  ;;  %v11106_v2 = vsub.f32 %v7395_v7, %v7534_v46  ;;  %v609_v54 = vsel %vm7873_vm11, %v7622_v57, %v7756_v26  ;;  %v684_v8 = vsub.f32 1.5, %v683_v18  ;;  %vm658_vm11 = vmor %vm656_vm8, %vm657_vm6 }
  0xe4   : > { %v722_v35 = vmul.f32 %v589_v25, %v11103_v47  ;;  %vm687_vm1 = vweird.f32 %v7816_v58  ;;  %vm676_vm12 = vweird.f32 %v7765_v38  ;;  %v619_v46 = vsel %vm7887_vm7, %v7702_v5, %v615_v29  ;;  %vm648_vm7 = vmor %vm646_vm9, %vm647_vm5  ;;  %v11115_v47 = vld [vmem:[#allocation11_spill] sm:$0xff] }
  0xe5   : > { %v723_v48 = vmul.f32 %v599_v17, %v11106_v2  ;;  %v11109_v57 = vsub.f32 %v7377_v0, %v7530_v44  ;;  %vm696_vm2 = vweird.f32 %v7733_v55  ;;  %v674_v19 = vsub.f32 1.5, %v673_v62  ;;  %v7937_v44 = vpop.eup %6743  ;;  %vm668_vm5 = vmor %vm666_vm10, %vm667_vm4  ;;  %v11118_v2 = vld [vmem:[#allocation14_spill] sm:$0xff] }
  0xe6   : > { %v742_v7 = vmul.f32 %v7744_v9, %v722_v35  ;;  %v11112_v5 = vsub.f32 %v7392_v6, %v7541_v49  ;;  %v629_v0 = vsel %vm7907_vm14, %v7686_v1, %v7812_v31  ;;  %v685_v39 = vmul.f32 %v7816_v58, %v684_v8  ;;  %vm678_vm6 = vmor %vm676_vm12, %vm677_vm0 }
  0xe7   : > { %v724_v26 = vmul.f32 %v609_v54, %v11109_v57  ;;  %v743_v22 = vmul.f32 %v7744_v9, %v723_v48  ;;  %vm686_vm15 = vweird.f32 %v7763_v42  ;;  %v639_v6 = vsel %vm7924_vm13, %v7677_v52, %v7803_v32  ;;  %v11124_v57 = vld [vmem:[#allocation13_spill] sm:$0xff] }
  0xe8   : > { %v725_v29 = vmul.f32 %v619_v46, %v11112_v5  ;;  %v762_v50 = vadd.f32 %v7772_v4, %v742_v7  ;;  %v675_v49 = vmul.f32 %v7819_v56, %v674_v19  ;;  %v711_v1 = vmul.f32 %v7937_v44, %v7833_v27  ;;  %v6746_v45 = vpop.eup %6745  ;;  %v11123_v46 = vld [vmem:[#allocation5_spill] sm:$0xff]  ;;  %vm688_vm0 = vmor %vm686_vm15, %vm687_vm1  ;;  %v11127_v19 = vld [vmem:[#allocation4_spill] sm:$0xff] }
  0xe9   : > { %v744_v30 = vmul.f32 %v7744_v9, %v724_v26  ;;  %vm717_vm3 = vweird.f32 %v7937_v44  ;;  %v763_v31 = vadd.f32 %v7772_v4, %v743_v22  ;;  %v11113_v52 = vsub.f32 %v7413_v14, %v7568_v11  ;;  %v11128_v22 = vld [vmem:[#allocation12_spill] sm:$0xff] }
  0xea   : > { %v745_v43 = vmul.f32 %v7744_v9, %v725_v29  ;;  %v11114_v61 = vsub.f32 %v7410_v13, %v7562_v3  ;;  %v712_v37 = vmul.f32 %v7937_v44, %v711_v1  ;;  %v701_v60 = vmul.f32 %v6746_v45, %v7857_v16  ;;  %v11132_v1 = vld [vmem:[#allocation17_spill] sm:$0xff] }
  0xeb   : > { %v7955_v25 = vadd.f32 %v7772_v4, %v744_v30  ;;  %v726_v32 = vmul.f32 %v629_v0, %v11113_v52  ;;  %vm706_vm14 = vweird.f32 %v7857_v16  ;;  %vm707_vm13 = vweird.f32 %v6746_v45  ;;  %v11135_v52 = vld [vmem:[#allocation16_spill] sm:$0xff] }
  0xec   : > { %v727_v20 = vmul.f32 %v639_v6, %v11114_v61  ;;  %v777_v17 = vpack.c.bf16 %v763_v31, %v762_v50  ;;  %v765_v13 = vadd.f32 %v7772_v4, %v745_v43  ;;  %v649_v11 = vsel %vm648_vm7, %v7786_v63, %v645_v41  ;;  %v11117_v41 = vld [vmem:[#allocation6_spill] sm:$0xff]  ;;  %vm708_vm1 = vmor %vm706_vm14, %vm707_vm13 }
  0xed   : > { %v746_v14 = vmul.f32 %v7744_v9, %v726_v32  ;;  %v713_v36 = vmul.f32 0.5, %v712_v37  ;;  %v702_v24 = vmul.f32 %v6746_v45, %v701_v60  ;;  %v659_v18 = vsel %vm658_vm11, %v7753_v21, %v7861_v33  ;;  %v11137_v32 = vld [vmem:[#allocation18_spill] sm:$0xff] }
  0xee   : > { %v747_v3 = vmul.f32 %v7744_v9, %v727_v20  ;;  %v11116_v35 = vsub.f32 %v7407_v12, %v11115_v47  ;;  %v778_v28 = vpack.c.bf16 %v765_v13, %v7955_v25  ;;  %v11119_v48 = vsub.f32 %v11117_v41, %v11118_v2  ;;  %v11134_v25 = vld [vmem:[#allocation8_spill] sm:$0xff]  ;;  %v11138_v61 = vld [vmem:[#allocation10_spill] sm:$0xff] }
  0xef   : > { %v766_v62 = vadd.f32 %v7772_v4, %v746_v14  ;;  %v714_v12 = vsub.f32 1.5, %v713_v36  ;;  %v703_v21 = vmul.f32 0.5, %v702_v24  ;;  %v669_v33 = vsel %vm668_vm5, %v7735_v40, %v7852_v23  ;;  %v11139_v14 = vld [vmem:[#allocation7_spill] sm:$0xff] }
  0xf0   : > { %v728_v15 = vmul.f32 %v649_v11, %v11116_v35  ;;  %v767_v63 = vadd.f32 %v7772_v4, %v747_v3  ;;  %v729_v54 = vmul.f32 %v659_v18, %v11119_v48  ;;  %vm11120_vm9 = vweird.f32 %v7797_v51  ;;  %v11140_v3 = vld [vmem:[#allocation15_spill] sm:$0xff] }
  0xf1   : > { %vm8004_vm4 = vmor %vm696_vm2, %vm11120_vm9  ;;  %v679_v38 = vsel %vm678_vm6, %v7819_v56, %v675_v49  ;;  %v11125_v26 = vsub.f32 %v11123_v46, %v11124_v57  ;;  %v715_v55 = vmul.f32 %v7937_v44, %v714_v12  ;;  %v704_v40 = vsub.f32 1.5, %v703_v21  ;;  %v11131_v49 = vld [vmem:[#allocation9_spill] sm:$0xff] }
  0xf2   : > { %v748_v10 = vmul.f32 %v7744_v9, %v728_v15  ;;  %v779_v8 = vpack.c.bf16 %v767_v63, %v766_v62  ;;  %v749_v7 = vmul.f32 %v7744_v9, %v729_v54  ;;  %vm11126_vm8 = vcmask 261120  }
  0xf3   : > { %v730_v59 = vmul.f32 %v669_v33, %v11125_v26  ;;  %6153 = vmatmul.msk.bf16.gmra.mxu0 %vm11126_vm8, %v777_v17  ;;  %v11129_v5 = vsub.f32 %v11127_v19, %v11128_v22  ;;  %v689_v50 = vsel %vm688_vm0, %v7816_v58, %v685_v39  ;;  %v699_v42 = vsel %vm8004_vm4, %v7797_v51, %v7893_v53  ;;  %vm11142_vm2 = vmmov %vm11126_vm8 }
  0xf4   : > { %v768_v23 = vadd.f32 %v7772_v4, %v748_v10  ;;  %v769_v29 = vadd.f32 %v7772_v4, %v749_v7  ;;  %vm11130_vm10 = vweird.f32 %v7833_v27  ;;  %v705_v30 = vmul.f32 %v6746_v45, %v704_v40  ;;  %vm11143_vm15 = vmmov %vm11142_vm2 }
  0xf5   : > { %v731_v56 = vmul.f32 %v679_v38, %v11129_v5  ;;  %v750_v0 = vmul.f32 %v7744_v9, %v730_v59  ;;  %vm718_vm12 = vmor %vm11130_vm10, %vm717_vm3  ;;  %v11133_v31 = vsub.f32 %v11131_v49, %v11132_v1  ;;  %v11136_v58 = vsub.f32 %v11134_v25, %v11135_v52 }
  0xf6   : > { %v543_v20 = vsub.f32 %v11138_v61, %v11137_v32  ;;  %v780_v51 = vpack.c.bf16 %v769_v29, %v768_v23  ;;  %v719_v53 = vsel %vm718_vm12, %v7937_v44, %v715_v55  ;;  %v709_v13 = vsel %vm708_vm1, %v6746_v45, %v705_v30  ;;  %vm11144_vm3 = vmmov %vm11142_vm2 }
  0xf7   : > { %v751_v6 = vmul.f32 %v7744_v9, %v731_v56  ;;  %v732_v43 = vmul.f32 %v689_v50, %v11133_v31  ;;  %v733_v39 = vmul.f32 %v699_v42, %v11136_v58  ;;  %v770_v27 = vadd.f32 %v7772_v4, %v750_v0  ;;  %vm11145_vm11 = vmmov %vm11142_vm2 }
  0xf8   : > { %v11141_v11 = vsub.f32 %v11139_v14, %v11140_v3  ;;  %v735_v24 = vmul.f32 %v719_v53, %v543_v20  ;;  %vm11146_vm7 = vmmov %vm11142_vm2  ;;  %vm889_vm13 = vcmask 781312   ;;  %vm950_vm5 = vcmask 31744  }
  0xf9   : > { %v771_v37 = vadd.f32 %v7772_v4, %v751_v6  ;;  %v752_v60 = vmul.f32 %v7744_v9, %v732_v43  ;;  %v753_v17 = vmul.f32 %v7744_v9, %v733_v39  ;;  %vm11147_vm14 = vmmov %vm11142_vm2  ;;  %vm1085_vm6 = vcmask 523264  }
  0xfa   : > { %v734_v36 = vmul.f32 %v709_v13, %v11141_v11  ;;  %v755_v44 = vmul.f32 %v7744_v9, %v735_v24  ;;  %vm1440_vm9 = vcmask 27648   ;;  %vm2069_vm4 = vcmask 60448  }
  0xfb   : > { %v781_v18 = vpack.c.bf16 %v771_v37, %v770_v27  ;;  %v772_v16 = vadd.f32 %v7772_v4, %v752_v60  ;;  %v773_v47 = vadd.f32 %v7772_v4, %v753_v17  ;;  %vm2698_vm0 = vcmask 93248  }
  0xfc   : > { %v754_v35 = vmul.f32 %v7744_v9, %v734_v36  ;;  %v775_v63 = vadd.f32 %v7772_v4, %v755_v44  ;;  %vm3327_vm8 = vcmask 126048   ;;  %vm3956_vm10 = vcmask 158848  }
  0xfd   : > { %v782_v15 = vpack.c.bf16 %v773_v47, %v772_v16  ;;  %vm4585_vm12 = vcmask 191648   ;;  %vm5214_vm1 = vcmask 224448  }
  0xfe   : > { %v774_v62 = vadd.f32 %v7772_v4, %v754_v35 }
 0x100   : > { %v783_v45 = vpack.c.bf16 %v775_v63, %v774_v62 }
 0x103   : > { %6154 = vmatmul.msk.bf16.gmra.mxu0 %vm11142_vm2, %v778_v28  ;;  %vm5843_vm2 = vcmask 257248  }
 0x113   : > { %6155 = vmatmul.msk.bf16.gmra.mxu0 %vm11143_vm15, %v779_v8  ;;  %vm11181_vm15 = vmmov %vm11144_vm3 }
 0x123   : > { %6156 = vmatmul.msk.bf16.gmra.mxu0 %vm11144_vm3, %v780_v51 }
 0x133   : > { %6157 = vmatmul.msk.bf16.gmra.mxu0 %vm11145_vm11, %v781_v18  ;;  %vm11191_vm11 = vmmov %vm11144_vm3 }
 0x143   : > { %6158 = vmatmul.msk.bf16.gmra.mxu0 %vm11146_vm7, %v782_v15  ;;  %vm11192_vm7 = vmmov %vm11144_vm3 }
 0x153   : > { %6159 = vmatmul.msk.bf16.gmra.mxu0 %vm11147_vm14, %v783_v45  ;;  %vm11194_vm14 = vmmov %vm11144_vm3 }
 0x15a   : > { %v833_v41 = vpop.f32.mrf.mxu0 }
 0x15b   : > { %v873_v9 = vpack.c.bf16 %v833_v41, %v833_v41 }
 0x15d   : > { %890 = vst.msk [vmem:[#allocation2] sm:$0xf] %vm889_vm13, %v873_v9 }
 0x162   : > { %v835_v2 = vpop.f32.mrf.mxu0 }
 0x163   : > { %v874_v4 = vpack.c.bf16 %v835_v2, %v835_v2 }
 0x165   : > { %891 = vst.msk [vmem:[#allocation2 + $0x4] sm:$0xf] %vm889_vm13, %v874_v4 }
 0x16c   : > { %v6608_v54 = vld [vmem:[#allocation2] sm:$0xff] }
 0x16d   : > { %v8068_v12 = vld [vmem:[#allocation2] sm:$0xff]  ;;  %1501 = vrot.lane.b32.xlu1 %v6608_v54, %s7281_s20 }
 0x16e   : > { %1266 = vrot.lane.b32.xlu0 %v8068_v12, %s7282_s24  ;;  %942 = vrot.lane.b32.xlu2 %v8068_v12, %s7283_s25  ;;  %v6616_v33 = vld [vmem:[#allocation2] sm:$0xff] }
 0x16f   : > { %v6632_v7 = vld [vmem:[#allocation2] sm:$0xff] }
 0x170   : > { %v838_v28 = vpop.f32.mrf.mxu0  ;;  %v6624_v57 = vld [vmem:[#allocation2] sm:$0xff] }
 0x171   : > { %v875_v48 = vpack.c.bf16 %v838_v28, %v838_v28 }
 0x173   : > { %892 = vst.msk [vmem:[#allocation2 + $0x8] sm:$0xf] %vm889_vm13, %v875_v48 }
 0x175   : > { %2130 = vrot.lane.b32.xlu1 %v6616_v33, %s7284_s26 }
 0x176   : > { %1493 = vrot.lane.b32.xlu0 %v6608_v54, %s7285_s27  ;;  %2122 = vrot.lane.b32.xlu2 %v6616_v33, %s7286_s28 }
 0x178   : > { %v840_v21 = vpop.f32.mrf.mxu0 }
 0x179   : > { %v876_v10 = vpack.c.bf16 %v840_v21, %v840_v21 }
 0x17b   : > { %893 = vst.msk [vmem:[#allocation2 + $0xc] sm:$0xf] %vm889_vm13, %v876_v10 }
 0x17d   : > { %3388 = vrot.lane.b32.xlu1 %v6632_v7, %s7287_s29 }
 0x17e   : > { %1831 = vrot.lane.b32.xlu0 %v6608_v54, %s7288_s30  ;;  %2460 = vrot.lane.b32.xlu2 %v6616_v33, %s7289_s7 }
 0x180   : > { %v843_v34 = vpop.f32.mrf.mxu0 }
 0x181   : > { %v877_v8 = vpack.c.bf16 %v843_v34, %v843_v34 }
 0x182   : > { %v6609_v26 = vld [vmem:[#allocation2 + $0x8] sm:$0xff] }
 0x183   : > { %894 = vst.msk [vmem:[#allocation2 + $0x10] sm:$0xf] %vm889_vm13, %v877_v8  ;;  %v8088_v40 = vld [vmem:[#allocation2 + $0x8] sm:$0xff] }
 0x184   : > { %v6617_v22 = vld [vmem:[#allocation2 + $0x8] sm:$0xff] }
 0x185   : > { %1495 = vrot.lane.b32.xlu1 %v6609_v26, %s7285_s27  ;;  %v6625_v29 = vld [vmem:[#allocation2 + $0x8] sm:$0xff] }
 0x186   : > { %2759 = vrot.lane.b32.xlu0 %v6624_v57, %s7290_s8  ;;  %2751 = vrot.lane.b32.xlu2 %v6624_v57, %s7291_s9  ;;  %v6633_v6 = vld [vmem:[#allocation2 + $0x8] sm:$0xff] }
 0x188   : > { %v845_v38 = vpop.f32.mrf.mxu0 }
 0x189   : > { %v878_v46 = vpack.c.bf16 %v845_v38, %v845_v38 }
 0x18b   : > { %895 = vst.msk [vmem:[#allocation2 + $0x14] sm:$0xf] %vm889_vm13, %v878_v46 }
 0x18d   : > { %1833 = vrot.lane.b32.xlu1 %v6609_v26, %s7288_s30 }
 0x18e   : > { %944 = vrot.lane.b32.xlu0 %v8088_v40, %s7283_s25  ;;  %3089 = vrot.lane.b32.xlu2 %v6624_v57, %s7292_s10 }
 0x190   : > { %v848_v59 = vpop.f32.mrf.mxu0 }
 0x191   : > { %v879_v55 = vpack.c.bf16 %v848_v59, %v848_v59 }
 0x192   : > { %v6610_v49 = vld [vmem:[#allocation2 + $0x10] sm:$0xff] }
 0x193   : > { %896 = vst.msk [vmem:[#allocation2 + $0x18] sm:$0xf] %vm889_vm13, %v879_v55  ;;  %v8112_v43 = vld [vmem:[#allocation2 + $0x10] sm:$0xff] }
 0x194   : > { %v6618_v58 = vld [vmem:[#allocation2 + $0x10] sm:$0xff] }
 0x195   : > { %2124 = vrot.lane.b32.xlu1 %v6617_v22, %s7286_s28  ;;  %v6626_v61 = vld [vmem:[#allocation2 + $0x10] sm:$0xff] }
 0x196   : > { %2132 = vrot.lane.b32.xlu0 %v6617_v22, %s7284_s26  ;;  %3380 = vrot.lane.b32.xlu2 %v6632_v7, %s7293_s13  ;;  %v8130_v53 = vld [vmem:[#allocation2 + $0x10] sm:$0xff] }
 0x198   : > { %v850_v23 = vpop.f32.mrf.mxu0 }
 0x199   : > { %v880_v19 = vpack.c.bf16 %v850_v23, %v850_v23 }
 0x19b   : > { %897 = vst.msk [vmem:[#allocation2 + $0x1c] sm:$0xf] %vm889_vm13, %v880_v19 }
 0x19d   : > { %2462 = vrot.lane.b32.xlu1 %v6617_v22, %s7289_s7 }
 0x19e   : > { %2753 = vrot.lane.b32.xlu0 %v6625_v29, %s7291_s9  ;;  %1268 = vrot.lane.b32.xlu2 %v8088_v40, %s7282_s24 }
 0x1a0   : > { %v853_v5 = vpop.f32.mrf.mxu0 }
 0x1a1   : > { %v881_v56 = vpack.c.bf16 %v853_v5, %v853_v5 }
 0x1a2   : > { %v8133_v37 = vld [vmem:[#allocation2 + $0x18] sm:$0xff] }
 0x1a3   : > { %898 = vst.msk [vmem:[#allocation2 + $0x20] sm:$0xf] %vm889_vm13, %v881_v56  ;;  %v6611_v14 = vld [vmem:[#allocation2 + $0x18] sm:$0xff] }
 0x1a4   : > { %v6619_v3 = vld [vmem:[#allocation2 + $0x18] sm:$0xff] }
 0x1a5   : > { %2761 = vrot.lane.b32.xlu1 %v6625_v29, %s7290_s8  ;;  %v6627_v47 = vld [vmem:[#allocation2 + $0x18] sm:$0xff] }
 0x1a6   : > { %3091 = vrot.lane.b32.xlu0 %v6625_v29, %s7292_s10  ;;  %1503 = vrot.lane.b32.xlu2 %v6609_v26, %s7281_s20  ;;  %v8167_v63 = vld [vmem:[#allocation2 + $0x18] sm:$0xff] }
 0x1a8   : > { %v855_v0 = vpop.f32.mrf.mxu0 }
 0x1a9   : > { %v882_v50 = vpack.c.bf16 %v855_v0, %v855_v0 }
 0x1ab   : > { %899 = vst.msk [vmem:[#allocation2 + $0x24] sm:$0xf] %vm889_vm13, %v882_v50 }
 0x1ad   : > { %3382 = vrot.lane.b32.xlu1 %v6633_v6, %s7293_s13 }
 0x1ae   : > { %3390 = vrot.lane.b32.xlu0 %v6633_v6, %s7287_s29  ;;  %1497 = vrot.lane.b32.xlu2 %v6610_v49, %s7285_s27 }
 0x1b0   : > { %v858_v42 = vpop.f32.mrf.mxu0 }
 0x1b1   : > { %v883_v30 = vpack.c.bf16 %v858_v42, %v858_v42 }
 0x1b2   : > { %v6612_v16 = vld [vmem:[#allocation2 + $0x20] sm:$0xff] }
 0x1b3   : > { %900 = vst.msk [vmem:[#allocation2 + $0x28] sm:$0xf] %vm889_vm13, %v883_v30  ;;  %v6628_v62 = vld [vmem:[#allocation2 + $0x20] sm:$0xff] }
 0x1b4   : > { %v8179_v4 = vld [vmem:[#allocation2 + $0x20] sm:$0xff] }
 0x1b5   : > { %946 = vrot.lane.b32.xlu1 %v8112_v43, %s7283_s25  ;;  %v6620_v8 = vld [vmem:[#allocation2 + $0x20] sm:$0xff] }
 0x1b6   : > { %1505 = vrot.lane.b32.xlu0 %v6610_v49, %s7281_s20  ;;  %1835 = vrot.lane.b32.xlu2 %v6610_v49, %s7288_s30 }
 0x1b8   : > { %v860_v1 = vpop.f32.mrf.mxu0 }
 0x1b9   : > { %v884_v31 = vpack.c.bf16 %v860_v1, %v860_v1 }
 0x1bb   : > { %901 = vst.msk [vmem:[#allocation2 + $0x2c] sm:$0xf] %vm889_vm13, %v884_v31 }
 0x1bd   : > { %1270 = vrot.lane.b32.xlu1 %v8112_v43, %s7282_s24 }
 0x1be   : > { %2126 = vrot.lane.b32.xlu0 %v6618_v58, %s7286_s28  ;;  %2134 = vrot.lane.b32.xlu2 %v6618_v58, %s7284_s26 }
 0x1c0   : > { %v863_v25 = vpop.f32.mrf.mxu0 }
 0x1c1   : > { %v885_v52 = vpack.c.bf16 %v863_v25, %v863_v25 }
 0x1c2   : > { %v6613_v2 = vld [vmem:[#allocation2 + $0x28] sm:$0xff] }
 0x1c3   : > { %902 = vst.msk [vmem:[#allocation2 + $0x30] sm:$0xf] %vm889_vm13, %v885_v52  ;;  %v6621_v21 = vld [vmem:[#allocation2 + $0x28] sm:$0xff] }
 0x1c4   : > { %v8230_v5 = vld [vmem:[#allocation2 + $0x28] sm:$0xff] }
 0x1c5   : > { %2755 = vrot.lane.b32.xlu1 %v6626_v61, %s7291_s9  ;;  %v6629_v25 = vld [vmem:[#allocation2 + $0x28] sm:$0xff] }
 0x1c6   : > { %2464 = vrot.lane.b32.xlu0 %v6618_v58, %s7289_s7  ;;  %2763 = vrot.lane.b32.xlu2 %v6626_v61, %s7290_s8 }
 0x1c8   : > { %v865_v39 = vpop.f32.mrf.mxu0  ;;  %v8128_v20 = vpop.permute.xlu2 %942 }
 0x1c9   : > { %v886_v32 = vpack.c.bf16 %v865_v39, %v865_v39 }
 0x1cb   : > { %903 = vst.msk [vmem:[#allocation2 + $0x34] sm:$0xf] %vm889_vm13, %v886_v32 }
 0x1cd   : > { %3093 = vrot.lane.b32.xlu1 %v6626_v61, %s7292_s10 }
 0x1ce   : > { %3384 = vrot.lane.b32.xlu0 %v8130_v53, %s7293_s13  ;;  %948 = vrot.lane.b32.xlu2 %v8133_v37, %s7283_s25 }
 0x1d0   : > { %v868_v51 = vpop.f32.mrf.mxu0  ;;  %v8140_v60 = vpop.permute.xlu2 %2122 }
 0x1d1   : > { %v887_v27 = vpack.c.bf16 %v868_v51, %v868_v51 }
 0x1d2   : > { %v8208_v57 = vld [vmem:[#allocation2 + $0x30] sm:$0xff] }
 0x1d3   : > { %904 = vst.msk [vmem:[#allocation2 + $0x38] sm:$0xf] %vm889_vm13, %v887_v27  ;;  %v6614_v56 = vld [vmem:[#allocation2 + $0x30] sm:$0xff] }
 0x1d4   : > { %v6622_v42 = vld [vmem:[#allocation2 + $0x30] sm:$0xff] }
 0x1d5   : > { %1507 = vrot.lane.b32.xlu1 %v6611_v14, %s7281_s20  ;;  %v6630_v31 = vld [vmem:[#allocation2 + $0x30] sm:$0xff] }
 0x1d6   : > { %1272 = vrot.lane.b32.xlu0 %v8133_v37, %s7282_s24  ;;  %2128 = vrot.lane.b32.xlu2 %v6619_v3, %s7286_s28 }
 0x1d8   : > { %v870_v17 = vpop.f32.mrf.mxu0  ;;  %v8147_v11 = vpop.permute.xlu2 %2460 }
 0x1d9   : > { %v888_v13 = vpack.c.bf16 %v870_v17, %v870_v17 }
 0x1db   : > { %905 = vst.msk [vmem:[#allocation2 + $0x3c] sm:$0xf] %vm889_vm13, %v888_v13  ;;  %vm11198_vm13 = vmmov %vm11144_vm3 }
 0x1dd   : > { %2136 = vrot.lane.b32.xlu1 %v6619_v3, %s7284_s26 }
 0x1de   : > { %1499 = vrot.lane.b32.xlu0 %v6611_v14, %s7285_s27  ;;  %2466 = vrot.lane.b32.xlu2 %v6619_v3, %s7289_s7 }
 0x1df   : > { %v8152_v36 = vpop.permute.xlu1 %1501 }
 0x1e0   : > { %v8154_v24 = vpop.permute.xlu0 %1266  ;;  %v8156_v18 = vpop.permute.xlu2 %2751 }
 0x1e2   : > { %v6615_v61 = vld [vmem:[#allocation2 + $0x38] sm:$0xff] }
 0x1e5   : > { %1904 = vrot.lane.b32.xlu1 %v6612_v16, %s7288_s30 }
 0x1e6   : > { %1837 = vrot.lane.b32.xlu0 %v6611_v14, %s7288_s30  ;;  %2757 = vrot.lane.b32.xlu2 %v6627_v47, %s7291_s9  ;;  %v8263_v14 = vld [vmem:[#allocation2 + $0x38] sm:$0xff] }
 0x1e7   : > { %v8161_v35 = vpop.permute.xlu1 %2130 }
 0x1e8   : > { %v8163_v44 = vpop.permute.xlu0 %1493  ;;  %v8165_v15 = vpop.permute.xlu2 %3089 }
 0x1ed   : > { %2840 = vrot.lane.b32.xlu1 %v6628_v62, %s7291_s9 }
 0x1ee   : > { %2765 = vrot.lane.b32.xlu0 %v6627_v47, %s7290_s8  ;;  %3386 = vrot.lane.b32.xlu2 %v8167_v63, %s7293_s13 }
 0x1ef   : > { %v8173_v45 = vpop.permute.xlu1 %3388 }
 0x1f0   : > { %v8175_v41 = vpop.permute.xlu0 %1831  ;;  %v8177_v9 = vpop.permute.xlu2 %3380 }
 0x1f5   : > { %1592 = vrot.lane.b32.xlu1 %v6613_v2, %s7281_s20 }
 0x1f6   : > { %3095 = vrot.lane.b32.xlu0 %v6627_v47, %s7292_s10  ;;  %1339 = vrot.lane.b32.xlu2 %v8179_v4, %s7282_s24 }
 0x1f7   : > { %v8185_v28 = vpop.permute.xlu1 %1495 }
 0x1f8   : > { %v8187_v48 = vpop.permute.xlu0 %2759  ;;  %v8189_v54 = vpop.permute.xlu2 %1268 }
 0x1fd   : > { %2221 = vrot.lane.b32.xlu1 %v6621_v21, %s7284_s26 }
 0x1fe   : > { %1024 = vrot.lane.b32.xlu0 %v8179_v4, %s7283_s25  ;;  %1582 = vrot.lane.b32.xlu2 %v6612_v16, %s7285_s27 }
 0x1ff   : > { %v8195_v10 = vpop.permute.xlu1 %1833 }
 0x200   : > { %v945_v33 = vpop.permute.xlu0 %944  ;;  %v8197_v34 = vpop.permute.xlu2 %1503 }
 0x201   : > { %v967_v13 = vsel %vm950_vm5, %v945_v33, 0 }
 0x205   : > { %2535 = vrot.lane.b32.xlu1 %v6621_v21, %s7289_s7 }
 0x206   : > { %1590 = vrot.lane.b32.xlu0 %v6612_v16, %s7281_s20  ;;  %2219 = vrot.lane.b32.xlu2 %v6620_v8, %s7284_s26 }
 0x207   : > { %v8202_v7 = vpop.permute.xlu1 %2124 }
 0x208   : > { %v8204_v38 = vpop.permute.xlu0 %2132  ;;  %v8206_v46 = vpop.permute.xlu2 %1497 }
 0x20d   : > { %1028 = vrot.lane.b32.xlu1 %v8208_v57, %s7283_s25 }
 0x20e   : > { %2211 = vrot.lane.b32.xlu0 %v6620_v8, %s7286_s28  ;;  %2848 = vrot.lane.b32.xlu2 %v6628_v62, %s7290_s8 }
 0x20f   : > { %v8214_v26 = vpop.permute.xlu1 %2462 }
 0x210   : > { %v8216_v59 = vpop.permute.xlu0 %2753  ;;  %v8218_v55 = vpop.permute.xlu2 %1835 }
 0x215   : > { %1343 = vrot.lane.b32.xlu1 %v8208_v57, %s7282_s24 }
 0x216   : > { %2533 = vrot.lane.b32.xlu0 %v6620_v8, %s7289_s7  ;;  %3162 = vrot.lane.b32.xlu2 %v6628_v62, %s7292_s10  ;;  %v964_v62 = vsel %vm950_vm5, %v8128_v20, 0  ;;  %v8286_v20 = vld [vmem:[#allocation2 + $0x30] sm:$0xff] }
 0x217   : > { %v8224_v23 = vpop.permute.xlu1 %2761 }
 0x218   : > { %v8226_v19 = vpop.permute.xlu0 %3091  ;;  %v8228_v22 = vpop.permute.xlu2 %2134 }
 0x21d   : > { %1586 = vrot.lane.b32.xlu1 %v6614_v56, %s7285_s27 }
 0x21e   : > { %1341 = vrot.lane.b32.xlu0 %v8230_v5, %s7282_s24  ;;  %1026 = vrot.lane.b32.xlu2 %v8230_v5, %s7283_s25 }
 0x21f   : > { %v8237_v29 = vpop.permute.xlu1 %3382 }
 0x220   : > { %v8239_v0 = vpop.permute.xlu0 %3390  ;;  %v8241_v50 = vpop.permute.xlu2 %2763 }
 0x225   : > { %2215 = vrot.lane.b32.xlu1 %v6622_v42, %s7286_s28 }
 0x226   : > { %1584 = vrot.lane.b32.xlu0 %v6613_v2, %s7285_s27  ;;  %2213 = vrot.lane.b32.xlu2 %v6621_v21, %s7286_s28 }
 0x227   : > { %v947_v30 = vpop.permute.xlu1 %946 }
 0x228   : > { %v1506_v6 = vpop.permute.xlu0 %1505  ;;  %v949_v49 = vpop.permute.xlu2 %948  ;;  %v970_v32 = vsel %vm950_vm5, %v947_v30, 0  ;;  %v8298_v30 = vld [vmem:[#allocation2 + $0x38] sm:$0xff] }
 0x229   : > { %v973_v1 = vsel %vm950_vm5, %v949_v49, 0 }
 0x22a   : > { %979 = vmatpush.bf16.xpose.msra.mxu2 %v973_v1 }
 0x22d   : > { %2852 = vrot.lane.b32.xlu1 %v6630_v31, %s7290_s8 }
 0x22e   : > { %1906 = vrot.lane.b32.xlu0 %v6613_v2, %s7288_s30  ;;  %2842 = vrot.lane.b32.xlu2 %v6629_v25, %s7291_s9 }
 0x22f   : > { %v1271_v52 = vpop.permute.xlu1 %1270 }
 0x230   : > { %v8250_v58 = vpop.permute.xlu0 %2126  ;;  %v8252_v39 = vpop.permute.xlu2 %2128 }
 0x232   : > { %980 = vmatpush.bf16.xpose.msra.mxu2 %v970_v32 }
 0x235   : > { %1910 = vrot.lane.b32.xlu1 %v6615_v61, %s7288_s30 }
 0x236   : > { %2850 = vrot.lane.b32.xlu0 %v6629_v25, %s7290_s8  ;;  %1594 = vrot.lane.b32.xlu2 %v6614_v56, %s7281_s20 }
 0x237   : > { %v8258_v51 = vpop.permute.xlu1 %2755 }
 0x238   : > { %v8260_v27 = vpop.permute.xlu0 %2464  ;;  %v2467_v17 = vpop.permute.xlu2 %2466 }
 0x23a   : > { %981 = vmatpush.bf16.xpose.msra.mxu2 %v967_v13 }
 0x23d   : > { %2846 = vrot.lane.b32.xlu1 %v8263_v14, %s7291_s9 }
 0x23e   : > { %3164 = vrot.lane.b32.xlu0 %v6629_v25, %s7292_s10  ;;  %1908 = vrot.lane.b32.xlu2 %v6614_v56, %s7288_s30  ;;  %s7307_s30 = smov 16  }
 0x23f   : > { %v8269_v3 = vpop.permute.xlu1 %3093 }
 0x240   : > { %v8271_v16 = vpop.permute.xlu0 %3384  ;;  %v8273_v47 = vpop.permute.xlu2 %2757 }
 0x242   : > { %982 = vmatpush.bf16.xpose.msra.mxu2 %v964_v62 }
 0x245   : > { %3394 = vrot.lane.b32.xlu1 %v8167_v63, %s7287_s29 }
 0x246   : > { %2223 = vrot.lane.b32.xlu0 %v6622_v42, %s7284_s26  ;;  %2537 = vrot.lane.b32.xlu2 %v6622_v42, %s7289_s7 }
 0x247   : > { %v1508_v2 = vpop.permute.xlu1 %1507 }
 0x248   : > { %v1273_v21 = vpop.permute.xlu0 %1272  ;;  %v8281_v33 = vpop.permute.xlu2 %3386  ;;  %v1531_v8 = vsel %vm950_vm5, %v1508_v2, 0 }
 0x249   : > { %1294 = vmatpush.bf16.msra.mxu3 %v1273_v21  ;;  %6176 = vmatmul.msk.bf16.vlgmr.msra.gmra.mxu2 %vm950_vm5, %v8068_v12  ;;  %v1528_v12 = vsel %vm950_vm5, %v1506_v6, 0  ;;  %v1525_v6 = vsel %vm950_vm5, %v8197_v34, 0 }
 0x24a   : > { %1537 = vmatpush.bf16.xpose.msra.mxu1 %v1531_v8  ;;  %v2783_v8 = vsel %vm950_vm5, %v8224_v23, 0 }
 0x24d   : > { %1295 = vmatpush.bf16.msra.mxu3 %v1271_v52  ;;  %3473 = vrot.lane.b32.xlu1 %v8286_v20, %s7293_s13 }
 0x24e   : > { %2844 = vrot.lane.b32.xlu0 %v6630_v31, %s7291_s9  ;;  %3166 = vrot.lane.b32.xlu2 %v6630_v31, %s7292_s10  ;;  %s7310_s9 = smov 28  }
 0x24f   : > { %v2137_v63 = vpop.permute.xlu1 %2136 }
 0x250   : > { %v8292_v56 = vpop.permute.xlu0 %1499  ;;  %v8294_v42 = vpop.permute.xlu2 %1339  ;;  %v2160_v34 = vsel %vm950_vm5, %v2137_v63, 0 }
 0x251   : > { %1296 = vmatpush.bf16.msra.mxu3 %v8189_v54 }
 0x252   : > { %1538 = vmatpush.bf16.xpose.msra.mxu1 %v1528_v12  ;;  %v2780_v12 = vsel %vm950_vm5, %v8187_v48, 0 }
 0x255   : > { %1297 = vmatpush.bf16.msra.mxu3 %v8154_v24  ;;  %3168 = vrot.lane.b32.xlu1 %v8263_v14, %s7292_s10  ;;  %v6637_v24 = vld [vmem:[#allocation2 + $0x28] sm:$0xff] }
 0x256   : > { %1030 = vrot.lane.b32.xlu0 %v8298_v30, %s7283_s25  ;;  %1345 = vrot.lane.b32.xlu2 %v8298_v30, %s7282_s24  ;;  %s7301_s24 = smov 68   ;;  %s7302_s25 = smov 48  }
 0x257   : > { %v8307_v49 = vpop.permute.xlu1 %1904 }
 0x258   : > { %v1838_v1 = vpop.permute.xlu0 %1837  ;;  %v8309_v54 = vpop.permute.xlu2 %1582 }
 0x259   : > { %1859 = vmatpush.bf16.msrb.mxu0 %v1838_v1  ;;  %6177 = vmatmul.msk.bf16.gmra.mxu2 %vm950_vm5, %v8088_v40  ;;  %v1522_v40 = vsel %vm950_vm5, %v8152_v36, 0  ;;  %v2157_v36 = vsel %vm950_vm5, %v8228_v22, 0  ;;  %v6636_v22 = vld [vmem:[#allocation2 + $0x20] sm:$0xff] }
 0x25a   : > { %1539 = vmatpush.bf16.xpose.msra.mxu1 %v1525_v6 }
 0x25d   : > { %1860 = vmatpush.bf16.msrb.mxu0 %v8218_v55  ;;  %3479 = vrot.lane.b32.xlu1 %v6637_v24, %s7287_s29  ;;  %v6623_v55 = vld [vmem:[#allocation2 + $0x38] sm:$0xff] }
 0x25e   : > { %1596 = vrot.lane.b32.xlu0 %v6615_v61, %s7281_s20  ;;  %1588 = vrot.lane.b32.xlu2 %v6615_v61, %s7285_s27  ;;  %s7300_s20 = smov 104   ;;  %s7304_s27 = smov 44  }
 0x25f   : > { %v8319_v31 = vpop.permute.xlu1 %2840 }
 0x260   : > { %v2766_v25 = vpop.permute.xlu0 %2765  ;;  %v8321_v52 = vpop.permute.xlu2 %2219 }
 0x261   : > { %1861 = vmatpush.bf16.msrb.mxu0 %v8195_v10 }
 0x262   : > { %1540 = vmatpush.bf16.xpose.msra.mxu1 %v1522_v40 }
 0x265   : > { %1862 = vmatpush.bf16.msrb.mxu0 %v8175_v41 }
 0x266   : > { %2217 = vrot.lane.b32.xlu0 %v6623_v55, %s7286_s28  ;;  %2225 = vrot.lane.b32.xlu2 %v6623_v55, %s7284_s26  ;;  %s7303_s26 = smov 100   ;;  %s7305_s28 = smov 40  }
 0x267   : > { %v8330_v32 = vpop.permute.xlu1 %1592 }
 0x268   : > { %v8332_v61 = vpop.permute.xlu0 %3095  ;;  %v8334_v10 = vpop.permute.xlu2 %2848 }
 0x269   : > { %2488 = vmatpush.bf16.msra.mxu0 %v2467_v17  ;;  %6224 = vmatmul.msk.bf16.vlgmr.msra.gmra.mxu1 %vm950_vm5, %v8163_v44 }
 0x26a   : > { %2166 = vmatpush.bf16.xpose.msrb.mxu1 %v2160_v34  ;;  %6178 = vmatmul.msk.bf16.gmra.mxu2 %vm950_vm5, %v8112_v43  ;;  %v2154_v43 = vsel %vm950_vm5, %v8204_v38, 0  ;;  %v2789_v38 = vsel %vm950_vm5, %v2766_v25, 0 }
 0x26d   : > { %2489 = vmatpush.bf16.msra.mxu0 %v8260_v27 }
 0x26e   : > { %2539 = vrot.lane.b32.xlu0 %v6623_v55, %s7289_s7  ;;  %2854 = vrot.lane.b32.xlu2 %v8263_v14, %s7290_s8  ;;  %s7308_s7 = smov 20   ;;  %s7309_s8 = smov 24  }
 0x26f   : > { %v8347_v41 = vpop.permute.xlu1 %2221 }
 0x270   : > { %v8349_v17 = vpop.permute.xlu0 %1024  ;;  %v8351_v44 = vpop.permute.xlu2 %3162 }
 0x271   : > { %2490 = vmatpush.bf16.msra.mxu0 %v8214_v26  ;;  %11148 = vst [vmem:[#allocation11_spill] sm:$0xff] %v8351_v44 }
 0x272   : > { %2167 = vmatpush.bf16.xpose.msrb.mxu1 %v2157_v36 }
 0x275   : > { %2491 = vmatpush.bf16.msra.mxu0 %v8147_v11  ;;  %v2151_v11 = vsel %vm950_vm5, %v8161_v35, 0 }
 0x276   : > { %3469 = vrot.lane.b32.xlu0 %v6636_v22, %s7293_s13  ;;  %3392 = vrot.lane.b32.xlu2 %v8130_v53, %s7287_s29  ;;  %v6639_v53 = vld [vmem:[#allocation2 + $0x38] sm:$0xff] }
 0x277   : > { %v8359_v26 = vpop.permute.xlu1 %2535 }
 0x278   : > { %v8361_v27 = vpop.permute.xlu0 %1590  ;;  %v8363_v13 = vpop.permute.xlu2 %1026 }
 0x279   : > { %6225 = vmatmul.msk.bf16.gmra.mxu1 %vm950_vm5, %v8185_v28 }
 0x27a   : > { %2168 = vmatpush.bf16.xpose.msrb.mxu1 %v2154_v43  ;;  %6179 = vmatmul.msk.bf16.gmra.mxu2 %vm950_vm5, %v8133_v37  ;;  %v2786_v37 = vsel %vm950_vm5, %v8241_v50, 0 }
 0x27e   : > { %3475 = vrot.lane.b32.xlu0 %v6639_v53, %s7293_s13  ;;  %3471 = vrot.lane.b32.xlu2 %v6637_v24, %s7293_s13 }
 0x27f   : > { %v1029_v14 = vpop.permute.xlu1 %1028 }
 0x280   : > { %v8374_v62 = vpop.permute.xlu0 %2211  ;;  %v8376_v2 = vpop.permute.xlu2 %2213 }
 0x282   : > { %2169 = vmatpush.bf16.xpose.msrb.mxu1 %v2151_v11 }
 0x286   : > { %3481 = vrot.lane.b32.xlu0 %v8286_v20, %s7287_s29  ;;  %3477 = vrot.lane.b32.xlu2 %v6636_v22, %s7287_s29 }
 0x287   : > { %v1344_v35 = vpop.permute.xlu1 %1343 }
 0x288   : > { %v8383_v28 = vpop.permute.xlu0 %2533  ;;  %v8385_v21 = vpop.permute.xlu2 %2842 }
 0x289   : > { %6226 = vmatmul.msk.bf16.gmra.mxu1 %vm950_vm5, %v8206_v46 }
 0x28a   : > { %2795 = vmatpush.bf16.xpose.msra.mxu1 %v2789_v38 }
 0x28e   : > { %3483 = vrot.lane.b32.xlu2 %v6639_v53, %s7287_s29  ;;  %s7306_s29 = smov 36  }
 0x28f   : > { %v8392_v50 = vpop.permute.xlu1 %1586 }
 0x290   : > { %v1342_v63 = vpop.permute.xlu0 %1341  ;;  %v1595_v20 = vpop.permute.xlu2 %1594 }
 0x292   : > { %2796 = vmatpush.bf16.xpose.msra.mxu1 %v2786_v37 }
 0x297   : > { %v8396_v1 = vpop.permute.xlu1 %2215 }
 0x298   : > { %v8398_v6 = vpop.permute.xlu0 %1584  ;;  %v8400_v24 = vpop.permute.xlu2 %1908 }
 0x299   : > { %6227 = vmatmul.msk.bf16.gmra.mxu1 %vm950_vm5, %v8292_v56 }
 0x29a   : > { %2797 = vmatpush.bf16.xpose.msra.mxu1 %v2783_v8 }
 0x29f   : > { %v8404_v46 = vpop.permute.xlu1 %2852 }
 0x2a0   : > { %v8406_v23 = vpop.permute.xlu0 %1906  ;;  %v8408_v25 = vpop.permute.xlu2 %2537 }
 0x2a2   : > { %2798 = vmatpush.bf16.xpose.msra.mxu1 %v2780_v12 }
 0x2a7   : > { %v8410_v40 = vpop.permute.xlu1 %1910 }
 0x2a8   : > { %v8412_v34 = vpop.permute.xlu0 %2850  ;;  %v8414_v48 = vpop.permute.xlu2 %3166 }
 0x2a9   : > { %11149 = vst [vmem:[#allocation6_spill] sm:$0xff] %v8414_v48  ;;  %6272 = vmatmul.msk.bf16.vlgmr.msrb.gmra.mxu1 %vm950_vm5, %v8140_v60 }
 0x2af   : > { %v8418_v55 = vpop.permute.xlu1 %2846 }
 0x2b0   : > { %v8420_v36 = vpop.permute.xlu0 %3164  ;;  %v1346_v56 = vpop.permute.xlu2 %1345 }
 0x2b1   : > { %11150 = vst [vmem:[#allocation14_spill] sm:$0xff] %v8420_v36  ;;  %1367 = vmatpush.bf16.msrb.mxu3 %v1346_v56 }
 0x2b5   : > { %1368 = vmatpush.bf16.msrb.mxu3 %v1344_v35 }
 0x2b7   : > { %v3395_v43 = vpop.permute.xlu1 %3394 }
 0x2b8   : > { %v8422_v22 = vpop.permute.xlu0 %2223  ;;  %v3418_v11 = vsel %vm950_vm5, %v3395_v43, 0  ;;  %v8425_v38 = vpop.permute.xlu2 %1588 }
 0x2b9   : > { %6273 = vmatmul.msk.bf16.gmra.mxu1 %vm950_vm5, %v8202_v7  ;;  %1369 = vmatpush.bf16.msrb.mxu3 %v1342_v63  ;;  %v1051_v63 = vsel %vm950_vm5, %v1029_v14, 0  ;;  %v1045_v14 = vsel %vm950_vm5, %v8349_v17, 0  ;;  %v1617_v17 = vsel %vm950_vm5, %v1595_v20, 0 }
 0x2ba   : > { %3424 = vmatpush.bf16.xpose.msrb.mxu1 %v3418_v11  ;;  %v3412_v11 = vsel %vm950_vm5, %v8239_v0, 0 }
 0x2bd   : > { %1370 = vmatpush.bf16.msrb.mxu3 %v8294_v42 }
 0x2c0   : > { %v8430_v60 = vpop.permute.xlu0 %2844  ;;  %v2226_v53 = vpop.permute.xlu2 %2225 }
 0x2c8   : > { %v1031_v37 = vpop.permute.xlu0 %1030  ;;  %v8432_v8 = vpop.permute.xlu2 %2854 }
 0x2c9   : > { %6274 = vmatmul.msk.bf16.gmra.mxu1 %vm950_vm5, %v8250_v58  ;;  %v1054_v35 = vsel %vm950_vm5, %v1031_v37, 0  ;;  %v1048_v58 = vsel %vm950_vm5, %v8363_v13, 0 }
 0x2ca   : > { %1060 = vmatpush.bf16.xpose.msrb.mxu2 %v1054_v35 }
 0x2cc   : > { %v8437_v12 = vpop.f32.mrf.mxu2 }
 0x2cd   : > { %v1086_v7 = vsel %vm1085_vm6, %v8437_v12, -inf }
 0x2ce   : > { %1087 = vmax.xlane.f32.xlu2 %v1086_v7 }
 0x2d0   : > { %v3393_v42 = vpop.permute.xlu2 %3392  ;;  %v1597_v37 = vpop.permute.xlu0 %1596 }
 0x2d1   : > { %v3415_v56 = vsel %vm950_vm5, %v3393_v42, 0  ;;  %v1620_v35 = vsel %vm950_vm5, %v1597_v37, 0  ;;  %v2249_v37 = vsel %vm950_vm5, %v2226_v53, 0 }
 0x2d2   : > { %1061 = vmatpush.bf16.xpose.msrb.mxu2 %v1051_v63  ;;  %3425 = vmatpush.bf16.xpose.msrb.mxu1 %v3415_v56 }
 0x2d4   : > { %v8447_v43 = vpop.f32.mrf.mxu2 }
 0x2d5   : > { %v1089_v63 = vsel %vm1085_vm6, %v8447_v43, -inf }
 0x2d9   : > { %6275 = vmatmul.msk.bf16.gmra.mxu1 %vm950_vm5, %v8252_v39  ;;  %v3409_v39 = vsel %vm950_vm5, %v8173_v45, 0 }
 0x2da   : > { %1062 = vmatpush.bf16.xpose.msrb.mxu2 %v1048_v58  ;;  %3426 = vmatpush.bf16.xpose.msrb.mxu1 %v3412_v11 }
 0x2dc   : > { %v8456_v13 = vpop.f32.mrf.mxu2 }
 0x2e2   : > { %1063 = vmatpush.bf16.xpose.msrb.mxu2 %v1045_v14  ;;  %3427 = vmatpush.bf16.xpose.msrb.mxu1 %v3409_v39 }
 0x2e4   : > { %v8467_v45 = vpop.f32.mrf.mxu2 }
 0x2e5   : > { %v1095_v20 = vsel %vm1085_vm6, %v8467_v45, -inf }
 0x2e6   : > { %v8458_v7 = vpop.f32.mrf.mxu1 }
 0x2e7   : > { %v1651_v0 = vsel %vm1085_vm6, %v8458_v7, -inf }
 0x2e8   : > { %1652 = vmax.xlane.f32.xlu1 %v1651_v0 }
 0x2e9   : > { %6196 = vmatmul.msk.bf16.vlgmr.msrb.gmra.mxu2 %vm950_vm5, %v8179_v4  ;;  %6320 = vmatmul.msk.bf16.vlgmr.msra.gmra.mxu1 %vm950_vm5, %v8156_v18  ;;  %v1614_v4 = vsel %vm950_vm5, %v8330_v32, 0  ;;  %v1611_v32 = vsel %vm950_vm5, %v8361_v27, 0 }
 0x2ea   : > { %1626 = vmatpush.bf16.xpose.msra.mxu2 %v1620_v35  ;;  %v1092_v35 = vsel %vm1085_vm6, %v8456_v13, -inf }
 0x2ed   : > { %v8483_v11 = vpop.f32.mrf.mxu2 }
 0x2ee   : > { %v8469_v42 = vpop.f32.mrf.mxu1  ;;  %v1098_v53 = vsel %vm1085_vm6, %v8483_v11, -inf }
 0x2ef   : > { %v1654_v56 = vsel %vm1085_vm6, %v8469_v42, -inf }
 0x2f0   : > { %1090 = vmax.xlane.f32.xlu1 %v1089_v63  ;;  %1655 = vmax.xlane.f32.xlu2 %v1654_v56 }
 0x2f2   : > { %1627 = vmatpush.bf16.xpose.msra.mxu2 %v1617_v17 }
 0x2f6   : > { %v8477_v18 = vpop.f32.mrf.mxu1 }
 0x2f7   : > { %v1657_v58 = vsel %vm1085_vm6, %v8477_v18, -inf }
 0x2f8   : > { %1096 = vmax.xlane.f32.xlu2 %v1095_v20  ;;  %1658 = vmax.xlane.f32.xlu0 %v1657_v58 }
 0x2f9   : > { %6197 = vmatmul.msk.bf16.gmra.mxu2 %vm950_vm5, %v8230_v5  ;;  %6321 = vmatmul.msk.bf16.gmra.mxu1 %vm950_vm5, %v8216_v59  ;;  %v8498_v5 = vpop.f32.mrf.mxu2  ;;  %v2246_v59 = vsel %vm950_vm5, %v8422_v22, 0  ;;  %v2243_v22 = vsel %vm950_vm5, %v8347_v41, 0 }
 0x2fa   : > { %1628 = vmatpush.bf16.xpose.msra.mxu2 %v1614_v4  ;;  %v1101_v41 = vsel %vm1085_vm6, %v8498_v5, -inf }
 0x2fe   : > { %v8492_v14 = vpop.f32.mrf.mxu1 }
 0x2ff   : > { %v1660_v39 = vsel %vm1085_vm6, %v8492_v14, -inf }
 0x300   : > { %1093 = vmax.xlane.f32.xlu0 %v1092_v35  ;;  %1661 = vmax.xlane.f32.xlu1 %v1660_v39  ;;  %v2875_v39 = vsel %vm950_vm5, %v8404_v46, 0  ;;  %v2869_v46 = vsel %vm950_vm5, %v8334_v10, 0 }
 0x301   : > { %v8514_v17 = vpop.f32.mrf.mxu2 }
 0x302   : > { %1629 = vmatpush.bf16.xpose.msra.mxu2 %v1611_v32  ;;  %v1104_v56 = vsel %vm1085_vm6, %v8514_v17, -inf }
 0x306   : > { %v8502_v27 = vpop.f32.mrf.mxu1 }
 0x307   : > { %v1663_v0 = vsel %vm1085_vm6, %v8502_v27, -inf }
 0x308   : > { %1099 = vmax.xlane.f32.xlu1 %v1098_v53  ;;  %1664 = vmax.xlane.f32.xlu2 %v1663_v0 }
 0x309   : > { %6198 = vmatmul.msk.bf16.gmra.mxu2 %vm950_vm5, %v8208_v57  ;;  %6322 = vmatmul.msk.bf16.gmra.mxu1 %vm950_vm5, %v8258_v51  ;;  %v2240_v57 = vsel %vm950_vm5, %v8321_v52, 0  ;;  %v8534_v58 = vpop.f32.mrf.mxu2 }
 0x30a   : > { %2255 = vmatpush.bf16.xpose.msrb.mxu2 %v2249_v37  ;;  %v1107_v32 = vsel %vm1085_vm6, %v8534_v58, -inf }
 0x30e   : > { %v8516_v63 = vpop.f32.mrf.mxu1 }
 0x30f   : > { %v1666_v4 = vsel %vm1085_vm6, %v8516_v63, -inf }
 0x310   : > { %1105 = vmax.xlane.f32.xlu2 %v1104_v56  ;;  %1667 = vmax.xlane.f32.xlu0 %v1666_v4 }
 0x312   : > { %2256 = vmatpush.bf16.xpose.msrb.mxu2 %v2246_v59  ;;  %v2872_v59 = vsel %vm950_vm5, %v8412_v34, 0 }
 0x316   : > { %v8524_v51 = vpop.f32.mrf.mxu1 }
 0x317   : > { %v1669_v20 = vsel %vm1085_vm6, %v8524_v51, -inf }
 0x318   : > { %1102 = vmax.xlane.f32.xlu0 %v1101_v41  ;;  %1670 = vmax.xlane.f32.xlu1 %v1669_v20 }
 0x319   : > { %6199 = vmatmul.msk.bf16.gmra.mxu2 %vm950_vm5, %v8298_v30  ;;  %6323 = vmatmul.msk.bf16.gmra.mxu1 %vm950_vm5, %v8273_v47  ;;  %v2878_v47 = vsel %vm950_vm5, %v8432_v8, 0  ;;  %v8560_v8 = vpop.permute.xlu0 %2217 }
 0x31a   : > { %2257 = vmatpush.bf16.xpose.msrb.mxu2 %v2243_v22 }
 0x31e   : > { %v8536_v52 = vpop.f32.mrf.mxu1 }
 0x31f   : > { %v1672_v37 = vsel %vm1085_vm6, %v8536_v52, -inf }
 0x320   : > { %1108 = vmax.xlane.f32.xlu1 %v1107_v32  ;;  %1673 = vmax.xlane.f32.xlu2 %v1672_v37 }
 0x321   : > { %v8568_v53 = vpop.permute.xlu0 %2539 }
 0x322   : > { %2258 = vmatpush.bf16.xpose.msrb.mxu2 %v2240_v57 }
 0x326   : > { %v8542_v35 = vpop.f32.mrf.mxu1 }
 0x327   : > { %v2280_v30 = vsel %vm1085_vm6, %v8542_v35, -inf }
 0x328   : > { %2281 = vmax.xlane.f32.xlu1 %v2280_v30 }
 0x329   : > { %6244 = vmatmul.msk.bf16.vlgmr.msra.gmra.mxu2 %vm950_vm5, %v8309_v54  ;;  %6368 = vmatmul.msk.bf16.vlgmr.msrb.gmra.mxu1 %vm950_vm5, %v8177_v9  ;;  %v8562_v54 = vpop.permute.xlu2 %3471  ;;  %v8564_v9 = vpop.permute.xlu1 %3473 }
 0x32a   : > { %2884 = vmatpush.bf16.xpose.msra.mxu2 %v2878_v47 }
 0x32e   : > { %v8584_v10 = vpop.f32.mrf.mxu1 }
 0x331   : > { %v8572_v0 = vpop.permute.xlu1 %3168 }
 0x332   : > { %2885 = vmatpush.bf16.xpose.msra.mxu2 %v2875_v39  ;;  %11151 = vst [vmem:[#allocation5_spill] sm:$0xff] %v8572_v0 }
 0x336   : > { %v8592_v37 = vpop.f32.mrf.mxu1 }
 0x339   : > { %6245 = vmatmul.msk.bf16.gmra.mxu2 %vm950_vm5, %v8398_v6  ;;  %6369 = vmatmul.msk.bf16.gmra.mxu1 %vm950_vm5, %v8237_v29  ;;  %v8570_v6 = vpop.permute.xlu2 %3477  ;;  %v8578_v29 = vpop.permute.xlu0 %3469 }
 0x33a   : > { %2886 = vmatpush.bf16.xpose.msra.mxu2 %v2872_v59  ;;  %v8580_v22 = vpop.permute.xlu1 %3479 }
 0x341   : > { %v3484_v34 = vpop.permute.xlu2 %3483  ;;  %v8582_v56 = vpop.permute.xlu0 %3475 }
 0x342   : > { %2887 = vmatpush.bf16.xpose.msra.mxu2 %v2869_v46  ;;  %11152 = vst [vmem:[#allocation13_spill] sm:$0xff] %v8582_v56 }
 0x349   : > { %6246 = vmatmul.msk.bf16.gmra.mxu2 %vm950_vm5, %v8392_v50  ;;  %6370 = vmatmul.msk.bf16.gmra.mxu1 %vm950_vm5, %v8271_v16  ;;  %v1088_v4 = vpop.xlane.xlu2 %1087  ;;  %v3482_v32 = vpop.permute.xlu0 %3481 }
 0x34a   : > { %v1134_v57 = vsub.f32 %v8437_v12, %v1088_v4  ;;  %v3507_v12 = vsel %vm950_vm5, %v3484_v34, 0 }
 0x34c   : > { %v1150_v41 = vmul.f32 1.442695, %v1134_v57 }
 0x34e   : > { %6747 = vpow2.f32 %v1150_v41 }
 0x359   : > { %6247 = vmatmul.msk.bf16.gmra.mxu2 %vm950_vm5, %v8425_v38  ;;  %6371 = vmatmul.msk.bf16.gmra.mxu1 %vm950_vm5, %v8281_v33 }
 0x35b   : > { %v1653_v50 = vpop.xlane.xlu1 %1652 }
 0x35c   : > { %v1699_v16 = vsub.f32 %v8458_v7, %v1653_v50  ;;  %v8599_v7 = vpop.eup %6747 }
 0x35e   : > { %v1715_v20 = vmul.f32 1.442695, %v1699_v16 }
 0x360   : > { %6749 = vpow2.f32 %v1715_v20 }
 0x363   : > { %v1091_v30 = vpop.xlane.xlu1 %1090  ;;  %v1656_v47 = vpop.xlane.xlu2 %1655 }
 0x364   : > { %v1135_v39 = vsub.f32 %v8447_v43, %v1091_v30  ;;  %v1700_v38 = vsub.f32 %v8469_v42, %v1656_v47  ;;  %v8603_v43 = vpop.f32.mrf.mxu1 }
 0x366   : > { %v1152_v59 = vmul.f32 1.442695, %v1135_v39  ;;  %v1717_v33 = vmul.f32 1.442695, %v1700_v38  ;;  %v8601_v46 = vpop.eup %6749  ;;  %v3504_v38 = vsel %vm950_vm5, %v3482_v32, 0 }
 0x367   : > { %v1795_v20 = vpack.c.bf16 %v8601_v46, %v8601_v46 }
 0x368   : > { %6751 = vpow2.f32 %v1152_v59 }
 0x369   : > { %6753 = vpow2.f32 %v1717_v33  ;;  %6292 = vmatmul.msk.bf16.vlgmr.msrb.gmra.mxu2 %vm950_vm5, %v8374_v62  ;;  %v1230_v62 = vpack.c.bf16 %v8599_v7, %v8599_v7 }
 0x36a   : > { %3513 = vmatpush.bf16.xpose.msrb.mxu2 %v3507_v12  ;;  %v1819_v12 = vunpack.c.l.b16 %v1795_v20 }
 0x36b   : > { %v1097_v4 = vpop.xlane.xlu2 %1096  ;;  %v1659_v50 = vpop.xlane.xlu0 %1658  ;;  %v1254_v59 = vunpack.c.l.b16 %v1230_v62 }
 0x36c   : > { %v1701_v42 = vsub.f32 %v8477_v18, %v1659_v50  ;;  %v8606_v57 = vpop.f32.mrf.mxu2  ;;  %v1137_v16 = vsub.f32 %v8467_v45, %v1097_v4 }
 0x36d   : > { %v1110_v34 = vsel %vm1085_vm6, %v8606_v57, -inf }
 0x36e   : > { %v8613_v41 = vpop.eup %6751  ;;  %1111 = vmax.xlane.f32.xlu0 %v1110_v34  ;;  %v1719_v47 = vmul.f32 1.442695, %v1701_v42  ;;  %v1156_v39 = vmul.f32 1.442695, %v1137_v16  ;;  %v8631_v42 = vpop.f32.mrf.mxu1 }
 0x36f   : > { %v8617_v30 = vpop.eup %6753  ;;  %v1231_v18 = vpack.c.bf16 %v8613_v41, %v8613_v41 }
 0x370   : > { %v1796_v45 = vpack.c.bf16 %v8617_v30, %v8617_v30  ;;  %6755 = vpow2.f32 %v1719_v47  ;;  %v3498_v47 = vsel %vm950_vm5, %v8570_v6, 0 }
 0x371   : > { %v1255_v33 = vunpack.c.l.b16 %v1231_v18  ;;  %6757 = vpow2.f32 %v1156_v39 }
 0x372   : > { %3514 = vmatpush.bf16.xpose.msrb.mxu2 %v3504_v38  ;;  %v1820_v4 = vunpack.c.l.b16 %v1796_v45 }
 0x373   : > { %v1662_v50 = vpop.xlane.xlu1 %1661  ;;  %v1094_v44 = vpop.xlane.xlu0 %1093  ;;  %v1262_v34 = vpack.c.b16 %v1255_v33, %v1254_v59 }
 0x374   : > { %v1702_v36 = vsub.f32 %v8492_v14, %v1662_v50  ;;  %v1136_v48 = vsub.f32 %v8456_v13, %v1094_v44  ;;  %v8626_v0 = vpop.f32.mrf.mxu2  ;;  %v1827_v56 = vpack.c.b16 %v1820_v4, %v1819_v12  ;;  %v2283_v44 = vsel %vm1085_vm6, %v8584_v10, -inf }
 0x375   : > { %6200 = vmatmul.msk.bf16.vlgmr.msra.gmra.mxu3 %vm1085_vm6, %v1262_v34  ;;  %v1113_v32 = vsel %vm1085_vm6, %v8626_v0, -inf }
 0x376   : > { %v1721_v16 = vmul.f32 1.442695, %v1702_v36  ;;  %v1154_v62 = vmul.f32 1.442695, %v1136_v48  ;;  %6248 = vmatmul.msk.bf16.vlgmr.msrb.gmra.mxu0 %vm1085_vm6, %v1827_v56  ;;  %1932 = vmatpush.bf16.msra.mxu3 %v8410_v40  ;;  %v3501_v36 = vsel %vm950_vm5, %v8580_v22, 0  ;;  %v8642_v48 = vpop.eup %6755  ;;  %v8667_v18 = vpop.f32.mrf.mxu1 }
 0x377   : > { %3117 = vmatpush.bf16.msrb.mxu0 %v8332_v61  ;;  %2284 = vmax.xlane.f32.xlu0 %v2283_v44  ;;  %v8645_v40 = vpop.eup %6757  ;;  %v1797_v22 = vpack.c.bf16 %v8642_v48, %v8642_v48 }
 0x378   : > { %6759 = vpow2.f32 %v1721_v16  ;;  %1114 = vmax.xlane.f32.xlu2 %v1113_v32 }
 0x379   : > { %6761 = vpow2.f32 %v1154_v62  ;;  %6293 = vmatmul.msk.bf16.gmra.mxu2 %vm950_vm5, %v8376_v2  ;;  %v1821_v39 = vunpack.c.l.b16 %v1797_v22 }
 0x37a   : > { %1933 = vmatpush.bf16.msra.mxu3 %v8400_v24  ;;  %3515 = vmatpush.bf16.xpose.msrb.mxu2 %v3501_v36  ;;  %v1233_v24 = vpack.c.bf16 %v8645_v40, %v8645_v40 }
 0x37b   : > { %3118 = vmatpush.bf16.msrb.mxu0 %v8269_v3  ;;  %v1665_v61 = vpop.xlane.xlu2 %1664  ;;  %v1100_v59 = vpop.xlane.xlu1 %1099 }
 0x37c   : > { %v8648_v13 = vpop.f32.mrf.mxu2  ;;  %v1703_v14 = vsub.f32 %v8502_v27, %v1665_v61  ;;  %v2286_v27 = vsel %vm1085_vm6, %v8592_v37, -inf  ;;  %v1257_v33 = vunpack.c.l.b16 %v1233_v24  ;;  %v1138_v16 = vsub.f32 %v8483_v11, %v1100_v59 }
 0x37d   : > { %v1116_v2 = vsel %vm1085_vm6, %v8648_v13, -inf }
 0x37e   : > { %v8655_v56 = vpop.eup %6759  ;;  %1934 = vmatpush.bf16.msra.mxu3 %v8406_v23  ;;  %1117 = vmax.xlane.f32.xlu1 %v1116_v2  ;;  %v1723_v45 = vmul.f32 1.442695, %v1703_v14  ;;  %v8687_v11 = vpop.f32.mrf.mxu1 }
 0x37f   : > { %v8660_v3 = vpop.eup %6761  ;;  %3119 = vmatpush.bf16.msrb.mxu0 %v8226_v19  ;;  %v1798_v20 = vpack.c.bf16 %v8655_v56, %v8655_v56 }
 0x380   : > { %2287 = vmax.xlane.f32.xlu2 %v2286_v27  ;;  %v1232_v23 = vpack.c.bf16 %v8660_v3, %v8660_v3  ;;  %6763 = vpow2.f32 %v1723_v45 }
 0x381   : > { %v1822_v38 = vunpack.c.l.b16 %v1798_v20 }
 0x382   : > { %1935 = vmatpush.bf16.msra.mxu3 %v8307_v49  ;;  %3516 = vmatpush.bf16.xpose.msrb.mxu2 %v3498_v47  ;;  %v1256_v19 = vunpack.c.l.b16 %v1232_v23  ;;  %v1158_v49 = vmul.f32 1.442695, %v1138_v16  ;;  %v2295_v16 = vsel %vm1085_vm6, %v8667_v18, -inf }
 0x383   : > { %3120 = vmatpush.bf16.msrb.mxu0 %v8165_v15  ;;  %v1668_v12 = vpop.xlane.xlu0 %1667  ;;  %v1828_v4 = vpack.c.b16 %v1822_v38, %v1821_v39  ;;  %v2289_v15 = vsel %vm1085_vm6, %v8603_v43, -inf }
 0x384   : > { %v1704_v50 = vsub.f32 %v8516_v63, %v1668_v12  ;;  %v8676_v34 = vpop.f32.mrf.mxu2  ;;  %v1263_v32 = vpack.c.b16 %v1257_v33, %v1256_v19  ;;  %v1106_v63 = vpop.xlane.xlu2 %1105 }
 0x385   : > { %v1119_v6 = vsel %vm1085_vm6, %v8676_v34, -inf }
 0x386   : > { %v1725_v62 = vmul.f32 1.442695, %v1704_v50  ;;  %6201 = vmatmul.msk.bf16.gmra.mxu3 %vm1085_vm6, %v1263_v32  ;;  %6249 = vmatmul.msk.bf16.gmra.mxu0 %vm1085_vm6, %v1828_v4  ;;  %v8689_v44 = vpop.eup %6763  ;;  %v8711_v50 = vpop.f32.mrf.mxu1  ;;  %v1140_v32 = vsub.f32 %v8514_v17, %v1106_v63 }
 0x387   : > { %2290 = vmax.xlane.f32.xlu1 %v2289_v15  ;;  %1120 = vmax.xlane.f32.xlu0 %v1119_v6  ;;  %v1799_v20 = vpack.c.bf16 %v8689_v44, %v8689_v44 }
 0x388   : > { %6765 = vpow2.f32 %v1725_v62 }
 0x389   : > { %6294 = vmatmul.msk.bf16.gmra.mxu2 %vm950_vm5, %v8396_v1  ;;  %6767 = vpow2.f32 %v1158_v49  ;;  %v2292_v1 = vsel %vm1085_vm6, %v8631_v42, -inf  ;;  %v1162_v49 = vmul.f32 1.442695, %v1140_v32 }
 0x38b   : > { %v1671_v36 = vpop.xlane.xlu1 %1670  ;;  %v1103_v61 = vpop.xlane.xlu0 %1102 }
 0x38c   : > { %v1139_v14 = vsub.f32 %v8498_v5, %v1103_v61  ;;  %v8692_v2 = vpop.f32.mrf.mxu2  ;;  %v1705_v22 = vsub.f32 %v8524_v51, %v1671_v36  ;;  %v1823_v51 = vunpack.c.l.b16 %v1799_v20 }
 0x38d   : > { %v1122_v24 = vsel %vm1085_vm6, %v8692_v2, -inf }
 0x38e   : > { %v1160_v27 = vmul.f32 1.442695, %v1139_v14  ;;  %1123 = vmax.xlane.f32.xlu2 %v1122_v24  ;;  %v8701_v23 = vpop.eup %6765  ;;  %v1727_v45 = vmul.f32 1.442695, %v1705_v22  ;;  %v8740_v20 = vpop.f32.mrf.mxu1 }
 0x38f   : > { %2293 = vmax.xlane.f32.xlu0 %v2292_v1  ;;  %v1800_v5 = vpack.c.bf16 %v8701_v23, %v8701_v23  ;;  %v8705_v39 = vpop.eup %6767 }
 0x390   : > { %6769 = vpow2.f32 %v1160_v27  ;;  %v2298_v27 = vsel %vm1085_vm6, %v8687_v11, -inf }
 0x391   : > { %v1824_v47 = vunpack.c.l.b16 %v1800_v5  ;;  %6771 = vpow2.f32 %v1727_v45 }
 0x393   : > { %v1109_v38 = vpop.xlane.xlu1 %1108  ;;  %v1674_v59 = vpop.xlane.xlu2 %1673  ;;  %v1829_v4 = vpack.c.b16 %v1824_v47, %v1823_v51 }
 0x394   : > { %v1141_v19 = vsub.f32 %v8534_v58, %v1109_v38  ;;  %v1706_v33 = vsub.f32 %v8536_v52, %v1674_v59  ;;  %v8709_v12 = vpop.f32.mrf.mxu2  ;;  %v1234_v58 = vpack.c.bf16 %v8705_v39, %v8705_v39 }
 0x395   : > { %v1125_v6 = vsel %vm1085_vm6, %v8709_v12, -inf }
 0x396   : > { %v1729_v62 = vmul.f32 1.442695, %v1706_v33  ;;  %6250 = vmatmul.msk.bf16.gmra.mxu0 %vm1085_vm6, %v1829_v4  ;;  %2296 = vmax.xlane.f32.xlu2 %v2295_v16  ;;  %v8721_v52 = vpop.eup %6769  ;;  %v1164_v15 = vmul.f32 1.442695, %v1141_v19  ;;  %v1258_v63 = vunpack.c.l.b16 %v1234_v58  ;;  %v2301_v4 = vsel %vm1085_vm6, %v8711_v50, -inf  ;;  %v8761_v58 = vpop.f32.mrf.mxu1 }
 0x397   : > { %1126 = vmax.xlane.f32.xlu1 %v1125_v6  ;;  %v1235_v17 = vpack.c.bf16 %v8721_v52, %v8721_v52  ;;  %v8727_v61 = vpop.eup %6771  ;;  %v1182_v16 = vsel %vm1085_vm6, %v8599_v7, 0.0  ;;  %v2912_v7 = vsel %vm1085_vm6, %v8761_v58, -inf }
 0x398   : > { %6773 = vpow2.f32 %v1729_v62 }
 0x399   : > { %6295 = vmatmul.msk.bf16.gmra.mxu2 %vm950_vm5, %v8560_v8  ;;  %v1259_v36 = vunpack.c.l.b16 %v1235_v17  ;;  %6775 = vpow2.f32 %v1164_v15  ;;  %v1801_v8 = vpack.c.bf16 %v8727_v61, %v8727_v61 }
 0x39a   : > { %6777 = vpow2.f32 %v1162_v49 }
 0x39b   : > { %v1264_v22 = vpack.c.b16 %v1259_v36, %v1258_v63  ;;  %v1825_v51 = vunpack.c.l.b16 %v1801_v8  ;;  %v2909_v63 = vsel %vm1085_vm6, %v8740_v20, -inf  ;;  %v1747_v36 = vsel %vm1085_vm6, %v8601_v46, 0.0 }
 0x39c   : > { %v8729_v14 = vpop.f32.mrf.mxu2 }
 0x39d   : > { %v1128_v24 = vsel %vm1085_vm6, %v8729_v14, -inf  ;;  %6202 = vmatmul.msk.bf16.gmra.mxu3 %vm1085_vm6, %v1264_v22 }
 0x39e   : > { %1129 = vmax.xlane.f32.xlu0 %v1128_v24  ;;  %v8738_v1 = vpop.eup %6773  ;;  %v8774_v22 = vpop.f32.mrf.mxu1 }
 0x39f   : > { %2299 = vmax.xlane.f32.xlu1 %v2298_v27  ;;  %v1802_v5 = vpack.c.bf16 %v8738_v1, %v8738_v1  ;;  %v8744_v45 = vpop.eup %6775  ;;  %v2915_v8 = vsel %vm1085_vm6, %v8774_v22, -inf }
 0x3a0   : > { %v8746_v38 = vpop.eup %6777  ;;  %v1237_v33 = vpack.c.bf16 %v8744_v45, %v8744_v45 }
 0x3a1   : > { %v1826_v47 = vunpack.c.l.b16 %v1802_v5  ;;  %v1236_v6 = vpack.c.bf16 %v8746_v38, %v8746_v38  ;;  %v1750_v5 = vsel %vm1085_vm6, %v8617_v30, 0.0  ;;  %v1191_v30 = vsel %vm1085_vm6, %v8645_v40, 0.0 }
 0x3a2   : > { %v1261_v62 = vunpack.c.l.b16 %v1237_v33  ;;  %v1756_v40 = vsel %vm1085_vm6, %v8655_v56, 0.0 }
 0x3a3   : > { %v1830_v19 = vpack.c.b16 %v1826_v47, %v1825_v51  ;;  %v1260_v15 = vunpack.c.l.b16 %v1236_v6  ;;  %v1753_v51 = vsel %vm1085_vm6, %v8642_v48, 0.0  ;;  %v1188_v47 = vsel %vm1085_vm6, %v8660_v3, 0.0 }
 0x3a4   : > { %v8748_v59 = vpop.f32.mrf.mxu2 }
 0x3a5   : > { %v1131_v32 = vsel %vm1085_vm6, %v8748_v59, -inf  ;;  %v1265_v49 = vpack.c.b16 %v1261_v62, %v1260_v15 }
 0x3a6   : > { %6251 = vmatmul.msk.bf16.gmra.mxu0 %vm1085_vm6, %v1830_v19  ;;  %2302 = vmax.xlane.f32.xlu0 %v2301_v4  ;;  %v8794_v19 = vpop.f32.mrf.mxu1 }
 0x3a7   : > { %1183 = vadd.xlane.f32.xlu1 %v1182_v16  ;;  %1132 = vmax.xlane.f32.xlu2 %v1131_v32  ;;  %v2918_v32 = vsel %vm1085_vm6, %v8794_v19, -inf }
 0x3a9   : > { %6340 = vmatmul.msk.bf16.vlgmr.msra.gmra.mxu2 %vm950_vm5, %v8319_v31 }
 0x3ac   : > { %v8765_v17 = vpop.f32.mrf.mxu2 }
 0x3ad   : > { %6203 = vmatmul.msk.bf16.gmra.mxu3 %vm1085_vm6, %v1265_v49  ;;  %v1675_v24 = vsel %vm1085_vm6, %v8765_v17, -inf  ;;  %v1759_v49 = vsel %vm1085_vm6, %v8689_v44, 0.0  ;;  %v1194_v44 = vsel %vm1085_vm6, %v8705_v39, 0.0 }
 0x3ae   : > { %2910 = vmax.xlane.f32.xlu0 %v2909_v63  ;;  %v8804_v48 = vpop.f32.mrf.mxu1  ;;  %v1762_v63 = vsel %vm1085_vm6, %v8701_v23, 0.0  ;;  %v1200_v23 = vsel %vm1085_vm6, %v8746_v38, 0.0 }
 0x3af   : > { %2913 = vmax.xlane.f32.xlu1 %v2912_v7  ;;  %1748 = vadd.xlane.f32.xlu2 %v1747_v36  ;;  %v1197_v7 = vsel %vm1085_vm6, %v8721_v52, 0.0  ;;  %v2282_v36 = vpop.xlane.xlu1 %2281 }
 0x3b4   : > { %v8776_v31 = vpop.f32.mrf.mxu2 }
 0x3b5   : > { %v1678_v27 = vsel %vm1085_vm6, %v8776_v31, -inf }
 0x3b6   : > { %1676 = vmax.xlane.f32.xlu0 %v1675_v24  ;;  %v8816_v16 = vpop.f32.mrf.mxu1 }
 0x3b7   : > { %2916 = vmax.xlane.f32.xlu2 %v2915_v8  ;;  %1679 = vmax.xlane.f32.xlu1 %v1678_v27  ;;  %v2924_v15 = vsel %vm1085_vm6, %v8816_v16, -inf }
 0x3b9   : > { %6341 = vmatmul.msk.bf16.gmra.mxu2 %vm950_vm5, %v8385_v21  ;;  %v1185_v21 = vsel %vm1085_vm6, %v8613_v41, 0.0  ;;  %v2921_v41 = vsel %vm1085_vm6, %v8804_v48, -inf }
 0x3bc   : > { %v8786_v46 = vpop.f32.mrf.mxu2 }
 0x3bd   : > { %v1681_v4 = vsel %vm1085_vm6, %v8786_v46, -inf }
 0x3be   : > { %1751 = vadd.xlane.f32.xlu0 %v1750_v5  ;;  %v8836_v24 = vpop.f32.mrf.mxu1 }
 0x3bf   : > { %1754 = vadd.xlane.f32.xlu1 %v1753_v51  ;;  %1189 = vadd.xlane.f32.xlu2 %v1188_v47 }
 0x3c4   : > { %v8796_v33 = vpop.f32.mrf.mxu2 }
 0x3c6   : > { %1186 = vadd.xlane.f32.xlu0 %v1185_v21 }
 0x3c7   : > { %1192 = vadd.xlane.f32.xlu1 %v1191_v30  ;;  %1682 = vmax.xlane.f32.xlu2 %v1681_v4  ;;  %v2927_v4 = vsel %vm1085_vm6, %v8836_v24, -inf }
 0x3c9   : > { %6342 = vmatmul.msk.bf16.gmra.mxu2 %vm950_vm5, %v8430_v60  ;;  %v1684_v60 = vsel %vm1085_vm6, %v8796_v33, -inf }
 0x3cc   : > { %v8808_v3 = vpop.f32.mrf.mxu2 }
 0x3cd   : > { %v1687_v62 = vsel %vm1085_vm6, %v8808_v3, -inf }
 0x3ce   : > { %2919 = vmax.xlane.f32.xlu0 %v2918_v32 }
 0x3cf   : > { %2922 = vmax.xlane.f32.xlu1 %v2921_v41  ;;  %1757 = vadd.xlane.f32.xlu2 %v1756_v40 }
 0x3d4   : > { %v8818_v6 = vpop.f32.mrf.mxu2 }
 0x3d5   : > { %v1690_v52 = vsel %vm1085_vm6, %v8818_v6, -inf }
 0x3d6   : > { %1685 = vmax.xlane.f32.xlu0 %v1684_v60 }
 0x3d7   : > { %1688 = vmax.xlane.f32.xlu1 %v1687_v62  ;;  %2925 = vmax.xlane.f32.xlu2 %v2924_v15 }
 0x3d9   : > { %6343 = vmatmul.msk.bf16.gmra.mxu2 %vm950_vm5, %v8418_v55  ;;  %v2328_v55 = vsub.f32 %v8542_v35, %v2282_v36 }
 0x3db   : > { %v2344_v51 = vmul.f32 1.442695, %v2328_v55 }
 0x3dc   : > { %v8828_v56 = vpop.f32.mrf.mxu2 }
 0x3dd   : > { %6779 = vpow2.f32 %v2344_v51  ;;  %v1693_v36 = vsel %vm1085_vm6, %v8828_v56, -inf }
 0x3de   : > { %1760 = vadd.xlane.f32.xlu0 %v1759_v49 }
 0x3df   : > { %1763 = vadd.xlane.f32.xlu1 %v1762_v63  ;;  %1198 = vadd.xlane.f32.xlu2 %v1197_v7 }
 0x3e1   : > { %v1112_v27 = vpop.xlane.xlu0 %1111 }
 0x3e2   : > { %v1142_v8 = vsub.f32 %v8606_v57, %v1112_v27  ;;  %v8850_v57 = vpop.f32.mrf.mxu1 }
 0x3e3   : > { %v2930_v41 = vsel %vm1085_vm6, %v8850_v57, -inf }
 0x3e4   : > { %v8840_v5 = vpop.f32.mrf.mxu2  ;;  %v1166_v47 = vmul.f32 1.442695, %v1142_v8 }
 0x3e5   : > { %v1696_v8 = vsel %vm1085_vm6, %v8840_v5, -inf }
 0x3e6   : > { %1195 = vadd.xlane.f32.xlu0 %v1194_v44  ;;  %6781 = vpow2.f32 %v1166_v47 }
 0x3e7   : > { %1201 = vadd.xlane.f32.xlu1 %v1200_v23  ;;  %1691 = vmax.xlane.f32.xlu2 %v1690_v52 }
 0x3e9   : > { %6388 = vmatmul.msk.bf16.vlgmr.msrb.gmra.mxu2 %vm950_vm5, %v8578_v29  ;;  %v1765_v29 = vsel %vm1085_vm6, %v8727_v61, 0.0 }
 0x3ea   : > { %v2285_v35 = vpop.xlane.xlu0 %2284  ;;  %v8873_v23 = vpop.f32.mrf.mxu1 }
 0x3eb   : > { %v1115_v21 = vpop.xlane.xlu2 %1114  ;;  %v2329_v39 = vsub.f32 %v8584_v10, %v2285_v35  ;;  %v8862_v10 = vpop.eup %6779 }
 0x3ec   : > { %v1143_v38 = vsub.f32 %v8626_v0, %v1115_v21  ;;  %v8860_v40 = vpop.f32.mrf.mxu2  ;;  %v6782_v60 = vpop.eup %6781  ;;  %v2424_v15 = vpack.c.bf16 %v8862_v10, %v8862_v10 }
 0x3ed   : > { %v2346_v30 = vmul.f32 1.442695, %v2329_v39  ;;  %v1238_v61 = vpack.c.bf16 %v6782_v60, %v6782_v60  ;;  %v1206_v44 = vsel %vm1085_vm6, %v6782_v60, 0.0 }
 0x3ee   : > { %v1168_v32 = vmul.f32 1.442695, %v1143_v38  ;;  %2928 = vmax.xlane.f32.xlu0 %v2927_v4 }
 0x3ef   : > { %6783 = vpow2.f32 %v2346_v30  ;;  %2931 = vmax.xlane.f32.xlu1 %v2930_v41  ;;  %1766 = vadd.xlane.f32.xlu2 %v1765_v29  ;;  %v1327_v21 = vunpack.c.l.b16 %v1238_v61 }
 0x3f0   : > { %6785 = vpow2.f32 %v1168_v32 }
 0x3f1   : > { %v1118_v0 = vpop.xlane.xlu1 %1117 }
 0x3f2   : > { %v1144_v63 = vsub.f32 %v8648_v13, %v1118_v0 }
 0x3f3   : > { %v2288_v62 = vpop.xlane.xlu2 %2287 }
 0x3f4   : > { %v2330_v49 = vsub.f32 %v8592_v37, %v2288_v62  ;;  %v2448_v37 = vunpack.c.l.b16 %v2424_v15  ;;  %v1170_v47 = vmul.f32 1.442695, %v1144_v63  ;;  %v8875_v35 = vpop.f32.mrf.mxu2  ;;  %v3538_v62 = vsel %vm1085_vm6, %v8873_v23, -inf  ;;  %v8892_v15 = vpop.f32.mrf.mxu1 }
 0x3f5   : > { %v6784_v7 = vpop.eup %6783 }
 0x3f6   : > { %v6786_v27 = vpop.eup %6785  ;;  %v2425_v55 = vpack.c.bf16 %v6784_v7, %v6784_v7  ;;  %1694 = vmax.xlane.f32.xlu0 %v1693_v36  ;;  %v2348_v51 = vmul.f32 1.442695, %v2330_v49 }
 0x3f7   : > { %v1239_v52 = vpack.c.bf16 %v6786_v27, %v6786_v27  ;;  %1697 = vmax.xlane.f32.xlu1 %v1696_v8  ;;  %1207 = vadd.xlane.f32.xlu2 %v1206_v44  ;;  %v1203_v44 = vsel %vm1085_vm6, %v8744_v45, 0.0 }
 0x3f8   : > { %v2449_v13 = vunpack.c.l.b16 %v2425_v55  ;;  %6787 = vpow2.f32 %v2348_v51 }
 0x3f9   : > { %6389 = vmatmul.msk.bf16.gmra.mxu2 %vm950_vm5, %v8562_v54  ;;  %v1328_v39 = vunpack.c.l.b16 %v1239_v52  ;;  %6789 = vpow2.f32 %v1170_v47  ;;  %v1768_v54 = vsel %vm1085_vm6, %v8738_v1, 0.0 }
 0x3fa   : > { %v2456_v38 = vpack.c.b16 %v2449_v13, %v2448_v37  ;;  %v2291_v30 = vpop.xlane.xlu1 %2290  ;;  %v1121_v4 = vpop.xlane.xlu0 %1120 }
 0x3fb   : > { %v2331_v32 = vsub.f32 %v8603_v43, %v2291_v30  ;;  %v1145_v41 = vsub.f32 %v8676_v34, %v1121_v4  ;;  %v1335_v29 = vpack.c.b16 %v1328_v39, %v1327_v21  ;;  %v2304_v43 = vsel %vm1085_vm6, %v8860_v40, -inf }
 0x3fc   : > { %6296 = vmatmul.msk.bf16.vlgmr.msra.gmra.mxu0 %vm1085_vm6, %v2456_v38  ;;  %v8897_v1 = vpop.f32.mrf.mxu2 }
 0x3fd   : > { %v2350_v0 = vmul.f32 1.442695, %v2331_v32  ;;  %v1172_v60 = vmul.f32 1.442695, %v1145_v41  ;;  %6204 = vmatmul.msk.bf16.vlgmr.msrb.gmra.mxu3 %vm1085_vm6, %v1335_v29 }
 0x3fe   : > { %2561 = vmatpush.bf16.msrb.mxu3 %v8568_v53  ;;  %1769 = vadd.xlane.f32.xlu0 %v1768_v54  ;;  %v8890_v34 = vpop.eup %6787 }
 0x3ff   : > { %6791 = vpow2.f32 %v2350_v0  ;;  %3539 = vmax.xlane.f32.xlu1 %v3538_v62  ;;  %2305 = vmax.xlane.f32.xlu2 %v2304_v43  ;;  %v8894_v63 = vpop.eup %6789  ;;  %v2426_v55 = vpack.c.bf16 %v8890_v34, %v8890_v34 }
 0x400   : > { %6793 = vpow2.f32 %v1172_v60  ;;  %v1240_v52 = vpack.c.bf16 %v8894_v63, %v8894_v63 }
 0x401   : > { %v1124_v49 = vpop.xlane.xlu2 %1123  ;;  %v2450_v45 = vunpack.c.l.b16 %v2426_v55 }
 0x402   : > { %2562 = vmatpush.bf16.msrb.mxu3 %v8408_v25  ;;  %v2294_v53 = vpop.xlane.xlu0 %2293  ;;  %v1146_v61 = vsub.f32 %v8692_v2, %v1124_v49  ;;  %v2379_v2 = vsel %vm1085_vm6, %v6784_v7, 0.0  ;;  %v1329_v38 = vunpack.c.l.b16 %v1240_v52  ;;  %v8918_v7 = vpop.f32.mrf.mxu1 }
 0x403   : > { %v2332_v36 = vsub.f32 %v8631_v42, %v2294_v53  ;;  %v1209_v42 = vsel %vm1085_vm6, %v6786_v27, 0.0 }
 0x404   : > { %v1174_v13 = vmul.f32 1.442695, %v1146_v61  ;;  %v8922_v0 = vpop.f32.mrf.mxu2 }
 0x405   : > { %v8903_v8 = vpop.eup %6791  ;;  %v2352_v37 = vmul.f32 1.442695, %v2332_v36 }
 0x406   : > { %v6794_v51 = vpop.eup %6793  ;;  %v2427_v25 = vpack.c.bf16 %v8903_v8, %v8903_v8  ;;  %2563 = vmatpush.bf16.msrb.mxu3 %v8359_v26  ;;  %1204 = vadd.xlane.f32.xlu0 %v1203_v44 }
 0x407   : > { %1210 = vadd.xlane.f32.xlu1 %v1209_v42  ;;  %2380 = vadd.xlane.f32.xlu2 %v2379_v2  ;;  %v1241_v47 = vpack.c.bf16 %v6794_v51, %v6794_v51  ;;  %6795 = vpow2.f32 %v2352_v37  ;;  %v2382_v37 = vsel %vm1085_vm6, %v8890_v34, 0.0 }
 0x408   : > { %v2451_v21 = vunpack.c.l.b16 %v2427_v25  ;;  %6797 = vpow2.f32 %v1174_v13  ;;  %v3541_v25 = vsel %vm1085_vm6, %v8892_v15, -inf }
 0x409   : > { %v2297_v39 = vpop.xlane.xlu2 %2296  ;;  %6390 = vmatmul.msk.bf16.gmra.mxu2 %vm950_vm5, %v8564_v9  ;;  %v1330_v30 = vunpack.c.l.b16 %v1241_v47 }
 0x40a   : > { %2564 = vmatpush.bf16.msrb.mxu3 %v8383_v28  ;;  %v2333_v26 = vsub.f32 %v8667_v18, %v2297_v39  ;;  %v1127_v27 = vpop.xlane.xlu1 %1126  ;;  %v2457_v4 = vpack.c.b16 %v2451_v21, %v2450_v45  ;;  %v2376_v28 = vsel %vm1085_vm6, %v8862_v10, 0.0  ;;  %v2307_v18 = vsel %vm1085_vm6, %v8875_v35, -inf  ;;  %v11153_v39 = vld [vmem:[#allocation13_spill] sm:$0xff] }
 0x40b   : > { %v1147_v32 = vsub.f32 %v8709_v12, %v1127_v27  ;;  %v1336_v41 = vpack.c.b16 %v1330_v30, %v1329_v38  ;;  %v3544_v12 = vsel %vm1085_vm6, %v8918_v7, -inf }
 0x40c   : > { %v2354_v29 = vmul.f32 1.442695, %v2333_v26  ;;  %6297 = vmatmul.msk.bf16.gmra.mxu0 %vm1085_vm6, %v2457_v4  ;;  %v8954_v2 = vpop.f32.mrf.mxu2  ;;  %v8959_v4 = vpop.f32.mrf.mxu1 }
 0x40d   : > { %v1176_v9 = vmul.f32 1.442695, %v1147_v32  ;;  %6205 = vmatmul.msk.bf16.gmra.mxu3 %vm1085_vm6, %v1336_v41  ;;  %v8931_v60 = vpop.eup %6795 }
 0x40e   : > { %6799 = vpow2.f32 %v2354_v29  ;;  %2377 = vadd.xlane.f32.xlu0 %v2376_v28  ;;  %v8933_v54 = vpop.eup %6797  ;;  %v2428_v10 = vpack.c.bf16 %v8931_v60, %v8931_v60  ;;  %v2313_v28 = vsel %vm1085_vm6, %v8922_v0, -inf }
 0x40f   : > { %6801 = vpow2.f32 %v1176_v9  ;;  %2308 = vmax.xlane.f32.xlu1 %v2307_v18  ;;  %3545 = vmax.xlane.f32.xlu2 %v3544_v12  ;;  %v1242_v36 = vpack.c.bf16 %v8933_v54, %v8933_v54  ;;  %v1212_v9 = vsel %vm1085_vm6, %v8894_v63, 0.0  ;;  %v1299_v12 = vpop.f32.mrf.mxu3 }
 0x410   : > { %v2452_v13 = vunpack.c.l.b16 %v2428_v10 }
 0x411   : > { %v1130_v62 = vpop.xlane.xlu0 %1129  ;;  %v1331_v45 = vunpack.c.l.b16 %v1242_v36 }
 0x412   : > { %v2300_v43 = vpop.xlane.xlu1 %2299  ;;  %v1148_v49 = vsub.f32 %v8729_v14, %v1130_v62 }
 0x413   : > { %v2334_v53 = vsub.f32 %v8687_v11, %v2300_v43  ;;  %v1215_v11 = vsel %vm1085_vm6, %v6794_v51, 0.0 }
 0x414   : > { %v8939_v61 = vpop.eup %6799  ;;  %v1178_v52 = vmul.f32 1.442695, %v1148_v49  ;;  %v8972_v43 = vpop.f32.mrf.mxu2 }
 0x415   : > { %v8943_v55 = vpop.eup %6801  ;;  %v2429_v44 = vpack.c.bf16 %v8939_v61, %v8939_v61  ;;  %v2356_v14 = vmul.f32 1.442695, %v2334_v53 }
 0x416   : > { %3542 = vmax.xlane.f32.xlu0 %v3541_v25  ;;  %v1243_v42 = vpack.c.bf16 %v8943_v55, %v8943_v55  ;;  %6803 = vpow2.f32 %v1178_v52 }
 0x417   : > { %2383 = vadd.xlane.f32.xlu1 %v2382_v37  ;;  %1216 = vadd.xlane.f32.xlu2 %v1215_v11  ;;  %v2453_v47 = vunpack.c.l.b16 %v2429_v44  ;;  %6805 = vpow2.f32 %v2356_v14 }
 0x418   : > { %v1332_v21 = vunpack.c.l.b16 %v1243_v42 }
 0x419   : > { %6391 = vmatmul.msk.bf16.gmra.mxu2 %vm950_vm5, %v11153_v39  ;;  %v2303_v38 = vpop.xlane.xlu0 %2302  ;;  %v2458_v30 = vpack.c.b16 %v2453_v47, %v2452_v13 }
 0x41a   : > { %v1184_v34 = vpop.xlane.xlu1 %1183  ;;  %v1133_v51 = vpop.xlane.xlu2 %1132  ;;  %v2335_v26 = vsub.f32 %v8711_v50, %v2303_v38  ;;  %v1337_v27 = vpack.c.b16 %v1332_v21, %v1331_v45  ;;  %v3547_v50 = vsel %vm1085_vm6, %v8959_v4, -inf  ;;  %v1218_v45 = vsel %vm1085_vm6, %v8933_v54, 0.0 }
 0x41b   : > { %6807 = vrcp.f32 %v1184_v34  ;;  %v1149_v32 = vsub.f32 %v8748_v59, %v1133_v51 }
 0x41c   : > { %v2358_v41 = vmul.f32 1.442695, %v2335_v26  ;;  %6298 = vmatmul.msk.bf16.gmra.mxu0 %vm1085_vm6, %v2458_v30  ;;  %v6804_v18 = vpop.eup %6803 }
 0x41d   : > { %v1180_v29 = vmul.f32 1.442695, %v1149_v32  ;;  %6206 = vmatmul.msk.bf16.gmra.mxu3 %vm1085_vm6, %v1337_v27  ;;  %v8970_v59 = vpop.eup %6805  ;;  %v1244_v37 = vpack.c.bf16 %v6804_v18, %v6804_v18 }
 0x41e   : > { %6809 = vpow2.f32 %v2358_v41  ;;  %1213 = vadd.xlane.f32.xlu0 %v1212_v9  ;;  %v2430_v44 = vpack.c.bf16 %v8970_v59, %v8970_v59  ;;  %v8996_v41 = vpop.f32.mrf.mxu2 }
 0x41f   : > { %6811 = vpow2.f32 %v1180_v29  ;;  %3548 = vmax.xlane.f32.xlu1 %v3547_v50  ;;  %2314 = vmax.xlane.f32.xlu2 %v2313_v28  ;;  %v1333_v30 = vunpack.c.l.b16 %v1244_v37  ;;  %v1301_v50 = vpop.f32.mrf.mxu3  ;;  %v1221_v37 = vsel %vm1085_vm6, %v8943_v55, 0.0 }
 0x420   : > { %v2454_v39 = vunpack.c.l.b16 %v2430_v44 }
 0x421   : > { %v6808_v62 = vpop.eup %6807  ;;  %v2911_v49 = vpop.xlane.xlu0 %2910 }
 0x422   : > { %v2914_v63 = vpop.xlane.xlu1 %2913  ;;  %v8974_v10 = vpop.xlane.xlu2 %1748  ;;  %v2957_v53 = vsub.f32 %v8740_v20, %v2911_v49  ;;  %v1408_v36 = vmul.f32 %v6808_v62, %v1299_v12  ;;  %v2310_v20 = vsel %vm1085_vm6, %v8897_v1, -inf  ;;  %v2385_v12 = vsel %vm1085_vm6, %v8903_v8, 0.0 }
 0x423   : > { %v2958_v52 = vsub.f32 %v8761_v58, %v2914_v63  ;;  %v2388_v58 = vsel %vm1085_vm6, %v8931_v60, 0.0  ;;  %v1224_v49 = vsel %vm1085_vm6, %v6804_v18, 0.0 }
 0x424   : > { %v8980_v25 = vpop.eup %6809  ;;  %v2973_v14 = vmul.f32 1.442695, %v2957_v53  ;;  %v1424_v11 = vpack.c.bf16 %v1408_v36, %v1408_v36 }
 0x425   : > { %v8982_v42 = vpop.eup %6811  ;;  %v2431_v13 = vpack.c.bf16 %v8980_v25, %v8980_v25  ;;  %v2975_v47 = vmul.f32 1.442695, %v2958_v52 }
 0x426   : > { %2311 = vmax.xlane.f32.xlu0 %v2310_v20  ;;  %v1245_v21 = vpack.c.bf16 %v8982_v42, %v8982_v42  ;;  %1441 = vst.msk [vmem:[#allocation3] sm:$0xf] %vm1440_vm9, %v1424_v11  ;;  %6813 = vpow2.f32 %v2973_v14  ;;  %v9020_v18 = vpop.f32.mrf.mxu2  ;;  %v2391_v20 = vsel %vm1085_vm6, %v8939_v61, 0.0 }
 0x427   : > { %1219 = vadd.xlane.f32.xlu1 %v1218_v45  ;;  %2389 = vadd.xlane.f32.xlu2 %v2388_v58  ;;  %v2455_v38 = vunpack.c.l.b16 %v2431_v13  ;;  %6815 = vpow2.f32 %v2975_v47  ;;  %v2322_v45 = vsel %vm1085_vm6, %v8996_v41, -inf  ;;  %v1304_v58 = vpop.f32.mrf.mxu3 }
 0x428   : > { %v1334_v34 = vunpack.c.l.b16 %v1245_v21 }
 0x429   : > { %v1677_v51 = vpop.xlane.xlu0 %1676  ;;  %v2459_v26 = vpack.c.b16 %v2455_v38, %v2454_v39 }
 0x42a   : > { %v2917_v27 = vpop.xlane.xlu2 %2916  ;;  %v1680_v54 = vpop.xlane.xlu1 %1679  ;;  %v1707_v32 = vsub.f32 %v8765_v17, %v1677_v51  ;;  %v1338_v60 = vpack.c.b16 %v1334_v34, %v1333_v30  ;;  %v2316_v17 = vsel %vm1085_vm6, %v8954_v2, -inf }
 0x42b   : > { %v1708_v29 = vsub.f32 %v8776_v31, %v1680_v54  ;;  %v2959_v51 = vsub.f32 %v8774_v22, %v2917_v27  ;;  %v1227_v22 = vsel %vm1085_vm6, %v8982_v42, 0.0  ;;  %v2397_v27 = vsel %vm1085_vm6, %v8980_v25, 0.0 }
 0x42c   : > { %v1731_v9 = vmul.f32 1.442695, %v1707_v32  ;;  %6299 = vmatmul.msk.bf16.gmra.mxu0 %vm1085_vm6, %v2459_v26  ;;  %v9003_v62 = vpop.eup %6813 }
 0x42d   : > { %v1733_v28 = vmul.f32 1.442695, %v1708_v29  ;;  %6207 = vmatmul.msk.bf16.gmra.mxu3 %vm1085_vm6, %v1338_v60  ;;  %v9008_v31 = vpop.eup %6815  ;;  %v3053_v8 = vpack.c.bf16 %v9003_v62, %v9003_v62  ;;  %v2319_v60 = vsel %vm1085_vm6, %v8972_v43, -inf  ;;  %v2977_v29 = vmul.f32 1.442695, %v2959_v51 }
 0x42e   : > { %6817 = vpow2.f32 %v1731_v9  ;;  %2386 = vadd.xlane.f32.xlu0 %v2385_v12  ;;  %v3054_v53 = vpack.c.bf16 %v9008_v31, %v9008_v31  ;;  %v11154_v9 = vld [vmem:[#allocation5_spill] sm:$0xff]  ;;  %v9044_v12 = vpop.f32.mrf.mxu2 }
 0x42f   : > { %2317 = vmax.xlane.f32.xlu1 %v2316_v17  ;;  %1225 = vadd.xlane.f32.xlu2 %v1224_v49  ;;  %6819 = vpow2.f32 %v1733_v28  ;;  %v3077_v47 = vunpack.c.l.b16 %v3053_v8 }
 0x430   : > { %v3078_v13 = vunpack.c.l.b16 %v3054_v53  ;;  %v1306_v53 = vpop.f32.mrf.mxu3 }
 0x431   : > { %v9010_v63 = vpop.xlane.xlu0 %1751 }
 0x432   : > { %v9016_v36 = vpop.xlane.xlu1 %1754  ;;  %v1190_v44 = vpop.xlane.xlu2 %1189  ;;  %v3085_v34 = vpack.c.b16 %v3078_v13, %v3077_v47 }
 0x433   : > { %6821 = vrcp.f32 %v1190_v44 }
 0x434   : > { %v9018_v52 = vpop.eup %6817 }
 0x435   : > { %v1803_v14 = vpack.c.bf16 %v9018_v52, %v9018_v52  ;;  %v9026_v11 = vpop.eup %6819 }
 0x436   : > { %1222 = vadd.xlane.f32.xlu0 %v1221_v37  ;;  %v1804_v21 = vpack.c.bf16 %v9026_v11, %v9026_v11  ;;  %v11155_v37 = vld [vmem:[#allocation6_spill] sm:$0xff] }
 0x437   : > { %v1892_v39 = vunpack.c.l.b16 %v1803_v14  ;;  %2392 = vadd.xlane.f32.xlu1 %v2391_v20  ;;  %2323 = vmax.xlane.f32.xlu2 %v2322_v45 }
 0x438   : > { %v1893_v38 = vunpack.c.l.b16 %v1804_v21  ;;  %v2394_v21 = vsel %vm1085_vm6, %v8970_v59, 0.0  ;;  %v9063_v59 = vpop.f32.mrf.mxu2 }
 0x439   : > { %v1187_v55 = vpop.xlane.xlu0 %1186  ;;  %v6822_v30 = vpop.eup %6821 }
 0x43a   : > { %v1193_v26 = vpop.xlane.xlu1 %1192  ;;  %v1683_v54 = vpop.xlane.xlu2 %1682  ;;  %6823 = vrcp.f32 %v1187_v55  ;;  %v1900_v61 = vpack.c.b16 %v1893_v38, %v1892_v39  ;;  %v1410_v32 = vmul.f32 %v6822_v30, %v1304_v58  ;;  %v11156_v39 = vld [vmem:[#allocation14_spill] sm:$0xff] }
 0x43b   : > { %6825 = vrcp.f32 %v1193_v26  ;;  %v1709_v14 = vsub.f32 %v8786_v46, %v1683_v54  ;;  %v2325_v46 = vsel %vm1085_vm6, %v9020_v18, -inf }
 0x43c   : > { %6344 = vmatmul.msk.bf16.vlgmr.msrb.gmra.mxu0 %vm1085_vm6, %v3085_v34  ;;  %v1426_v28 = vpack.c.bf16 %v1410_v32, %v1410_v32  ;;  %6827 = vpow2.f32 %v2977_v29  ;;  %v11157_v34 = vld [vmem:[#allocation11_spill] sm:$0xff] }
 0x43d   : > { %6252 = vmatmul.msk.bf16.vlgmr.msra.gmra.mxu3 %vm1085_vm6, %v1900_v61 }
 0x43e   : > { %3190 = vmatpush.bf16.msra.mxu3 %v11154_v9  ;;  %2320 = vmax.xlane.f32.xlu0 %v2319_v60  ;;  %1443 = vst.msk [vmem:[#allocation3 + $0x8] sm:$0xf] %vm1440_vm9, %v1426_v28  ;;  %v9073_v9 = vpop.f32.mrf.mxu3 }
 0x43f   : > { %1228 = vadd.xlane.f32.xlu1 %v1227_v22  ;;  %2398 = vadd.xlane.f32.xlu2 %v2397_v27  ;;  %v2936_v27 = vsel %vm1085_vm6, %v9063_v59, -inf }
 0x440   : > { %v6824_v17 = vpop.eup %6823 }
 0x441   : > { %v6826_v49 = vpop.eup %6825  ;;  %v2920_v8 = vpop.xlane.xlu0 %2919  ;;  %v1409_v44 = vmul.f32 %v6824_v17, %v1301_v50  ;;  %v1735_v50 = vmul.f32 1.442695, %v1709_v14 }
 0x442   : > { %3191 = vmatpush.bf16.msra.mxu3 %v11155_v37  ;;  %v2923_v42 = vpop.xlane.xlu1 %2922  ;;  %v9049_v13 = vpop.xlane.xlu2 %1757  ;;  %v2960_v25 = vsub.f32 %v8794_v19, %v2920_v8  ;;  %v1411_v47 = vmul.f32 %v6826_v49, %v1306_v53  ;;  %v2933_v19 = vsel %vm1085_vm6, %v9044_v12, -inf }
 0x443   : > { %v1425_v20 = vpack.c.bf16 %v1409_v44, %v1409_v44  ;;  %v9061_v38 = vpop.eup %6827  ;;  %v2961_v30 = vsub.f32 %v8804_v48, %v2923_v42 }
 0x444   : > { %v2979_v45 = vmul.f32 1.442695, %v2960_v25  ;;  %v1427_v58 = vpack.c.bf16 %v1411_v47, %v1411_v47  ;;  %v3055_v61 = vpack.c.bf16 %v9061_v38, %v9061_v38 }
 0x445   : > { %1442 = vst.msk [vmem:[#allocation3 + $0x4] sm:$0xf] %vm1440_vm9, %v1425_v20  ;;  %v2981_v28 = vmul.f32 1.442695, %v2961_v30  ;;  %v1774_v20 = vsel %vm1085_vm6, %v9026_v11, 0.0 }
 0x446   : > { %6829 = vpow2.f32 %v2979_v45  ;;  %3192 = vmatpush.bf16.msra.mxu3 %v11156_v39  ;;  %2395 = vadd.xlane.f32.xlu0 %v2394_v21  ;;  %1444 = vst.msk [vmem:[#allocation3 + $0xc] sm:$0xf] %vm1440_vm9, %v1427_v58  ;;  %v3079_v17 = vunpack.c.l.b16 %v3055_v61  ;;  %v1311_v45 = vpop.f32.mrf.mxu3 }
 0x447   : > { %2326 = vmax.xlane.f32.xlu1 %v2325_v46  ;;  %2934 = vmax.xlane.f32.xlu2 %v2933_v19  ;;  %6831 = vpow2.f32 %v1735_v50 }
 0x449   : > { %v1686_v55 = vpop.xlane.xlu0 %1685 }
 0x44a   : > { %3193 = vmatpush.bf16.msra.mxu3 %v11157_v34  ;;  %v1689_v51 = vpop.xlane.xlu1 %1688  ;;  %v2926_v26 = vpop.xlane.xlu2 %2925  ;;  %v1710_v54 = vsub.f32 %v8796_v33, %v1686_v55  ;;  %v3008_v33 = vsel %vm1085_vm6, %v9008_v31, 0.0 }
 0x44b   : > { %v2962_v32 = vsub.f32 %v8816_v16, %v2926_v26  ;;  %v3005_v16 = vsel %vm1085_vm6, %v9003_v62, 0.0  ;;  %v1711_v8 = vsub.f32 %v8808_v3, %v1689_v51  ;;  %v1864_v51 = vpop.f32.mrf.mxu0 }
 0x44c   : > { %v9071_v60 = vpop.eup %6829  ;;  %v1737_v29 = vmul.f32 1.442695, %v1710_v54 }
 0x44d   : > { %v3056_v22 = vpack.c.bf16 %v9071_v60, %v9071_v60  ;;  %v2983_v48 = vmul.f32 1.442695, %v2962_v32  ;;  %v9083_v53 = vpop.eup %6831  ;;  %v1739_v25 = vmul.f32 1.442695, %v1711_v8 }
 0x44e   : > { %6833 = vpow2.f32 %v1737_v29  ;;  %2937 = vmax.xlane.f32.xlu0 %v2936_v27  ;;  %v1805_v62 = vpack.c.bf16 %v9083_v53, %v9083_v53 }
 0x44f   : > { %3009 = vadd.xlane.f32.xlu2 %v3008_v33  ;;  %3006 = vadd.xlane.f32.xlu1 %v3005_v16  ;;  %v3080_v49 = vunpack.c.l.b16 %v3056_v22  ;;  %6835 = vpow2.f32 %v2983_v48 }
 0x450   : > { %6837 = vpow2.f32 %v2981_v28  ;;  %v1894_v58 = vunpack.c.l.b16 %v1805_v62 }
 0x451   : > { %v9086_v44 = vpop.xlane.xlu0 %1760  ;;  %v3086_v14 = vpack.c.b16 %v3080_v49, %v3079_v17  ;;  %6839 = vrcp.f32 %v8974_v10  ;;  %v1771_v10 = vsel %vm1085_vm6, %v9018_v52, 0.0  ;;  %v9108_v52 = vpop.f32.mrf.mxu2 }
 0x452   : > { %v9088_v37 = vpop.xlane.xlu1 %1763  ;;  %v1199_v42 = vpop.xlane.xlu2 %1198  ;;  %v2939_v48 = vsel %vm1085_vm6, %v9108_v52, -inf }
 0x453   : > { %6345 = vmatmul.msk.bf16.gmra.mxu0 %vm1085_vm6, %v3086_v14  ;;  %6841 = vrcp.f32 %v1199_v42  ;;  %v1314_v49 = vpop.f32.mrf.mxu3 }
 0x454   : > { %v9094_v31 = vpop.eup %6833  ;;  %6843 = vpow2.f32 %v1739_v25 }
 0x455   : > { %v1806_v3 = vpack.c.bf16 %v9094_v31, %v9094_v31  ;;  %v9098_v47 = vpop.eup %6835 }
 0x456   : > { %v9104_v50 = vpop.eup %6837  ;;  %v3058_v46 = vpack.c.bf16 %v9098_v47, %v9098_v47 }
 0x457   : > { %1775 = vadd.xlane.f32.xlu2 %v1774_v20  ;;  %1772 = vadd.xlane.f32.xlu1 %v1771_v10  ;;  %v1895_v21 = vunpack.c.l.b16 %v1806_v3  ;;  %v6840_v39 = vpop.eup %6839  ;;  %v3057_v26 = vpack.c.bf16 %v9104_v50, %v9104_v50 }
 0x458   : > { %v1973_v61 = vmul.f32 %v6840_v39, %v1864_v51  ;;  %v3082_v22 = vunpack.c.l.b16 %v3058_v46  ;;  %v3014_v46 = vsel %vm1085_vm6, %v9071_v60, 0.0 }
 0x459   : > { %v1196_v19 = vpop.xlane.xlu0 %1195  ;;  %v1901_v55 = vpack.c.b16 %v1895_v21, %v1894_v58  ;;  %v6842_v30 = vpop.eup %6841  ;;  %v3081_v33 = vunpack.c.l.b16 %v3057_v26 }
 0x45a   : > { %v1202_v34 = vpop.xlane.xlu1 %1201  ;;  %v1692_v11 = vpop.xlane.xlu2 %1691  ;;  %6845 = vrcp.f32 %v1196_v19  ;;  %v1413_v32 = vmul.f32 %v6842_v30, %v1311_v45  ;;  %v1989_v17 = vpack.c.bf16 %v1973_v61, %v1973_v61 }
 0x45b   : > { %6847 = vrcp.f32 %v1202_v34  ;;  %v1712_v54 = vsub.f32 %v8818_v6, %v1692_v11  ;;  %6253 = vmatmul.msk.bf16.gmra.mxu3 %vm1085_vm6, %v1901_v55  ;;  %v9116_v28 = vpop.eup %6843  ;;  %v3087_v14 = vpack.c.b16 %v3082_v22, %v3081_v33  ;;  %v1866_v19 = vpop.f32.mrf.mxu0 }
 0x45c   : > { %v1429_v27 = vpack.c.bf16 %v1413_v32, %v1413_v32  ;;  %v1807_v58 = vpack.c.bf16 %v9116_v28, %v9116_v28 }
 0x45d   : > { %v1741_v29 = vmul.f32 1.442695, %v1712_v54 }
 0x45e   : > { %1446 = vst.msk [vmem:[#allocation3 + $0x14] sm:$0xf] %vm1440_vm9, %v1429_v27  ;;  %v1896_v55 = vunpack.c.l.b16 %v1807_v58 }
 0x45f   : > { %6849 = vpow2.f32 %v1741_v29  ;;  %2940 = vmax.xlane.f32.xlu1 %v2939_v48 }
 0x460   : > { %v6846_v16 = vpop.eup %6845  ;;  %6851 = vrcp.f32 %v9010_v63 }
 0x461   : > { %v6848_v6 = vpop.eup %6847  ;;  %v2929_v8 = vpop.xlane.xlu0 %2928  ;;  %v1412_v42 = vmul.f32 %v6846_v16, %v9073_v9 }
 0x462   : > { %v2932_v62 = vpop.xlane.xlu1 %2931  ;;  %v9121_v25 = vpop.xlane.xlu2 %1766  ;;  %v2963_v3 = vsub.f32 %v8836_v24, %v2929_v8  ;;  %2021 = vrot.lane.b32.xlu0 %v1989_v17, %s7294_s14  ;;  %v1414_v20 = vmul.f32 %v6848_v6, %v1314_v49 }
 0x463   : > { %v2964_v63 = vsub.f32 %v8850_v57, %v2932_v62  ;;  %6346 = vmatmul.msk.bf16.gmra.mxu0 %vm1085_vm6, %v3087_v14  ;;  %v1428_v10 = vpack.c.bf16 %v1412_v42, %v1412_v42 }
 0x464   : > { %v2985_v45 = vmul.f32 1.442695, %v2963_v3  ;;  %v1430_v21 = vpack.c.bf16 %v1414_v20, %v1414_v20 }
 0x465   : > { %v9129_v9 = vpop.eup %6849  ;;  %v2987_v39 = vmul.f32 1.442695, %v2964_v63  ;;  %1445 = vst.msk [vmem:[#allocation3 + $0x10] sm:$0xf] %vm1440_vm9, %v1428_v10  ;;  %v1316_v63 = vpop.f32.mrf.mxu3 }
 0x466   : > { %v6852_v24 = vpop.eup %6851  ;;  %6853 = vpow2.f32 %v2985_v45  ;;  %v1808_v57 = vpack.c.bf16 %v9129_v9, %v9129_v9  ;;  %1447 = vst.msk [vmem:[#allocation3 + $0x18] sm:$0xf] %vm1440_vm9, %v1430_v21 }
 0x467   : > { %6855 = vpow2.f32 %v2987_v39  ;;  %3015 = vadd.xlane.f32.xlu1 %v3014_v46  ;;  %v1974_v11 = vmul.f32 %v6852_v24, %v1866_v19 }
 0x468   : > { %v1897_v30 = vunpack.c.l.b16 %v1808_v57 }
 0x469   : > { %v1695_v34 = vpop.xlane.xlu0 %1694  ;;  %v1990_v33 = vpack.c.bf16 %v1974_v11, %v1974_v11 }
 0x46a   : > { %v1698_v51 = vpop.xlane.xlu1 %1697  ;;  %v1208_v26 = vpop.xlane.xlu2 %1207  ;;  %v1713_v54 = vsub.f32 %v8828_v56, %v1695_v34  ;;  %v1902_v61 = vpack.c.b16 %v1897_v30, %v1896_v55  ;;  %v1780_v56 = vsel %vm1085_vm6, %v9094_v31, 0.0 }
 0x46b   : > { %v1714_v32 = vsub.f32 %v8840_v5, %v1698_v51  ;;  %v1869_v34 = vpop.f32.mrf.mxu0 }
 0x46c   : > { %v9139_v60 = vpop.eup %6853  ;;  %v1743_v29 = vmul.f32 1.442695, %v1713_v54  ;;  %6254 = vmatmul.msk.bf16.gmra.mxu3 %vm1085_vm6, %v1902_v61 }
 0x46d   : > { %v9142_v22 = vpop.eup %6855  ;;  %v3059_v48 = vpack.c.bf16 %v9139_v60, %v9139_v60  ;;  %v1745_v27 = vmul.f32 1.442695, %v1714_v32 }
 0x46e   : > { %v3060_v16 = vpack.c.bf16 %v9142_v22, %v9142_v22  ;;  %6857 = vpow2.f32 %v1743_v29 }
 0x46f   : > { %6859 = vpow2.f32 %v1745_v27  ;;  %2023 = vrot.lane.b32.xlu2 %v1990_v33, %s7294_s14  ;;  %1781 = vadd.xlane.f32.xlu1 %v1780_v56  ;;  %v3083_v5 = vunpack.c.l.b16 %v3059_v48 }
 0x470   : > { %v3084_v17 = vunpack.c.l.b16 %v3060_v16  ;;  %6861 = vrcp.f32 %v9016_v36 }
 0x471   : > { %v9151_v6 = vpop.xlane.xlu0 %1769  ;;  %6863 = vrcp.f32 %v1208_v26 }
 0x472   : > { %v9153_v49 = vpop.xlane.xlu1 %3539  ;;  %v2306_v8 = vpop.xlane.xlu2 %2305  ;;  %v3088_v14 = vpack.c.b16 %v3084_v17, %v3083_v5 }
 0x473   : > { %v2336_v24 = vsub.f32 %v8860_v40, %v2306_v8 }
 0x474   : > { %v9155_v42 = vpop.eup %6857  ;;  %6347 = vmatmul.msk.bf16.gmra.mxu0 %vm1085_vm6, %v3088_v14 }
 0x475   : > { %v9158_v62 = vpop.eup %6859  ;;  %v1809_v31 = vpack.c.bf16 %v9155_v42, %v9155_v42  ;;  %v2360_v19 = vmul.f32 1.442695, %v2336_v24 }
 0x476   : > { %v1810_v3 = vpack.c.bf16 %v9158_v62, %v9158_v62  ;;  %v6862_v46 = vpop.eup %6861 }
 0x477   : > { %v1898_v20 = vunpack.c.l.b16 %v1809_v31  ;;  %v6864_v57 = vpop.eup %6863  ;;  %v1975_v61 = vmul.f32 %v6862_v46, %v1869_v34  ;;  %v3011_v31 = vsel %vm1085_vm6, %v9061_v38, 0.0 }
 0x478   : > { %v1899_v10 = vunpack.c.l.b16 %v1810_v3 }
 0x479   : > { %v1205_v45 = vpop.xlane.xlu0 %1204  ;;  %v1991_v27 = vpack.c.bf16 %v1975_v61, %v1975_v61 }
 0x47a   : > { %v1211_v58 = vpop.xlane.xlu1 %1210  ;;  %v9165_v21 = vpop.xlane.xlu2 %2380  ;;  %6865 = vrcp.f32 %v1205_v45  ;;  %v1903_v39 = vpack.c.b16 %v1899_v10, %v1898_v20 }
 0x47b   : > { %6867 = vrcp.f32 %v1211_v58 }
 0x47c   : > { %6255 = vmatmul.msk.bf16.gmra.mxu3 %vm1085_vm6, %v1903_v39  ;;  %6869 = vpow2.f32 %v2360_v19 }
 0x480   : > { %v6866_v55 = vpop.eup %6865  ;;  %v1372_v30 = vpop.f32.mrf.mxu3 }
 0x481   : > { %v1416_v36 = vmul.f32 %v6864_v57, %v1372_v30  ;;  %v9169_v11 = vpop.xlane.xlu0 %2377  ;;  %v1415_v51 = vmul.f32 %v6866_v55, %v1316_v63  ;;  %v6868_v33 = vpop.eup %6867  ;;  %v1777_v55 = vsel %vm1085_vm6, %v9083_v53, 0.0 }
 0x482   : > { %v2309_v26 = vpop.xlane.xlu1 %2308  ;;  %v9171_v54 = vpop.xlane.xlu2 %3545 }
 0x483   : > { %v1432_v32 = vpack.c.bf16 %v1416_v36, %v1416_v36  ;;  %v2337_v40 = vsub.f32 %v8875_v35, %v2309_v26  ;;  %v1431_v29 = vpack.c.bf16 %v1415_v51, %v1415_v51  ;;  %v9177_v56 = vpop.eup %6869  ;;  %v9190_v63 = vpop.f32.mrf.mxu2 }
 0x484   : > { %v2432_v3 = vpack.c.bf16 %v9177_v56, %v9177_v56  ;;  %v2942_v36 = vsel %vm1085_vm6, %v9190_v63, -inf }
 0x485   : > { %1449 = vst.msk [vmem:[#allocation3 + $0x20] sm:$0xf] %vm1440_vm9, %v1432_v32  ;;  %v2362_v48 = vmul.f32 1.442695, %v2337_v40 }
 0x486   : > { %1448 = vst.msk [vmem:[#allocation3 + $0x1c] sm:$0xf] %vm1440_vm9, %v1431_v29  ;;  %v2521_v45 = vunpack.c.l.b16 %v2432_v3 }
 0x487   : > { %6871 = vpow2.f32 %v2362_v48 }
 0x488   : > { %v1374_v16 = vpop.f32.mrf.mxu3  ;;  %2025 = vrot.lane.b32.xlu1 %v1991_v27, %s7294_s14 }
 0x489   : > { %v1417_v5 = vmul.f32 %v6868_v33, %v1374_v16  ;;  %v9179_v17 = vpop.xlane.xlu0 %3542 }
 0x48a   : > { %v9181_v8 = vpop.xlane.xlu1 %2383  ;;  %v1217_v35 = vpop.xlane.xlu2 %1216 }
 0x48b   : > { %v1433_v14 = vpack.c.bf16 %v1417_v5, %v1417_v5  ;;  %6873 = vrcp.f32 %v1217_v35  ;;  %v9202_v26 = vpop.f32.mrf.mxu2  ;;  %v3017_v35 = vsel %vm1085_vm6, %v9104_v50, 0.0 }
 0x48c   : > { %3012 = vadd.xlane.f32.xlu0 %v3011_v31  ;;  %v2945_v33 = vsel %vm1085_vm6, %v9202_v26, -inf }
 0x48d   : > { %v9187_v20 = vpop.eup %6871  ;;  %1450 = vst.msk [vmem:[#allocation3 + $0x24] sm:$0xf] %vm1440_vm9, %v1433_v14 }
 0x48e   : > { %v2433_v10 = vpack.c.bf16 %v9187_v20, %v9187_v20 }
 0x490   : > { %v2522_v58 = vunpack.c.l.b16 %v2433_v10  ;;  %v1377_v39 = vpop.f32.mrf.mxu3 }
 0x491   : > { %v1214_v24 = vpop.xlane.xlu0 %1213  ;;  %v6874_v34 = vpop.eup %6873 }
 0x492   : > { %v2529_v46 = vpack.c.b16 %v2522_v58, %v2521_v45  ;;  %v9194_v38 = vpop.xlane.xlu1 %3548  ;;  %v2315_v57 = vpop.xlane.xlu2 %2314  ;;  %6875 = vrcp.f32 %v1214_v24 }
 0x493   : > { %v2339_v19 = vsub.f32 %v8922_v0, %v2315_v57 }
 0x494   : > { %6300 = vmatmul.msk.bf16.vlgmr.msrb.gmra.mxu3 %vm1085_vm6, %v2529_v46  ;;  %1778 = vadd.xlane.f32.xlu0 %v1777_v55 }
 0x495   : > { %v2366_v30 = vmul.f32 1.442695, %v2339_v19 }
 0x497   : > { %6877 = vpow2.f32 %v2366_v30 }
 0x498   : > { %v6876_v51 = vpop.eup %6875  ;;  %v1379_v61 = vpop.f32.mrf.mxu3  ;;  %2943 = vmax.xlane.f32.xlu2 %v2942_v36 }
 0x499   : > { %v1419_v32 = vmul.f32 %v6874_v34, %v1379_v61  ;;  %v2312_v40 = vpop.xlane.xlu0 %2311  ;;  %v1418_v29 = vmul.f32 %v6876_v51, %v1377_v39  ;;  %v1871_v34 = vpop.f32.mrf.mxu0 }
 0x49a   : > { %v1220_v0 = vpop.xlane.xlu1 %1219  ;;  %v9204_v48 = vpop.xlane.xlu2 %2389  ;;  %v2338_v53 = vsub.f32 %v8897_v1, %v2312_v40 }
 0x49b   : > { %v1435_v27 = vpack.c.bf16 %v1419_v32, %v1419_v32  ;;  %6879 = vrcp.f32 %v1220_v0  ;;  %v1434_v16 = vpack.c.bf16 %v1418_v29, %v1418_v29  ;;  %v9231_v0 = vpop.f32.mrf.mxu2 }
 0x49c   : > { %v2364_v5 = vmul.f32 1.442695, %v2338_v53  ;;  %2946 = vmax.xlane.f32.xlu0 %v2945_v33 }
 0x49d   : > { %1452 = vst.msk [vmem:[#allocation3 + $0x2c] sm:$0xf] %vm1440_vm9, %v1435_v27  ;;  %v9213_v14 = vpop.eup %6877 }
 0x49e   : > { %6881 = vpow2.f32 %v2364_v5  ;;  %1451 = vst.msk [vmem:[#allocation3 + $0x28] sm:$0xf] %vm1440_vm9, %v1434_v16  ;;  %v2435_v39 = vpack.c.bf16 %v9213_v14, %v9213_v14 }
 0x49f   : > { %6883 = vrcp.f32 %v9049_v13  ;;  %v1783_v13 = vsel %vm1085_vm6, %v9116_v28, 0.0 }
 0x4a0   : > { %v1382_v31 = vpop.f32.mrf.mxu3  ;;  %3018 = vadd.xlane.f32.xlu2 %v3017_v35  ;;  %v2524_v55 = vunpack.c.l.b16 %v2435_v39 }
 0x4a1   : > { %v6880_v1 = vpop.eup %6879  ;;  %v9216_v3 = vpop.xlane.xlu0 %2386 }
 0x4a2   : > { %v1420_v10 = vmul.f32 %v6880_v1, %v1382_v31  ;;  %v2318_v45 = vpop.xlane.xlu1 %2317  ;;  %v1226_v58 = vpop.xlane.xlu2 %1225 }
 0x4a3   : > { %6885 = vrcp.f32 %v1226_v58  ;;  %v2340_v61 = vsub.f32 %v8954_v2, %v2318_v45  ;;  %v2948_v2 = vsel %vm1085_vm6, %v9231_v0, -inf }
 0x4a4   : > { %v9220_v24 = vpop.eup %6881  ;;  %v1436_v46 = vpack.c.bf16 %v1420_v10, %v1420_v10 }
 0x4a5   : > { %v2434_v50 = vpack.c.bf16 %v9220_v24, %v9220_v24  ;;  %v6884_v57 = vpop.eup %6883  ;;  %v2368_v28 = vmul.f32 1.442695, %v2340_v61 }
 0x4a6   : > { %1453 = vst.msk [vmem:[#allocation3 + $0x30] sm:$0xf] %vm1440_vm9, %v1436_v46  ;;  %v1976_v29 = vmul.f32 %v6884_v57, %v1871_v34 }
 0x4a7   : > { %v2523_v19 = vunpack.c.l.b16 %v2434_v50 }
 0x4a8   : > { %v1384_v30 = vpop.f32.mrf.mxu3  ;;  %1784 = vadd.xlane.f32.xlu2 %v1783_v13  ;;  %v1992_v53 = vpack.c.bf16 %v1976_v29, %v1976_v29  ;;  %v1874_v13 = vpop.f32.mrf.mxu0 }
 0x4a9   : > { %v1223_v36 = vpop.xlane.xlu0 %1222  ;;  %v2530_v51 = vpack.c.b16 %v2524_v55, %v2523_v19  ;;  %v6886_v27 = vpop.eup %6885  ;;  %v3023_v55 = vsel %vm1085_vm6, %v9139_v60, 0.0 }
 0x4aa   : > { %v9228_v32 = vpop.xlane.xlu1 %2392  ;;  %v2324_v40 = vpop.xlane.xlu2 %2323  ;;  %6887 = vrcp.f32 %v1223_v36 }
 0x4ab   : > { %6301 = vmatmul.msk.bf16.gmra.mxu3 %vm1085_vm6, %v2530_v51  ;;  %6889 = vrcp.f32 %v9086_v44 }
 0x4ac   : > { %6891 = vpow2.f32 %v2368_v28 }
 0x4b0   : > { %v6888_v33 = vpop.eup %6887  ;;  %v1387_v16 = vpop.f32.mrf.mxu3  ;;  %2027 = vrot.lane.b32.xlu0 %v1992_v53, %s7294_s14 }
 0x4b1   : > { %v1422_v5 = vmul.f32 %v6886_v27, %v1387_v16  ;;  %v2321_v35 = vpop.xlane.xlu0 %2320  ;;  %v1421_v31 = vmul.f32 %v6888_v33, %v1384_v30  ;;  %v6890_v44 = vpop.eup %6889 }
 0x4b2   : > { %v1229_v1 = vpop.xlane.xlu1 %1228  ;;  %v9237_v10 = vpop.xlane.xlu2 %2398  ;;  %2949 = vmax.xlane.f32.xlu1 %v2948_v2  ;;  %v2341_v45 = vsub.f32 %v8972_v43, %v2321_v35  ;;  %v2342_v43 = vsub.f32 %v8996_v41, %v2324_v40  ;;  %v1977_v51 = vmul.f32 %v6890_v44, %v1874_v13 }
 0x4b3   : > { %v1438_v58 = vpack.c.bf16 %v1422_v5, %v1422_v5  ;;  %6893 = vrcp.f32 %v1229_v1  ;;  %v1437_v39 = vpack.c.bf16 %v1421_v31, %v1421_v31  ;;  %v9242_v50 = vpop.eup %6891 }
 0x4b4   : > { %v2370_v46 = vmul.f32 1.442695, %v2341_v45  ;;  %v2436_v61 = vpack.c.bf16 %v9242_v50, %v9242_v50  ;;  %v2372_v41 = vmul.f32 1.442695, %v2342_v43  ;;  %v1993_v40 = vpack.c.bf16 %v1977_v51, %v1977_v51 }
 0x4b5   : > { %1455 = vst.msk [vmem:[#allocation3 + $0x38] sm:$0xf] %vm1440_vm9, %v1438_v58 }
 0x4b6   : > { %6895 = vpow2.f32 %v2370_v46  ;;  %1454 = vst.msk [vmem:[#allocation3 + $0x34] sm:$0xf] %vm1440_vm9, %v1437_v39  ;;  %v2525_v16 = vunpack.c.l.b16 %v2436_v61 }
 0x4b8   : > { %v1389_v19 = vpop.f32.mrf.mxu3 }
 0x4b9   : > { %v6894_v57 = vpop.eup %6893  ;;  %v9250_v28 = vpop.xlane.xlu0 %2395 }
 0x4ba   : > { %v1423_v30 = vmul.f32 %v6894_v57, %v1389_v19  ;;  %v2327_v34 = vpop.xlane.xlu1 %2326  ;;  %v2935_v36 = vpop.xlane.xlu2 %2934  ;;  %3024 = vadd.xlane.f32.xlu1 %v3023_v55 }
 0x4bb   : > { %v2343_v29 = vsub.f32 %v9020_v18, %v2327_v34  ;;  %v1789_v18 = vsel %vm1085_vm6, %v9155_v42, 0.0  ;;  %v2965_v46 = vsub.f32 %v9044_v12, %v2935_v36  ;;  %v1876_v12 = vpop.f32.mrf.mxu0 }
 0x4bc   : > { %v9252_v53 = vpop.eup %6895  ;;  %v1439_v27 = vpack.c.bf16 %v1423_v30, %v1423_v30 }
 0x4bd   : > { %v2437_v60 = vpack.c.bf16 %v9252_v53, %v9252_v53  ;;  %v2374_v33 = vmul.f32 1.442695, %v2343_v29  ;;  %v2989_v55 = vmul.f32 1.442695, %v2965_v46 }
 0x4be   : > { %1456 = vst.msk [vmem:[#allocation3 + $0x3c] sm:$0xf] %vm1440_vm9, %v1439_v27  ;;  %vm11201_vm9 = vmmov %vm11144_vm3 }
 0x4bf   : > { %v2526_v5 = vunpack.c.l.b16 %v2437_v60  ;;  %6897 = vpow2.f32 %v2374_v33  ;;  %v3020_v60 = vsel %vm1085_vm6, %v9098_v47, 0.0 }
 0x4c0   : > { %2029 = vrot.lane.b32.xlu2 %v1993_v40, %s7294_s14  ;;  %6899 = vpow2.f32 %v2372_v41  ;;  %v9294_v40 = vpop.f32.mrf.mxu2 }
 0x4c1   : > { %v2531_v2 = vpack.c.b16 %v2526_v5, %v2525_v16  ;;  %v2938_v31 = vpop.xlane.xlu0 %2937  ;;  %6901 = vrcp.f32 %v9088_v37 }
 0x4c2   : > { %v9260_v35 = vpop.xlane.xlu2 %3009  ;;  %1790 = vadd.xlane.f32.xlu1 %v1789_v18  ;;  %v2966_v58 = vsub.f32 %v9063_v59, %v2938_v31  ;;  %v9271_v42 = vpop.xlane.xlu1 %3006  ;;  %v1786_v31 = vsel %vm1085_vm6, %v9129_v9, 0.0  ;;  %v3026_v9 = vsel %vm1085_vm6, %v9142_v22, 0.0  ;;  %v2400_v22 = vsel %vm1085_vm6, %v9177_v56, 0.0 }
 0x4c3   : > { %6302 = vmatmul.msk.bf16.gmra.mxu3 %vm1085_vm6, %v2531_v2 }
 0x4c4   : > { %v2991_v13 = vmul.f32 1.442695, %v2966_v58 }
 0x4c5   : > { %v9263_v1 = vpop.eup %6897 }
 0x4c6   : > { %v9265_v45 = vpop.eup %6899  ;;  %v2439_v39 = vpack.c.bf16 %v9263_v1, %v9263_v1  ;;  %6903 = vpow2.f32 %v2991_v13 }
 0x4c7   : > { %v2438_v57 = vpack.c.bf16 %v9265_v45, %v9265_v45  ;;  %v6902_v30 = vpop.eup %6901  ;;  %6905 = vpow2.f32 %v2989_v55  ;;  %v1792_v55 = vsel %vm1085_vm6, %v9158_v62, 0.0 }
 0x4c8   : > { %v2528_v19 = vunpack.c.l.b16 %v2439_v39  ;;  %v1978_v37 = vmul.f32 %v6902_v30, %v1876_v12  ;;  %v9299_v47 = vpop.f32.mrf.mxu2  ;;  %v2951_v39 = vsel %vm1085_vm6, %v9294_v40, -inf  ;;  %6907 = vrcp.f32 %v9121_v25 }
 0x4c9   : > { %v2527_v43 = vunpack.c.l.b16 %v2438_v57  ;;  %v2954_v46 = vsel %vm1085_vm6, %v9299_v47, -inf  ;;  %6909 = vrcp.f32 %v9151_v6 }
 0x4ca   : > { %v9273_v44 = vpop.xlane.xlu2 %1775  ;;  %v9280_v36 = vpop.xlane.xlu1 %1772  ;;  %v1994_v33 = vpack.c.bf16 %v1978_v37, %v1978_v37 }
 0x4cb   : > { %v2532_v59 = vpack.c.b16 %v2528_v19, %v2527_v43  ;;  %v1879_v19 = vpop.f32.mrf.mxu0 }
 0x4cc   : > { %v9283_v61 = vpop.eup %6903 }
 0x4cd   : > { %v9285_v29 = vpop.eup %6905  ;;  %v3062_v27 = vpack.c.bf16 %v9283_v61, %v9283_v61 }
 0x4ce   : > { %v3061_v41 = vpack.c.bf16 %v9285_v29, %v9285_v29  ;;  %v6908_v13 = vpop.eup %6907 }
 0x4cf   : > { %v3151_v16 = vunpack.c.l.b16 %v3062_v27  ;;  %v1979_v43 = vmul.f32 %v6908_v13, %v1879_v19  ;;  %v6910_v12 = vpop.eup %6909 }
 0x4d0   : > { %v3150_v18 = vunpack.c.l.b16 %v3061_v41 }
 0x4d1   : > { %v1995_v30 = vpack.c.bf16 %v1979_v43, %v1979_v43  ;;  %v9342_v43 = vpop.f32.mrf.mxu1 }
 0x4d2   : > { %v2024_v34 = vpop.permute.xlu2 %2023  ;;  %v2941_v5 = vpop.xlane.xlu1 %2940  ;;  %v3158_v2 = vpack.c.b16 %v3151_v16, %v3150_v18 }
 0x4d3   : > { %2071 = vst.msk [vmem:[#allocation3 + $0x4] sm:$0xf] %vm2069_vm4, %v2024_v34  ;;  %6303 = vmatmul.msk.bf16.gmra.mxu3 %vm1085_vm6, %v2532_v59  ;;  %v2967_v25 = vsub.f32 %v9108_v52, %v2941_v5 }
 0x4d4   : > { %v2022_v51 = vpop.permute.xlu0 %2021 }
 0x4d5   : > { %2070 = vst.msk [vmem:[#allocation3] sm:$0xf] %vm2069_vm4, %v2022_v51  ;;  %v2993_v62 = vmul.f32 1.442695, %v2967_v25  ;;  %v1881_v51 = vpop.f32.mrf.mxu0 }
 0x4d6   : > { %v1980_v27 = vmul.f32 %v6910_v12, %v1881_v51 }
 0x4d7   : > { %6911 = vpow2.f32 %v2993_v62  ;;  %v2403_v62 = vsel %vm1085_vm6, %v9187_v20, 0.0 }
 0x4d8   : > { %6913 = vrcp.f32 %v9169_v11  ;;  %v1996_v6 = vpack.c.bf16 %v1980_v27, %v1980_v27 }
 0x4da   : > { %3021 = vadd.xlane.f32.xlu0 %v3020_v60  ;;  %v9301_v58 = vpop.xlane.xlu1 %3015 }
 0x4db   : > { %2031 = vrot.lane.b32.xlu1 %v1994_v33, %s7294_s14 }
 0x4dd   : > { %v9327_v52 = vpop.eup %6911 }
 0x4de   : > { %v6914_v16 = vpop.eup %6913  ;;  %v3063_v5 = vpack.c.bf16 %v9327_v52, %v9327_v52 }
 0x4e2   : > { %1787 = vadd.xlane.f32.xlu0 %v1786_v31  ;;  %v9310_v57 = vpop.xlane.xlu1 %1781  ;;  %v3152_v31 = vunpack.c.l.b16 %v3063_v5 }
 0x4e3   : > { %6348 = vmatmul.msk.bf16.vlgmr.msra.gmra.mxu3 %vm1085_vm6, %v3158_v2 }
 0x4e9   : > { %2952 = vmax.xlane.f32.xlu2 %v2951_v39 }
 0x4ea   : > { %2955 = vmax.xlane.f32.xlu0 %v2954_v46 }
 0x4f1   : > { %3027 = vadd.xlane.f32.xlu2 %v3026_v9 }
 0x4f9   : > { %1793 = vadd.xlane.f32.xlu2 %v1792_v55 }
 0x4fa   : > { %v2026_v59 = vpop.permute.xlu1 %2025 }
 0x4fb   : > { %2072 = vst.msk [vmem:[#allocation3 + $0x8] sm:$0xf] %vm2069_vm4, %v2026_v59 }
 0x4fe   : > { %2033 = vrot.lane.b32.xlu0 %v1995_v30, %s7294_s14 }
 0x4ff   : > { %v9320_v34 = vpop.xlane.xlu0 %3012 }
 0x505   : > { %2401 = vadd.xlane.f32.xlu1 %v2400_v22 }
 0x507   : > { %v9324_v41 = vpop.xlane.xlu0 %1778 }
 0x50b   : > { %v2944_v37 = vpop.xlane.xlu2 %2943 }
 0x50c   : > { %v2968_v60 = vsub.f32 %v9190_v63, %v2944_v37  ;;  %v2493_v63 = vpop.f32.mrf.mxu0  ;;  %v9351_v37 = vpop.f32.mrf.mxu1 }
 0x50d   : > { %v2602_v2 = vmul.f32 %v6914_v16, %v2493_v63  ;;  %v2406_v63 = vsel %vm1085_vm6, %v9220_v24, 0.0 }
 0x50e   : > { %v2995_v33 = vmul.f32 1.442695, %v2968_v60  ;;  %v3553_v60 = vsel %vm1085_vm6, %v9351_v37, -inf }
 0x50f   : > { %v2947_v46 = vpop.xlane.xlu0 %2946  ;;  %v2618_v19 = vpack.c.bf16 %v2602_v2, %v2602_v2 }
 0x510   : > { %6915 = vpow2.f32 %v2995_v33  ;;  %v2969_v55 = vsub.f32 %v9202_v26, %v2947_v46 }
 0x511   : > { %2035 = vrot.lane.b32.xlu2 %v1996_v6, %s7294_s14 }
 0x512   : > { %v2997_v59 = vmul.f32 1.442695, %v2969_v55 }
 0x513   : > { %v9329_v56 = vpop.xlane.xlu2 %3018 }
 0x514   : > { %6917 = vpow2.f32 %v2997_v59  ;;  %v2495_v20 = vpop.f32.mrf.mxu0 }
 0x516   : > { %v9333_v18 = vpop.eup %6915 }
 0x517   : > { %v3064_v11 = vpack.c.bf16 %v9333_v18, %v9333_v18 }
 0x519   : > { %v3153_v39 = vunpack.c.l.b16 %v3064_v11 }
 0x51a   : > { %v9349_v51 = vpop.eup %6917 }
 0x51b   : > { %v9337_v9 = vpop.xlane.xlu2 %1784  ;;  %v3159_v13 = vpack.c.b16 %v3153_v39, %v3152_v31  ;;  %v3065_v27 = vpack.c.bf16 %v9349_v51, %v9349_v51 }
 0x51c   : > { %v2498_v31 = vpop.f32.mrf.mxu0 }
 0x51d   : > { %6349 = vmatmul.msk.bf16.gmra.mxu3 %vm1085_vm6, %v3159_v13  ;;  %v3154_v6 = vunpack.c.l.b16 %v3065_v27  ;;  %v9368_v13 = vpop.f32.mrf.mxu1 }
 0x51e   : > { %2650 = vrot.lane.b32.xlu1 %v2618_v19, %s7295_s15  ;;  %v3556_v19 = vsel %vm1085_vm6, %v9368_v13, -inf }
 0x522   : > { %v2028_v30 = vpop.permute.xlu0 %2027 }
 0x523   : > { %v2030_v25 = vpop.permute.xlu2 %2029  ;;  %2073 = vst.msk [vmem:[#allocation3 + $0xc] sm:$0xf] %vm2069_vm4, %v2028_v30 }
 0x524   : > { %2074 = vst.msk [vmem:[#allocation3 + $0x10] sm:$0xf] %vm2069_vm4, %v2030_v25 }
 0x525   : > { %v2950_v22 = vpop.xlane.xlu1 %2949 }
 0x526   : > { %v2970_v12 = vsub.f32 %v9231_v0, %v2950_v22 }
 0x528   : > { %v2999_v26 = vmul.f32 1.442695, %v2970_v12  ;;  %2404 = vadd.xlane.f32.xlu0 %v2403_v62  ;;  %v9384_v12 = vpop.f32.mrf.mxu2 }
 0x52a   : > { %6919 = vpow2.f32 %v2999_v26 }
 0x52b   : > { %6921 = vrcp.f32 %v9181_v8 }
 0x52c   : > { %6923 = vrcp.f32 %v9165_v21  ;;  %v2409_v21 = vsel %vm1085_vm6, %v9213_v14, 0.0  ;;  %v2500_v14 = vpop.f32.mrf.mxu0 }
 0x52d   : > { %v9365_v2 = vpop.xlane.xlu1 %3024  ;;  %6925 = vrcp.f32 %v9216_v3 }
 0x530   : > { %v9357_v33 = vpop.eup %6919  ;;  %3554 = vmax.xlane.f32.xlu0 %v3553_v60 }
 0x531   : > { %v3066_v0 = vpack.c.bf16 %v9357_v33, %v9357_v33  ;;  %v6922_v11 = vpop.eup %6921 }
 0x532   : > { %v2604_v39 = vmul.f32 %v6922_v11, %v2498_v31  ;;  %v6924_v24 = vpop.eup %6923 }
 0x533   : > { %v3155_v16 = vunpack.c.l.b16 %v3066_v0  ;;  %v2603_v55 = vmul.f32 %v6924_v24, %v2495_v20  ;;  %v6926_v20 = vpop.eup %6925  ;;  %v2412_v24 = vsel %vm1085_vm6, %v9242_v50, 0.0  ;;  %v3550_v50 = vsel %vm1085_vm6, %v9342_v43, -inf }
 0x534   : > { %v2620_v46 = vpack.c.bf16 %v2604_v39, %v2604_v39 }
 0x535   : > { %v3160_v5 = vpack.c.b16 %v3155_v16, %v3154_v6  ;;  %v9371_v8 = vpop.xlane.xlu1 %1790  ;;  %v2619_v25 = vpack.c.bf16 %v2603_v55, %v2603_v55  ;;  %v2605_v16 = vmul.f32 %v6926_v20, %v2500_v14 }
 0x537   : > { %6350 = vmatmul.msk.bf16.gmra.mxu3 %vm1085_vm6, %v3160_v5  ;;  %v2621_v11 = vpack.c.bf16 %v2605_v16, %v2605_v16 }
 0x53a   : > { %2407 = vadd.xlane.f32.xlu2 %v2406_v63  ;;  %v9390_v63 = vpop.f32.mrf.mxu2 }
 0x544   : > { %2654 = vrot.lane.b32.xlu0 %v2620_v46, %s7295_s15 }
 0x548   : > { %3557 = vmax.xlane.f32.xlu1 %v3556_v19 }
 0x54d   : > { %v2032_v59 = vpop.permute.xlu1 %2031  ;;  %v9375_v30 = vpop.xlane.xlu0 %3021 }
 0x54e   : > { %2075 = vst.msk [vmem:[#allocation3 + $0x14] sm:$0xf] %vm2069_vm4, %v2032_v59  ;;  %v9406_v59 = vpop.f32.mrf.mxu2 }
 0x550   : > { %2410 = vadd.xlane.f32.xlu1 %v2409_v21 }
 0x552   : > { %2652 = vrot.lane.b32.xlu2 %v2619_v25, %s7295_s15 }
 0x555   : > { %v9381_v22 = vpop.xlane.xlu0 %1787 }
 0x55c   : > { %v2953_v62 = vpop.xlane.xlu2 %2952 }
 0x55d   : > { %v2971_v26 = vsub.f32 %v9294_v40, %v2953_v62  ;;  %v2956_v27 = vpop.xlane.xlu0 %2955  ;;  %v3562_v62 = vsel %vm1085_vm6, %v9384_v12, -inf }
 0x55e   : > { %v2972_v60 = vsub.f32 %v9299_v47, %v2956_v27 }
 0x55f   : > { %v3001_v0 = vmul.f32 1.442695, %v2971_v26  ;;  %v9412_v26 = vpop.f32.mrf.mxu2 }
 0x560   : > { %v3003_v6 = vmul.f32 1.442695, %v2972_v60  ;;  %v3571_v27 = vsel %vm1085_vm6, %v9412_v26, -inf  ;;  %v2503_v60 = vpop.f32.mrf.mxu0 }
 0x561   : > { %6927 = vpow2.f32 %v3001_v0  ;;  %v2415_v0 = vsel %vm1085_vm6, %v9252_v53, 0.0  ;;  %v3565_v53 = vsel %vm1085_vm6, %v9390_v63, -inf }
 0x562   : > { %6929 = vpow2.f32 %v3003_v6 }
 0x563   : > { %6931 = vrcp.f32 %v9228_v32 }
 0x564   : > { %v9388_v5 = vpop.xlane.xlu2 %3027  ;;  %6933 = vrcp.f32 %v9204_v48 }
 0x565   : > { %6935 = vrcp.f32 %v9250_v28  ;;  %v9447_v28 = vpop.f32.mrf.mxu1 }
 0x566   : > { %6937 = vrcp.f32 %v9271_v42 }
 0x567   : > { %v9392_v3 = vpop.eup %6927  ;;  %6939 = vrcp.f32 %v9237_v10 }
 0x568   : > { %v9394_v31 = vpop.eup %6929  ;;  %v3067_v40 = vpack.c.bf16 %v9392_v3, %v9392_v3  ;;  %v2505_v14 = vpop.f32.mrf.mxu0  ;;  %6941 = vrcp.f32 %v9280_v36 }
 0x569   : > { %v3068_v47 = vpack.c.bf16 %v9394_v31, %v9394_v31  ;;  %2656 = vrot.lane.b32.xlu1 %v2621_v11, %s7295_s15  ;;  %v6932_v6 = vpop.eup %6931  ;;  %6943 = vrcp.f32 %v9320_v34 }
 0x56a   : > { %v3156_v39 = vunpack.c.l.b16 %v3067_v40  ;;  %v2607_v16 = vmul.f32 %v6932_v6, %v2505_v14  ;;  %v3559_v14 = vsel %vm1085_vm6, %v9447_v28, -inf  ;;  %6945 = vrcp.f32 %v9273_v44 }
 0x56b   : > { %v3157_v46 = vunpack.c.l.b16 %v3068_v47  ;;  %v6934_v47 = vpop.eup %6933  ;;  %6947 = vrcp.f32 %v9301_v58 }
 0x56c   : > { %v9401_v19 = vpop.xlane.xlu2 %1793  ;;  %v2623_v40 = vpack.c.bf16 %v2607_v16, %v2607_v16  ;;  %v2606_v32 = vmul.f32 %v6934_v47, %v2503_v60  ;;  %v3029_v16 = vsel %vm1085_vm6, %v9285_v29, 0.0  ;;  %6949 = vrcp.f32 %v9260_v35 }
 0x56d   : > { %v3161_v55 = vpack.c.b16 %v3157_v46, %v3156_v39  ;;  %v9428_v39 = vpop.f32.mrf.mxu2  ;;  %6951 = vrcp.f32 %v9324_v41  ;;  %v3041_v41 = vsel %vm1085_vm6, %v9349_v51, 0.0 }
 0x56e   : > { %2413 = vadd.xlane.f32.xlu0 %v2412_v24  ;;  %v2622_v46 = vpack.c.bf16 %v2606_v32, %v2606_v32  ;;  %v3574_v48 = vsel %vm1085_vm6, %v9428_v39, -inf  ;;  %v2418_v24 = vsel %vm1085_vm6, %v9265_v45, 0.0  ;;  %v2421_v45 = vsel %vm1085_vm6, %v9263_v1, 0.0 }
 0x56f   : > { %6351 = vmatmul.msk.bf16.gmra.mxu3 %vm1085_vm6, %v3161_v55  ;;  %v3568_v1 = vsel %vm1085_vm6, %v9406_v59, -inf  ;;  %6953 = vrcp.f32 %v9310_v57 }
 0x570   : > { %v2034_v21 = vpop.permute.xlu0 %2033  ;;  %6955 = vrcp.f32 %v9375_v30 }
 0x571   : > { %2076 = vst.msk [vmem:[#allocation3 + $0x18] sm:$0xf] %vm2069_vm4, %v2034_v21  ;;  %6957 = vrcp.f32 %v9337_v9 }
 0x572   : > { %6959 = vrcp.f32 %v9365_v2 }
 0x573   : > { %6961 = vrcp.f32 %v9329_v56 }
 0x574   : > { %v2036_v25 = vpop.permute.xlu2 %2035  ;;  %6963 = vrcp.f32 %v9381_v22 }
 0x575   : > { %2077 = vst.msk [vmem:[#allocation3 + $0x1c] sm:$0xf] %vm2069_vm4, %v2036_v25  ;;  %6965 = vrcp.f32 %v9388_v5  ;;  %v3050_v5 = vsel %vm1085_vm6, %v9394_v31, 0.0  ;;  %v9559_v31 = vpop.f32.mrf.mxu2 }
 0x576   : > { %3563 = vmax.xlane.f32.xlu0 %v3562_v62  ;;  %v6936_v62 = vpop.eup %6935 }
 0x577   : > { %v6938_v47 = vpop.eup %6937 }
 0x578   : > { %v9421_v20 = vpop.xlane.xlu1 %2401  ;;  %v6940_v29 = vpop.eup %6939 }
 0x57b   : > { %3551 = vmax.xlane.f32.xlu2 %v3550_v50  ;;  %v2508_v50 = vpop.f32.mrf.mxu0 }
 0x57e   : > { %3572 = vmax.xlane.f32.xlu0 %v3571_v27 }
 0x583   : > { %2416 = vadd.xlane.f32.xlu2 %v2415_v0  ;;  %v2608_v0 = vmul.f32 %v6936_v62, %v2508_v50  ;;  %v3032_v50 = vsel %vm1085_vm6, %v9283_v61, 0.0 }
 0x585   : > { %v2624_v6 = vpack.c.bf16 %v2608_v0, %v2608_v0  ;;  %v6942_v0 = vpop.eup %6941 }
 0x590   : > { %v2651_v11 = vpop.permute.xlu1 %2650 }
 0x591   : > { %2699 = vst.msk [vmem:[#allocation3] sm:$0xf] %vm2698_vm0, %v2651_v11  ;;  %v2510_v11 = vpop.f32.mrf.mxu0 }
 0x592   : > { %2660 = vrot.lane.b32.xlu0 %v2623_v40, %s7295_s15  ;;  %v2609_v42 = vmul.f32 %v6940_v29, %v2510_v11  ;;  %v3035_v29 = vsel %vm1085_vm6, %v9327_v52, 0.0 }
 0x593   : > { %3566 = vmax.xlane.f32.xlu1 %v3565_v53 }
 0x594   : > { %v2625_v62 = vpack.c.bf16 %v2609_v42, %v2609_v42 }
 0x599   : > { %v3122_v53 = vpop.f32.mrf.mxu0 }
 0x59a   : > { %v3231_v32 = vmul.f32 %v6938_v47, %v3122_v53  ;;  %v3038_v53 = vsel %vm1085_vm6, %v9333_v18, 0.0 }
 0x59b   : > { %3575 = vmax.xlane.f32.xlu1 %v3574_v48  ;;  %2658 = vrot.lane.b32.xlu2 %v2622_v46, %s7295_s15  ;;  %v9435_v55 = vpop.xlane.xlu0 %2404 }
 0x59c   : > { %v3247_v48 = vpack.c.bf16 %v3231_v32, %v3231_v32 }
 0x5a3   : > { %2419 = vadd.xlane.f32.xlu1 %v2418_v24  ;;  %v9440_v25 = vpop.xlane.xlu0 %3554 }
 0x5ad   : > { %v9438_v21 = vpop.xlane.xlu2 %2407 }
 0x5ae   : > { %6967 = vrcp.f32 %v9438_v21 }
 0x5af   : > { %6969 = vrcp.f32 %v9371_v8 }
 0x5b0   : > { %6971 = vrcp.f32 %v9401_v19 }
 0x5b1   : > { %6973 = vrcp.f32 %v9435_v55 }
 0x5b5   : > { %v2653_v27 = vpop.permute.xlu2 %2652 }
 0x5b6   : > { %2700 = vst.msk [vmem:[#allocation3 + $0x4] sm:$0xf] %vm2698_vm0, %v2653_v27  ;;  %v2655_v60 = vpop.permute.xlu0 %2654 }
 0x5b7   : > { %2701 = vst.msk [vmem:[#allocation3 + $0x8] sm:$0xf] %vm2698_vm0, %v2655_v60 }
 0x5bb   : > { %v9454_v40 = vpop.xlane.xlu1 %3557 }
 0x5bc   : > { %2662 = vrot.lane.b32.xlu1 %v2624_v6, %s7295_s15  ;;  %2422 = vadd.xlane.f32.xlu0 %v2421_v45  ;;  %v1937_v45 = vpop.f32.mrf.mxu3 }
 0x5c3   : > { %v9458_v46 = vpop.xlane.xlu1 %2410 }
 0x5c4   : > { %3560 = vmax.xlane.f32.xlu2 %v3559_v14  ;;  %3030 = vadd.xlane.f32.xlu0 %v3029_v16  ;;  %v3124_v14 = vpop.f32.mrf.mxu0  ;;  %v1981_v16 = vmul.f32 %v6942_v0, %v1937_v45  ;;  %v1939_v42 = vpop.f32.mrf.mxu3 }
 0x5c6   : > { %v1997_v61 = vpack.c.bf16 %v1981_v16, %v1981_v16 }
 0x5cc   : > { %3569 = vmax.xlane.f32.xlu2 %v3568_v1  ;;  %v6944_v1 = vpop.eup %6943  ;;  %v3127_v36 = vpop.f32.mrf.mxu0  ;;  %6975 = vrcp.f32 %v9421_v20 }
 0x5cd   : > { %v3233_v32 = vmul.f32 %v6944_v1, %v3127_v36 }
 0x5cf   : > { %v3249_v34 = vpack.c.bf16 %v3233_v32, %v3233_v32 }
 0x5d4   : > { %v3129_v44 = vpop.f32.mrf.mxu0 }
 0x5d8   : > { %3279 = vrot.lane.b32.xlu0 %v3247_v48, %s7296_s16 }
 0x5db   : > { %v2657_v24 = vpop.permute.xlu1 %2656 }
 0x5dc   : > { %2702 = vst.msk [vmem:[#allocation3 + $0xc] sm:$0xf] %vm2698_vm0, %v2657_v24  ;;  %v6946_v24 = vpop.eup %6945 }
 0x5dd   : > { %v6948_v0 = vpop.eup %6947 }
 0x5de   : > { %v3234_v45 = vmul.f32 %v6948_v0, %v3129_v44  ;;  %v6950_v16 = vpop.eup %6949  ;;  %v3132_v0 = vpop.f32.mrf.mxu0 }
 0x5df   : > { %v3232_v58 = vmul.f32 %v6950_v16, %v3124_v14  ;;  %v6952_v36 = vpop.eup %6951 }
 0x5e0   : > { %v3250_v52 = vpack.c.bf16 %v3234_v45, %v3234_v45 }
 0x5e1   : > { %v9466_v27 = vpop.xlane.xlu0 %2413 }
 0x5e4   : > { %2664 = vrot.lane.b32.xlu2 %v2625_v62, %s7295_s15  ;;  %v1982_v62 = vmul.f32 %v6946_v24, %v1939_v42 }
 0x5e6   : > { %3033 = vadd.xlane.f32.xlu1 %v3032_v50  ;;  %v1998_v50 = vpack.c.bf16 %v1982_v62, %v1982_v62 }
 0x5e9   : > { %v9471_v10 = vpop.xlane.xlu0 %3563 }
 0x5ee   : > { %v9468_v60 = vpop.xlane.xlu2 %3551 }
 0x5f1   : > { %v9476_v11 = vpop.xlane.xlu0 %3572 }
 0x5f6   : > { %v9473_v6 = vpop.xlane.xlu2 %2416 }
 0x5f7   : > { %6977 = vrcp.f32 %v9473_v6 }
 0x5f8   : > { %6979 = vrcp.f32 %v9458_v46  ;;  %v9613_v46 = vld [vmem:[#allocation2 + $0x38] sm:$0xff] }
 0x5fe   : > { %v2659_v47 = vpop.permute.xlu2 %2658 }
 0x5ff   : > { %2703 = vst.msk [vmem:[#allocation3 + $0x10] sm:$0xf] %vm2698_vm0, %v2659_v47  ;;  %2037 = vrot.lane.b32.xlu1 %v1997_v61, %s7294_s14  ;;  %v1942_v61 = vpop.f32.mrf.mxu3  ;;  %v3248_v47 = vpack.c.bf16 %v3232_v58, %v3232_v58 }
 0x600   : > { %v1983_v32 = vmul.f32 %v6952_v36, %v1942_v61  ;;  %v3047_v61 = vsel %vm1085_vm6, %v9392_v3, 0.0 }
 0x602   : > { %3039 = vadd.xlane.f32.xlu0 %v3038_v53 }
 0x604   : > { %v2661_v48 = vpop.permute.xlu0 %2660 }
 0x605   : > { %2704 = vst.msk [vmem:[#allocation3 + $0x14] sm:$0xf] %vm2698_vm0, %v2661_v48  ;;  %v1999_v48 = vpack.c.bf16 %v1983_v32, %v1983_v32  ;;  %v3044_v32 = vsel %vm1085_vm6, %v9357_v33, 0.0 }
 0x606   : > { %v9488_v18 = vpop.xlane.xlu1 %3566 }
 0x607   : > { %3283 = vrot.lane.b32.xlu1 %v3249_v34, %s7296_s16  ;;  %v1944_v53 = vpop.f32.mrf.mxu3 }
 0x60d   : > { %3036 = vadd.xlane.f32.xlu2 %v3035_v29 }
 0x60e   : > { %v9492_v1 = vpop.xlane.xlu1 %3575 }
 0x60f   : > { %v1947_v29 = vpop.f32.mrf.mxu3 }
 0x616   : > { %2039 = vrot.lane.b32.xlu0 %v1998_v50, %s7294_s14  ;;  %v9497_v35 = vpop.xlane.xlu1 %2419  ;;  %v6954_v50 = vpop.eup %6953 }
 0x617   : > { %v1949_v42 = vpop.f32.mrf.mxu3  ;;  %v1984_v45 = vmul.f32 %v6954_v50, %v1944_v53  ;;  %v6956_v57 = vpop.eup %6955 }
 0x618   : > { %v6958_v3 = vpop.eup %6957 }
 0x619   : > { %v6960_v50 = vpop.eup %6959 }
 0x61a   : > { %v6962_v2 = vpop.eup %6961 }
 0x61e   : > { %3285 = vrot.lane.b32.xlu0 %v3250_v52, %s7296_s16  ;;  %v2000_v52 = vpack.c.bf16 %v1984_v45, %v1984_v45 }
 0x61f   : > { %v9513_v16 = vpop.f32.mrf.mxu3 }
 0x625   : > { %3281 = vrot.lane.b32.xlu2 %v3248_v47, %s7296_s16  ;;  %v3134_v47 = vpop.f32.mrf.mxu0 }
 0x626   : > { %v3236_v30 = vmul.f32 %v6956_v57, %v3134_v47 }
 0x627   : > { %v9521_v36 = vpop.f32.mrf.mxu3 }
 0x628   : > { %v3252_v53 = vpack.c.bf16 %v3236_v30, %v3236_v30 }
 0x62d   : > { %2041 = vrot.lane.b32.xlu2 %v1999_v48, %s7294_s14  ;;  %v3137_v9 = vpop.f32.mrf.mxu0 }
 0x62e   : > { %v2663_v34 = vpop.permute.xlu1 %2662  ;;  %v3237_v45 = vmul.f32 %v6960_v50, %v3137_v9 }
 0x62f   : > { %2705 = vst.msk [vmem:[#allocation3 + $0x18] sm:$0xf] %vm2698_vm0, %v2663_v34  ;;  %v9505_v24 = vpop.xlane.xlu0 %2422  ;;  %v9527_v48 = vpop.f32.mrf.mxu3  ;;  %v1985_v34 = vmul.f32 %v6958_v3, %v1947_v29 }
 0x631   : > { %3042 = vadd.xlane.f32.xlu1 %v3041_v41  ;;  %v2001_v41 = vpack.c.bf16 %v1985_v34, %v1985_v34 }
 0x635   : > { %v3139_v22 = vpop.f32.mrf.mxu0 }
 0x637   : > { %v9503_v14 = vpop.xlane.xlu2 %3560  ;;  %v9510_v44 = vpop.xlane.xlu0 %3030 }
 0x63f   : > { %v9508_v62 = vpop.xlane.xlu2 %3569 }
 0x647   : > { %v2665_v51 = vpop.permute.xlu2 %2664 }
 0x648   : > { %2706 = vst.msk [vmem:[#allocation3 + $0x1c] sm:$0xf] %vm2698_vm0, %v2665_v51  ;;  %3048 = vadd.xlane.f32.xlu0 %v3047_v61  ;;  %v9531_v51 = vpop.f32.mrf.mxu3  ;;  %v3253_v61 = vpack.c.bf16 %v3237_v45, %v3237_v45  ;;  %v9553_v45 = vld [vmem:[#allocation2 + $0x18] sm:$0xff] }
 0x64a   : > { %2043 = vrot.lane.b32.xlu1 %v2000_v52, %s7294_s14  ;;  %v3280_v58 = vpop.permute.xlu0 %3279  ;;  %v3235_v52 = vmul.f32 %v6962_v2, %v3132_v0 }
 0x64b   : > { %3328 = vst.msk [vmem:[#allocation3] sm:$0xf] %vm3327_vm8, %v3280_v58  ;;  %v6964_v58 = vpop.eup %6963 }
 0x64c   : > { %v3251_v29 = vpack.c.bf16 %v3235_v52, %v3235_v52  ;;  %v1986_v47 = vmul.f32 %v6964_v58, %v1949_v42  ;;  %v6966_v3 = vpop.eup %6965  ;;  %v9562_v52 = vld [vmem:[#allocation2] sm:$0xff]  ;;  %v3577_v58 = vsel %vm1085_vm6, %v9559_v31, -inf }
 0x64d   : > { %v3238_v0 = vmul.f32 %v6966_v3, %v3139_v22  ;;  %v9573_v3 = vld [vmem:[#allocation2 + $0x10] sm:$0xff] }
 0x64f   : > { %v3254_v42 = vpack.c.bf16 %v3238_v0, %v3238_v0 }
 0x650   : > { %v2571_v33 = vpop.f32.mrf.mxu3 }
 0x652   : > { %3289 = vrot.lane.b32.xlu1 %v3252_v53, %s7296_s16  ;;  %v2002_v53 = vpack.c.bf16 %v1986_v47, %v1986_v47 }
 0x656   : > { %3045 = vadd.xlane.f32.xlu2 %v3044_v32 }
 0x658   : > { %v9539_v30 = vpop.f32.mrf.mxu3 }
 0x659   : > { %v9535_v57 = vpop.xlane.xlu1 %3033 }
 0x65c   : > { %2045 = vrot.lane.b32.xlu0 %v2001_v41, %s7294_s14 }
 0x660   : > { %v9543_v34 = vpop.f32.mrf.mxu3 }
 0x664   : > { %3291 = vrot.lane.b32.xlu0 %v3253_v61, %s7296_s16 }
 0x668   : > { %v2578_v9 = vpop.f32.mrf.mxu3 }
 0x66e   : > { %3287 = vrot.lane.b32.xlu2 %v3251_v29, %s7296_s16  ;;  %v6968_v29 = vpop.eup %6967 }
 0x66f   : > { %v6970_v22 = vpop.eup %6969 }
 0x670   : > { %v9567_v47 = vpop.f32.mrf.mxu3  ;;  %v1987_v8 = vmul.f32 %v6970_v22, %v9513_v16  ;;  %v9593_v16 = vld [vmem:[#allocation2 + $0x30] sm:$0xff] }
 0x671   : > { %v2038_v56 = vpop.permute.xlu1 %2037 }
 0x672   : > { %2078 = vst.msk [vmem:[#allocation3 + $0x20] sm:$0xf] %vm2069_vm4, %v2038_v56 }
 0x675   : > { %v9549_v41 = vpop.xlane.xlu0 %3039 }
 0x676   : > { %2047 = vrot.lane.b32.xlu2 %v2002_v53, %s7294_s14  ;;  %v2612_v53 = vmul.f32 %v6968_v29, %v2571_v33  ;;  %v2003_v33 = vpack.c.bf16 %v1987_v8, %v1987_v8 }
 0x678   : > { %v2628_v0 = vpack.c.bf16 %v2612_v53, %v2612_v53 }
 0x679   : > { %v3284_v32 = vpop.permute.xlu1 %3283 }
 0x67a   : > { %3330 = vst.msk [vmem:[#allocation3 + $0x8] sm:$0xf] %vm3327_vm8, %v3284_v32  ;;  %v9579_v32 = vpop.f32.mrf.mxu3 }
 0x67c   : > { %3051 = vadd.xlane.f32.xlu1 %v3050_v5  ;;  %v9582_v5 = vld [vmem:[#allocation2 + $0x8] sm:$0xff] }
 0x67e   : > { %3293 = vrot.lane.b32.xlu2 %v3254_v42, %s7296_s16  ;;  %v6972_v42 = vpop.eup %6971 }
 0x67f   : > { %v6974_v19 = vpop.eup %6973 }
 0x680   : > { %v9551_v50 = vpop.xlane.xlu2 %3036  ;;  %v2611_v55 = vmul.f32 %v6974_v19, %v9531_v51  ;;  %v9623_v19 = vld [vmem:[#allocation2 + $0x10] sm:$0xff] }
 0x681   : > { %6981 = vrcp.f32 %v9551_v50  ;;  %v9631_v50 = vld [vmem:[#allocation2 + $0x28] sm:$0xff] }
 0x682   : > { %v2627_v20 = vpack.c.bf16 %v2611_v55, %v2611_v55  ;;  %6983 = vrcp.f32 %v9466_v27 }
 0x686   : > { %4023 = vrot.lane.b32.xlu2 %v9553_v45, %s7297_s17 }
 0x688   : > { %v3282_v61 = vpop.permute.xlu2 %3281  ;;  %v2040_v2 = vpop.permute.xlu0 %2039 }
 0x689   : > { %3329 = vst.msk [vmem:[#allocation3 + $0x4] sm:$0xf] %vm3327_vm8, %v3282_v61  ;;  %v9588_v61 = vpop.f32.mrf.mxu3 }
 0x68a   : > { %2079 = vst.msk [vmem:[#allocation3 + $0x24] sm:$0xf] %vm2069_vm4, %v2040_v2  ;;  %v1988_v2 = vmul.f32 %v6972_v42, %v9521_v36  ;;  %v9606_v36 = vld [vmem:[#allocation2 + $0x18] sm:$0xff] }
 0x68c   : > { %v2004_v29 = vpack.c.bf16 %v1988_v2, %v1988_v2 }
 0x68e   : > { %4017 = vrot.lane.b32.xlu2 %v9562_v52, %s7297_s17  ;;  %3578 = vmax.xlane.f32.xlu0 %v3577_v58  ;;  %v6976_v58 = vpop.eup %6975 }
 0x68f   : > { %v6978_v53 = vpop.eup %6977 }
 0x690   : > { %v2042_v21 = vpop.permute.xlu2 %2041  ;;  %v3286_v56 = vpop.permute.xlu0 %3285  ;;  %v2615_v51 = vmul.f32 %v6978_v53, %v2578_v9 }
 0x691   : > { %2080 = vst.msk [vmem:[#allocation3 + $0x28] sm:$0xf] %vm2069_vm4, %v2042_v21  ;;  %v9604_v21 = vpop.f32.mrf.mxu3  ;;  %v6980_v22 = vpop.eup %6979 }
 0x692   : > { %3331 = vst.msk [vmem:[#allocation3 + $0xc] sm:$0xf] %vm3327_vm8, %v3286_v56  ;;  %v2610_v56 = vmul.f32 %v6976_v58, %v9527_v48  ;;  %v2613_v48 = vmul.f32 %v6980_v22, %v9539_v30  ;;  %v6982_v2 = vpop.eup %6981 }
 0x694   : > { %v2626_v6 = vpack.c.bf16 %v2610_v56, %v2610_v56  ;;  %v2629_v42 = vpack.c.bf16 %v2613_v48, %v2613_v48 }
 0x695   : > { %4021 = vrot.lane.b32.xlu1 %v9573_v3, %s7297_s17 }
 0x696   : > { %2670 = vrot.lane.b32.xlu2 %v2628_v0, %s7295_s15 }
 0x699   : > { %v3200_v0 = vpop.f32.mrf.mxu3 }
 0x69a   : > { %v3241_v55 = vmul.f32 %v6982_v2, %v3200_v0  ;;  %v9646_v2 = vld [vmem:[#allocation2 + $0x20] sm:$0xff] }
 0x69d   : > { %2049 = vrot.lane.b32.xlu1 %v2003_v33, %s7294_s14  ;;  %v2631_v33 = vpack.c.bf16 %v2615_v51, %v2615_v51 }
 0x69e   : > { %4011 = vrot.lane.b32.xlu2 %v9582_v5, %s7298_s18 }
 0x6a1   : > { %v3202_v30 = vpop.f32.mrf.mxu3 }
 0x6a2   : > { %4019 = vrot.lane.b32.xlu0 %v9582_v5, %s7297_s17 }
 0x6a4   : > { %v9615_v8 = vpop.xlane.xlu1 %3042 }
 0x6a5   : > { %4009 = vrot.lane.b32.xlu1 %v9562_v52, %s7298_s18 }
 0x6a6   : > { %4110 = vrot.lane.b32.xlu2 %v9593_v16, %s7297_s17 }
 0x6a9   : > { %v9636_v56 = vpop.f32.mrf.mxu3 }
 0x6aa   : > { %2051 = vrot.lane.b32.xlu0 %v2004_v29, %s7294_s14  ;;  %v6984_v29 = vpop.eup %6983  ;;  %s325_s14 = scalar_lea.vmem %s11042_s4, %s6595_s12 }
 0x6ab   : > { %v2614_v27 = vmul.f32 %v6984_v29, %v9543_v34 }
 0x6ad   : > { %2668 = vrot.lane.b32.xlu1 %v2627_v20, %s7295_s15  ;;  %v3257_v20 = vpack.c.bf16 %v3241_v55, %v3241_v55  ;;  %v2630_v51 = vpack.c.bf16 %v2614_v27, %v2614_v27 }
 0x6ae   : > { %4652 = vrot.lane.b32.xlu2 %v9606_v36, %s7299_s19 }
 0x6b2   : > { %2666 = vrot.lane.b32.xlu0 %v2626_v6, %s7295_s15 }
 0x6b5   : > { %4112 = vrot.lane.b32.xlu1 %v9613_v46, %s7297_s17 }
 0x6b6   : > { %2676 = vrot.lane.b32.xlu2 %v2631_v33, %s7295_s15  ;;  %v3207_v33 = vpop.f32.mrf.mxu3 }
 0x6ba   : > { %2672 = vrot.lane.b32.xlu0 %v2629_v42, %s7295_s15 }
 0x6bb   : > { %v9638_v53 = vpop.xlane.xlu0 %3048 }
 0x6bc   : > { %v2044_v9 = vpop.permute.xlu1 %2043 }
 0x6bd   : > { %2081 = vst.msk [vmem:[#allocation3 + $0x2c] sm:$0xf] %vm2069_vm4, %v2044_v9  ;;  %4013 = vrot.lane.b32.xlu1 %v9573_v3, %s7298_s18 }
 0x6be   : > { %4650 = vrot.lane.b32.xlu2 %v9623_v19, %s7299_s19 }
 0x6c4   : > { %v3290_v58 = vpop.permute.xlu1 %3289 }
 0x6c5   : > { %3333 = vst.msk [vmem:[#allocation3 + $0x14] sm:$0xf] %vm3327_vm8, %v3290_v58  ;;  %4108 = vrot.lane.b32.xlu1 %v9631_v50, %s7297_s17 }
 0x6c6   : > { %3299 = vrot.lane.b32.xlu2 %v3257_v20, %s7296_s16 }
 0x6c9   : > { %v3046_v6 = vpop.xlane.xlu2 %3045 }
 0x6ca   : > { %6985 = vrcp.f32 %v3046_v6  ;;  %v9658_v6 = vpop.f32.mrf.mxu2 }
 0x6cb   : > { %6987 = vrcp.f32 %v9505_v24 }
 0x6cc   : > { %6989 = vrcp.f32 %v9510_v44  ;;  %v3580_v44 = vsel %vm1085_vm6, %v9658_v6, -inf }
 0x6cd   : > { %2674 = vrot.lane.b32.xlu1 %v2630_v51, %s7295_s15  ;;  %6991 = vrcp.f32 %v9549_v41 }
 0x6ce   : > { %v2046_v22 = vpop.permute.xlu0 %2045  ;;  %6993 = vrcp.f32 %v9497_v35 }
 0x6cf   : > { %2082 = vst.msk [vmem:[#allocation3 + $0x30] sm:$0xf] %vm2069_vm4, %v2046_v22  ;;  %6995 = vrcp.f32 %v9535_v57 }
 0x6d0   : > { %v6986_v0 = vpop.eup %6985  ;;  %6997 = vrcp.f32 %v9615_v8 }
 0x6d1   : > { %v3288_v48 = vpop.permute.xlu2 %3287  ;;  %v3244_v42 = vmul.f32 %v6986_v0, %v3207_v33  ;;  %v6988_v34 = vpop.eup %6987  ;;  %6999 = vrcp.f32 %v9638_v53 }
 0x6d2   : > { %3332 = vst.msk [vmem:[#allocation3 + $0x10] sm:$0xf] %vm3327_vm8, %v3288_v48  ;;  %v2617_v55 = vmul.f32 %v6988_v34, %v9579_v32  ;;  %v6990_v20 = vpop.eup %6989 }
 0x6d3   : > { %v3260_v9 = vpack.c.bf16 %v3244_v42, %v3244_v42  ;;  %v3239_v27 = vmul.f32 %v6990_v20, %v9588_v61  ;;  %v6992_v22 = vpop.eup %6991 }
 0x6d4   : > { %v2633_v58 = vpack.c.bf16 %v2617_v55, %v2617_v55  ;;  %v3242_v0 = vmul.f32 %v6992_v22, %v3202_v30  ;;  %v6994_v48 = vpop.eup %6993 }
 0x6d5   : > { %3305 = vrot.lane.b32.xlu2 %v3260_v9, %s7296_s16  ;;  %4106 = vrot.lane.b32.xlu1 %v9646_v2, %s7297_s17  ;;  %v3255_v32 = vpack.c.bf16 %v3239_v27, %v3239_v27  ;;  %v2616_v9 = vmul.f32 %v6994_v48, %v9567_v47  ;;  %v6996_v30 = vpop.eup %6995  ;;  %v9685_v27 = vld [vmem:[#allocation2] sm:$0xff]  ;;  %v9701_v48 = vld [vmem:[#allocation2 + $0x38] sm:$0xff] }
 0x6d6   : > { %v3292_v24 = vpop.permute.xlu0 %3291  ;;  %v3258_v61 = vpack.c.bf16 %v3242_v0, %v3242_v0  ;;  %v3240_v55 = vmul.f32 %v6996_v30, %v9604_v21 }
 0x6d7   : > { %3334 = vst.msk [vmem:[#allocation3 + $0x18] sm:$0xf] %vm3327_vm8, %v3292_v24  ;;  %v2632_v34 = vpack.c.bf16 %v2616_v9, %v2616_v9  ;;  %v9673_v24 = vpop.f32.mrf.mxu2 }
 0x6d8   : > { %v3583_v57 = vsel %vm1085_vm6, %v9673_v24, -inf  ;;  %v3256_v47 = vpack.c.bf16 %v3240_v55, %v3240_v55 }
 0x6d9   : > { %v2048_v29 = vpop.permute.xlu2 %2047 }
 0x6da   : > { %2083 = vst.msk [vmem:[#allocation3 + $0x34] sm:$0xf] %vm2069_vm4, %v2048_v29  ;;  %v6998_v29 = vpop.eup %6997 }
 0x6db   : > { %v3243_v20 = vmul.f32 %v6998_v29, %v9636_v56  ;;  %v9696_v56 = vld [vmem:[#allocation2 + $0x8] sm:$0xff] }
 0x6dd   : > { %2680 = vrot.lane.b32.xlu1 %v2633_v58, %s7295_s15  ;;  %v3259_v21 = vpack.c.bf16 %v3243_v20, %v3243_v20 }
 0x6e1   : > { %v3294_v51 = vpop.permute.xlu2 %3293 }
 0x6e2   : > { %3335 = vst.msk [vmem:[#allocation3 + $0x1c] sm:$0xf] %vm3327_vm8, %v3294_v51 }
 0x6e4   : > { %3581 = vmax.xlane.f32.xlu0 %v3580_v44 }
 0x6e5   : > { %3295 = vrot.lane.b32.xlu1 %v3255_v32, %s7296_s16 }
 0x6e9   : > { %v4024_v33 = vpop.permute.xlu2 %4023 }
 0x6ea   : > { %v4047_v41 = vsel %vm950_vm5, %v4024_v33, 0 }
 0x6eb   : > { %4053 = vmatpush.bf16.xpose.msra.mxu1 %v4047_v41  ;;  %v7000_v41 = vpop.eup %6999 }
 0x6ed   : > { %3301 = vrot.lane.b32.xlu1 %v3258_v61, %s7296_s16 }
 0x6ef   : > { %v3052_v58 = vpop.xlane.xlu1 %3051 }
 0x6f0   : > { %7001 = vrcp.f32 %v3052_v58 }
 0x6f1   : > { %v4018_v42 = vpop.permute.xlu2 %4017 }
 0x6f5   : > { %4015 = vrot.lane.b32.xlu1 %v9553_v45, %s7298_s18 }
 0x6f8   : > { %2678 = vrot.lane.b32.xlu0 %v2632_v34, %s7295_s15  ;;  %v3210_v34 = vpop.f32.mrf.mxu3 }
 0x6f9   : > { %v2671_v35 = vpop.permute.xlu2 %2670  ;;  %v3245_v30 = vmul.f32 %v7000_v41, %v3210_v34 }
 0x6fa   : > { %2709 = vst.msk [vmem:[#allocation3 + $0x28] sm:$0xf] %vm2698_vm0, %v2671_v35 }
 0x6fb   : > { %v3261_v55 = vpack.c.bf16 %v3245_v30, %v3245_v30 }
 0x6fd   : > { %4098 = vrot.lane.b32.xlu1 %v9646_v2, %s7298_s18 }
 0x6fe   : > { %3584 = vmax.xlane.f32.xlu2 %v3583_v57 }
 0x700   : > { %3297 = vrot.lane.b32.xlu0 %v3256_v47, %s7296_s16  ;;  %v4038_v47 = vsel %vm950_vm5, %v4018_v42, 0 }
 0x701   : > { %v9682_v8 = vpop.permute.xlu2 %4011  ;;  %v9691_v22 = vpop.xlane.xlu0 %3578 }
 0x705   : > { %4646 = vrot.lane.b32.xlu1 %v9685_v27, %s7299_s19 }
 0x707   : > { %v4022_v51 = vpop.permute.xlu1 %4021 }
 0x708   : > { %3303 = vrot.lane.b32.xlu0 %v3259_v21, %s7296_s16  ;;  %v4044_v44 = vsel %vm950_vm5, %v4022_v51, 0 }
 0x709   : > { %v4111_v32 = vpop.permute.xlu2 %4110  ;;  %4054 = vmatpush.bf16.xpose.msra.mxu1 %v4044_v44  ;;  %v9720_v44 = vld [vmem:[#allocation2 + $0x10] sm:$0xff] }
 0x70d   : > { %4100 = vrot.lane.b32.xlu1 %v9631_v50, %s7298_s18 }
 0x70f   : > { %v2050_v0 = vpop.permute.xlu1 %2049 }
 0x710   : > { %2084 = vst.msk [vmem:[#allocation3 + $0x38] sm:$0xf] %vm2069_vm4, %v2050_v0  ;;  %4648 = vrot.lane.b32.xlu0 %v9696_v56, %s7299_s19  ;;  %v9727_v0 = vld [vmem:[#allocation2 + $0x30] sm:$0xff] }
 0x711   : > { %v4653_v33 = vpop.permute.xlu2 %4652 }
 0x712   : > { %v4676_v29 = vsel %vm950_vm5, %v4653_v33, 0  ;;  %v7002_v33 = vpop.eup %7001 }
 0x714   : > { %v4020_v61 = vpop.permute.xlu0 %4019 }
 0x715   : > { %4102 = vrot.lane.b32.xlu1 %v9593_v16, %s7298_s18  ;;  %v4041_v9 = vsel %vm950_vm5, %v4020_v61, 0  ;;  %v3212_v61 = vpop.f32.mrf.mxu3 }
 0x716   : > { %4741 = vrot.lane.b32.xlu2 %v9701_v48, %s7299_s19  ;;  %4055 = vmatpush.bf16.xpose.msra.mxu1 %v4041_v9  ;;  %v3246_v34 = vmul.f32 %v7002_v33, %v3212_v61 }
 0x717   : > { %v4010_v53 = vpop.permute.xlu1 %4009 }
 0x718   : > { %4638 = vrot.lane.b32.xlu0 %v9685_v27, %s7300_s20  ;;  %v3262_v30 = vpack.c.bf16 %v3246_v34, %v3246_v34 }
 0x719   : > { %v2677_v35 = vpop.permute.xlu2 %2676 }
 0x71a   : > { %2712 = vst.msk [vmem:[#allocation3 + $0x34] sm:$0xf] %vm2698_vm0, %v2677_v35 }
 0x71c   : > { %v2052_v57 = vpop.permute.xlu0 %2051 }
 0x71d   : > { %3307 = vrot.lane.b32.xlu1 %v3261_v55, %s7296_s16  ;;  %2085 = vst.msk [vmem:[#allocation3 + $0x3c] sm:$0xf] %vm2069_vm4, %v2052_v57  ;;  %v4133_v55 = vsel %vm950_vm5, %v4111_v32, 0  ;;  %vm11202_vm4 = vmmov %vm11144_vm3 }
 0x71e   : > { %4104 = vrot.lane.b32.xlu2 %v9613_v46, %s7298_s18  ;;  %4056 = vmatpush.bf16.xpose.msra.mxu1 %v4038_v47  ;;  %v9739_v47 = vld [vmem:[#allocation2 + $0x20] sm:$0xff]  ;;  %s10793_s18 = scalar_lea.vmem %s11044_s6, %s6594_s23 }
 0x71f   : > { %v2669_v20 = vpop.permute.xlu1 %2668 }
 0x720   : > { %2708 = vst.msk [vmem:[#allocation3 + $0x24] sm:$0xf] %vm2698_vm0, %v2669_v20  ;;  %4640 = vrot.lane.b32.xlu0 %v9696_v56, %s7300_s20 }
 0x721   : > { %v4651_v21 = vpop.permute.xlu2 %4650 }
 0x722   : > { %v4673_v42 = vsel %vm950_vm5, %v4651_v21, 0 }
 0x724   : > { %v2667_v51 = vpop.permute.xlu0 %2666 }
 0x725   : > { %2707 = vst.msk [vmem:[#allocation3 + $0x20] sm:$0xf] %vm2698_vm0, %v2667_v51  ;;  %6416 = vmatmul.msk.bf16.vlgmr.msra.gmra.mxu1 %vm950_vm5, %v4010_v53  ;;  %v9750_v51 = vld [vmem:[#allocation2] sm:$0xff] }
 0x726   : > { %4682 = vmatpush.bf16.xpose.msrb.mxu1 %v4676_v29  ;;  %5279 = vrot.lane.b32.xlu2 %v9720_v44, %s7301_s24  ;;  %v3586_v29 = vsub.f32 %v8873_v23, %v9153_v49  ;;  %v9754_v23 = vld [vmem:[#allocation2 + $0x18] sm:$0xff] }
 0x727   : > { %v4113_v41 = vpop.permute.xlu1 %4112 }
 0x728   : > { %v4136_v58 = vsel %vm950_vm5, %v4113_v41, 0  ;;  %4739 = vrot.lane.b32.xlu0 %v9727_v0, %s7299_s19  ;;  %v3602_v21 = vmul.f32 1.442695, %v3586_v29  ;;  %v9765_v41 = vld [vmem:[#allocation2 + $0x28] sm:$0xff]  ;;  %v7261_v29 = vld [vmem:[#allocation2 + $0x10] sm:$0xff] }
 0x729   : > { %v3300_v9 = vpop.permute.xlu2 %3299  ;;  %4142 = vmatpush.bf16.xpose.msra.mxu2 %v4136_v58 }
 0x72a   : > { %3338 = vst.msk [vmem:[#allocation3 + $0x28] sm:$0xf] %vm3327_vm8, %v3300_v9  ;;  %7003 = vpow2.f32 %v3602_v21  ;;  %v9770_v9 = vld [vmem:[#allocation2 + $0x8] sm:$0xff] }
 0x72b   : > { %v7262_v21 = vld [vmem:[#allocation2 + $0x8] sm:$0xff] }
 0x72c   : > { %v2673_v53 = vpop.permute.xlu0 %2672 }
 0x72d   : > { %2710 = vst.msk [vmem:[#allocation3 + $0x2c] sm:$0xf] %vm2698_vm0, %v2673_v53  ;;  %v9777_v53 = vld [vmem:[#allocation2 + $0x30] sm:$0xff] }
 0x72e   : > { %4683 = vmatpush.bf16.xpose.msrb.mxu1 %v4673_v42  ;;  %4644 = vrot.lane.b32.xlu2 %v9606_v36, %s7300_s20  ;;  %v7259_v42 = vld [vmem:[#allocation2] sm:$0xff] }
 0x72f   : > { %v4014_v35 = vpop.permute.xlu1 %4013 }
 0x730   : > { %3309 = vrot.lane.b32.xlu0 %v3262_v30, %s7296_s16 }
 0x731   : > { %v3306_v57 = vpop.permute.xlu2 %3305  ;;  %4143 = vmatpush.bf16.xpose.msra.mxu2 %v4133_v55 }
 0x732   : > { %3341 = vst.msk [vmem:[#allocation3 + $0x34] sm:$0xf] %vm3327_vm8, %v3306_v57  ;;  %v7260_v57 = vld [vmem:[#allocation2 + $0x18] sm:$0xff] }
 0x735   : > { %6417 = vmatmul.msk.bf16.gmra.mxu1 %vm950_vm5, %v9682_v8  ;;  %v9759_v8 = vpop.eup %7003 }
 0x736   : > { %4727 = vrot.lane.b32.xlu2 %v9739_v47, %s7300_s20  ;;  %v3634_v33 = vsel %vm1085_vm6, %v9759_v8, 0.0 }
 0x737   : > { %v4109_v20 = vpop.permute.xlu1 %4108 }
 0x738   : > { %4642 = vrot.lane.b32.xlu0 %v9623_v19, %s7300_s20  ;;  %v4130_v32 = vsel %vm950_vm5, %v4109_v20, 0 }
 0x739   : > { %4144 = vmatpush.bf16.xpose.msra.mxu2 %v4130_v32 }
 0x73e   : > { %5275 = vrot.lane.b32.xlu2 %v9750_v51, %s7301_s24 }
 0x73f   : > { %v2675_v49 = vpop.permute.xlu1 %2674 }
 0x740   : > { %2711 = vst.msk [vmem:[#allocation3 + $0x30] sm:$0xf] %vm2698_vm0, %v2675_v49  ;;  %5281 = vrot.lane.b32.xlu0 %v9754_v23, %s7301_s24 }
 0x745   : > { %6418 = vmatmul.msk.bf16.gmra.mxu1 %vm950_vm5, %v4014_v35  ;;  %v9784_v35 = vld [vmem:[#allocation2 + $0x28] sm:$0xff] }
 0x746   : > { %3718 = vrot.lane.b32.xlu2 %v7259_v42, %s7302_s25  ;;  %v9798_v42 = vld [vmem:[#allocation2 + $0x38] sm:$0xff] }
 0x747   : > { %v4107_v58 = vpop.permute.xlu1 %4106  ;;  %3635 = vadd.xlane.f32.xlu1 %v3634_v33 }
 0x748   : > { %4737 = vrot.lane.b32.xlu0 %v9765_v41, %s7299_s19  ;;  %v4127_v61 = vsel %vm950_vm5, %v4107_v58, 0 }
 0x749   : > { %4145 = vmatpush.bf16.xpose.msra.mxu2 %v4127_v61 }
 0x74e   : > { %5269 = vrot.lane.b32.xlu2 %v9770_v9, %s7303_s26 }
 0x74f   : > { %v2681_v34 = vpop.permute.xlu1 %2680 }
 0x750   : > { %2714 = vst.msk [vmem:[#allocation3 + $0x3c] sm:$0xf] %vm2698_vm0, %v2681_v34  ;;  %4735 = vrot.lane.b32.xlu0 %v9739_v47, %s7299_s19 }
 0x756   : > { %5368 = vrot.lane.b32.xlu2 %v9777_v53, %s7301_s24 }
 0x757   : > { %v3296_v30 = vpop.permute.xlu1 %3295  ;;  %v9791_v20 = vpop.xlane.xlu0 %3581 }
 0x758   : > { %3336 = vst.msk [vmem:[#allocation3 + $0x20] sm:$0xf] %vm3327_vm8, %v3296_v30  ;;  %5277 = vrot.lane.b32.xlu0 %v9770_v9, %s7301_s24 }
 0x75e   : > { %5366 = vrot.lane.b32.xlu2 %v9784_v35, %s7301_s24 }
 0x75f   : > { %v3302_v55 = vpop.permute.xlu1 %3301 }
 0x760   : > { %3339 = vst.msk [vmem:[#allocation3 + $0x2c] sm:$0xf] %vm3327_vm8, %v3302_v55  ;;  %3724 = vrot.lane.b32.xlu1 %v7260_v57, %s7302_s25  ;;  %3722 = vrot.lane.b32.xlu0 %v7261_v29, %s7302_s25  ;;  %v6660_v29 = vld [vmem:[#allocation2 + $0x20] sm:$0xff] }
 0x767   : > { %v4016_v32 = vpop.permute.xlu1 %4015 }
 0x768   : > { %4729 = vrot.lane.b32.xlu1 %v9765_v41, %s7300_s20  ;;  %6419 = vmatmul.msk.bf16.gmra.mxu1 %vm950_vm5, %v4016_v32 }
 0x769   : > { %3720 = vrot.lane.b32.xlu0 %v7262_v21, %s7302_s25 }
 0x76a   : > { %v2679_v49 = vpop.permute.xlu0 %2678 }
 0x76b   : > { %2713 = vst.msk [vmem:[#allocation3 + $0x38] sm:$0xf] %vm2698_vm0, %v2679_v49  ;;  %vm11203_vm0 = vmmov %vm11144_vm3 }
 0x76f   : > { %v4099_v33 = vpop.permute.xlu1 %4098 }
 0x770   : > { %6436 = vmatmul.msk.bf16.vlgmr.msra.gmra.mxu2 %vm950_vm5, %v4099_v33  ;;  %5370 = vrot.lane.b32.xlu1 %v9798_v42, %s7301_s24  ;;  %v7263_v33 = vld [vmem:[#allocation2 + $0x30] sm:$0xff] }
 0x771   : > { %v9803_v58 = vpop.xlane.xlu2 %3584  ;;  %5267 = vrot.lane.b32.xlu0 %v9750_v51, %s7303_s26 }
 0x772   : > { %v3298_v61 = vpop.permute.xlu0 %3297 }
 0x773   : > { %3337 = vst.msk [vmem:[#allocation3 + $0x24] sm:$0xf] %vm3327_vm8, %v3298_v61  ;;  %v7264_v61 = vld [vmem:[#allocation2 + $0x38] sm:$0xff] }
 0x777   : > { %v4647_v34 = vpop.permute.xlu1 %4646 }
 0x778   : > { %4733 = vrot.lane.b32.xlu1 %v9701_v48, %s7300_s20 }
 0x779   : > { %v4742_v30 = vpop.permute.xlu2 %4741  ;;  %4731 = vrot.lane.b32.xlu0 %v9727_v0, %s7300_s20 }
 0x77a   : > { %v4765_v55 = vsel %vm950_vm5, %v4742_v30, 0  ;;  %v3304_v57 = vpop.permute.xlu0 %3303 }
 0x77b   : > { %4771 = vmatpush.bf16.xpose.msrb.mxu2 %v4765_v55  ;;  %3340 = vst.msk [vmem:[#allocation3 + $0x30] sm:$0xf] %vm3327_vm8, %v3304_v57  ;;  %v4667_v55 = vsel %vm950_vm5, %v4647_v34, 0 }
 0x77f   : > { %v4101_v32 = vpop.permute.xlu1 %4100 }
 0x780   : > { %6437 = vmatmul.msk.bf16.gmra.mxu2 %vm950_vm5, %v4101_v32  ;;  %5364 = vrot.lane.b32.xlu1 %v6660_v29, %s7301_s24 }
 0x781   : > { %5271 = vrot.lane.b32.xlu0 %v9720_v44, %s7303_s26  ;;  %v4105_v34 = vpop.permute.xlu2 %4104 }
 0x782   : > { %v4649_v48 = vpop.permute.xlu0 %4648 }
 0x783   : > { %v4670_v21 = vsel %vm950_vm5, %v4649_v48, 0 }
 0x784   : > { %4684 = vmatpush.bf16.xpose.msrb.mxu1 %v4670_v21  ;;  %v7265_v21 = vld [vmem:[#allocation2 + $0x28] sm:$0xff] }
 0x787   : > { %v4103_v49 = vpop.permute.xlu1 %4102 }
 0x788   : > { %3795 = vrot.lane.b32.xlu1 %v7263_v33, %s7302_s25 }
 0x789   : > { %3797 = vrot.lane.b32.xlu0 %v7264_v61, %s7302_s25 }
 0x78a   : > { %v4639_v30 = vpop.permute.xlu0 %4638 }
 0x78c   : > { %4685 = vmatpush.bf16.xpose.msrb.mxu1 %v4667_v55 }
 0x78f   : > { %v3308_v57 = vpop.permute.xlu1 %3307 }
 0x790   : > { %3342 = vst.msk [vmem:[#allocation3 + $0x38] sm:$0xf] %vm3327_vm8, %v3308_v57  ;;  %6438 = vmatmul.msk.bf16.gmra.mxu2 %vm950_vm5, %v4103_v49  ;;  %5273 = vrot.lane.b32.xlu1 %v9754_v23, %s7303_s26 }
 0x792   : > { %v4641_v44 = vpop.permute.xlu0 %4640 }
 0x793   : > { %6464 = vmatmul.msk.bf16.vlgmr.msrb.gmra.mxu1 %vm950_vm5, %v4639_v30  ;;  %v5280_v30 = vpop.permute.xlu2 %5279 }
 0x798   : > { %4353 = vrot.lane.b32.xlu1 %v9553_v45, %s7304_s27 }
 0x79a   : > { %v4740_v32 = vpop.permute.xlu0 %4739 }
 0x79b   : > { %v4762_v48 = vsel %vm950_vm5, %v4740_v32, 0 }
 0x79c   : > { %4772 = vmatpush.bf16.xpose.msrb.mxu2 %v4762_v48  ;;  %v4645_v48 = vpop.permute.xlu2 %4644 }
 0x7a0   : > { %6439 = vmatmul.msk.bf16.gmra.mxu2 %vm950_vm5, %v4105_v34  ;;  %3793 = vrot.lane.b32.xlu1 %v7265_v21, %s7302_s25  ;;  %v5302_v34 = vsel %vm950_vm5, %v5280_v30, 0 }
 0x7a2   : > { %v9832_v49 = vpop.f32.mrf.mxu1  ;;  %v3310_v33 = vpop.permute.xlu0 %3309 }
 0x7a3   : > { %3343 = vst.msk [vmem:[#allocation3 + $0x3c] sm:$0xf] %vm3327_vm8, %v3310_v33  ;;  %6465 = vmatmul.msk.bf16.gmra.mxu1 %vm950_vm5, %v4641_v44  ;;  %v4167_v45 = vsel %vm1085_vm6, %v9832_v49, -inf  ;;  %vm11204_vm8 = vmmov %vm11203_vm0 }
 0x7a4   : > { %4168 = vmax.xlane.f32.xlu2 %v4167_v45  ;;  %v4728_v21 = vpop.permute.xlu2 %4727 }
 0x7a8   : > { %5356 = vrot.lane.b32.xlu1 %v6660_v29, %s7303_s26 }
 0x7aa   : > { %v4643_v61 = vpop.permute.xlu0 %4642  ;;  %v9839_v55 = vpop.f32.mrf.mxu1 }
 0x7ab   : > { %v4170_v57 = vsel %vm1085_vm6, %v9839_v55, -inf }
 0x7ac   : > { %v5276_v30 = vpop.permute.xlu2 %5275 }
 0x7b0   : > { %4349 = vrot.lane.b32.xlu1 %v9582_v5, %s7304_s27 }
 0x7b2   : > { %v5282_v32 = vpop.permute.xlu0 %5281  ;;  %v9853_v33 = vpop.f32.mrf.mxu1 }
 0x7b3   : > { %4171 = vmax.xlane.f32.xlu0 %v4170_v57  ;;  %v5305_v44 = vsel %vm950_vm5, %v5282_v32, 0  ;;  %6466 = vmatmul.msk.bf16.gmra.mxu1 %vm950_vm5, %v4643_v61  ;;  %v7266_v61 = vld [vmem:[#allocation2 + $0x20] sm:$0xff] }
 0x7b4   : > { %5311 = vmatpush.bf16.xpose.msra.mxu1 %v5305_v44 }
 0x7b8   : > { %4347 = vrot.lane.b32.xlu1 %v9562_v52, %s7304_s27 }
 0x7ba   : > { %v4738_v29 = vpop.permute.xlu0 %4737  ;;  %v9862_v57 = vpop.xlane.xlu1 %3635 }
 0x7bb   : > { %v4759_v5 = vsel %vm950_vm5, %v4738_v29, 0  ;;  %v9864_v32 = vpop.f32.mrf.mxu1 }
 0x7bc   : > { %4351 = vrot.lane.b32.xlu2 %v9573_v3, %s7304_s27  ;;  %5312 = vmatpush.bf16.xpose.msra.mxu1 %v5302_v34  ;;  %v3587_v3 = vsub.f32 %v8892_v15, %v9179_v17  ;;  %v3719_v34 = vpop.permute.xlu2 %3718 }
 0x7bd   : > { %4773 = vmatpush.bf16.xpose.msrb.mxu2 %v4759_v5 }
 0x7be   : > { %v3604_v29 = vmul.f32 1.442695, %v3587_v3 }
 0x7c0   : > { %7005 = vpow2.f32 %v3604_v29 }
 0x7c2   : > { %v4736_v45 = vpop.permute.xlu0 %4735 }
 0x7c3   : > { %6467 = vmatmul.msk.bf16.gmra.mxu1 %vm950_vm5, %v4645_v48  ;;  %v4756_v52 = vsel %vm950_vm5, %v4736_v45, 0  ;;  %v5296_v45 = vsel %vm950_vm5, %v5276_v30, 0  ;;  %v9869_v15 = vpop.f32.mrf.mxu1 }
 0x7c4   : > { %5358 = vrot.lane.b32.xlu2 %v9784_v35, %s7303_s26 }
 0x7c5   : > { %4774 = vmatpush.bf16.xpose.msrb.mxu2 %v4756_v52  ;;  %v3589_v52 = vsub.f32 %v8959_v4, %v9194_v38 }
 0x7c6   : > { %v9871_v17 = vpop.eup %7005 }
 0x7c7   : > { %3791 = vrot.lane.b32.xlu0 %v7266_v61, %s7302_s25  ;;  %v3588_v61 = vsub.f32 %v8918_v7, %v9171_v54  ;;  %v3608_v29 = vmul.f32 1.442695, %v3589_v52  ;;  %v4173_v7 = vsel %vm1085_vm6, %v9853_v33, -inf }
 0x7c9   : > { %7007 = vpow2.f32 %v3608_v29 }
 0x7ca   : > { %v5278_v44 = vpop.permute.xlu0 %5277 }
 0x7cb   : > { %v5299_v35 = vsel %vm950_vm5, %v5278_v44, 0  ;;  %v3682_v44 = vpack.c.bf16 %v9759_v8, %v9759_v8  ;;  %v9882_v4 = vpop.f32.mrf.mxu1 }
 0x7cc   : > { %6484 = vmatmul.msk.bf16.vlgmr.msrb.gmra.mxu2 %vm950_vm5, %v4728_v21  ;;  %5313 = vmatpush.bf16.xpose.msra.mxu1 %v5299_v35  ;;  %v3683_v21 = vpack.c.bf16 %v9871_v17, %v9871_v17  ;;  %v4182_v29 = vsel %vm1085_vm6, %v9882_v4, -inf }
 0x7ce   : > { %v3707_v35 = vunpack.c.l.b16 %v3683_v21 }
 0x7cf   : > { %v9889_v21 = vpop.eup %7007 }
 0x7d2   : > { %v3725_v48 = vpop.permute.xlu1 %3724  ;;  %v3723_v5 = vpop.permute.xlu0 %3722 }
 0x7d3   : > { %3746 = vmatpush.bf16.msra.mxu0 %v3725_v48  ;;  %v5270_v48 = vpop.permute.xlu2 %5269 }
 0x7d4   : > { %5314 = vmatpush.bf16.xpose.msra.mxu1 %v5296_v45  ;;  %v3706_v45 = vunpack.c.l.b16 %v3682_v44  ;;  %v3590_v44 = vsub.f32 %v9342_v43, %v9468_v60  ;;  %v4179_v60 = vsel %vm1085_vm6, %v9869_v15, -inf }
 0x7d6   : > { %v3714_v38 = vpack.c.b16 %v3707_v35, %v3706_v45  ;;  %v3591_v35 = vsub.f32 %v9351_v37, %v9440_v25  ;;  %v4176_v37 = vsel %vm1085_vm6, %v9864_v32, -inf }
 0x7d7   : > { %3747 = vmatpush.bf16.msra.mxu0 %v3723_v5  ;;  %v3606_v5 = vmul.f32 1.442695, %v3588_v61 }
 0x7d9   : > { %7009 = vpow2.f32 %v3606_v5 }
 0x7da   : > { %v4730_v3 = vpop.permute.xlu1 %4729 }
 0x7db   : > { %v3721_v30 = vpop.permute.xlu0 %3720  ;;  %v5369_v61 = vpop.permute.xlu2 %5368 }
 0x7dc   : > { %3748 = vmatpush.bf16.msra.mxu0 %v3721_v30  ;;  %6485 = vmatmul.msk.bf16.gmra.mxu2 %vm950_vm5, %v4730_v3  ;;  %v3685_v30 = vpack.c.bf16 %v9889_v21, %v9889_v21  ;;  %v5391_v43 = vsel %vm950_vm5, %v5369_v61, 0 }
 0x7e0   : > { %3749 = vmatpush.bf16.msra.mxu0 %v3719_v34  ;;  %v9893_v34 = vpop.eup %7009 }
 0x7e1   : > { %v3684_v45 = vpack.c.bf16 %v9893_v34, %v9893_v34 }
 0x7e2   : > { %v5371_v54 = vpop.permute.xlu1 %5370  ;;  %4174 = vmax.xlane.f32.xlu1 %v4173_v7  ;;  %v3610_v7 = vmul.f32 1.442695, %v3590_v44 }
 0x7e3   : > { %v5394_v8 = vsel %vm950_vm5, %v5371_v54, 0  ;;  %6392 = vmatmul.msk.bf16.vlgmr.msra.gmra.mxu0 %vm1085_vm6, %v3714_v38  ;;  %v5268_v52 = vpop.permute.xlu0 %5267  ;;  %v3709_v54 = vunpack.c.l.b16 %v3685_v30  ;;  %v5367_v25 = vpop.permute.xlu2 %5366 }
 0x7e4   : > { %6512 = vmatmul.msk.bf16.vlgmr.msra.gmra.mxu1 %vm950_vm5, %v5268_v52  ;;  %5400 = vmatpush.bf16.xpose.msra.mxu2 %v5394_v8  ;;  %v3612_v8 = vmul.f32 1.442695, %v3591_v35  ;;  %v3708_v52 = vunpack.c.l.b16 %v3684_v45  ;;  %7011 = vpow2.f32 %v3610_v7  ;;  %v5388_v35 = vsel %vm950_vm5, %v5367_v25, 0 }
 0x7e5   : > { %v9891_v3 = vpop.f32.mrf.mxu1 }
 0x7e6   : > { %v4185_v44 = vsel %vm1085_vm6, %v9891_v3, -inf  ;;  %v3715_v61 = vpack.c.b16 %v3709_v54, %v3708_v52  ;;  %7013 = vpow2.f32 %v3612_v8 }
 0x7ea   : > { %v4734_v5 = vpop.permute.xlu1 %4733  ;;  %4183 = vmax.xlane.f32.xlu1 %v4182_v29  ;;  %v9920_v7 = vpop.eup %7011 }
 0x7eb   : > { %v4732_v38 = vpop.permute.xlu0 %4731  ;;  %v3686_v54 = vpack.c.bf16 %v9920_v7, %v9920_v7 }
 0x7ec   : > { %6486 = vmatmul.msk.bf16.gmra.mxu2 %vm950_vm5, %v4732_v38 }
 0x7ed   : > { %5401 = vmatpush.bf16.xpose.msra.mxu2 %v5391_v43  ;;  %4180 = vmax.xlane.f32.xlu2 %v4179_v60  ;;  %v9911_v29 = vpop.f32.mrf.mxu1  ;;  %v9922_v43 = vpop.eup %7013  ;;  %v3593_v60 = vsub.f32 %v9447_v28, %v9503_v14  ;;  %v3710_v14 = vunpack.c.l.b16 %v3686_v54 }
 0x7ee   : > { %v4188_v45 = vsel %vm1085_vm6, %v9911_v29, -inf }
 0x7f1   : > { %4177 = vmax.xlane.f32.xlu0 %v4176_v37  ;;  %v3687_v37 = vpack.c.bf16 %v9922_v43, %v9922_v43 }
 0x7f2   : > { %v5365_v38 = vpop.permute.xlu1 %5364  ;;  %4186 = vmax.xlane.f32.xlu1 %v4185_v44  ;;  %v3616_v44 = vmul.f32 1.442695, %v3593_v60 }
 0x7f3   : > { %6393 = vmatmul.msk.bf16.gmra.mxu0 %vm1085_vm6, %v3715_v61  ;;  %v5272_v30 = vpop.permute.xlu0 %5271  ;;  %v9928_v8 = vpop.f32.mrf.mxu2  ;;  %v5385_v61 = vsel %vm950_vm5, %v5365_v38, 0 }
 0x7f4   : > { %6513 = vmatmul.msk.bf16.gmra.mxu1 %vm950_vm5, %v5270_v48  ;;  %v3592_v48 = vsub.f32 %v9368_v13, %v9454_v40  ;;  %v4191_v28 = vsel %vm1085_vm6, %v9928_v8, -inf  ;;  %7015 = vpow2.f32 %v3616_v44 }
 0x7f5   : > { %5402 = vmatpush.bf16.xpose.msra.mxu2 %v5388_v35  ;;  %4189 = vmax.xlane.f32.xlu2 %v4188_v45  ;;  %v3711_v45 = vunpack.c.l.b16 %v3687_v37 }
 0x7f6   : > { %v3614_v35 = vmul.f32 1.442695, %v3592_v48 }
 0x7f7   : > { %v3716_v13 = vpack.c.b16 %v3711_v45, %v3710_v14  ;;  %v3594_v45 = vsub.f32 %v9384_v12, %v9471_v10 }
 0x7f8   : > { %7017 = vpow2.f32 %v3614_v35 }
 0x7fa   : > { %v3796_v52 = vpop.permute.xlu1 %3795 }
 0x7fb   : > { %v3798_v25 = vpop.permute.xlu0 %3797 }
 0x7fc   : > { %3819 = vmatpush.bf16.msrb.mxu3 %v3798_v25  ;;  %6487 = vmatmul.msk.bf16.gmra.mxu2 %vm950_vm5, %v4734_v5  ;;  %v9942_v5 = vpop.eup %7015 }
 0x7fd   : > { %5403 = vmatpush.bf16.xpose.msra.mxu2 %v5385_v61  ;;  %4192 = vmax.xlane.f32.xlu2 %v4191_v28  ;;  %v3689_v60 = vpack.c.bf16 %v9942_v5, %v9942_v5  ;;  %v3595_v28 = vsub.f32 %v9390_v63, %v9488_v18 }
 0x7fe   : > { %v9944_v38 = vpop.eup %7017 }
 0x7ff   : > { %v3688_v48 = vpack.c.bf16 %v9944_v38, %v9944_v38 }
 0x800   : > { %3820 = vmatpush.bf16.msrb.mxu3 %v3796_v52  ;;  %v3713_v52 = vunpack.c.l.b16 %v3689_v60  ;;  %v3618_v60 = vmul.f32 1.442695, %v3594_v45 }
 0x802   : > { %v5274_v40 = vpop.permute.xlu1 %5273 }
 0x803   : > { %6394 = vmatmul.msk.bf16.gmra.mxu0 %vm1085_vm6, %v3716_v13  ;;  %v3620_v13 = vmul.f32 1.442695, %v3595_v28 }
 0x804   : > { %6514 = vmatmul.msk.bf16.gmra.mxu1 %vm950_vm5, %v5272_v30  ;;  %v3712_v30 = vunpack.c.l.b16 %v3688_v48 }
 0x805   : > { %5360 = vrot.lane.b32.xlu0 %v9777_v53, %s7303_s26 }
 0x806   : > { %v3717_v37 = vpack.c.b16 %v3713_v52, %v3712_v30  ;;  %v9963_v52 = vpop.f32.mrf.mxu2 }
 0x807   : > { %v4194_v12 = vsel %vm1085_vm6, %v9963_v52, -inf }
 0x80a   : > { %v4354_v54 = vpop.permute.xlu1 %4353 }
 0x80b   : > { %5362 = vrot.lane.b32.xlu1 %v9798_v42, %s7303_s26  ;;  %4375 = vmatpush.bf16.msrb.mxu0 %v4354_v54 }
 0x810   : > { %v9972_v18 = vpop.f32.mrf.mxu1 }
 0x812   : > { %v3794_v25 = vpop.permute.xlu1 %3793 }
 0x813   : > { %6395 = vmatmul.msk.bf16.gmra.mxu0 %vm1085_vm6, %v3717_v37  ;;  %3821 = vmatpush.bf16.msrb.mxu3 %v3794_v25  ;;  %v3596_v25 = vsub.f32 %v9406_v59, %v9508_v62 }
 0x814   : > { %6515 = vmatmul.msk.bf16.gmra.mxu1 %vm950_vm5, %v5274_v40 }
 0x815   : > { %4426 = vrot.lane.b32.xlu2 %v9613_v46, %s7304_s27  ;;  %v3622_v45 = vmul.f32 1.442695, %v3596_v25 }
 0x817   : > { %v4169_v53 = vpop.xlane.xlu2 %4168 }
 0x818   : > { %v4215_v61 = vsub.f32 %v9832_v49, %v4169_v53 }
 0x81a   : > { %v5357_v44 = vpop.permute.xlu1 %5356  ;;  %v4231_v35 = vmul.f32 1.442695, %v4215_v61  ;;  %v3597_v61 = vsub.f32 %v9412_v26, %v9476_v11 }
 0x81b   : > { %6532 = vmatmul.msk.bf16.vlgmr.msra.gmra.mxu2 %vm950_vm5, %v5357_v44 }
 0x81c   : > { %7019 = vpow2.f32 %v4231_v35 }
 0x81d   : > { %7021 = vpow2.f32 %v3620_v13  ;;  %v3624_v13 = vmul.f32 1.442695, %v3597_v61 }
 0x81f   : > { %v4352_v42 = vpop.permute.xlu2 %4351 }
 0x820   : > { %4376 = vmatpush.bf16.msrb.mxu0 %v4352_v42 }
 0x822   : > { %v4350_v14 = vpop.permute.xlu1 %4349  ;;  %v9966_v63 = vpop.eup %7019 }
 0x823   : > { %v9970_v10 = vpop.eup %7021 }
 0x824   : > { %4377 = vmatpush.bf16.msrb.mxu0 %v4350_v14  ;;  %v3691_v44 = vpack.c.bf16 %v9970_v10, %v9970_v10  ;;  %v4796_v14 = vsel %vm1085_vm6, %v9972_v18, -inf }
 0x826   : > { %v4172_v40 = vpop.xlane.xlu0 %4171  ;;  %v3780_v62 = vunpack.c.l.b16 %v3691_v44 }
 0x827   : > { %v4216_v46 = vsub.f32 %v9839_v55, %v4172_v40  ;;  %v5359_v49 = vpop.permute.xlu2 %5358  ;;  %v4311_v55 = vpack.c.bf16 %v9966_v63, %v9966_v63 }
 0x829   : > { %v4233_v54 = vmul.f32 1.442695, %v4216_v46  ;;  %v4335_v42 = vunpack.c.l.b16 %v4311_v55  ;;  %v3598_v55 = vsub.f32 %v9428_v39, %v9492_v1 }
 0x82a   : > { %v4348_v48 = vpop.permute.xlu1 %4347 }
 0x82b   : > { %7023 = vpow2.f32 %v4233_v54  ;;  %4378 = vmatpush.bf16.msrb.mxu0 %v4348_v48  ;;  %6533 = vmatmul.msk.bf16.gmra.mxu2 %vm950_vm5, %v5359_v49  ;;  %v3599_v48 = vsub.f32 %v9559_v31, %v9691_v22  ;;  %v3626_v61 = vmul.f32 1.442695, %v3598_v55 }
 0x82c   : > { %7025 = vpow2.f32 %v3618_v60  ;;  %v9993_v60 = vpop.f32.mrf.mxu1 }
 0x82d   : > { %7027 = vpow2.f32 %v3622_v45  ;;  %v4799_v11 = vsel %vm1085_vm6, %v9993_v60, -inf }
 0x82e   : > { %7029 = vpow2.f32 %v3624_v13 }
 0x82f   : > { %4195 = vmax.xlane.f32.xlu0 %v4194_v12 }
 0x831   : > { %v9976_v30 = vpop.eup %7023 }
 0x832   : > { %v9978_v37 = vpop.eup %7025  ;;  %v4312_v53 = vpack.c.bf16 %v9976_v30, %v9976_v30 }
 0x833   : > { %11158 = vst [vmem:[#allocation4_spill] sm:$0xff] %v9978_v37  ;;  %v3690_v35 = vpack.c.bf16 %v9978_v37, %v9978_v37  ;;  %v9998_v54 = vpop.eup %7027  ;;  %v7270_v37 = vld [vmem:[#allocation2 + $0x30] sm:$0xff] }
 0x834   : > { %v4336_v28 = vunpack.c.l.b16 %v4312_v53  ;;  %11159 = vst [vmem:[#allocation12_spill] sm:$0xff] %v9998_v54  ;;  %v10000_v49 = vpop.eup %7029  ;;  %v3692_v12 = vpack.c.bf16 %v9998_v54, %v9998_v54  ;;  %v3628_v53 = vmul.f32 1.442695, %v3599_v48 }
 0x835   : > { %4797 = vmax.xlane.f32.xlu1 %v4796_v14  ;;  %v3779_v40 = vunpack.c.l.b16 %v3690_v35  ;;  %11160 = vst [vmem:[#allocation9_spill] sm:$0xff] %v10000_v49  ;;  %v3693_v25 = vpack.c.bf16 %v10000_v49, %v10000_v49  ;;  %v10033_v14 = vpop.f32.mrf.mxu2 }
 0x836   : > { %v4343_v59 = vpack.c.b16 %v4336_v28, %v4335_v42  ;;  %v3781_v44 = vunpack.c.l.b16 %v3692_v12  ;;  %7031 = vpow2.f32 %v3628_v53 }
 0x837   : > { %v3787_v26 = vpack.c.b16 %v3780_v62, %v3779_v40  ;;  %v3782_v42 = vunpack.c.l.b16 %v3693_v25  ;;  %7033 = vpow2.f32 %v3626_v61 }
 0x838   : > { %6440 = vmatmul.msk.bf16.vlgmr.msrb.gmra.mxu0 %vm1085_vm6, %v4343_v59 }
 0x839   : > { %v3792_v46 = vpop.permute.xlu0 %3791  ;;  %v3788_v31 = vpack.c.b16 %v3782_v42, %v3781_v44 }
 0x83a   : > { %3822 = vmatpush.bf16.msrb.mxu3 %v3792_v46 }
 0x83c   : > { %v10017_v39 = vpop.eup %7031 }
 0x83d   : > { %6396 = vmatmul.msk.bf16.vlgmr.msrb.gmra.mxu3 %vm1085_vm6, %v3787_v26  ;;  %11161 = vst [vmem:[#allocation17_spill] sm:$0xff] %v10017_v39  ;;  %v10019_v1 = vpop.eup %7033  ;;  %v3695_v22 = vpack.c.bf16 %v10017_v39, %v10017_v39  ;;  %v10043_v62 = vpop.f32.mrf.mxu2 }
 0x83e   : > { %4800 = vmax.xlane.f32.xlu2 %v4799_v11  ;;  %11162 = vst [vmem:[#allocation8_spill] sm:$0xff] %v10019_v1  ;;  %v3694_v28 = vpack.c.bf16 %v10019_v1, %v10019_v1 }
 0x83f   : > { %v3784_v35 = vunpack.c.l.b16 %v3695_v22 }
 0x843   : > { %4424 = vrot.lane.b32.xlu0 %v9593_v16, %s7304_s27  ;;  %v3601_v16 = vsub.f32 %v9673_v24, %v9803_v58  ;;  %v3783_v58 = vunpack.c.l.b16 %v3694_v28 }
 0x845   : > { %v3789_v59 = vpack.c.b16 %v3784_v35, %v3783_v58  ;;  %v10058_v61 = vpop.f32.mrf.mxu2 }
 0x84b   : > { %4422 = vrot.lane.b32.xlu0 %v9631_v50, %s7304_s27  ;;  %v3600_v50 = vsub.f32 %v9658_v6, %v9791_v20  ;;  %v10039_v6 = vpop.f32.mrf.mxu1 }
 0x84d   : > { %6397 = vmatmul.msk.bf16.gmra.mxu3 %vm1085_vm6, %v3788_v31  ;;  %v3630_v24 = vmul.f32 1.442695, %v3600_v50  ;;  %v10073_v58 = vpop.f32.mrf.mxu2 }
 0x84e   : > { %4982 = vrot.lane.b32.xlu1 %v9606_v36, %s7305_s28  ;;  %v3632_v36 = vmul.f32 1.442695, %v3601_v16 }
 0x850   : > { %7035 = vpow2.f32 %v3632_v36 }
 0x851   : > { %7037 = vpow2.f32 %v3630_v24 }
 0x853   : > { %4420 = vrot.lane.b32.xlu0 %v9646_v2, %s7304_s27  ;;  %v10054_v55 = vpop.f32.mrf.mxu1 }
 0x855   : > { %v4175_v45 = vpop.xlane.xlu1 %4174 }
 0x856   : > { %4980 = vrot.lane.b32.xlu2 %v9623_v19, %s7305_s28  ;;  %v4217_v2 = vsub.f32 %v9853_v33, %v4175_v45  ;;  %v10041_v20 = vpop.eup %7035 }
 0x857   : > { %11163 = vst [vmem:[#allocation16_spill] sm:$0xff] %v10041_v20  ;;  %v10045_v40 = vpop.eup %7037  ;;  %v3697_v46 = vpack.c.bf16 %v10041_v20, %v10041_v20 }
 0x858   : > { %v4235_v13 = vmul.f32 1.442695, %v4217_v2  ;;  %11164 = vst [vmem:[#allocation18_spill] sm:$0xff] %v10045_v40  ;;  %v3696_v33 = vpack.c.bf16 %v10045_v40, %v10045_v40 }
 0x859   : > { %v3786_v48 = vunpack.c.l.b16 %v3697_v46 }
 0x85a   : > { %7039 = vpow2.f32 %v4235_v13  ;;  %v3785_v25 = vunpack.c.l.b16 %v3696_v33 }
 0x85c   : > { %v3790_v31 = vpack.c.b16 %v3786_v48, %v3785_v25 }
 0x85d   : > { %6398 = vmatmul.msk.bf16.gmra.mxu3 %vm1085_vm6, %v3789_v59  ;;  %v4184_v53 = vpop.xlane.xlu1 %4183  ;;  %v4200_v59 = vsel %vm1085_vm6, %v10043_v62, -inf }
 0x85e   : > { %4978 = vrot.lane.b32.xlu2 %v9696_v56, %s7305_s28 }
 0x860   : > { %v4181_v19 = vpop.xlane.xlu2 %4180  ;;  %v10056_v44 = vpop.eup %7039 }
 0x861   : > { %v4219_v42 = vsub.f32 %v9869_v15, %v4181_v19  ;;  %v10071_v15 = vpop.f32.mrf.mxu1 }
 0x863   : > { %v4239_v22 = vmul.f32 1.442695, %v4219_v42 }
 0x864   : > { %v4178_v26 = vpop.xlane.xlu0 %4177 }
 0x865   : > { %v4218_v56 = vsub.f32 %v9864_v32, %v4178_v26  ;;  %v4220_v32 = vsub.f32 %v9882_v4, %v4184_v53  ;;  %v4187_v13 = vpop.xlane.xlu1 %4186  ;;  %v10093_v53 = vpop.f32.mrf.mxu2 }
 0x866   : > { %4976 = vrot.lane.b32.xlu2 %v9685_v27, %s7305_s28  ;;  %v4313_v27 = vpack.c.bf16 %v10056_v44, %v10056_v44  ;;  %v4221_v48 = vsub.f32 %v9891_v3, %v4187_v13  ;;  %v4802_v13 = vsel %vm1085_vm6, %v10039_v6, -inf }
 0x867   : > { %v4237_v11 = vmul.f32 1.442695, %v4218_v56  ;;  %v4241_v36 = vmul.f32 1.442695, %v4220_v32  ;;  %v4197_v56 = vsel %vm1085_vm6, %v10033_v14, -inf }
 0x868   : > { %v4190_v12 = vpop.xlane.xlu2 %4189  ;;  %v4337_v35 = vunpack.c.l.b16 %v4313_v27  ;;  %v4805_v27 = vsel %vm1085_vm6, %v10054_v55, -inf }
 0x869   : > { %7041 = vpow2.f32 %v4237_v11  ;;  %v4222_v26 = vsub.f32 %v9911_v29, %v4190_v12  ;;  %v10088_v11 = vpop.f32.mrf.mxu1  ;;  %v4203_v29 = vsel %vm1085_vm6, %v10058_v61, -inf }
 0x86a   : > { %7043 = vpow2.f32 %v4239_v22 }
 0x86b   : > { %7045 = vpow2.f32 %v4241_v36  ;;  %v4245_v42 = vmul.f32 1.442695, %v4222_v26  ;;  %v4808_v36 = vsel %vm1085_vm6, %v10071_v15, -inf  ;;  %v4209_v26 = vsel %vm1085_vm6, %v10093_v53, -inf }
 0x86d   : > { %6399 = vmatmul.msk.bf16.gmra.mxu3 %vm1085_vm6, %v3790_v31  ;;  %v4243_v31 = vmul.f32 1.442695, %v4221_v48  ;;  %7047 = vpow2.f32 %v4245_v42  ;;  %v4811_v42 = vsel %vm1085_vm6, %v10088_v11, -inf }
 0x86f   : > { %v10065_v16 = vpop.eup %7041  ;;  %7049 = vpow2.f32 %v4243_v31 }
 0x870   : > { %v4314_v50 = vpack.c.bf16 %v10065_v16, %v10065_v16  ;;  %v10069_v28 = vpop.xlane.xlu2 %4192  ;;  %v10079_v19 = vpop.eup %7043 }
 0x871   : > { %v10081_v46 = vpop.eup %7045  ;;  %v4315_v33 = vpack.c.bf16 %v10079_v19, %v10079_v19  ;;  %v10100_v3 = vpop.f32.mrf.mxu1 }
 0x872   : > { %v4338_v24 = vunpack.c.l.b16 %v4314_v50  ;;  %v4316_v25 = vpack.c.bf16 %v10081_v46, %v10081_v46 }
 0x873   : > { %v4339_v12 = vunpack.c.l.b16 %v4315_v33 }
 0x874   : > { %v4344_v4 = vpack.c.b16 %v4338_v24, %v4337_v35  ;;  %v4340_v32 = vunpack.c.l.b16 %v4316_v25  ;;  %v10105_v35 = vpop.eup %7047  ;;  %v10107_v24 = vpop.f32.mrf.mxu2 }
 0x876   : > { %6441 = vmatmul.msk.bf16.gmra.mxu0 %vm1085_vm6, %v4344_v4  ;;  %v4345_v22 = vpack.c.b16 %v4340_v32, %v4339_v12  ;;  %v10109_v4 = vpop.eup %7049  ;;  %v4814_v12 = vsel %vm1085_vm6, %v10100_v3, -inf }
 0x877   : > { %v5361_v45 = vpop.permute.xlu0 %5360 }
 0x878   : > { %4201 = vmax.xlane.f32.xlu1 %v4200_v59  ;;  %6534 = vmatmul.msk.bf16.gmra.mxu2 %vm950_vm5, %v5361_v45  ;;  %v4427_v2 = vpop.permute.xlu2 %4426  ;;  %v4318_v45 = vpack.c.bf16 %v10105_v35, %v10105_v35  ;;  %v4206_v59 = vsel %vm1085_vm6, %v10073_v58, -inf }
 0x879   : > { %4448 = vmatpush.bf16.msra.mxu3 %v4427_v2  ;;  %v4317_v2 = vpack.c.bf16 %v10109_v4, %v10109_v4 }
 0x87a   : > { %v4342_v33 = vunpack.c.l.b16 %v4318_v45 }
 0x87b   : > { %v4341_v25 = vunpack.c.l.b16 %v4317_v2 }
 0x87c   : > { %v10123_v48 = vpop.f32.mrf.mxu2 }
 0x87d   : > { %4198 = vmax.xlane.f32.xlu0 %v4197_v56  ;;  %v5363_v50 = vpop.permute.xlu1 %5362  ;;  %v10121_v56 = vpop.f32.mrf.mxu1  ;;  %v4820_v45 = vsel %vm1085_vm6, %v10123_v48, -inf }
 0x87e   : > { %v4817_v31 = vsel %vm1085_vm6, %v10121_v56, -inf }
 0x880   : > { %4204 = vmax.xlane.f32.xlu1 %v4203_v29  ;;  %v4346_v29 = vpack.c.b16 %v4342_v33, %v4341_v25  ;;  %v4223_v33 = vsub.f32 %v9928_v8, %v10069_v28  ;;  %v7267_v25 = vld [vmem:[#allocation2 + $0x38] sm:$0xff] }
 0x885   : > { %4806 = vmax.xlane.f32.xlu0 %v4805_v27  ;;  %v10132_v32 = vpop.f32.mrf.mxu1  ;;  %v10134_v27 = vpop.f32.mrf.mxu2 }
 0x886   : > { %6442 = vmatmul.msk.bf16.gmra.mxu0 %vm1085_vm6, %v4345_v22  ;;  %v4212_v22 = vsel %vm1085_vm6, %v10107_v24, -inf }
 0x888   : > { %4809 = vmax.xlane.f32.xlu1 %v4808_v36  ;;  %6535 = vmatmul.msk.bf16.gmra.mxu2 %vm950_vm5, %v5363_v50  ;;  %v4823_v50 = vsel %vm1085_vm6, %v10134_v27, -inf  ;;  %vm11199_vm5 = vmmov %vm11144_vm3 }
 0x88d   : > { %4207 = vmax.xlane.f32.xlu0 %v4206_v59  ;;  %v10140_v36 = vpop.f32.mrf.mxu1 }
 0x88e   : > { %v5428_v59 = vsel %vm1085_vm6, %v10140_v36, -inf }
 0x88f   : > { %4803 = vmax.xlane.f32.xlu2 %v4802_v13  ;;  %v5425_v13 = vsel %vm1085_vm6, %v10132_v32, -inf }
 0x890   : > { %4210 = vmax.xlane.f32.xlu1 %v4209_v26 }
 0x895   : > { %4812 = vmax.xlane.f32.xlu0 %v4811_v42 }
 0x896   : > { %6443 = vmatmul.msk.bf16.gmra.mxu0 %vm1085_vm6, %v4346_v29 }
 0x897   : > { %4815 = vmax.xlane.f32.xlu2 %v4814_v12 }
 0x898   : > { %4818 = vmax.xlane.f32.xlu1 %v4817_v31  ;;  %v4247_v31 = vmul.f32 1.442695, %v4223_v33 }
 0x89d   : > { %4213 = vmax.xlane.f32.xlu0 %v4212_v22 }
 0x89f   : > { %4824 = vmax.xlane.f32.xlu2 %v4823_v50 }
 0x8a2   : > { %v4196_v2 = vpop.xlane.xlu0 %4195 }
 0x8a3   : > { %v4224_v26 = vsub.f32 %v9963_v52, %v4196_v2 }
 0x8a5   : > { %4821 = vmax.xlane.f32.xlu0 %v4820_v45  ;;  %v4249_v29 = vmul.f32 1.442695, %v4224_v26 }
 0x8a7   : > { %5429 = vmax.xlane.f32.xlu2 %v5428_v59  ;;  %7051 = vpow2.f32 %v4249_v29 }
 0x8a8   : > { %v4798_v12 = vpop.xlane.xlu1 %4797  ;;  %7053 = vpow2.f32 %v4247_v31 }
 0x8a9   : > { %v4844_v45 = vsub.f32 %v9972_v18, %v4798_v12 }
 0x8ab   : > { %v4860_v52 = vmul.f32 1.442695, %v4844_v45 }
 0x8ad   : > { %5426 = vmax.xlane.f32.xlu0 %v5425_v13  ;;  %v10156_v28 = vpop.eup %7051 }
 0x8ae   : > { %11165 = vst [vmem:[#allocation10_spill] sm:$0xff] %v10156_v28  ;;  %v10158_v13 = vpop.eup %7053  ;;  %v4320_v18 = vpack.c.bf16 %v10156_v28, %v10156_v28 }
 0x8af   : > { %11166 = vst [vmem:[#allocation7_spill] sm:$0xff] %v10158_v13 }
 0x8b1   : > { %5055 = vrot.lane.b32.xlu1 %v7267_v25, %s7305_s28  ;;  %v4801_v42 = vpop.xlane.xlu2 %4800  ;;  %v4409_v25 = vunpack.c.l.b16 %v4320_v18 }
 0x8b2   : > { %v4845_v22 = vsub.f32 %v9993_v60, %v4801_v42 }
 0x8b4   : > { %v4862_v59 = vmul.f32 1.442695, %v4845_v22  ;;  %v7268_v22 = vld [vmem:[#allocation2 + $0x10] sm:$0xff] }
 0x8b5   : > { %v4425_v50 = vpop.permute.xlu0 %4424 }
 0x8b6   : > { %4449 = vmatpush.bf16.msra.mxu3 %v4425_v50  ;;  %7055 = vpow2.f32 %v4862_v59  ;;  %v10182_v59 = vpop.f32.mrf.mxu2 }
 0x8b7   : > { %7057 = vpow2.f32 %v4860_v52  ;;  %v10187_v52 = vpop.f32.mrf.mxu1 }
 0x8b9   : > { %5051 = vrot.lane.b32.xlu1 %v9765_v41, %s7305_s28  ;;  %v4981_v8 = vpop.permute.xlu2 %4980  ;;  %v4319_v41 = vpack.c.bf16 %v10158_v13, %v10158_v13 }
 0x8bb   : > { %v4408_v29 = vunpack.c.l.b16 %v4319_v41 }
 0x8bc   : > { %v10170_v33 = vpop.eup %7055 }
 0x8bd   : > { %v4423_v2 = vpop.permute.xlu0 %4422  ;;  %v10172_v42 = vpop.eup %7057  ;;  %v4941_v12 = vpack.c.bf16 %v10170_v33, %v10170_v33 }
 0x8be   : > { %4450 = vmatpush.bf16.msra.mxu3 %v4423_v2  ;;  %v4940_v31 = vpack.c.bf16 %v10172_v42, %v10172_v42 }
 0x8bf   : > { %5611 = vrot.lane.b32.xlu2 %v9754_v23, %s7306_s29  ;;  %v10191_v2 = vpop.f32.mrf.mxu1 }
 0x8c0   : > { %v4983_v60 = vpop.permute.xlu1 %4982  ;;  %v4964_v50 = vunpack.c.l.b16 %v4940_v31 }
 0x8c1   : > { %5049 = vrot.lane.b32.xlu1 %v9739_v47, %s7305_s28  ;;  %5004 = vmatpush.bf16.msra.mxu0 %v4983_v60  ;;  %v4979_v26 = vpop.permute.xlu2 %4978  ;;  %v4416_v47 = vpack.c.b16 %v4409_v25, %v4408_v29 }
 0x8c2   : > { %5053 = vrot.lane.b32.xlu0 %v9727_v0, %s7305_s28  ;;  %v4965_v0 = vunpack.c.l.b16 %v4941_v12 }
 0x8c5   : > { %5005 = vmatpush.bf16.msra.mxu0 %v4981_v8  ;;  %v4421_v23 = vpop.permute.xlu0 %4420  ;;  %v4972_v8 = vpack.c.b16 %v4965_v0, %v4964_v50  ;;  %v4826_v50 = vsel %vm1085_vm6, %v10182_v59, -inf }
 0x8c6   : > { %4451 = vmatpush.bf16.msra.mxu3 %v4421_v23 }
 0x8c7   : > { %v10195_v60 = vpop.f32.mrf.mxu1 }
 0x8c9   : > { %5607 = vrot.lane.b32.xlu1 %v9770_v9, %s7306_s29  ;;  %5006 = vmatpush.bf16.msra.mxu0 %v4979_v26  ;;  %v4977_v45 = vpop.permute.xlu2 %4976  ;;  %v10189_v9 = vpop.f32.mrf.mxu2 }
 0x8ca   : > { %5609 = vrot.lane.b32.xlu0 %v7268_v22, %s7306_s29  ;;  %6444 = vmatmul.msk.bf16.vlgmr.msra.gmra.mxu3 %vm1085_vm6, %v4416_v47  ;;  %v4829_v41 = vsel %vm1085_vm6, %v10189_v9, -inf }
 0x8cd   : > { %5007 = vmatpush.bf16.msra.mxu0 %v4977_v45 }
 0x8cf   : > { %v10204_v12 = vpop.f32.mrf.mxu1 }
 0x8d0   : > { %6488 = vmatmul.msk.bf16.vlgmr.msra.gmra.mxu0 %vm1085_vm6, %v4972_v8  ;;  %v5437_v8 = vsel %vm1085_vm6, %v10195_v60, -inf }
 0x8d1   : > { %5605 = vrot.lane.b32.xlu1 %v9750_v51, %s7306_s29  ;;  %v10193_v18 = vpop.f32.mrf.mxu2 }
 0x8d2   : > { %v4832_v29 = vsel %vm1085_vm6, %v10193_v18, -inf }
 0x8d9   : > { %v10199_v26 = vpop.f32.mrf.mxu2 }
 0x8e1   : > { %v10209_v45 = vpop.f32.mrf.mxu2 }
 0x8e2   : > { %v4838_v39 = vsel %vm1085_vm6, %v10209_v45, -inf }
 0x8e8   : > { %4830 = vmax.xlane.f32.xlu2 %v4829_v41 }
 0x8e9   : > { %v10229_v40 = vpop.f32.mrf.mxu2 }
 0x8eb   : > { %v4202_v25 = vpop.xlane.xlu1 %4201 }
 0x8ec   : > { %v4226_v23 = vsub.f32 %v10043_v62, %v4202_v25 }
 0x8ee   : > { %v4253_v51 = vmul.f32 1.442695, %v4226_v23  ;;  %v10216_v23 = vpop.f32.mrf.mxu1 }
 0x8f0   : > { %v4199_v47 = vpop.xlane.xlu0 %4198  ;;  %4833 = vmax.xlane.f32.xlu2 %v4832_v29  ;;  %7059 = vpow2.f32 %v4253_v51  ;;  %v5431_v51 = vsel %vm1085_vm6, %v10187_v52, -inf }
 0x8f1   : > { %v4225_v31 = vsub.f32 %v10033_v14, %v4199_v47 }
 0x8f3   : > { %v4251_v0 = vmul.f32 1.442695, %v4225_v31  ;;  %v4205_v22 = vpop.xlane.xlu1 %4204  ;;  %v5434_v31 = vsel %vm1085_vm6, %v10191_v2, -inf }
 0x8f4   : > { %4827 = vmax.xlane.f32.xlu0 %v4826_v50  ;;  %v4227_v25 = vsub.f32 %v10058_v61, %v4205_v22 }
 0x8f5   : > { %7061 = vpow2.f32 %v4251_v0 }
 0x8f6   : > { %v10211_v62 = vpop.eup %7059  ;;  %v4255_v22 = vmul.f32 1.442695, %v4227_v25  ;;  %v4841_v25 = vsel %vm1085_vm6, %v10229_v40, -inf }
 0x8f7   : > { %11167 = vst [vmem:[#allocation15_spill] sm:$0xff] %v10211_v62  ;;  %v4322_v14 = vpack.c.bf16 %v10211_v62, %v10211_v62 }
 0x8f8   : > { %v4807_v41 = vpop.xlane.xlu0 %4806  ;;  %5438 = vmax.xlane.f32.xlu2 %v5437_v8  ;;  %7063 = vpow2.f32 %v4255_v22  ;;  %v10244_v22 = vpop.f32.mrf.mxu2 }
 0x8f9   : > { %v4847_v47 = vsub.f32 %v10054_v55, %v4807_v41  ;;  %v4411_v8 = vunpack.c.l.b16 %v4322_v14 }
 0x8fb   : > { %v10222_v29 = vpop.eup %7061  ;;  %5432 = vmax.xlane.f32.xlu1 %v5431_v51  ;;  %v4810_v61 = vpop.xlane.xlu1 %4809  ;;  %v4866_v20 = vmul.f32 1.442695, %v4847_v47  ;;  %v4835_v47 = vsel %vm1085_vm6, %v10199_v26, -inf }
 0x8fc   : > { %11168 = vst [vmem:[#allocation13_spill] sm:$0xff] %v10222_v29  ;;  %v4321_v0 = vpack.c.bf16 %v10222_v29, %v10222_v29  ;;  %5435 = vmax.xlane.f32.xlu0 %v5434_v31 }
 0x8fd   : > { %7065 = vpow2.f32 %v4866_v20 }
 0x8fe   : > { %v4410_v50 = vunpack.c.l.b16 %v4321_v0  ;;  %v10240_v0 = vpop.f32.mrf.mxu1 }
 0x8ff   : > { %v5446_v20 = vsel %vm1085_vm6, %v10240_v0, -inf }
 0x900   : > { %v4208_v1 = vpop.xlane.xlu0 %4207  ;;  %4839 = vmax.xlane.f32.xlu2 %v4838_v39  ;;  %v4417_v55 = vpack.c.b16 %v4411_v8, %v4410_v50 }
 0x901   : > { %v4228_v41 = vsub.f32 %v10073_v58, %v4208_v1  ;;  %v10242_v58 = vpop.eup %7063 }
 0x902   : > { %6445 = vmatmul.msk.bf16.gmra.mxu3 %vm1085_vm6, %v4417_v55  ;;  %v4804_v51 = vpop.xlane.xlu2 %4803  ;;  %11169 = vst [vmem:[#allocation5_spill] sm:$0xff] %v10242_v58  ;;  %v10251_v55 = vpop.f32.mrf.mxu0 }
 0x903   : > { %v4257_v14 = vmul.f32 1.442695, %v4228_v41  ;;  %v4846_v31 = vsub.f32 %v10039_v6, %v4804_v51  ;;  %4842 = vmax.xlane.f32.xlu1 %v4841_v25  ;;  %v4211_v1 = vpop.xlane.xlu1 %4210  ;;  %v10248_v6 = vpop.eup %7065  ;;  %v4323_v41 = vpack.c.bf16 %v10242_v58, %v10242_v58 }
 0x904   : > { %4836 = vmax.xlane.f32.xlu0 %v4835_v47  ;;  %v4229_v8 = vsub.f32 %v10093_v53, %v4211_v1  ;;  %v5440_v47 = vsel %vm1085_vm6, %v10204_v12, -inf  ;;  %v4943_v53 = vpack.c.bf16 %v10248_v6, %v10248_v6 }
 0x905   : > { %7067 = vpow2.f32 %v4257_v14  ;;  %v4864_v39 = vmul.f32 1.442695, %v4846_v31  ;;  %v5449_v14 = vsel %vm1085_vm6, %v10244_v22, -inf }
 0x906   : > { %v4967_v28 = vunpack.c.l.b16 %v4943_v53 }
 0x907   : > { %7069 = vpow2.f32 %v4864_v39  ;;  %v4848_v39 = vsub.f32 %v10071_v15, %v4810_v61 }
 0x908   : > { %v4813_v50 = vpop.xlane.xlu0 %4812  ;;  %5447 = vmax.xlane.f32.xlu2 %v5446_v20  ;;  %v4259_v20 = vmul.f32 1.442695, %v4229_v8 }
 0x909   : > { %v4849_v51 = vsub.f32 %v10088_v11, %v4813_v50  ;;  %v4868_v29 = vmul.f32 1.442695, %v4848_v39 }
 0x90a   : > { %v4816_v25 = vpop.xlane.xlu2 %4815  ;;  %7071 = vpow2.f32 %v4259_v20 }
 0x90b   : > { %v10258_v31 = vpop.eup %7067  ;;  %5450 = vmax.xlane.f32.xlu1 %v5449_v14  ;;  %v4870_v58 = vmul.f32 1.442695, %v4849_v51  ;;  %v4412_v14 = vunpack.c.l.b16 %v4323_v41  ;;  %v10275_v51 = vpop.f32.mrf.mxu0 }
 0x90c   : > { %11170 = vst [vmem:[#allocation6_spill] sm:$0xff] %v10258_v31  ;;  %v4324_v1 = vpack.c.bf16 %v10258_v31, %v10258_v31  ;;  %5441 = vmax.xlane.f32.xlu0 %v5440_v47  ;;  %v5443_v31 = vsel %vm1085_vm6, %v10216_v23, -inf  ;;  %v4819_v41 = vpop.xlane.xlu1 %4818 }
 0x90d   : > { %v10267_v11 = vpop.eup %7069  ;;  %7073 = vpow2.f32 %v4870_v58 }
 0x90e   : > { %v4942_v50 = vpack.c.bf16 %v10267_v11, %v10267_v11  ;;  %v4413_v62 = vunpack.c.l.b16 %v4324_v1  ;;  %7075 = vpow2.f32 %v4868_v29  ;;  %v4851_v29 = vsub.f32 %v10121_v56, %v4819_v41 }
 0x910   : > { %v4214_v54 = vpop.xlane.xlu0 %4213  ;;  %v4418_v49 = vpack.c.b16 %v4413_v62, %v4412_v14  ;;  %v4966_v13 = vunpack.c.l.b16 %v4942_v50  ;;  %v10278_v62 = vpop.eup %7071  ;;  %v4874_v56 = vmul.f32 1.442695, %v4851_v29 }
 0x911   : > { %v4230_v15 = vsub.f32 %v10107_v24, %v4214_v54  ;;  %11171 = vst [vmem:[#allocation14_spill] sm:$0xff] %v10278_v62  ;;  %v10282_v24 = vpop.f32.mrf.mxu2 }
 0x912   : > { %6446 = vmatmul.msk.bf16.gmra.mxu3 %vm1085_vm6, %v4418_v49  ;;  %v4825_v61 = vpop.xlane.xlu2 %4824  ;;  %v4973_v47 = vpack.c.b16 %v4967_v28, %v4966_v13  ;;  %v4850_v49 = vsub.f32 %v10100_v3, %v4816_v25  ;;  %v4325_v13 = vpack.c.bf16 %v10278_v62, %v10278_v62  ;;  %v5452_v39 = vsel %vm1085_vm6, %v10282_v24, -inf }
 0x913   : > { %v4261_v8 = vmul.f32 1.442695, %v4230_v15  ;;  %v10280_v54 = vpop.eup %7073  ;;  %v10300_v20 = vpop.f32.mrf.mxu0 }
 0x914   : > { %5444 = vmax.xlane.f32.xlu0 %v5443_v31  ;;  %6489 = vmatmul.msk.bf16.gmra.mxu0 %vm1085_vm6, %v4973_v47  ;;  %v10285_v28 = vpop.eup %7075  ;;  %v4945_v53 = vpack.c.bf16 %v10280_v54, %v10280_v54  ;;  %v4872_v25 = vmul.f32 1.442695, %v4850_v49  ;;  %11173 = vst [vmem:[#allocation19_spill] sm:$0xff] %v10300_v20  ;;  %v4414_v50 = vunpack.c.l.b16 %v4325_v13 }
 0x915   : > { %7077 = vpow2.f32 %v4261_v8  ;;  %v4944_v3 = vpack.c.bf16 %v10285_v28, %v10285_v28  ;;  %v7269_v8 = vld [vmem:[#allocation2 + $0x38] sm:$0xff] }
 0x916   : > { %v4969_v15 = vunpack.c.l.b16 %v4945_v53  ;;  %7079 = vpow2.f32 %v4872_v25 }
 0x917   : > { %v4968_v62 = vunpack.c.l.b16 %v4944_v3  ;;  %7081 = vpow2.f32 %v4874_v56  ;;  %v7271_v56 = vld [vmem:[#allocation2 + $0x20] sm:$0xff] }
 0x918   : > { %v4822_v47 = vpop.xlane.xlu0 %4821 }
 0x919   : > { %v4974_v49 = vpack.c.b16 %v4969_v15, %v4968_v62  ;;  %v10305_v13 = vpop.f32.mrf.mxu2  ;;  %v4852_v29 = vsub.f32 %v10123_v48, %v4822_v47 }
 0x91a   : > { %v5430_v58 = vpop.xlane.xlu2 %5429 }
 0x91b   : > { %v10290_v31 = vpop.eup %7077  ;;  %v10314_v25 = vpop.f32.mrf.mxu0  ;;  %v4876_v62 = vmul.f32 1.442695, %v4852_v29  ;;  %v5474_v15 = vsub.f32 %v10140_v36, %v5430_v58 }
 0x91c   : > { %11172 = vst [vmem:[#allocation11_spill] sm:$0xff] %v10290_v31  ;;  %v4326_v1 = vpack.c.bf16 %v10290_v31, %v10290_v31  ;;  %5453 = vmax.xlane.f32.xlu0 %v5452_v39  ;;  %v10309_v53 = vpop.eup %7079 }
 0x91d   : > { %v10312_v3 = vpop.eup %7081  ;;  %7083 = vpow2.f32 %v4876_v62 }
 0x91e   : > { %v4415_v14 = vunpack.c.l.b16 %v4326_v1  ;;  %v4853_v1 = vsub.f32 %v10134_v27, %v4825_v61  ;;  %v4947_v48 = vpack.c.bf16 %v10312_v3, %v10312_v3 }
 0x920   : > { %5684 = vrot.lane.b32.xlu2 %v7269_v8, %s7306_s29  ;;  %v4419_v41 = vpack.c.b16 %v4415_v14, %v4414_v50  ;;  %v4878_v50 = vmul.f32 1.442695, %v4853_v1  ;;  %v4971_v8 = vunpack.c.l.b16 %v4947_v48  ;;  %v5491_v1 = vmul.f32 1.442695, %v5474_v15 }
 0x921   : > { %v10322_v61 = vpop.f32.mrf.mxu2 }
 0x922   : > { %6447 = vmatmul.msk.bf16.gmra.mxu3 %vm1085_vm6, %v4419_v41  ;;  %v5612_v39 = vpop.permute.xlu2 %5611  ;;  %7085 = vpow2.f32 %v4878_v50  ;;  %v7272_v41 = vld [vmem:[#allocation2 + $0x28] sm:$0xff] }
 0x923   : > { %v5056_v31 = vpop.permute.xlu1 %5055  ;;  %5633 = vmatpush.bf16.msrb.mxu0 %v5612_v39  ;;  %v10328_v29 = vpop.eup %7083 }
 0x924   : > { %5682 = vrot.lane.b32.xlu1 %v7270_v37, %s7306_s29  ;;  %5077 = vmatpush.bf16.msrb.mxu3 %v5056_v31  ;;  %v5427_v37 = vpop.xlane.xlu0 %5426  ;;  %v4946_v31 = vpack.c.bf16 %v10309_v53, %v10309_v53  ;;  %v4948_v36 = vpack.c.bf16 %v10328_v29, %v10328_v29 }
 0x925   : > { %6490 = vmatmul.msk.bf16.gmra.mxu0 %vm1085_vm6, %v4974_v49  ;;  %v5473_v27 = vsub.f32 %v10132_v32, %v5427_v37  ;;  %v10326_v49 = vpop.f32.mrf.mxu0 }
 0x926   : > { %v4970_v47 = vunpack.c.l.b16 %v4946_v31  ;;  %v5037_v31 = vunpack.c.l.b16 %v4948_v36 }
 0x927   : > { %v5489_v39 = vmul.f32 1.442695, %v5473_v27 }
 0x928   : > { %5678 = vrot.lane.b32.xlu2 %v7271_v56, %s7306_s29  ;;  %v4975_v62 = vpack.c.b16 %v4971_v8, %v4970_v47  ;;  %v10330_v32 = vpop.eup %7085 }
 0x929   : > { %7087 = vpow2.f32 %v5489_v39  ;;  %v10335_v58 = vpop.f32.mrf.mxu2  ;;  %v4949_v37 = vpack.c.bf16 %v10330_v32, %v10330_v32 }
 0x92a   : > { %7089 = vpow2.f32 %v5491_v1 }
 0x92b   : > { %v5052_v14 = vpop.permute.xlu1 %5051  ;;  %v5038_v15 = vunpack.c.l.b16 %v4949_v37 }
 0x92d   : > { %v10339_v27 = vpop.f32.mrf.mxu0  ;;  %v5045_v8 = vpack.c.b16 %v5038_v15, %v5037_v31  ;;  %v5458_v31 = vsel %vm1085_vm6, %v10322_v61, -inf }
 0x92e   : > { %11174 = vst [vmem:[#allocation20_spill] sm:$0xff] %v10339_v27 }
 0x92f   : > { %v7088_v48 = vpop.eup %7087 }
 0x930   : > { %5680 = vrot.lane.b32.xlu0 %v7272_v41, %s7306_s29  ;;  %v5569_v41 = vpack.c.bf16 %v7088_v48, %v7088_v48 }
 0x931   : > { %v10346_v1 = vpop.f32.mrf.mxu2 }
 0x933   : > { %v5050_v56 = vpop.permute.xlu1 %5049 }
 0x934   : > { %v5054_v20 = vpop.permute.xlu0 %5053 }
 0x935   : > { %5078 = vmatpush.bf16.msrb.mxu3 %v5054_v20  ;;  %6491 = vmatmul.msk.bf16.gmra.mxu0 %vm1085_vm6, %v4975_v62  ;;  %v10341_v20 = vpop.eup %7089  ;;  %v10348_v37 = vpop.f32.mrf.mxu0 }
 0x936   : > { %v5570_v39 = vpack.c.bf16 %v10341_v20, %v10341_v20  ;;  %11175 = vst [vmem:[#allocation21_spill] sm:$0xff] %v10348_v37 }
 0x938   : > { %v5594_v36 = vunpack.c.l.b16 %v5570_v39  ;;  %v5455_v39 = vsel %vm1085_vm6, %v10305_v13, -inf }
 0x939   : > { %5079 = vmatpush.bf16.msrb.mxu3 %v5052_v14  ;;  %v5593_v14 = vunpack.c.l.b16 %v5569_v41 }
 0x93b   : > { %v5608_v50 = vpop.permute.xlu1 %5607  ;;  %v5601_v27 = vpack.c.b16 %v5594_v36, %v5593_v14 }
 0x93c   : > { %v5610_v47 = vpop.permute.xlu0 %5609 }
 0x93d   : > { %5080 = vmatpush.bf16.msrb.mxu3 %v5050_v56  ;;  %5634 = vmatpush.bf16.msrb.mxu0 %v5610_v47  ;;  %v10351_v56 = vpop.f32.mrf.mxu2  ;;  %v10355_v15 = vpop.f32.mrf.mxu0 }
 0x940   : > { %6492 = vmatmul.msk.bf16.vlgmr.msrb.gmra.mxu3 %vm1085_vm6, %v5045_v8  ;;  %v5467_v8 = vsel %vm1085_vm6, %v10351_v56, -inf }
 0x941   : > { %5635 = vmatpush.bf16.msrb.mxu0 %v5608_v50  ;;  %v5461_v50 = vsel %vm1085_vm6, %v10335_v58, -inf }
 0x943   : > { %v5606_v62 = vpop.permute.xlu1 %5605 }
 0x945   : > { %5636 = vmatpush.bf16.msrb.mxu0 %v5606_v62  ;;  %v10359_v47 = vpop.f32.mrf.mxu2  ;;  %v10363_v41 = vpop.f32.mrf.mxu0  ;;  %v4263_v62 = vsel %vm1085_vm6, %v9966_v63, 0.0 }
 0x948   : > { %6536 = vmatmul.msk.bf16.vlgmr.msrb.gmra.mxu0 %vm1085_vm6, %v5601_v27  ;;  %v5470_v27 = vsel %vm1085_vm6, %v10359_v47, -inf }
 0x94e   : > { %5459 = vmax.xlane.f32.xlu1 %v5458_v31  ;;  %v4266_v31 = vsel %vm1085_vm6, %v9976_v30, 0.0  ;;  %v3637_v30 = vsel %vm1085_vm6, %v9871_v17, 0.0 }
 0x951   : > { %5462 = vmax.xlane.f32.xlu2 %v5461_v50  ;;  %v5464_v50 = vsel %vm1085_vm6, %v10346_v1, -inf }
 0x956   : > { %5468 = vmax.xlane.f32.xlu1 %v5467_v8  ;;  %v10376_v8 = vpop.f32.mrf.mxu0 }
 0x959   : > { %5471 = vmax.xlane.f32.xlu2 %v5470_v27 }
 0x95a   : > { %5456 = vmax.xlane.f32.xlu0 %v5455_v39  ;;  %v4895_v39 = vsel %vm1085_vm6, %v10170_v33, 0.0  ;;  %v3640_v33 = vsel %vm1085_vm6, %v9893_v34, 0.0  ;;  %v4892_v34 = vsel %vm1085_vm6, %v10172_v42, 0.0 }
 0x95b   : > { %v4831_v14 = vpop.xlane.xlu2 %4830 }
 0x95c   : > { %v4855_v36 = vsub.f32 %v10189_v9, %v4831_v14  ;;  %v5521_v14 = vsel %vm1085_vm6, %v7088_v48, 0.0 }
 0x95e   : > { %4264 = vadd.xlane.f32.xlu1 %v4263_v62  ;;  %v4882_v27 = vmul.f32 1.442695, %v4855_v36  ;;  %v10384_v62 = vpop.f32.mrf.mxu0 }
 0x960   : > { %7091 = vpow2.f32 %v4882_v27 }
 0x961   : > { %4267 = vadd.xlane.f32.xlu2 %v4266_v31 }
 0x962   : > { %5465 = vmax.xlane.f32.xlu0 %v5464_v50 }
 0x963   : > { %v4834_v37 = vpop.xlane.xlu2 %4833 }
 0x966   : > { %4896 = vadd.xlane.f32.xlu1 %v4895_v39  ;;  %v10388_v36 = vpop.eup %7091  ;;  %v4856_v39 = vsub.f32 %v10193_v18, %v4834_v37  ;;  %v10403_v18 = vpop.f32.mrf.mxu0  ;;  %v4272_v37 = vsel %vm1085_vm6, %v10065_v16, 0.0 }
 0x967   : > { %v4828_v63 = vpop.xlane.xlu0 %4827 }
 0x968   : > { %v4854_v9 = vsub.f32 %v10182_v59, %v4828_v63  ;;  %v3643_v63 = vsel %vm1085_vm6, %v9889_v21, 0.0  ;;  %v4884_v21 = vmul.f32 1.442695, %v4856_v39  ;;  %v5524_v39 = vsel %vm1085_vm6, %v10341_v20, 0.0 }
 0x969   : > { %5522 = vadd.xlane.f32.xlu2 %v5521_v14 }
 0x96a   : > { %v4880_v31 = vmul.f32 1.442695, %v4854_v9  ;;  %3638 = vadd.xlane.f32.xlu0 %v3637_v30  ;;  %v4951_v9 = vpack.c.bf16 %v10388_v36, %v10388_v36 }
 0x96b   : > { %v5439_v50 = vpop.xlane.xlu2 %5438 }
 0x96c   : > { %7093 = vpow2.f32 %v4880_v31 }
 0x96e   : > { %v5433_v27 = vpop.xlane.xlu1 %5432  ;;  %3641 = vadd.xlane.f32.xlu1 %v3640_v33 }
 0x96f   : > { %v5475_v59 = vsub.f32 %v10187_v52, %v5433_v27  ;;  %v5436_v48 = vpop.xlane.xlu0 %5435  ;;  %v5040_v27 = vunpack.c.l.b16 %v4951_v9 }
 0x970   : > { %v5476_v17 = vsub.f32 %v10191_v2, %v5436_v48  ;;  %v5477_v48 = vsub.f32 %v10195_v60, %v5439_v50 }
 0x971   : > { %v5493_v14 = vmul.f32 1.442695, %v5475_v59  ;;  %3644 = vadd.xlane.f32.xlu2 %v3643_v63  ;;  %v4898_v63 = vsel %vm1085_vm6, %v10267_v11, 0.0 }
 0x972   : > { %v10399_v30 = vpop.eup %7093  ;;  %v5495_v31 = vmul.f32 1.442695, %v5476_v17  ;;  %4893 = vadd.xlane.f32.xlu0 %v4892_v34  ;;  %v5497_v60 = vmul.f32 1.442695, %v5477_v48 }
 0x973   : > { %v4950_v52 = vpack.c.bf16 %v10399_v30, %v10399_v30  ;;  %7095 = vpow2.f32 %v5493_v14  ;;  %v4840_v2 = vpop.xlane.xlu2 %4839 }
 0x974   : > { %7097 = vpow2.f32 %v5495_v31 }
 0x975   : > { %v5039_v33 = vunpack.c.l.b16 %v4950_v52  ;;  %7099 = vpow2.f32 %v4884_v21 }
 0x976   : > { %4273 = vadd.xlane.f32.xlu1 %v4272_v37  ;;  %v4843_v52 = vpop.xlane.xlu1 %4842 }
 0x977   : > { %v4837_v42 = vpop.xlane.xlu0 %4836  ;;  %v5046_v59 = vpack.c.b16 %v5040_v27, %v5039_v33  ;;  %v10417_v33 = vpop.f32.mrf.mxu0  ;;  %v4859_v20 = vsub.f32 %v10229_v40, %v4843_v52 }
 0x978   : > { %v4857_v17 = vsub.f32 %v10199_v26, %v4837_v42 }
 0x979   : > { %v7096_v14 = vpop.eup %7095  ;;  %6493 = vmatmul.msk.bf16.gmra.mxu3 %vm1085_vm6, %v5046_v59  ;;  %4899 = vadd.xlane.f32.xlu2 %v4898_v63  ;;  %v4858_v59 = vsub.f32 %v10209_v45, %v4840_v2 }
 0x97a   : > { %v7098_v16 = vpop.eup %7097  ;;  %v5571_v9 = vpack.c.bf16 %v7096_v14, %v7096_v14  ;;  %v4886_v34 = vmul.f32 1.442695, %v4857_v17  ;;  %5525 = vadd.xlane.f32.xlu0 %v5524_v39  ;;  %v5527_v26 = vsel %vm1085_vm6, %v7096_v14, 0.0  ;;  %v4269_v14 = vsel %vm1085_vm6, %v10056_v44, 0.0 }
 0x97b   : > { %v5572_v31 = vpack.c.bf16 %v7098_v16, %v7098_v16  ;;  %v5448_v21 = vpop.xlane.xlu2 %5447  ;;  %v10415_v37 = vpop.eup %7099  ;;  %v5530_v48 = vsel %vm1085_vm6, %v7098_v16, 0.0  ;;  %v4890_v39 = vmul.f32 1.442695, %v4859_v20  ;;  %v4888_v2 = vmul.f32 1.442695, %v4858_v59 }
 0x97c   : > { %v5595_v50 = vunpack.c.l.b16 %v5571_v9  ;;  %7101 = vpow2.f32 %v4886_v34  ;;  %v4952_v63 = vpack.c.bf16 %v10415_v37, %v10415_v37  ;;  %v3649_v16 = vsel %vm1085_vm6, %v9922_v43, 0.0 }
 0x97d   : > { %v5596_v11 = vunpack.c.l.b16 %v5572_v31  ;;  %7103 = vpow2.f32 %v5497_v60  ;;  %v4275_v20 = vsel %vm1085_vm6, %v10079_v19, 0.0  ;;  %v4904_v19 = vsel %vm1085_vm6, %v10285_v28, 0.0 }
 0x97e   : > { %5528 = vadd.xlane.f32.xlu1 %v5527_v26  ;;  %v5041_v34 = vunpack.c.l.b16 %v4952_v63  ;;  %v5480_v26 = vsub.f32 %v10240_v0, %v5448_v21 }
 0x97f   : > { %v5442_v27 = vpop.xlane.xlu0 %5441  ;;  %v5602_v42 = vpack.c.b16 %v5596_v11, %v5595_v50  ;;  %v10436_v50 = vpop.f32.mrf.mxu0 }
 0x980   : > { %v5478_v17 = vsub.f32 %v10204_v12, %v5442_v27  ;;  %v4901_v27 = vsel %vm1085_vm6, %v10248_v6, 0.0  ;;  %v5503_v0 = vmul.f32 1.442695, %v5480_v26 }
 0x981   : > { %6537 = vmatmul.msk.bf16.gmra.mxu0 %vm1085_vm6, %v5602_v42  ;;  %5531 = vadd.xlane.f32.xlu2 %v5530_v48 }
 0x982   : > { %v10428_v40 = vpop.eup %7101  ;;  %v5499_v9 = vmul.f32 1.442695, %v5478_v17  ;;  %4270 = vadd.xlane.f32.xlu0 %v4269_v14  ;;  %v5451_v14 = vpop.xlane.xlu1 %5450 }
 0x983   : > { %v4953_v45 = vpack.c.bf16 %v10428_v40, %v10428_v40  ;;  %v5685_v12 = vpop.permute.xlu2 %5684  ;;  %v10434_v52 = vpop.eup %7103 }
 0x984   : > { %7105 = vpow2.f32 %v5499_v9  ;;  %5706 = vmatpush.bf16.msra.mxu3 %v5685_v12  ;;  %v5573_v43 = vpack.c.bf16 %v10434_v52, %v10434_v52  ;;  %v4907_v12 = vsel %vm1085_vm6, %v10280_v54, 0.0 }
 0x985   : > { %v5042_v31 = vunpack.c.l.b16 %v4953_v45  ;;  %7107 = vpow2.f32 %v4890_v39 }
 0x986   : > { %3650 = vadd.xlane.f32.xlu1 %v3649_v16  ;;  %7109 = vpow2.f32 %v4888_v2  ;;  %v5481_v2 = vsub.f32 %v10244_v22, %v5451_v14  ;;  %v3646_v16 = vsel %vm1085_vm6, %v9920_v7, 0.0  ;;  %v3652_v7 = vsel %vm1085_vm6, %v9944_v38, 0.0  ;;  %v10480_v14 = vpop.f32.mrf.mxu3 }
 0x987   : > { %v5445_v44 = vpop.xlane.xlu0 %5444  ;;  %v5047_v60 = vpack.c.b16 %v5042_v31, %v5041_v34  ;;  %v10464_v34 = vpop.f32.mrf.mxu0 }
 0x988   : > { %v5479_v11 = vsub.f32 %v10216_v23, %v5445_v44  ;;  %v5597_v23 = vunpack.c.l.b16 %v5573_v43  ;;  %v5505_v26 = vmul.f32 1.442695, %v5481_v2 }
 0x989   : > { %6494 = vmatmul.msk.bf16.gmra.mxu3 %vm1085_vm6, %v5047_v60  ;;  %4276 = vadd.xlane.f32.xlu2 %v4275_v20 }
 0x98a   : > { %v7106_v42 = vpop.eup %7105  ;;  %v5501_v59 = vmul.f32 1.442695, %v5479_v11  ;;  %4902 = vadd.xlane.f32.xlu0 %v4901_v27 }
 0x98b   : > { %v5574_v17 = vpack.c.bf16 %v7106_v42, %v7106_v42  ;;  %v10447_v48 = vpop.eup %7107  ;;  %v5536_v54 = vsel %vm1085_vm6, %v7106_v42, 0.0 }
 0x98c   : > { %v10451_v63 = vpop.eup %7109  ;;  %7111 = vpow2.f32 %v5501_v59  ;;  %v4955_v6 = vpack.c.bf16 %v10447_v48, %v10447_v48  ;;  %v4278_v59 = vsel %vm1085_vm6, %v10081_v46, 0.0 }
 0x98d   : > { %v5598_v21 = vunpack.c.l.b16 %v5574_v17  ;;  %7113 = vpow2.f32 %v5503_v0  ;;  %v4954_v28 = vpack.c.bf16 %v10451_v63, %v10451_v63 }
 0x98e   : > { %4905 = vadd.xlane.f32.xlu1 %v4904_v19  ;;  %v5044_v31 = vunpack.c.l.b16 %v4955_v6  ;;  %v4281_v19 = vsel %vm1085_vm6, %v10109_v4, 0.0  ;;  %v4284_v6 = vsel %vm1085_vm6, %v10105_v35, 0.0  ;;  %v5679_v35 = vpop.permute.xlu2 %5678 }
 0x98f   : > { %v5454_v39 = vpop.xlane.xlu0 %5453  ;;  %v5603_v9 = vpack.c.b16 %v5598_v21, %v5597_v23  ;;  %v5043_v60 = vunpack.c.l.b16 %v4954_v28  ;;  %v10472_v17 = vpop.f32.mrf.mxu0  ;;  %v4913_v28 = vsel %vm1085_vm6, %v10312_v3, 0.0  ;;  %v4910_v3 = vsel %vm1085_vm6, %v10309_v53, 0.0 }
 0x990   : > { %v5482_v45 = vsub.f32 %v10282_v24, %v5454_v39  ;;  %v5533_v39 = vsel %vm1085_vm6, %v10434_v52, 0.0  ;;  %v3655_v52 = vsel %vm1085_vm6, %v9942_v5, 0.0 }
 0x991   : > { %6538 = vmatmul.msk.bf16.gmra.mxu0 %vm1085_vm6, %v5603_v9  ;;  %4908 = vadd.xlane.f32.xlu2 %v4907_v12  ;;  %v5048_v43 = vpack.c.b16 %v5044_v31, %v5043_v60  ;;  %v10497_v31 = vpop.f32.mrf.mxu3 }
 0x992   : > { %3647 = vadd.xlane.f32.xlu0 %v3646_v16  ;;  %v5507_v44 = vmul.f32 1.442695, %v5482_v45  ;;  %v7112_v24 = vpop.eup %7111 }
 0x993   : > { %v7114_v11 = vpop.eup %7113  ;;  %v5575_v22 = vpack.c.bf16 %v7112_v24, %v7112_v24 }
 0x994   : > { %7115 = vpow2.f32 %v5507_v44  ;;  %v5576_v27 = vpack.c.bf16 %v7114_v11, %v7114_v11  ;;  %v5539_v44 = vsel %vm1085_vm6, %v7112_v24, 0.0  ;;  %v5542_v5 = vsel %vm1085_vm6, %v7114_v11, 0.0 }
 0x995   : > { %7117 = vpow2.f32 %v5505_v26  ;;  %v5599_v42 = vunpack.c.l.b16 %v5575_v22 }
 0x996   : > { %v5683_v20 = vpop.permute.xlu1 %5682  ;;  %5537 = vadd.xlane.f32.xlu1 %v5536_v54  ;;  %v5600_v23 = vunpack.c.l.b16 %v5576_v27  ;;  %7119 = vrcp.f32 %v9862_v57 }
 0x997   : > { %5707 = vmatpush.bf16.msra.mxu3 %v5683_v20  ;;  %v10491_v45 = vpop.f32.mrf.mxu0 }
 0x998   : > { %v5604_v21 = vpack.c.b16 %v5600_v23, %v5599_v42 }
 0x999   : > { %6495 = vmatmul.msk.bf16.gmra.mxu3 %vm1085_vm6, %v5048_v43  ;;  %3653 = vadd.xlane.f32.xlu2 %v3652_v7  ;;  %v10516_v42 = vpop.f32.mrf.mxu3 }
 0x99a   : > { %4279 = vadd.xlane.f32.xlu0 %v4278_v59  ;;  %v10474_v0 = vpop.eup %7115 }
 0x99b   : > { %v10478_v38 = vpop.eup %7117  ;;  %v5578_v46 = vpack.c.bf16 %v10474_v0, %v10474_v0 }
 0x99c   : > { %v5577_v4 = vpack.c.bf16 %v10478_v38, %v10478_v38  ;;  %v7120_v26 = vpop.eup %7119 }
 0x99d   : > { %v5667_v12 = vunpack.c.l.b16 %v5578_v46  ;;  %v3860_v54 = vmul.f32 %v7120_v26, %v10251_v55 }
 0x99e   : > { %4282 = vadd.xlane.f32.xlu1 %v4281_v19  ;;  %v5666_v2 = vunpack.c.l.b16 %v5577_v4 }
 0x99f   : > { %v10502_v60 = vpop.f32.mrf.mxu0  ;;  %v3876_v22 = vpack.c.bf16 %v3860_v54, %v3860_v54 }
 0x9a0   : > { %v5674_v16 = vpack.c.b16 %v5667_v12, %v5666_v2 }
 0x9a1   : > { %6539 = vmatmul.msk.bf16.gmra.mxu0 %vm1085_vm6, %v5604_v21  ;;  %4285 = vadd.xlane.f32.xlu2 %v4284_v6  ;;  %v10525_v12 = vpop.f32.mrf.mxu3 }
 0x9a2   : > { %5534 = vadd.xlane.f32.xlu0 %v5533_v39  ;;  %v5681_v9 = vpop.permute.xlu0 %5680 }
 0x9a3   : > { %5708 = vmatpush.bf16.msra.mxu3 %v5681_v9 }
 0x9a6   : > { %4914 = vadd.xlane.f32.xlu1 %v4913_v28 }
 0x9a7   : > { %5709 = vmatpush.bf16.msra.mxu3 %v5679_v35  ;;  %v10508_v20 = vpop.f32.mrf.mxu0 }
 0x9aa   : > { %3656 = vadd.xlane.f32.xlu0 %v3655_v52  ;;  %6540 = vmatmul.msk.bf16.vlgmr.msra.gmra.mxu3 %vm1085_vm6, %v5674_v16 }
 0x9ae   : > { %5540 = vadd.xlane.f32.xlu1 %v5539_v44 }
 0x9af   : > { %v10511_v57 = vpop.f32.mrf.mxu0 }
 0x9b2   : > { %4911 = vadd.xlane.f32.xlu0 %v4910_v3 }
 0x9b6   : > { %5543 = vadd.xlane.f32.xlu1 %v5542_v5 }
 0x9b7   : > { %v10514_v27 = vpop.f32.mrf.mxu0 }
 0x9b9   : > { %3908 = vrot.lane.b32.xlu2 %v3876_v22, %s7307_s30 }
 0x9bf   : > { %v10521_v6 = vpop.f32.mrf.mxu0 }
 0x9c1   : > { %v5460_v24 = vpop.xlane.xlu1 %5459 }
 0x9c2   : > { %v5484_v7 = vsub.f32 %v10322_v61, %v5460_v24  ;;  %v10538_v24 = vpop.f32.mrf.mxu3 }
 0x9c4   : > { %v5463_v43 = vpop.xlane.xlu2 %5462  ;;  %v5511_v59 = vmul.f32 1.442695, %v5484_v7 }
 0x9c5   : > { %v5485_v39 = vsub.f32 %v10335_v58, %v5463_v43 }
 0x9c6   : > { %7121 = vpow2.f32 %v5511_v59 }
 0x9c7   : > { %v5513_v16 = vmul.f32 1.442695, %v5485_v39  ;;  %v10534_v22 = vpop.f32.mrf.mxu0 }
 0x9c9   : > { %v5469_v53 = vpop.xlane.xlu1 %5468 }
 0x9cc   : > { %v5472_v55 = vpop.xlane.xlu2 %5471  ;;  %v10519_v46 = vpop.eup %7121 }
 0x9cd   : > { %v5457_v11 = vpop.xlane.xlu0 %5456  ;;  %v5580_v28 = vpack.c.bf16 %v10519_v46, %v10519_v46  ;;  %v5488_v59 = vsub.f32 %v10359_v47, %v5472_v55 }
 0x9ce   : > { %v5483_v23 = vsub.f32 %v10305_v13, %v5457_v11 }
 0x9cf   : > { %v5669_v3 = vunpack.c.l.b16 %v5580_v28  ;;  %v5519_v47 = vmul.f32 1.442695, %v5488_v59 }
 0x9d0   : > { %v5509_v19 = vmul.f32 1.442695, %v5483_v23 }
 0x9d1   : > { %v4265_v21 = vpop.xlane.xlu1 %4264 }
 0x9d2   : > { %7123 = vpow2.f32 %v5509_v19 }
 0x9d3   : > { %7125 = vrcp.f32 %v4265_v21 }
 0x9d4   : > { %v4268_v61 = vpop.xlane.xlu2 %4267 }
 0x9d5   : > { %v5466_v4 = vpop.xlane.xlu0 %5465 }
 0x9d6   : > { %v5486_v9 = vsub.f32 %v10346_v1, %v5466_v4  ;;  %v5487_v4 = vsub.f32 %v10351_v56, %v5469_v53 }
 0x9d8   : > { %v10529_v13 = vpop.eup %7123  ;;  %v5515_v2 = vmul.f32 1.442695, %v5486_v9 }
 0x9d9   : > { %v7126_v35 = vpop.eup %7125  ;;  %v5579_v52 = vpack.c.bf16 %v10529_v13, %v10529_v13  ;;  %v4897_v11 = vpop.xlane.xlu1 %4896 }
 0x9da   : > { %v4489_v44 = vmul.f32 %v7126_v35, %v10363_v41  ;;  %7127 = vpow2.f32 %v5515_v2  ;;  %v10553_v2 = vpop.f32.mrf.mxu0  ;;  %v5517_v35 = vmul.f32 1.442695, %v5487_v4 }
 0x9db   : > { %v5668_v58 = vunpack.c.l.b16 %v5579_v52  ;;  %7129 = vpow2.f32 %v5513_v16  ;;  %v10556_v16 = vpop.f32.mrf.mxu3 }
 0x9dc   : > { %v5523_v26 = vpop.xlane.xlu2 %5522  ;;  %v4505_v1 = vpack.c.bf16 %v4489_v44, %v4489_v44 }
 0x9dd   : > { %v3639_v54 = vpop.xlane.xlu0 %3638  ;;  %v5675_v5 = vpack.c.b16 %v5669_v3, %v5668_v58 }
 0x9de   : > { %7131 = vrcp.f32 %v3639_v54  ;;  %4537 = vrot.lane.b32.xlu1 %v4505_v1, %s7308_s7 }
 0x9df   : > { %6541 = vmatmul.msk.bf16.gmra.mxu3 %vm1085_vm6, %v5675_v5  ;;  %7133 = vrcp.f32 %v4268_v61 }
 0x9e0   : > { %v10540_v43 = vpop.eup %7127 }
 0x9e1   : > { %v10542_v41 = vpop.eup %7129  ;;  %v5582_v19 = vpack.c.bf16 %v10540_v43, %v10540_v43  ;;  %v10562_v58 = vpop.xlane.xlu1 %3641 }
 0x9e2   : > { %v5581_v61 = vpack.c.bf16 %v10542_v41, %v10542_v41  ;;  %v5638_v59 = vpop.f32.mrf.mxu0 }
 0x9e3   : > { %v5671_v55 = vunpack.c.l.b16 %v5582_v19 }
 0x9e4   : > { %v7132_v7 = vpop.eup %7131  ;;  %v10545_v23 = vpop.xlane.xlu2 %3644 }
 0x9e5   : > { %v3861_v21 = vmul.f32 %v7132_v7, %v10275_v51  ;;  %v4894_v39 = vpop.xlane.xlu0 %4893  ;;  %v7134_v28 = vpop.eup %7133  ;;  %v5670_v51 = vunpack.c.l.b16 %v5581_v61 }
 0x9e6   : > { %7135 = vrcp.f32 %v4894_v39  ;;  %v4490_v56 = vmul.f32 %v7134_v28, %v10376_v8  ;;  %v10572_v39 = vpop.f32.mrf.mxu3 }
 0x9e7   : > { %v3877_v9 = vpack.c.bf16 %v3861_v21, %v3861_v21  ;;  %7137 = vrcp.f32 %v4897_v11  ;;  %v5676_v3 = vpack.c.b16 %v5671_v55, %v5670_v51 }
 0x9e8   : > { %7139 = vrcp.f32 %v5523_v26  ;;  %v4506_v26 = vpack.c.bf16 %v4490_v56, %v4490_v56 }
 0x9e9   : > { %3910 = vrot.lane.b32.xlu0 %v3877_v9, %s7307_s30  ;;  %7141 = vpow2.f32 %v5519_v47  ;;  %v10578_v55 = vpop.xlane.xlu1 %4273 }
 0x9ea   : > { %7143 = vpow2.f32 %v5517_v35 }
 0x9ec   : > { %v7136_v53 = vpop.eup %7135  ;;  %v10559_v52 = vpop.xlane.xlu2 %4899 }
 0x9ed   : > { %v5118_v44 = vmul.f32 %v7136_v53, %v10491_v45  ;;  %v7138_v1 = vpop.eup %7137  ;;  %v5526_v54 = vpop.xlane.xlu0 %5525 }
 0x9ee   : > { %v7140_v7 = vpop.eup %7139  ;;  %7145 = vrcp.f32 %v5526_v54  ;;  %v5119_v45 = vmul.f32 %v7138_v1, %v10502_v60  ;;  %v5640_v60 = vpop.f32.mrf.mxu0 }
 0x9ef   : > { %6542 = vmatmul.msk.bf16.gmra.mxu3 %vm1085_vm6, %v5676_v3  ;;  %v5134_v5 = vpack.c.bf16 %v5118_v44, %v5118_v44  ;;  %v10567_v8 = vpop.eup %7141  ;;  %v5747_v11 = vmul.f32 %v7140_v7, %v5638_v59  ;;  %v10584_v3 = vpop.f32.mrf.mxu3  ;;  %7147 = vrcp.f32 %v10545_v23  ;;  %v11177_v23 = vld [vmem:[#allocation10_spill] sm:$0xff] }
 0x9f0   : > { %v10570_v19 = vpop.eup %7143  ;;  %v5584_v4 = vpack.c.bf16 %v10567_v8, %v10567_v8  ;;  %v5135_v9 = vpack.c.bf16 %v5119_v45, %v5119_v45  ;;  %v4916_v45 = vsel %vm1085_vm6, %v10328_v29, 0.0 }
 0x9f1   : > { %4539 = vrot.lane.b32.xlu0 %v4506_v26, %s7308_s7  ;;  %5166 = vrot.lane.b32.xlu2 %v5134_v5, %s7309_s8  ;;  %v5583_v61 = vpack.c.bf16 %v10570_v19, %v10570_v19  ;;  %v5763_v28 = vpack.c.bf16 %v5747_v11, %v5747_v11  ;;  %v10588_v54 = vpop.xlane.xlu1 %5528  ;;  %v3661_v5 = vsel %vm1085_vm6, %v9970_v10, 0.0 }
 0x9f2   : > { %v5673_v35 = vunpack.c.l.b16 %v5584_v4 }
 0x9f3   : > { %v5672_v51 = vunpack.c.l.b16 %v5583_v61 }
 0x9f4   : > { %v5532_v21 = vpop.xlane.xlu2 %5531  ;;  %v7146_v47 = vpop.eup %7145 }
 0x9f5   : > { %v5748_v56 = vmul.f32 %v7146_v47, %v5640_v60  ;;  %v5677_v44 = vpack.c.b16 %v5673_v35, %v5672_v51  ;;  %v4271_v4 = vpop.xlane.xlu0 %4270  ;;  %v11176_v35 = vld [vmem:[#allocation4_spill] sm:$0xff] }
 0x9f6   : > { %v3658_v60 = vsel %vm1085_vm6, %v11176_v35, 0.0 }
 0x9f7   : > { %v5764_v1 = vpack.c.bf16 %v5748_v56, %v5748_v56 }
 0x9f9   : > { %5168 = vrot.lane.b32.xlu0 %v5135_v9, %s7309_s8  ;;  %5795 = vrot.lane.b32.xlu2 %v5763_v28, %s7310_s9  ;;  %v10594_v7 = vpop.xlane.xlu1 %3650  ;;  %v7148_v28 = vpop.eup %7147 }
 0x9fa   : > { %v3863_v29 = vmul.f32 %v7148_v28, %v10314_v25 }
 0x9fc   : > { %v10582_v53 = vpop.xlane.xlu2 %4276  ;;  %v3879_v56 = vpack.c.bf16 %v3863_v29, %v3863_v29 }
 0x9fd   : > { %v4903_v10 = vpop.xlane.xlu0 %4902 }
 0x9fe   : > { %7149 = vrcp.f32 %v4903_v10  ;;  %v5643_v51 = vpop.f32.mrf.mxu0 }
 0x9ff   : > { %6543 = vmatmul.msk.bf16.gmra.mxu3 %vm1085_vm6, %v5677_v44  ;;  %7151 = vrcp.f32 %v5532_v21  ;;  %v11179_v21 = vld [vmem:[#allocation19_spill] sm:$0xff] }
 0xa00   : > { %7153 = vrcp.f32 %v10562_v58  ;;  %v5545_v58 = vsel %vm1085_vm6, %v10478_v38, 0.0 }
 0xa01   : > { %5797 = vrot.lane.b32.xlu0 %v5764_v1, %s7310_s9  ;;  %v10602_v61 = vpop.xlane.xlu1 %4905  ;;  %v4290_v1 = vsel %vm1085_vm6, %v11177_v23, 0.0  ;;  %7155 = vrcp.f32 %v4271_v4 }
 0xa02   : > { %7157 = vrcp.f32 %v10559_v52 }
 0xa03   : > { %7159 = vrcp.f32 %v10588_v54 }
 0xa04   : > { %v10590_v26 = vpop.xlane.xlu2 %4908  ;;  %v7150_v44 = vpop.eup %7149  ;;  %7161 = vrcp.f32 %v10578_v55 }
 0xa05   : > { %v5121_v35 = vmul.f32 %v7150_v44, %v10511_v57  ;;  %v10619_v10 = vpop.xlane.xlu0 %3647  ;;  %v7152_v29 = vpop.eup %7151  ;;  %7163 = vrcp.f32 %v10582_v53 }
 0xa06   : > { %v5645_v28 = vpop.f32.mrf.mxu0  ;;  %v7154_v57 = vpop.eup %7153  ;;  %7165 = vrcp.f32 %v10619_v10  ;;  %v11185_v10 = vld [vmem:[#allocation20_spill] sm:$0xff] }
 0xa07   : > { %v5137_v25 = vpack.c.bf16 %v5121_v35, %v5121_v35  ;;  %7167 = vrcp.f32 %v10594_v7 }
 0xa08   : > { %3662 = vadd.xlane.f32.xlu1 %v3661_v5 }
 0xa09   : > { %v10606_v47 = vpop.xlane.xlu1 %5537 }
 0xa0c   : > { %v10596_v59 = vpop.xlane.xlu2 %3653 }
 0xa10   : > { %4917 = vadd.xlane.f32.xlu1 %v4916_v45  ;;  %v11178_v45 = vld [vmem:[#allocation7_spill] sm:$0xff] }
 0xa11   : > { %v10614_v5 = vpop.xlane.xlu1 %4282 }
 0xa14   : > { %v10600_v11 = vpop.xlane.xlu2 %4285 }
 0xa19   : > { %v10625_v23 = vpop.xlane.xlu1 %4914 }
 0xa1c   : > { %v3909_v9 = vpop.permute.xlu2 %3908 }
 0xa1d   : > { %3957 = vst.msk [vmem:[#allocation3] sm:$0xf] %vm3956_vm10, %v3909_v9  ;;  %v4287_v9 = vsel %vm1085_vm6, %v11178_v45, 0.0  ;;  %v3862_v45 = vmul.f32 %v7154_v57, %v11179_v21 }
 0xa21   : > { %v10633_v35 = vpop.xlane.xlu1 %5540 }
 0xa22   : > { %3659 = vadd.xlane.f32.xlu2 %v3658_v60  ;;  %v4919_v60 = vsel %vm1085_vm6, %v10330_v32, 0.0  ;;  %v7156_v32 = vpop.eup %7155 }
 0xa23   : > { %v4491_v4 = vmul.f32 %v7156_v32, %v10384_v62  ;;  %v7158_v38 = vpop.eup %7157 }
 0xa29   : > { %3914 = vrot.lane.b32.xlu1 %v3879_v56, %s7307_s30  ;;  %v5750_v56 = vmul.f32 %v7152_v29, %v5645_v28  ;;  %v5548_v28 = vsel %vm1085_vm6, %v10474_v0, 0.0  ;;  %v10643_v29 = vpop.xlane.xlu1 %5543  ;;  %v7160_v0 = vpop.eup %7159 }
 0xa2a   : > { %4291 = vadd.xlane.f32.xlu2 %v4290_v1  ;;  %v10627_v1 = vpop.xlane.xlu0 %4279  ;;  %v7162_v21 = vpop.eup %7161 }
 0xa2b   : > { %4288 = vadd.xlane.f32.xlu0 %v4287_v9  ;;  %v5766_v44 = vpack.c.bf16 %v5750_v56, %v5750_v56  ;;  %v3878_v9 = vpack.c.bf16 %v3862_v45, %v3862_v45  ;;  %v5120_v56 = vmul.f32 %v7158_v38, %v10508_v20  ;;  %v5749_v20 = vmul.f32 %v7160_v0, %v5643_v51  ;;  %v6672_v51 = vld [vmem:[%s325_s14] sm:$0xff] }
 0xa2c   : > { %v4492_v45 = vmul.f32 %v7162_v21, %v10403_v18  ;;  %v4925_v38 = vsel %vm1085_vm6, %v10388_v36, 0.0  ;;  %v5554_v0 = vsel %vm1085_vm6, %v10519_v46, 0.0  ;;  %v11182_v21 = vld [vmem:[#allocation12_spill] sm:$0xff]  ;;  %v4922_v46 = vsel %vm1085_vm6, %v10399_v30, 0.0 }
 0xa2d   : > { %v5136_v52 = vpack.c.bf16 %v5120_v56, %v5120_v56  ;;  %v3664_v36 = vsel %vm1085_vm6, %v11182_v21, 0.0  ;;  %7169 = vrcp.f32 %v10627_v1 }
 0xa2e   : > { %v4508_v32 = vpack.c.bf16 %v4492_v45, %v4492_v45  ;;  %7171 = vrcp.f32 %v10602_v61  ;;  %v10708_v61 = vpop.f32.mrf.mxu3 }
 0xa2f   : > { %7173 = vrcp.f32 %v10590_v26 }
 0xa31   : > { %5172 = vrot.lane.b32.xlu1 %v5137_v25, %s7309_s8 }
 0xa32   : > { %4920 = vadd.xlane.f32.xlu2 %v4919_v60  ;;  %v10635_v25 = vpop.xlane.xlu0 %5534  ;;  %v4507_v60 = vpack.c.bf16 %v4491_v4, %v4491_v4 }
 0xa33   : > { %7175 = vrcp.f32 %v10635_v25 }
 0xa34   : > { %7177 = vrcp.f32 %v10606_v47 }
 0xa35   : > { %7179 = vrcp.f32 %v10614_v5 }
 0xa39   : > { %5801 = vrot.lane.b32.xlu1 %v5766_v44, %s7310_s9 }
 0xa3a   : > { %5546 = vadd.xlane.f32.xlu2 %v5545_v58  ;;  %v10646_v57 = vpop.xlane.xlu0 %3656  ;;  %v6673_v58 = vld [vmem:[%s325_s14 + $0x8] sm:$0xff] }
 0xa3b   : > { %5966 = vmatpush.bf16.msrb.mxu1 %v6673_v58  ;;  %7181 = vrcp.f32 %v10646_v57 }
 0xa3c   : > { %7183 = vrcp.f32 %v10596_v59  ;;  %v10786_v59 = vld [vmem:[%s328_s11] ss:$0 sm:$0xff] }
 0xa3d   : > { %7185 = vrcp.f32 %v10600_v11 }
 0xa3f   : > { %3912 = vrot.lane.b32.xlu0 %v3878_v9, %s7307_s30  ;;  %v5765_v9 = vpack.c.bf16 %v5749_v20, %v5749_v20  ;;  %5967 = vmatpush.bf16.msrb.mxu1 %v6672_v51  ;;  %v11183_v20 = vld [vmem:[#allocation13_spill] sm:$0xff] }
 0xa42   : > { %5549 = vadd.xlane.f32.xlu2 %v5548_v28  ;;  %v10658_v55 = vpop.xlane.xlu0 %4911  ;;  %v11180_v28 = vld [vmem:[#allocation9_spill] sm:$0xff] }
 0xa43   : > { %7187 = vrcp.f32 %v10658_v55 }
 0xa44   : > { %7189 = vrcp.f32 %v10625_v23 }
 0xa45   : > { %7191 = vrcp.f32 %v10633_v35 }
 0xa47   : > { %4541 = vrot.lane.b32.xlu0 %v4507_v60, %s7308_s7  ;;  %v3667_v60 = vsel %vm1085_vm6, %v11180_v28, 0.0 }
 0xa4b   : > { %v5167_v62 = vpop.permute.xlu2 %5166 }
 0xa4f   : > { %5170 = vrot.lane.b32.xlu0 %v5136_v52, %s7309_s8 }
 0xa50   : > { %v4538_v44 = vpop.permute.xlu1 %4537 }
 0xa51   : > { %4586 = vst.msk [vmem:[#allocation3] sm:$0xf] %vm4585_vm12, %v4538_v44 }
 0xa52   : > { %5215 = vst.msk [vmem:[#allocation3] sm:$0xf] %vm5214_vm1, %v5167_v62  ;;  %v5551_v62 = vsel %vm1085_vm6, %v10529_v13, 0.0  ;;  %v11184_v13 = vld [vmem:[#allocation15_spill] sm:$0xff] }
 0xa53   : > { %v5796_v54 = vpop.permute.xlu2 %5795  ;;  %v4296_v45 = vsel %vm1085_vm6, %v11184_v13, 0.0 }
 0xa54   : > { %5844 = vst.msk [vmem:[#allocation3] sm:$0xf] %vm5843_vm2, %v5796_v54  ;;  %v4293_v54 = vsel %vm1085_vm6, %v11183_v20, 0.0 }
 0xa57   : > { %5799 = vrot.lane.b32.xlu0 %v5765_v9, %s7310_s9  ;;  %v7164_v9 = vpop.eup %7163 }
 0xa58   : > { %v7166_v28 = vpop.eup %7165 }
 0xa59   : > { %v3864_v30 = vmul.f32 %v7166_v28, %v10326_v49 }
 0xa5a   : > { %4543 = vrot.lane.b32.xlu2 %v4508_v32, %s7308_s7  ;;  %v4493_v32 = vmul.f32 %v7164_v9, %v10417_v33  ;;  %v10722_v9 = vpop.f32.mrf.mxu3 }
 0xa5b   : > { %v3911_v4 = vpop.permute.xlu0 %3910 }
 0xa5c   : > { %3958 = vst.msk [vmem:[#allocation3 + $0x4] sm:$0xf] %vm3956_vm10, %v3911_v4  ;;  %v4509_v51 = vpack.c.bf16 %v4493_v32, %v4493_v32 }
 0xa63   : > { %3668 = vadd.xlane.f32.xlu1 %v3667_v60  ;;  %v4540_v18 = vpop.permute.xlu0 %4539  ;;  %v7168_v60 = vpop.eup %7167 }
 0xa64   : > { %4587 = vst.msk [vmem:[#allocation3 + $0x4] sm:$0xf] %vm4585_vm12, %v4540_v18  ;;  %v7170_v33 = vpop.eup %7169 }
 0xa65   : > { %v4494_v7 = vmul.f32 %v7170_v33, %v10436_v50  ;;  %v7172_v49 = vpop.eup %7171  ;;  %v11186_v33 = vld [vmem:[#allocation5_spill] sm:$0xff] }
 0xa66   : > { %v5122_v21 = vmul.f32 %v7172_v49, %v10514_v27  ;;  %v4931_v49 = vsel %vm1085_vm6, %v10428_v40, 0.0  ;;  %v11187_v40 = vld [vmem:[#allocation8_spill] sm:$0xff] }
 0xa68   : > { %v5138_v20 = vpack.c.bf16 %v5122_v21, %v5122_v21 }
 0xa6b   : > { %4926 = vadd.xlane.f32.xlu1 %v4925_v38  ;;  %v5169_v56 = vpop.permute.xlu0 %5168  ;;  %v3880_v38 = vpack.c.bf16 %v3864_v30, %v3864_v30 }
 0xa6c   : > { %5216 = vst.msk [vmem:[#allocation3 + $0x4] sm:$0xf] %vm5214_vm1, %v5169_v56  ;;  %v3865_v56 = vmul.f32 %v7168_v60, %v11185_v10  ;;  %v10729_v60 = vpop.f32.mrf.mxu3  ;;  %v4299_v10 = vsel %vm1085_vm6, %v11186_v33, 0.0  ;;  %v11190_v33 = vld [vmem:[#allocation21_spill] sm:$0xff] }
 0xa6e   : > { %v3881_v1 = vpack.c.bf16 %v3865_v56, %v3865_v56 }
 0xa73   : > { %5552 = vadd.xlane.f32.xlu1 %v5551_v62  ;;  %v5798_v52 = vpop.permute.xlu0 %5797 }
 0xa74   : > { %5845 = vst.msk [vmem:[#allocation3 + $0x4] sm:$0xf] %vm5843_vm2, %v5798_v52  ;;  %v5648_v52 = vpop.f32.mrf.mxu0 }
 0xa7b   : > { %5555 = vadd.xlane.f32.xlu1 %v5554_v0  ;;  %v6664_v44 = vld [vmem:[#allocation3] sm:$0xff]  ;;  %v10684_v58 = vpop.xlane.xlu1 %3662  ;;  %v4510_v0 = vpack.c.bf16 %v4494_v7, %v4494_v7  ;;  %v10737_v7 = vpop.f32.mrf.mxu3 }
 0xa7c   : > { %6584 = vmatmul.msk.bf16.vlgmr.msrb.gmra.mxu1 %vm11181_vm15, %v6664_v44  ;;  %v7174_v44 = vpop.eup %7173  ;;  %v5650_v25 = vpop.f32.mrf.mxu0  ;;  %vm11205_vm15 = vmmov %vm11203_vm0 }
 0xa7d   : > { %v5123_v26 = vmul.f32 %v7174_v44, %v10521_v6  ;;  %v5557_v44 = vsel %vm1085_vm6, %v10542_v41, 0.0  ;;  %v11189_v41 = vld [vmem:[#allocation6_spill] sm:$0xff] }
 0xa7f   : > { %v5139_v13 = vpack.c.bf16 %v5123_v26, %v5123_v26 }
 0xa81   : > { %3665 = vadd.xlane.f32.xlu0 %v3664_v36 }
 0xa83   : > { %4294 = vadd.xlane.f32.xlu2 %v4293_v54  ;;  %v10690_v4 = vpop.xlane.xlu1 %4917  ;;  %v7176_v54 = vpop.eup %7175 }
 0xa84   : > { %v7178_v27 = vpop.eup %7177  ;;  %v5653_v23 = vpop.f32.mrf.mxu0 }
 0xa85   : > { %v5752_v32 = vmul.f32 %v7178_v27, %v5650_v25  ;;  %v4302_v27 = vsel %vm1085_vm6, %v11189_v41, 0.0 }
 0xa87   : > { %v5768_v47 = vpack.c.bf16 %v5752_v32, %v5752_v32  ;;  %v7180_v32 = vpop.eup %7179 }
 0xa89   : > { %4297 = vadd.xlane.f32.xlu0 %v4296_v45  ;;  %v5751_v45 = vmul.f32 %v7176_v54, %v5648_v52  ;;  %v3670_v54 = vsel %vm1085_vm6, %v11187_v40, 0.0 }
 0xa8b   : > { %4923 = vadd.xlane.f32.xlu2 %v4922_v46 }
 0xa94   : > { %4545 = vrot.lane.b32.xlu1 %v4509_v51, %s7308_s7  ;;  %v5767_v51 = vpack.c.bf16 %v5751_v45, %v5751_v45 }
 0xa95   : > { %v10694_v53 = vpop.xlane.xlu2 %3659 }
 0xa9b   : > { %v3915_v18 = vpop.permute.xlu1 %3914 }
 0xa9c   : > { %3960 = vst.msk [vmem:[#allocation3 + $0xc] sm:$0xf] %vm3956_vm10, %v3915_v18 }
 0xa9d   : > { %v10701_v62 = vpop.xlane.xlu2 %4291  ;;  %3916 = vrot.lane.b32.xlu0 %v3880_v38, %s7307_s30 }
 0xa9e   : > { %v10716_v50 = vpop.xlane.xlu0 %4288 }
 0xaa3   : > { %3918 = vrot.lane.b32.xlu2 %v3881_v1, %s7307_s30  ;;  %v5173_v28 = vpop.permute.xlu1 %5172 }
 0xaa5   : > { %v10711_v36 = vpop.xlane.xlu2 %4920  ;;  %4547 = vrot.lane.b32.xlu0 %v4510_v0, %s7308_s7  ;;  %v10743_v0 = vpop.f32.mrf.mxu3 }
 0xaab   : > { %5174 = vrot.lane.b32.xlu2 %v5138_v20, %s7309_s8  ;;  %v5802_v56 = vpop.permute.xlu1 %5801  ;;  %v5560_v20 = vsel %vm1085_vm6, %v10540_v43, 0.0  ;;  %v4928_v43 = vsel %vm1085_vm6, %v10415_v37, 0.0 }
 0xaad   : > { %v10719_v46 = vpop.xlane.xlu2 %5546  ;;  %5176 = vrot.lane.b32.xlu0 %v5139_v13, %s7309_s8  ;;  %v10748_v26 = vpop.f32.mrf.mxu3  ;;  %v11188_v13 = vld [vmem:[#allocation17_spill] sm:$0xff] }
 0xaae   : > { %v3673_v25 = vsel %vm1085_vm6, %v11188_v13, 0.0 }
 0xab1   : > { %v3913_v6 = vpop.permute.xlu0 %3912 }
 0xab2   : > { %3959 = vst.msk [vmem:[#allocation3 + $0x8] sm:$0xf] %vm3956_vm10, %v3913_v6 }
 0xab3   : > { %5803 = vrot.lane.b32.xlu2 %v5767_v51, %s7310_s9  ;;  %v4495_v51 = vmul.f32 %v7180_v32, %v10464_v34 }
 0xab5   : > { %v10726_v30 = vpop.xlane.xlu2 %5549  ;;  %5805 = vrot.lane.b32.xlu0 %v5768_v47, %s7310_s9  ;;  %v10756_v45 = vpop.f32.mrf.mxu3  ;;  %v4511_v5 = vpack.c.bf16 %v4495_v51, %v4495_v51 }
 0xab9   : > { %v4542_v18 = vpop.permute.xlu0 %4541 }
 0xaba   : > { %4588 = vst.msk [vmem:[#allocation3 + $0x8] sm:$0xf] %vm4585_vm12, %v4542_v18  ;;  %v7182_v18 = vpop.eup %7181 }
 0xabb   : > { %v7184_v37 = vpop.eup %7183  ;;  %v3867_v34 = vmul.f32 %v7182_v18, %v10355_v15 }
 0xabc   : > { %v3866_v57 = vmul.f32 %v7184_v37, %v11190_v33 }
 0xabd   : > { %v4544_v38 = vpop.permute.xlu2 %4543  ;;  %v10763_v6 = vpop.f32.mrf.mxu3 }
 0xabe   : > { %4589 = vst.msk [vmem:[#allocation3 + $0xc] sm:$0xf] %vm4585_vm12, %v4544_v38  ;;  %4300 = vadd.xlane.f32.xlu1 %v4299_v10  ;;  %v3882_v11 = vpack.c.bf16 %v3866_v57, %v3866_v57 }
 0xabf   : > { %5218 = vst.msk [vmem:[#allocation3 + $0xc] sm:$0xf] %vm5214_vm1, %v5173_v28 }
 0xac0   : > { %5847 = vst.msk [vmem:[#allocation3 + $0xc] sm:$0xf] %vm5843_vm2, %v5802_v56  ;;  %v3883_v56 = vpack.c.bf16 %v3867_v34, %v3867_v34 }
 0xac1   : > { %v5171_v1 = vpop.permute.xlu0 %5170 }
 0xac2   : > { %5217 = vst.msk [vmem:[#allocation3 + $0x8] sm:$0xf] %vm5214_vm1, %v5171_v1  ;;  %v7186_v1 = vpop.eup %7185 }
 0xac3   : > { %v7188_v55 = vpop.eup %7187 }
 0xac5   : > { %v10771_v28 = vpop.f32.mrf.mxu3 }
 0xac6   : > { %4932 = vadd.xlane.f32.xlu1 %v4931_v49 }
 0xac9   : > { %v5800_v52 = vpop.permute.xlu0 %5799 }
 0xaca   : > { %5846 = vst.msk [vmem:[#allocation3 + $0x8] sm:$0xf] %vm5843_vm2, %v5800_v52 }
 0xacd   : > { %v10795_v49 = vpop.f32.mrf.mxu3 }
 0xace   : > { %5558 = vadd.xlane.f32.xlu1 %v5557_v44  ;;  %v4496_v44 = vmul.f32 %v7186_v1, %v10472_v17 }
 0xad0   : > { %v4512_v13 = vpack.c.bf16 %v4496_v44, %v4496_v44 }
 0xad1   : > { %v6665_v21 = vld [vmem:[#allocation3 + $0x8] sm:$0xff] }
 0xad2   : > { %6585 = vmatmul.msk.bf16.gmra.mxu1 %vm11144_vm3, %v6665_v21 }
 0xad5   : > { %v5087_v17 = vpop.f32.mrf.mxu3 }
 0xad6   : > { %5561 = vadd.xlane.f32.xlu1 %v5560_v20  ;;  %v10766_v47 = vpop.xlane.xlu1 %3668  ;;  %v5124_v20 = vmul.f32 %v7188_v55, %v10534_v22 }
 0xadc   : > { %3671 = vadd.xlane.f32.xlu2 %v3670_v54 }
 0xade   : > { %v10774_v38 = vpop.xlane.xlu1 %4926 }
 0xadf   : > { %3674 = vadd.xlane.f32.xlu0 %v3673_v25  ;;  %v7190_v25 = vpop.eup %7189 }
 0xae0   : > { %v7192_v32 = vpop.eup %7191 }
 0xae1   : > { %v5753_v51 = vmul.f32 %v7192_v32, %v5653_v23 }
 0xae4   : > { %4303 = vadd.xlane.f32.xlu2 %v4302_v27  ;;  %v5140_v27 = vpack.c.bf16 %v5124_v20, %v5124_v20 }
 0xae6   : > { %v10808_v40 = vpop.xlane.xlu1 %5552 }
 0xae7   : > { %4929 = vadd.xlane.f32.xlu0 %v4928_v43  ;;  %v5125_v43 = vmul.f32 %v7190_v25, %v10553_v2  ;;  %v10826_v2 = vpop.f32.mrf.mxu3 }
 0xae9   : > { %v5141_v33 = vpack.c.bf16 %v5125_v43, %v5125_v43 }
 0xaee   : > { %v10822_v34 = vpop.xlane.xlu1 %5555 }
 0xaef   : > { %4549 = vrot.lane.b32.xlu1 %v4511_v5, %s7308_s7  ;;  %v10832_v20 = vpop.f32.mrf.mxu3 }
 0xaf4   : > { %v10803_v21 = vpop.xlane.xlu0 %3665 }
 0xaf6   : > { %v10779_v10 = vpop.xlane.xlu2 %4294 }
 0xaf9   : > { %v5969_v15 = vpop.f32.mrf.mxu1 }
 0xafa   : > { %v5970_v52 = vadd.f32 %v10786_v59, %v5969_v15 }
 0xafb   : > { %3922 = vrot.lane.b32.xlu0 %v3883_v56, %s7307_s30  ;;  %v5655_v56 = vpop.f32.mrf.mxu0 }
 0xafc   : > { %3920 = vrot.lane.b32.xlu2 %v3882_v11, %s7307_s30  ;;  %6009 = vst.msk [vmem:[%s10793_s18] sm:$0xff] %vm11191_vm11, %v5970_v52  ;;  %v10819_v37 = vpop.xlane.xlu0 %4297  ;;  %vm11207_vm11 = vmmov %vm11203_vm0 }
 0xafe   : > { %v4924_v54 = vpop.xlane.xlu2 %4923 }
 0xaff   : > { %7193 = vrcp.f32 %v4924_v54 }
 0xb00   : > { %7195 = vrcp.f32 %v10643_v29  ;;  %v5769_v29 = vpack.c.bf16 %v5753_v51, %v5753_v51  ;;  %v11195_v51 = vld [vmem:[#allocation18_spill] sm:$0xff] }
 0xb01   : > { %v5971_v41 = vpop.f32.mrf.mxu1  ;;  %7197 = vrcp.f32 %v10684_v58 }
 0xb02   : > { %v5972_v35 = vadd.f32 %v10786_v59, %v5971_v41  ;;  %v4934_v41 = vsel %vm1085_vm6, %v10451_v63, 0.0  ;;  %7199 = vrcp.f32 %v10690_v4  ;;  %v3676_v63 = vsel %vm1085_vm6, %v11195_v51, 0.0 }
 0xb03   : > { %4551 = vrot.lane.b32.xlu0 %v4512_v13, %s7308_s7  ;;  %v11193_v13 = vld [vmem:[#allocation16_spill] sm:$0xff]  ;;  %7201 = vrcp.f32 %v10719_v46  ;;  %v4937_v46 = vsel %vm1085_vm6, %v10447_v48, 0.0 }
 0xb04   : > { %5178 = vrot.lane.b32.xlu2 %v5140_v27, %s7309_s8  ;;  %6010 = vst.msk [vmem:[%s10793_s18 + $0x8] sm:$0xff] %vm11192_vm7, %v5972_v35  ;;  %v3679_v25 = vsel %vm1085_vm6, %v11193_v13, 0.0  ;;  %v10841_v27 = vpop.f32.mrf.mxu3  ;;  %7203 = vrcp.f32 %v10766_v47  ;;  %v5563_v47 = vsel %vm1085_vm6, %v10570_v19, 0.0  ;;  %vm11212_vm7 = vmmov %vm11203_vm0 }
 0xb05   : > { %v7194_v22 = vpop.eup %7193  ;;  %7205 = vrcp.f32 %v10694_v53 }
 0xb06   : > { %v10817_v5 = vmul.f32 %v7194_v22, %v5087_v17  ;;  %v3919_v18 = vpop.permute.xlu2 %3918  ;;  %v7196_v57 = vpop.eup %7195  ;;  %7207 = vrcp.f32 %v10701_v62 }
 0xb07   : > { %3962 = vst.msk [vmem:[#allocation3 + $0x14] sm:$0xf] %vm3956_vm10, %v3919_v18  ;;  %v5754_v1 = vmul.f32 %v7196_v57, %v5655_v56  ;;  %v4546_v55 = vpop.permute.xlu1 %4545  ;;  %v7198_v22 = vpop.eup %7197  ;;  %v11196_v56 = vld [vmem:[#allocation14_spill] sm:$0xff]  ;;  %7209 = vrcp.f32 %v10822_v34 }
 0xb08   : > { %v3869_v43 = vmul.f32 %v7198_v22, %v10497_v31  ;;  %v7200_v57 = vpop.eup %7199  ;;  %v4305_v4 = vsel %vm1085_vm6, %v11196_v56, 0.0  ;;  %7211 = vrcp.f32 %v10711_v36  ;;  %v5144_v34 = vpack.c.bf16 %v10817_v5, %v10817_v5 }
 0xb09   : > { %v5770_v52 = vpack.c.bf16 %v5754_v1, %v5754_v1  ;;  %v11197_v1 = vld [vmem:[#allocation11_spill] sm:$0xff]  ;;  %7213 = vrcp.f32 %v10716_v50 }
 0xb0a   : > { %v4308_v31 = vsel %vm1085_vm6, %v11197_v1, 0.0 }
 0xb0b   : > { %5180 = vrot.lane.b32.xlu0 %v5141_v33, %s7309_s8  ;;  %v3885_v33 = vpack.c.bf16 %v3869_v43, %v3869_v43 }
 0xb0c   : > { %5807 = vrot.lane.b32.xlu2 %v5769_v29, %s7310_s9  ;;  %v10844_v17 = vpop.f32.mrf.mxu3  ;;  %v5126_v29 = vmul.f32 %v7200_v57, %v10771_v28 }
 0xb0e   : > { %v5175_v15 = vpop.permute.xlu2 %5174 }
 0xb0f   : > { %v3917_v11 = vpop.permute.xlu0 %3916 }
 0xb10   : > { %3961 = vst.msk [vmem:[#allocation3 + $0x10] sm:$0xf] %vm3956_vm10, %v3917_v11  ;;  %v5142_v11 = vpack.c.bf16 %v5126_v29, %v5126_v29 }
 0xb11   : > { %4590 = vst.msk [vmem:[#allocation3 + $0x10] sm:$0xf] %vm4585_vm12, %v4546_v55  ;;  %v7202_v55 = vpop.eup %7201 }
 0xb12   : > { %5219 = vst.msk [vmem:[#allocation3 + $0x10] sm:$0xf] %vm5214_vm1, %v5175_v15 }
 0xb13   : > { %5809 = vrot.lane.b32.xlu0 %v5770_v52, %s7310_s9 }
 0xb14   : > { %v10852_v18 = vpop.f32.mrf.mxu3 }
 0xb16   : > { %v5804_v44 = vpop.permute.xlu2 %5803 }
 0xb17   : > { %5848 = vst.msk [vmem:[#allocation3 + $0x10] sm:$0xf] %vm5843_vm2, %v5804_v44  ;;  %v4548_v54 = vpop.permute.xlu0 %4547 }
 0xb18   : > { %4591 = vst.msk [vmem:[#allocation3 + $0x14] sm:$0xf] %vm4585_vm12, %v4548_v54  ;;  %v7204_v54 = vpop.eup %7203 }
 0xb19   : > { %3680 = vadd.xlane.f32.xlu1 %v3679_v25  ;;  %v7206_v25 = vpop.eup %7205 }
 0xb1a   : > { %v3868_v48 = vmul.f32 %v7206_v25, %v10480_v14  ;;  %v7208_v19 = vpop.eup %7207  ;;  %v5566_v14 = vsel %vm1085_vm6, %v10567_v8, 0.0  ;;  %vm11200_vm6 = vmmov %vm11144_vm3 }
 0xb1b   : > { %v4498_v62 = vmul.f32 %v7208_v19, %v10722_v9  ;;  %vm11206_vm3 = vmmov %vm11203_vm0 }
 0xb1c   : > { %v5711_v15 = vpop.f32.mrf.mxu3 }
 0xb1d   : > { %v5755_v52 = vmul.f32 %v7202_v55, %v5711_v15  ;;  %v4514_v9 = vpack.c.bf16 %v4498_v62, %v4498_v62 }
 0xb1f   : > { %v5177_v23 = vpop.permute.xlu0 %5176  ;;  %v5771_v44 = vpack.c.bf16 %v5755_v52, %v5755_v52 }
 0xb20   : > { %5220 = vst.msk [vmem:[#allocation3 + $0x14] sm:$0xf] %vm5214_vm1, %v5177_v23  ;;  %v3871_v23 = vmul.f32 %v7204_v54, %v10525_v12  ;;  %v3884_v12 = vpack.c.bf16 %v3868_v48, %v3868_v48 }
 0xb21   : > { %4935 = vadd.xlane.f32.xlu1 %v4934_v41 }
 0xb24   : > { %v5713_v13 = vpop.f32.mrf.mxu3 }
 0xb27   : > { %v5806_v32 = vpop.permute.xlu0 %5805 }
 0xb28   : > { %5849 = vst.msk [vmem:[#allocation3 + $0x14] sm:$0xf] %vm5843_vm2, %v5806_v32 }
 0xb2c   : > { %v10876_v22 = vpop.f32.mrf.mxu3 }
 0xb2f   : > { %v6666_v35 = vld [vmem:[#allocation3 + $0x10] sm:$0xff] }
 0xb30   : > { %6586 = vmatmul.msk.bf16.gmra.mxu1 %vm11194_vm14, %v6666_v35  ;;  %v3887_v35 = vpack.c.bf16 %v3871_v23, %v3871_v23  ;;  %vm11213_vm14 = vmmov %vm11203_vm0 }
 0xb31   : > { %v4301_v58 = vpop.xlane.xlu1 %4300 }
 0xb32   : > { %7215 = vrcp.f32 %v4301_v58 }
 0xb33   : > { %7217 = vrcp.f32 %v10726_v30 }
 0xb34   : > { %v5718_v8 = vpop.f32.mrf.mxu3  ;;  %7219 = vrcp.f32 %v10803_v21 }
 0xb35   : > { %3677 = vadd.xlane.f32.xlu2 %v3676_v63 }
 0xb39   : > { %v4933_v28 = vpop.xlane.xlu1 %4932 }
 0xb3a   : > { %3926 = vrot.lane.b32.xlu1 %v3885_v33, %s7307_s30  ;;  %v7210_v33 = vpop.eup %7209  ;;  %7221 = vrcp.f32 %v4933_v28 }
 0xb3b   : > { %v7212_v56 = vpop.eup %7211  ;;  %7223 = vrcp.f32 %v10779_v10 }
 0xb3c   : > { %v5127_v5 = vmul.f32 %v7212_v56, %v10795_v49  ;;  %7225 = vrcp.f32 %v10819_v37 }
 0xb3d   : > { %4306 = vadd.xlane.f32.xlu0 %v4305_v4  ;;  %4309 = vadd.xlane.f32.xlu2 %v4308_v31  ;;  %v5758_v4 = vmul.f32 %v7210_v33, %v5718_v8  ;;  %v7214_v31 = vpop.eup %7213  ;;  %7227 = vrcp.f32 %v10774_v38 }
 0xb3e   : > { %v7216_v15 = vpop.eup %7215  ;;  %v4497_v58 = vmul.f32 %v7214_v31, %v10708_v61  ;;  %v5143_v55 = vpack.c.bf16 %v5127_v5, %v5127_v5  ;;  %7229 = vrcp.f32 %v10808_v40 }
 0xb3f   : > { %v5774_v50 = vpack.c.bf16 %v5758_v4, %v5758_v4  ;;  %v7218_v30 = vpop.eup %7217  ;;  %v4501_v49 = vmul.f32 %v7216_v15, %v10743_v0 }
 0xb40   : > { %v4513_v54 = vpack.c.bf16 %v4497_v58, %v4497_v58  ;;  %v7220_v21 = vpop.eup %7219 }
 0xb41   : > { %v10872_v41 = vpop.xlane.xlu1 %5558  ;;  %v4517_v25 = vpack.c.bf16 %v4501_v49, %v4501_v49  ;;  %v7222_v23 = vpop.eup %7221  ;;  %v3870_v61 = vmul.f32 %v7220_v21, %v10516_v42 }
 0xb42   : > { %5182 = vrot.lane.b32.xlu1 %v5142_v11, %s7309_s8  ;;  %v7224_v28 = vpop.eup %7223  ;;  %v5131_v10 = vmul.f32 %v7222_v23, %v10841_v27 }
 0xb43   : > { %v7226_v37 = vpop.eup %7225 }
 0xb44   : > { %v4500_v42 = vmul.f32 %v7226_v37, %v10737_v7  ;;  %v7228_v38 = vpop.eup %7227 }
 0xb45   : > { %4938 = vadd.xlane.f32.xlu0 %v4937_v46  ;;  %v5756_v46 = vmul.f32 %v7218_v30, %v5713_v13  ;;  %v7230_v19 = vpop.eup %7229 }
 0xb46   : > { %v5757_v40 = vmul.f32 %v7230_v19, %v10876_v22 }
 0xb47   : > { %v5772_v0 = vpack.c.bf16 %v5756_v46, %v5756_v46 }
 0xb49   : > { %v10892_v57 = vpop.xlane.xlu1 %5561 }
 0xb4a   : > { %5811 = vrot.lane.b32.xlu1 %v5771_v44, %s7310_s9 }
 0xb4d   : > { %5564 = vadd.xlane.f32.xlu0 %v5563_v47  ;;  %v4499_v47 = vmul.f32 %v7224_v28, %v10729_v60  ;;  %v5129_v60 = vmul.f32 %v7228_v38, %v10826_v2 }
 0xb4f   : > { %v10874_v53 = vpop.xlane.xlu2 %3671  ;;  %v5974_v32 = vpop.f32.mrf.mxu1  ;;  %v4515_v27 = vpack.c.bf16 %v4499_v47, %v4499_v47 }
 0xb50   : > { %v5975_v43 = vadd.f32 %v10786_v59, %v5974_v32  ;;  %v3886_v32 = vpack.c.bf16 %v3870_v61, %v3870_v61  ;;  %7231 = vrcp.f32 %v10874_v53 }
 0xb52   : > { %3930 = vrot.lane.b32.xlu1 %v3887_v35, %s7307_s30  ;;  %6011 = vst.msk [vmem:[%s10793_s18 + $0x10] sm:$0xff] %vm11198_vm13, %v5975_v43  ;;  %v3675_v36 = vpop.xlane.xlu0 %3674  ;;  %v5147_v35 = vpack.c.bf16 %v5131_v10, %v5131_v10  ;;  %vm11214_vm13 = vmmov %vm11203_vm0 }
 0xb53   : > { %7233 = vrcp.f32 %v3675_v36  ;;  %v5721_v36 = vpop.f32.mrf.mxu3 }
 0xb55   : > { %5567 = vadd.xlane.f32.xlu0 %v5566_v14  ;;  %3924 = vrot.lane.b32.xlu2 %v3884_v12, %s7307_s30  ;;  %v4516_v12 = vpack.c.bf16 %v4500_v42, %v4500_v42  ;;  %v5145_v14 = vpack.c.bf16 %v5129_v60, %v5129_v60 }
 0xb56   : > { %v7232_v7 = vpop.eup %7231 }
 0xb57   : > { %v10888_v51 = vpop.xlane.xlu2 %4303  ;;  %v5976_v63 = vpop.f32.mrf.mxu1  ;;  %v3872_v53 = vmul.f32 %v7232_v7, %v10538_v24 }
 0xb58   : > { %v5977_v29 = vadd.f32 %v10786_v59, %v5976_v63  ;;  %7235 = vrcp.f32 %v10888_v51  ;;  %v5773_v63 = vpack.c.bf16 %v5757_v40, %v5757_v40 }
 0xb59   : > { %v7234_v2 = vpop.eup %7233  ;;  %v3888_v33 = vpack.c.bf16 %v3872_v53, %v3872_v53 }
 0xb5a   : > { %5186 = vrot.lane.b32.xlu1 %v5144_v34, %s7309_s8  ;;  %6012 = vst.msk [vmem:[%s10793_s18 + $0x18] sm:$0xff] %vm11199_vm5, %v5977_v29  ;;  %v4930_v52 = vpop.xlane.xlu0 %4929  ;;  %v3873_v34 = vmul.f32 %v7234_v2, %v10556_v16  ;;  %vm11215_vm5 = vmmov %vm11203_vm0 }
 0xb5b   : > { %7237 = vrcp.f32 %v4930_v52  ;;  %v5723_v31 = vpop.f32.mrf.mxu3 }
 0xb5c   : > { %7239 = vrcp.f32 %v10872_v41  ;;  %v3889_v8 = vpack.c.bf16 %v3873_v34, %v3873_v34 }
 0xb5d   : > { %4555 = vrot.lane.b32.xlu2 %v4514_v9, %s7308_s7  ;;  %7241 = vrcp.f32 %v10892_v57 }
 0xb5e   : > { %v7236_v22 = vpop.eup %7235 }
 0xb5f   : > { %v3921_v1 = vpop.permute.xlu2 %3920  ;;  %v4502_v51 = vmul.f32 %v7236_v22, %v10748_v26 }
 0xb60   : > { %3963 = vst.msk [vmem:[#allocation3 + $0x18] sm:$0xf] %vm3956_vm10, %v3921_v1 }
 0xb61   : > { %v4550_v11 = vpop.permute.xlu1 %4549  ;;  %v7238_v24 = vpop.eup %7237  ;;  %v4518_v9 = vpack.c.bf16 %v4502_v51, %v4502_v51 }
 0xb62   : > { %4592 = vst.msk [vmem:[#allocation3 + $0x18] sm:$0xf] %vm4585_vm12, %v4550_v11  ;;  %5817 = vrot.lane.b32.xlu1 %v5774_v50, %s7310_s9  ;;  %v5130_v16 = vmul.f32 %v7238_v24, %v10832_v20  ;;  %v7240_v56 = vpop.eup %7239 }
 0xb63   : > { %v5759_v41 = vmul.f32 %v7240_v56, %v5721_v36  ;;  %v7242_v1 = vpop.eup %7241  ;;  %v5726_v19 = vpop.f32.mrf.mxu3 }
 0xb64   : > { %v5146_v26 = vpack.c.bf16 %v5130_v16, %v5130_v16  ;;  %v5760_v50 = vmul.f32 %v7242_v1, %v5723_v31 }
 0xb65   : > { %5184 = vrot.lane.b32.xlu2 %v5143_v55, %s7309_s8  ;;  %v5775_v15 = vpack.c.bf16 %v5759_v41, %v5759_v41 }
 0xb66   : > { %v5776_v58 = vpack.c.bf16 %v5760_v50, %v5760_v50 }
 0xb67   : > { %v5179_v44 = vpop.permute.xlu2 %5178 }
 0xb68   : > { %5221 = vst.msk [vmem:[#allocation3 + $0x18] sm:$0xf] %vm5214_vm1, %v5179_v44 }
 0xb69   : > { %4553 = vrot.lane.b32.xlu0 %v4513_v54, %s7308_s7 }
 0xb6a   : > { %4561 = vrot.lane.b32.xlu1 %v4517_v25, %s7308_s7 }
 0xb6d   : > { %5813 = vrot.lane.b32.xlu2 %v5772_v0, %s7310_s9  ;;  %v3923_v13 = vpop.permute.xlu0 %3922 }
 0xb6e   : > { %3964 = vst.msk [vmem:[#allocation3 + $0x1c] sm:$0xf] %vm3956_vm10, %v3923_v13 }
 0xb6f   : > { %v5808_v48 = vpop.permute.xlu2 %5807 }
 0xb70   : > { %5850 = vst.msk [vmem:[#allocation3 + $0x18] sm:$0xf] %vm5843_vm2, %v5808_v48 }
 0xb71   : > { %3928 = vrot.lane.b32.xlu0 %v3886_v32, %s7307_s30 }
 0xb72   : > { %5192 = vrot.lane.b32.xlu1 %v5147_v35, %s7309_s8 }
 0xb75   : > { %4557 = vrot.lane.b32.xlu2 %v4515_v27, %s7308_s7  ;;  %v4552_v43 = vpop.permute.xlu0 %4551 }
 0xb76   : > { %4593 = vst.msk [vmem:[#allocation3 + $0x1c] sm:$0xf] %vm4585_vm12, %v4552_v43 }
 0xb79   : > { %4559 = vrot.lane.b32.xlu0 %v4516_v12, %s7308_s7 }
 0xb7d   : > { %5188 = vrot.lane.b32.xlu2 %v5145_v14, %s7309_s8  ;;  %v5181_v62 = vpop.permute.xlu0 %5180 }
 0xb7e   : > { %5222 = vst.msk [vmem:[#allocation3 + $0x1c] sm:$0xf] %vm5214_vm1, %v5181_v62 }
 0xb81   : > { %5815 = vrot.lane.b32.xlu0 %v5773_v63, %s7310_s9  ;;  %v5728_v63 = vpop.f32.mrf.mxu3 }
 0xb85   : > { %3932 = vrot.lane.b32.xlu2 %v3888_v33, %s7307_s30  ;;  %v5810_v29 = vpop.permute.xlu0 %5809 }
 0xb86   : > { %5851 = vst.msk [vmem:[#allocation3 + $0x1c] sm:$0xf] %vm5843_vm2, %v5810_v29 }
 0xb89   : > { %3934 = vrot.lane.b32.xlu0 %v3889_v8, %s7307_s30 }
 0xb8c   : > { %v3681_v4 = vpop.xlane.xlu1 %3680 }
 0xb8d   : > { %4563 = vrot.lane.b32.xlu2 %v4518_v9, %s7308_s7  ;;  %v6667_v5 = vld [vmem:[#allocation3 + $0x18] sm:$0xff]  ;;  %7243 = vrcp.f32 %v3681_v4 }
 0xb8e   : > { %6587 = vmatmul.msk.bf16.gmra.mxu1 %vm11200_vm6, %v6667_v5  ;;  %vm11216_vm6 = vmmov %vm11203_vm0 }
 0xb91   : > { %5190 = vrot.lane.b32.xlu0 %v5146_v26, %s7309_s8 }
 0xb93   : > { %v7244_v57 = vpop.eup %7243 }
 0xb94   : > { %v4936_v11 = vpop.xlane.xlu1 %4935  ;;  %v3875_v20 = vmul.f32 %v7244_v57, %v10584_v3 }
 0xb95   : > { %5819 = vrot.lane.b32.xlu2 %v5775_v15, %s7310_s9  ;;  %7245 = vrcp.f32 %v4936_v11 }
 0xb96   : > { %v3891_v55 = vpack.c.bf16 %v3875_v20, %v3875_v20 }
 0xb99   : > { %5821 = vrot.lane.b32.xlu0 %v5776_v58, %s7310_s9 }
 0xb9b   : > { %v7246_v30 = vpop.eup %7245 }
 0xb9c   : > { %v5132_v49 = vmul.f32 %v7246_v30, %v10844_v17 }
 0xb9d   : > { %3938 = vrot.lane.b32.xlu2 %v3891_v55, %s7307_s30 }
 0xb9e   : > { %v5148_v52 = vpack.c.bf16 %v5132_v49, %v5132_v49 }
 0xba5   : > { %5194 = vrot.lane.b32.xlu2 %v5148_v52, %s7309_s8 }
 0xba8   : > { %v3678_v46 = vpop.xlane.xlu2 %3677 }
 0xba9   : > { %7247 = vrcp.f32 %v3678_v46 }
 0xbac   : > { %v3927_v44 = vpop.permute.xlu1 %3926 }
 0xbad   : > { %3966 = vst.msk [vmem:[#allocation3 + $0x24] sm:$0xf] %vm3956_vm10, %v3927_v44  ;;  %v5979_v54 = vpop.f32.mrf.mxu1 }
 0xbae   : > { %v5980_v21 = vadd.f32 %v10786_v59, %v5979_v54 }
 0xbaf   : > { %v7248_v3 = vpop.eup %7247 }
 0xbb0   : > { %v3874_v25 = vmul.f32 %v7248_v3, %v10572_v39  ;;  %v4310_v23 = vpop.xlane.xlu2 %4309  ;;  %v4307_v61 = vpop.xlane.xlu0 %4306  ;;  %6013 = vst.msk [vmem:[%s10793_s18 + $0x20] sm:$0xff] %vm11201_vm9, %v5980_v21 }
 0xbb1   : > { %7249 = vrcp.f32 %v4310_v23 }
 0xbb2   : > { %7251 = vrcp.f32 %v4307_v61  ;;  %v3890_v17 = vpack.c.bf16 %v3874_v25, %v3874_v25 }
 0xbb4   : > { %v5183_v0 = vpop.permute.xlu1 %5182  ;;  %3936 = vrot.lane.b32.xlu1 %v3890_v17, %s7307_s30 }
 0xbb5   : > { %v5981_v28 = vpop.f32.mrf.mxu1 }
 0xbb6   : > { %v5982_v13 = vadd.f32 %v10786_v59, %v5981_v28 }
 0xbb7   : > { %v7250_v10 = vpop.eup %7249 }
 0xbb8   : > { %v7252_v47 = vpop.eup %7251  ;;  %v4504_v48 = vmul.f32 %v7250_v10, %v10763_v6  ;;  %v3925_v32 = vpop.permute.xlu2 %3924  ;;  %6014 = vst.msk [vmem:[%s10793_s18 + $0x28] sm:$0xff] %vm11202_vm4, %v5982_v13 }
 0xbb9   : > { %v4939_v39 = vpop.xlane.xlu0 %4938  ;;  %v4503_v37 = vmul.f32 %v7252_v47, %v10756_v45  ;;  %3965 = vst.msk [vmem:[#allocation3 + $0x20] sm:$0xf] %vm3956_vm10, %v3925_v32 }
 0xbba   : > { %7253 = vrcp.f32 %v4939_v39  ;;  %v4520_v35 = vpack.c.bf16 %v4504_v48, %v4504_v48 }
 0xbbb   : > { %v4519_v42 = vpack.c.bf16 %v4503_v37, %v4503_v37 }
 0xbbc   : > { %v5812_v27 = vpop.permute.xlu1 %5811  ;;  %4567 = vrot.lane.b32.xlu1 %v4520_v35, %s7308_s7 }
 0xbbd   : > { %4565 = vrot.lane.b32.xlu0 %v4519_v42, %s7308_s7 }
 0xbc0   : > { %v7254_v38 = vpop.eup %7253  ;;  %v4556_v6 = vpop.permute.xlu2 %4555 }
 0xbc1   : > { %v5133_v43 = vmul.f32 %v7254_v38, %v10852_v18  ;;  %v5565_v60 = vpop.xlane.xlu0 %5564  ;;  %4595 = vst.msk [vmem:[#allocation3 + $0x24] sm:$0xf] %vm4585_vm12, %v4556_v6 }
 0xbc2   : > { %7255 = vrcp.f32 %v5565_v60 }
 0xbc3   : > { %v5149_v45 = vpack.c.bf16 %v5133_v43, %v5133_v43 }
 0xbc4   : > { %v3931_v12 = vpop.permute.xlu1 %3930 }
 0xbc5   : > { %3968 = vst.msk [vmem:[#allocation3 + $0x2c] sm:$0xf] %vm3956_vm10, %v3931_v12  ;;  %5196 = vrot.lane.b32.xlu0 %v5149_v45, %s7309_s8 }
 0xbc8   : > { %v7256_v40 = vpop.eup %7255  ;;  %v5185_v7 = vpop.permute.xlu2 %5184 }
 0xbc9   : > { %v5761_v14 = vmul.f32 %v7256_v40, %v5726_v19  ;;  %v5568_v62 = vpop.xlane.xlu0 %5567  ;;  %5224 = vst.msk [vmem:[#allocation3 + $0x24] sm:$0xf] %vm5214_vm1, %v5185_v7 }
 0xbca   : > { %7257 = vrcp.f32 %v5568_v62 }
 0xbcb   : > { %v5777_v18 = vpack.c.bf16 %v5761_v14, %v5761_v14 }
 0xbcc   : > { %v5187_v22 = vpop.permute.xlu1 %5186 }
 0xbcd   : > { %5823 = vrot.lane.b32.xlu1 %v5777_v18, %s7310_s9 }
 0xbd0   : > { %v7258_v53 = vpop.eup %7257  ;;  %v5814_v34 = vpop.permute.xlu2 %5813 }
 0xbd1   : > { %v5762_v2 = vmul.f32 %v7258_v53, %v5728_v63  ;;  %5853 = vst.msk [vmem:[#allocation3 + $0x24] sm:$0xf] %vm5843_vm2, %v5814_v34 }
 0xbd3   : > { %v5778_v33 = vpack.c.bf16 %v5762_v2, %v5762_v2 }
 0xbd4   : > { %v5818_v8 = vpop.permute.xlu1 %5817 }
 0xbd5   : > { %5825 = vrot.lane.b32.xlu2 %v5778_v33, %s7310_s9 }
 0xbd8   : > { %v4558_v29 = vpop.permute.xlu2 %4557 }
 0xbdb   : > { %v4554_v51 = vpop.permute.xlu0 %4553 }
 0xbdc   : > { %4594 = vst.msk [vmem:[#allocation3 + $0x20] sm:$0xf] %vm4585_vm12, %v4554_v51  ;;  %v4562_v56 = vpop.permute.xlu1 %4561 }
 0xbdd   : > { %5223 = vst.msk [vmem:[#allocation3 + $0x20] sm:$0xf] %vm5214_vm1, %v5183_v0 }
 0xbde   : > { %5852 = vst.msk [vmem:[#allocation3 + $0x20] sm:$0xf] %vm5843_vm2, %v5812_v27 }
 0xbe0   : > { %v5189_v24 = vpop.permute.xlu2 %5188 }
 0xbe3   : > { %v3929_v36 = vpop.permute.xlu0 %3928 }
 0xbe4   : > { %3967 = vst.msk [vmem:[#allocation3 + $0x28] sm:$0xf] %vm3956_vm10, %v3929_v36  ;;  %v5193_v50 = vpop.permute.xlu1 %5192 }
 0xbe5   : > { %4596 = vst.msk [vmem:[#allocation3 + $0x28] sm:$0xf] %vm4585_vm12, %v4558_v29  ;;  %v6668_v16 = vld [vmem:[#allocation3 + $0x20] sm:$0xff] }
 0xbe6   : > { %5225 = vst.msk [vmem:[#allocation3 + $0x28] sm:$0xf] %vm5214_vm1, %v5187_v22  ;;  %6588 = vmatmul.msk.bf16.gmra.mxu1 %vm11203_vm0, %v6668_v16 }
 0xbe8   : > { %v3933_v9 = vpop.permute.xlu2 %3932 }
 0xbe9   : > { %3969 = vst.msk [vmem:[#allocation3 + $0x30] sm:$0xf] %vm3956_vm10, %v3933_v9 }
 0xbea   : > { %4598 = vst.msk [vmem:[#allocation3 + $0x30] sm:$0xf] %vm4585_vm12, %v4562_v56 }
 0xbeb   : > { %v4560_v4 = vpop.permute.xlu0 %4559 }
 0xbec   : > { %4597 = vst.msk [vmem:[#allocation3 + $0x2c] sm:$0xf] %vm4585_vm12, %v4560_v4 }
 0xbed   : > { %5226 = vst.msk [vmem:[#allocation3 + $0x2c] sm:$0xf] %vm5214_vm1, %v5189_v24 }
 0xbee   : > { %5855 = vst.msk [vmem:[#allocation3 + $0x2c] sm:$0xf] %vm5843_vm2, %v5818_v8 }
 0xbf0   : > { %v4564_v5 = vpop.permute.xlu2 %4563 }
 0xbf3   : > { %v5816_v41 = vpop.permute.xlu0 %5815 }
 0xbf4   : > { %5854 = vst.msk [vmem:[#allocation3 + $0x28] sm:$0xf] %vm5843_vm2, %v5816_v41 }
 0xbf8   : > { %v5820_v26 = vpop.permute.xlu2 %5819 }
 0xbfb   : > { %v3935_v1 = vpop.permute.xlu0 %3934  ;;  %v6669_v31 = vld [vmem:[#allocation3 + $0x28] sm:$0xff] }
 0xbfc   : > { %3970 = vst.msk [vmem:[#allocation3 + $0x34] sm:$0xf] %vm3956_vm10, %v3935_v1  ;;  %6589 = vmatmul.msk.bf16.gmra.mxu1 %vm11204_vm8, %v6669_v31 }
 0xbfd   : > { %4599 = vst.msk [vmem:[#allocation3 + $0x34] sm:$0xf] %vm4585_vm12, %v4564_v5 }
 0xbfe   : > { %5228 = vst.msk [vmem:[#allocation3 + $0x34] sm:$0xf] %vm5214_vm1, %v5193_v50 }
 0xc00   : > { %v3939_v15 = vpop.permute.xlu2 %3938 }
 0xc01   : > { %3972 = vst.msk [vmem:[#allocation3 + $0x3c] sm:$0xf] %vm3956_vm10, %v3939_v15 }
 0xc03   : > { %v5191_v57 = vpop.permute.xlu0 %5190 }
 0xc04   : > { %5227 = vst.msk [vmem:[#allocation3 + $0x30] sm:$0xf] %vm5214_vm1, %v5191_v57 }
 0xc05   : > { %5856 = vst.msk [vmem:[#allocation3 + $0x30] sm:$0xf] %vm5843_vm2, %v5820_v26 }
 0xc08   : > { %v5195_v54 = vpop.permute.xlu2 %5194 }
 0xc0b   : > { %v5822_v11 = vpop.permute.xlu0 %5821  ;;  %v5984_v20 = vpop.f32.mrf.mxu1 }
 0xc0c   : > { %5857 = vst.msk [vmem:[#allocation3 + $0x34] sm:$0xf] %vm5843_vm2, %v5822_v11  ;;  %v5985_v58 = vadd.f32 %v10786_v59, %v5984_v20 }
 0xc0e   : > { %6015 = vst.msk [vmem:[%s10793_s18 + $0x30] sm:$0xff] %vm11205_vm15, %v5985_v58 }
 0xc13   : > { %v6670_v55 = vld [vmem:[#allocation3 + $0x30] sm:$0xff]  ;;  %v5986_v30 = vpop.f32.mrf.mxu1 }
 0xc14   : > { %v5987_v49 = vadd.f32 %v10786_v59, %v5986_v30  ;;  %6590 = vmatmul.msk.bf16.gmra.mxu1 %vm11206_vm3, %v6670_v55 }
 0xc16   : > { %6016 = vst.msk [vmem:[%s10793_s18 + $0x38] sm:$0xff] %vm11207_vm11, %v5987_v49 }
 0xc26   : > { %v3937_v52 = vpop.permute.xlu1 %3936 }
 0xc27   : > { %3971 = vst.msk [vmem:[#allocation3 + $0x38] sm:$0xf] %vm3956_vm10, %v3937_v52  ;;  %vm11208_vm10 = vmmov %vm11203_vm0 }
 0xc2e   : > { %v4568_v46 = vpop.permute.xlu1 %4567 }
 0xc2f   : > { %4601 = vst.msk [vmem:[#allocation3 + $0x3c] sm:$0xf] %vm4585_vm12, %v4568_v46  ;;  %v4566_v44 = vpop.permute.xlu0 %4565  ;;  %v5826_v21 = vpop.permute.xlu2 %5825 }
 0xc30   : > { %4600 = vst.msk [vmem:[#allocation3 + $0x38] sm:$0xf] %vm4585_vm12, %v4566_v44  ;;  %vm11209_vm12 = vmmov %vm11203_vm0 }
 0xc31   : > { %5229 = vst.msk [vmem:[#allocation3 + $0x38] sm:$0xf] %vm5214_vm1, %v5195_v54 }
 0xc37   : > { %v5197_v3 = vpop.permute.xlu0 %5196 }
 0xc38   : > { %5230 = vst.msk [vmem:[#allocation3 + $0x3c] sm:$0xf] %vm5214_vm1, %v5197_v3  ;;  %vm11210_vm1 = vmmov %vm11203_vm0 }
 0xc39   : > { %5859 = vst.msk [vmem:[#allocation3 + $0x3c] sm:$0xf] %vm5843_vm2, %v5826_v21 }
 0xc3f   : > { %v5824_v25 = vpop.permute.xlu1 %5823 }
 0xc40   : > { %5858 = vst.msk [vmem:[#allocation3 + $0x38] sm:$0xf] %vm5843_vm2, %v5824_v25  ;;  %vm11211_vm2 = vmmov %vm11203_vm0 }
 0xc47   : > { %v6671_v23 = vld [vmem:[#allocation3 + $0x38] sm:$0xff] }
 0xc48   : > { %6591 = vmatmul.msk.bf16.gmra.mxu1 %vm11208_vm10, %v6671_v23 }
 0xc63   : > { %v5989_v61 = vpop.f32.mrf.mxu1 }
 0xc64   : > { %v5990_v17 = vadd.f32 %v10786_v59, %v5989_v61 }
 0xc66   : > { %6017 = vst.msk [vmem:[%s10793_s18 + $0x40] sm:$0xff] %vm11209_vm12, %v5990_v17 }
 0xc6b   : > { %v5991_v0 = vpop.f32.mrf.mxu1 }
 0xc6c   : > { %v5992_v28 = vadd.f32 %v10786_v59, %v5991_v0 }
 0xc6e   : > { %6018 = vst.msk [vmem:[%s10793_s18 + $0x48] sm:$0xff] %vm11210_vm1, %v5992_v28 }
 0xc79   : > { %v5994_v10 = vpop.f32.mrf.mxu1 }
 0xc7a   : > { %v5995_v13 = vadd.f32 %v10786_v59, %v5994_v10 }
 0xc7c   : > { %6019 = vst.msk [vmem:[%s10793_s18 + $0x50] sm:$0xff] %vm11211_vm2, %v5995_v13 }
 0xc81   : > { %v5996_v47 = vpop.f32.mrf.mxu1 }
 0xc82   : > { %v5997_v48 = vadd.f32 %v10786_v59, %v5996_v47 }
 0xc84   : > { %6020 = vst.msk [vmem:[%s10793_s18 + $0x58] sm:$0xff] %vm11212_vm7, %v5997_v48 }
 0xc91   : > { %v5999_v32 = vpop.f32.mrf.mxu1 }
 0xc92   : > { %v6000_v39 = vadd.f32 %v10786_v59, %v5999_v32 }
 0xc94   : > { %6021 = vst.msk [vmem:[%s10793_s18 + $0x60] sm:$0xff] %vm11213_vm14, %v6000_v39 }
 0xc99   : > { %v6001_v37 = vpop.f32.mrf.mxu1 }
 0xc9a   : > { %v6002_v35 = vadd.f32 %v10786_v59, %v6001_v37 }
 0xc9c   : > { %6022 = vst.msk [vmem:[%s10793_s18 + $0x68] sm:$0xff] %vm11214_vm13, %v6002_v35 }
 0xcc5   : > { %v6004_v42 = vpop.f32.mrf.mxu1 }
 0xcc6   : > { %v6005_v27 = vadd.f32 %v10786_v59, %v6004_v42 }
 0xcc8   : > { %6023 = vst.msk [vmem:[%s10793_s18 + $0x70] sm:$0xff] %vm11215_vm5, %v6005_v27 }
 0xccd   : > { %v6006_v38 = vpop.f32.mrf.mxu1 }
 0xcce   : > { %v6007_v43 = vadd.f32 %v10786_v59, %v6006_v38 }
 0xcd0   : > { %6024 = vst.msk [vmem:[%s10793_s18 + $0x78] sm:$0xff] %vm11216_vm6, %v6007_v43 }
 0xcd1 PF: > { %s16_s21 = sadd.s32 1, %s7279_s21  }
 0xcd2   : > { %p13_p4 = scmp.ge.s32.totalorder %s16_s21, 5  }
 0xcd4   :  { %15 = sbr.rel (!%p13_p4) target bundleno = 1 (0x1), region = 89 }

</bundles_post_ra>
